<compile_context>
chip_gen: v6e
topology: v6e:2x2x1
jax: 0.10.0
libtpu: 0.0.40
codegen_flags: <defaults>
</compile_context>

<pallas_src>
import functools

import jax
import jax.numpy as jnp
from jax.experimental import pallas as pl
from jax.experimental.pallas import tpu as pltpu

LANE = 128  # TPU lane width: channels padded to this so every matmul/store is lane-dense


def _round8(v):
    return (v + 7) // 8 * 8


def _conv3x3_relu(src, w_ref, b_ref, rows, W, Cp):
    """One VALID 3x3 conv + bias + ReLU on a flattened (spatial_rows, Cp) slab.

    src   : (R_in, Cp) value; flat row q corresponds to pixel (q // W, q % W).
    w_ref : (9*Cp, Cp) ref; rows [t*Cp:(t+1)*Cp) hold the (cin, cout) matrix of tap t,
            with t = kh*3 + kw (matches the host-side reshape in prepare_params).
    Output row q = ReLU(b + sum_taps src[q + kh*W + kw] @ W_tap).  Columns wo >= W-2 of the
    output are wrap-around garbage; they never feed valid downstream positions.
    """
    acc = jnp.zeros((rows, Cp), jnp.float32)
    for kh in range(3):
        for kw in range(3):
            off = kh * W + kw
            t = kh * 3 + kw
            patch = src[off:off + rows, :]                     # static sublane-dim slice
            wt = w_ref[t * Cp:(t + 1) * Cp, :]                 # (Cp, Cp) tap weights
            acc = acc + jnp.dot(patch, wt, preferred_element_type=jnp.float32)
    return jnp.maximum(acc + b_ref[...], 0.0)


def fused_model_kernel(x_ref, w1_ref, b1_ref, w2_ref, b2_ref, w3_ref, b3_ref, o_ref,
                       *, W, r1, r2, r3):
    """Fused 3x(conv3x3 VALID + bias + ReLU) + per-pixel channel L2 normalize, one image.

    x_ref : (RX, Cp)   flattened image, rows >= H*W zero-padded, lanes >= Cin zero-padded
    w*_ref: (9*Cp, Cp) im2col-ordered tap weights (zero-padded channels)
    b*_ref: (1, Cp)    zero-padded bias
    o_ref : (r3, Cp)   flattened normalized output (only cols < W-6 / lanes < 50 are real)
    """
    Cp = o_ref.shape[-1]
    xv = x_ref[...]                                            # (RX, Cp)

    h1 = _conv3x3_relu(xv, w1_ref, b1_ref, r1, W, Cp)          # (r1, Cp)
    h2 = _conv3x3_relu(h1, w2_ref, b2_ref, r2, W, Cp)          # (r2, Cp)
    h3 = _conv3x3_relu(h2, w3_ref, b3_ref, r3, W, Cp)          # (r3, Cp)

    # F.normalize over channels: x / max(||x||_2, 1e-12).  Padded lanes are exactly 0.
    sq = jnp.sum(h3 * h3, axis=-1, keepdims=True)              # (r3, 1)
    inv = jax.lax.rsqrt(jnp.maximum(sq, 1e-24))                # == 1 / max(sqrt(sq), 1e-12)
    o_ref[...] = (h3 * inv).astype(o_ref.dtype)


def init_params(key, cin=4, cmid=50):
    """Deterministic PyTorch-style (kaiming-uniform-ish) init for the 3 convs (HWIO)."""
    ks = jax.random.split(key, 6)

    def conv_w(k, ci, co):
        bound = 1.0 / jnp.sqrt(ci * 9.0)
        return jax.random.uniform(k, (3, 3, ci, co), jnp.float32, -bound, bound)

    def conv_b(k, ci, co):
        bound = 1.0 / jnp.sqrt(ci * 9.0)
        return jax.random.uniform(k, (1, co), jnp.float32, -bound, bound)

    return {
        "w1": conv_w(ks[0], cin, cmid), "b1": conv_b(ks[1], cin, cmid),
        "w2": conv_w(ks[2], cmid, cmid), "b2": conv_b(ks[3], cmid, cmid),
        "w3": conv_w(ks[4], cmid, cmid), "b3": conv_b(ks[5], cmid, cmid),
    }


def prepare_params(params, cpad=LANE):
    """One-time prep (outside the hot path): zero-pad in/out channels to the lane width and
    flatten each (3,3,Ci,Co) weight to (9*cpad, cpad) with row = (kh*3 + kw)*cpad + cin."""
    def flatten_w(w):
        wp = jnp.pad(w, ((0, 0), (0, 0),
                         (0, cpad - w.shape[2]), (0, cpad - w.shape[3])))
        return wp.reshape(9 * cpad, cpad)

    def pad_b(b):
        return jnp.pad(b, ((0, 0), (0, cpad - b.shape[-1])))

    return {
        "w1": flatten_w(params["w1"]), "b1": pad_b(params["b1"]),
        "w2": flatten_w(params["w2"]), "b2": pad_b(params["b2"]),
        "w3": flatten_w(params["w3"]), "b3": pad_b(params["b3"]),
    }


@functools.partial(jax.jit, static_argnames=("cout",))
def custom_model_forward(x_nchw, prep, cout=50):
    """CustomModel.forward: backbone (3x conv3x3+ReLU) -> Identity projector ->
    F.normalize(dim=1).  NCHW in / NCHW out to match the PyTorch interface."""
    N, Cin, H, W = x_nchw.shape
    Cp = prep["w1"].shape[-1]
    H3, W3 = H - 6, W - 6

    # Row budgets: layer-l output row q reads input rows up to q + 2*W + 2.
    r3 = H3 * W                              # rows stored (only cols < W3 are real)
    r2 = _round8(r3 + 2 * W + 2)             # rows computed by layer 2
    r1 = _round8(r2 + 2 * W + 2)             # rows computed by layer 1
    rx = _round8(r1 + 2 * W + 2)             # padded flattened-input rows (>= H*W)

    # NCHW -> flattened lane-dense NHWC: (N, H*W, Cin) zero-padded to (N, rx, Cp).
    x = jnp.transpose(x_nchw, (0, 2, 3, 1)).reshape(N, H * W, Cin)
    x = jnp.pad(x, ((0, 0), (0, rx - H * W), (0, Cp - Cin)))

    kernel = functools.partial(fused_model_kernel, W=W, r1=r1, r2=r2, r3=r3)
    y = pl.pallas_call(
        kernel,
        out_shape=jax.ShapeDtypeStruct((N, r3, Cp), jnp.float32),
        grid=(N,),
        in_specs=[
            pl.BlockSpec((None, rx, Cp), lambda n: (n, 0, 0)),
            pl.BlockSpec((9 * Cp, Cp), lambda n: (0, 0)),
            pl.BlockSpec((1, Cp), lambda n: (0, 0)),
            pl.BlockSpec((9 * Cp, Cp), lambda n: (0, 0)),
            pl.BlockSpec((1, Cp), lambda n: (0, 0)),
            pl.BlockSpec((9 * Cp, Cp), lambda n: (0, 0)),
            pl.BlockSpec((1, Cp), lambda n: (0, 0)),
        ],
        out_specs=pl.BlockSpec((None, r3, Cp), lambda n: (n, 0, 0)),
        compiler_params=pltpu.CompilerParams(
            dimension_semantics=("parallel",)),   # shard batch across TCs on v7x
    )(x, prep["w1"], prep["b1"], prep["w2"], prep["b2"], prep["w3"], prep["b3"])

    # Drop wrap-around columns and channel padding, back to NCHW.
    y = y.reshape(N, H3, W, Cp)[:, :, :W3, :cout]        # (N, H3, W3, cout)
    return jnp.transpose(y, (0, 3, 1, 2))                # (N, cout, H3, W3)


def _reference_forward(x_nchw, params):
    """Pure-JAX reference (unpadded params) for validation."""
    x = jnp.transpose(x_nchw, (0, 2, 3, 1))

    def conv(h, w, b):
        y = jax.lax.conv_general_dilated(
            h, w, window_strides=(1, 1), padding="VALID",
            dimension_numbers=("NHWC", "HWIO", "NHWC"))
        return jnp.maximum(y + b.reshape(1, 1, 1, -1), 0.0)

    h = conv(x, params["w1"], params["b1"])
    h = conv(h, params["w2"], params["b2"])
    h = conv(h, params["w3"], params["b3"])
    nrm = jnp.sqrt(jnp.sum(h * h, axis=-1, keepdims=True))
    h = h / jnp.maximum(nrm, 1e-12)
    return jnp.transpose(h, (0, 3, 1, 2))


if __name__ == "__main__":
    key = jax.random.PRNGKey(0)
    k_x, k_p = jax.random.split(key)

    # Small shapes consistent with the module: batch=2, input_features=4, 16x16.
    x = jax.random.normal(k_x, (2, 4, 16, 16), jnp.float32)
    params = init_params(k_p, cin=4, cmid=50)
    prep = prepare_params(params)                 # one-time host-side prep

    out = custom_model_forward(x, prep)
    out = jax.block_until_ready(out)

    ref = _reference_forward(x, params)
    assert out.shape == (2, 50, 10, 10), out.shape
    assert jnp.allclose(out, ref, atol=1e-4, rtol=1e-4), "mismatch vs reference"

    print("KERNEL_OK")
</pallas_src>

<mosaic_0001>
module attributes {stable_mosaic.version = 11 : i64} {
  func.func @fused_model_kernel(%arg0: i32, %arg1: memref<1x280x128xf32, #tpu.memory_space<vmem>>, %arg2: memref<1152x128xf32, #tpu.memory_space<vmem>>, %arg3: memref<1x128xf32, #tpu.memory_space<vmem>>, %arg4: memref<1152x128xf32, #tpu.memory_space<vmem>>, %arg5: memref<1x128xf32, #tpu.memory_space<vmem>>, %arg6: memref<1152x128xf32, #tpu.memory_space<vmem>>, %arg7: memref<1x128xf32, #tpu.memory_space<vmem>>, %arg8: memref<1x160x128xf32, #tpu.memory_space<vmem>>) attributes {dimension_semantics = [#tpu.dimension_semantics<parallel>], iteration_bounds = array<i64: 2>, scalar_prefetch = 0 : i64, scratch_operands = 0 : i64, tpu.core_type = #tpu.core_type<tc>, window_params = [{transform_indices = @transform_0, window_bounds = array<i64: 1, 280, 128>}, {pipeline_mode = #tpu.pipeline_mode<synchronous>, transform_indices = @transform_1, window_bounds = array<i64: 1152, 128>}, {pipeline_mode = #tpu.pipeline_mode<synchronous>, transform_indices = @transform_2, window_bounds = array<i64: 1, 128>}, {pipeline_mode = #tpu.pipeline_mode<synchronous>, transform_indices = @transform_3, window_bounds = array<i64: 1152, 128>}, {pipeline_mode = #tpu.pipeline_mode<synchronous>, transform_indices = @transform_4, window_bounds = array<i64: 1, 128>}, {pipeline_mode = #tpu.pipeline_mode<synchronous>, transform_indices = @transform_5, window_bounds = array<i64: 1152, 128>}, {pipeline_mode = #tpu.pipeline_mode<synchronous>, transform_indices = @transform_6, window_bounds = array<i64: 1, 128>}, {transform_indices = @transform_7, window_bounds = array<i64: 1, 160, 128>}]} {
    %c0 = arith.constant 0 : index
    %c0_0 = arith.constant 0 : index
    %c0_1 = arith.constant 0 : index
    %0 = vector.load %arg1[%c0, %c0_0, %c0_1] : memref<1x280x128xf32, #tpu.memory_space<vmem>>, vector<1x280x128xf32>
    %1 = vector.shape_cast %0 : vector<1x280x128xf32> to vector<280x128xf32>
    %cst = arith.constant 0.000000e+00 : f32
    %2 = vector.broadcast %cst : f32 to vector<240x128xf32>
    %3 = vector.extract_strided_slice %1 {offsets = [0, 0], sizes = [240, 128], strides = [1, 1]} : vector<280x128xf32> to vector<240x128xf32>
    %c0_2 = arith.constant 0 : index
    %c0_3 = arith.constant 0 : index
    %4 = vector.load %arg2[%c0_2, %c0_3] : memref<1152x128xf32, #tpu.memory_space<vmem>>, vector<128x128xf32>
    %cst_4 = arith.constant dense<0.000000e+00> : vector<240x128xf32>
    %5 = tpu.matmul %3, %4, %cst_4 {dimension_numbers = #tpu.dot_dimension_numbers<[1], [0], [0], [1], [0, 0, 1, 1], [], []>} : vector<240x128xf32>, vector<128x128xf32>, vector<240x128xf32> -> vector<240x128xf32>
    %6 = arith.addf %2, %5 : vector<240x128xf32>
    %7 = vector.extract_strided_slice %1 {offsets = [1, 0], sizes = [240, 128], strides = [1, 1]} : vector<280x128xf32> to vector<240x128xf32>
    %c128 = arith.constant 128 : index
    %c0_5 = arith.constant 0 : index
    %8 = vector.load %arg2[%c128, %c0_5] : memref<1152x128xf32, #tpu.memory_space<vmem>>, vector<128x128xf32>
    %cst_6 = arith.constant dense<0.000000e+00> : vector<240x128xf32>
    %9 = tpu.matmul %7, %8, %cst_6 {dimension_numbers = #tpu.dot_dimension_numbers<[1], [0], [0], [1], [0, 0, 1, 1], [], []>} : vector<240x128xf32>, vector<128x128xf32>, vector<240x128xf32> -> vector<240x128xf32>
    %10 = arith.addf %6, %9 : vector<240x128xf32>
    %11 = vector.extract_strided_slice %1 {offsets = [2, 0], sizes = [240, 128], strides = [1, 1]} : vector<280x128xf32> to vector<240x128xf32>
    %c256 = arith.constant 256 : index
    %c0_7 = arith.constant 0 : index
    %12 = vector.load %arg2[%c256, %c0_7] : memref<1152x128xf32, #tpu.memory_space<vmem>>, vector<128x128xf32>
    %cst_8 = arith.constant dense<0.000000e+00> : vector<240x128xf32>
    %13 = tpu.matmul %11, %12, %cst_8 {dimension_numbers = #tpu.dot_dimension_numbers<[1], [0], [0], [1], [0, 0, 1, 1], [], []>} : vector<240x128xf32>, vector<128x128xf32>, vector<240x128xf32> -> vector<240x128xf32>
    %14 = arith.addf %10, %13 : vector<240x128xf32>
    %15 = vector.extract_strided_slice %1 {offsets = [16, 0], sizes = [240, 128], strides = [1, 1]} : vector<280x128xf32> to vector<240x128xf32>
    %c384 = arith.constant 384 : index
    %c0_9 = arith.constant 0 : index
    %16 = vector.load %arg2[%c384, %c0_9] : memref<1152x128xf32, #tpu.memory_space<vmem>>, vector<128x128xf32>
    %cst_10 = arith.constant dense<0.000000e+00> : vector<240x128xf32>
    %17 = tpu.matmul %15, %16, %cst_10 {dimension_numbers = #tpu.dot_dimension_numbers<[1], [0], [0], [1], [0, 0, 1, 1], [], []>} : vector<240x128xf32>, vector<128x128xf32>, vector<240x128xf32> -> vector<240x128xf32>
    %18 = arith.addf %14, %17 : vector<240x128xf32>
    %19 = vector.extract_strided_slice %1 {offsets = [17, 0], sizes = [240, 128], strides = [1, 1]} : vector<280x128xf32> to vector<240x128xf32>
    %c512 = arith.constant 512 : index
    %c0_11 = arith.constant 0 : index
    %20 = vector.load %arg2[%c512, %c0_11] : memref<1152x128xf32, #tpu.memory_space<vmem>>, vector<128x128xf32>
    %cst_12 = arith.constant dense<0.000000e+00> : vector<240x128xf32>
    %21 = tpu.matmul %19, %20, %cst_12 {dimension_numbers = #tpu.dot_dimension_numbers<[1], [0], [0], [1], [0, 0, 1, 1], [], []>} : vector<240x128xf32>, vector<128x128xf32>, vector<240x128xf32> -> vector<240x128xf32>
    %22 = arith.addf %18, %21 : vector<240x128xf32>
    %23 = vector.extract_strided_slice %1 {offsets = [18, 0], sizes = [240, 128], strides = [1, 1]} : vector<280x128xf32> to vector<240x128xf32>
    %c640 = arith.constant 640 : index
    %c0_13 = arith.constant 0 : index
    %24 = vector.load %arg2[%c640, %c0_13] : memref<1152x128xf32, #tpu.memory_space<vmem>>, vector<128x128xf32>
    %cst_14 = arith.constant dense<0.000000e+00> : vector<240x128xf32>
    %25 = tpu.matmul %23, %24, %cst_14 {dimension_numbers = #tpu.dot_dimension_numbers<[1], [0], [0], [1], [0, 0, 1, 1], [], []>} : vector<240x128xf32>, vector<128x128xf32>, vector<240x128xf32> -> vector<240x128xf32>
    %26 = arith.addf %22, %25 : vector<240x128xf32>
    %27 = vector.extract_strided_slice %1 {offsets = [32, 0], sizes = [240, 128], strides = [1, 1]} : vector<280x128xf32> to vector<240x128xf32>
    %c768 = arith.constant 768 : index
    %c0_15 = arith.constant 0 : index
    %28 = vector.load %arg2[%c768, %c0_15] : memref<1152x128xf32, #tpu.memory_space<vmem>>, vector<128x128xf32>
    %cst_16 = arith.constant dense<0.000000e+00> : vector<240x128xf32>
    %29 = tpu.matmul %27, %28, %cst_16 {dimension_numbers = #tpu.dot_dimension_numbers<[1], [0], [0], [1], [0, 0, 1, 1], [], []>} : vector<240x128xf32>, vector<128x128xf32>, vector<240x128xf32> -> vector<240x128xf32>
    %30 = arith.addf %26, %29 : vector<240x128xf32>
    %31 = vector.extract_strided_slice %1 {offsets = [33, 0], sizes = [240, 128], strides = [1, 1]} : vector<280x128xf32> to vector<240x128xf32>
    %c896 = arith.constant 896 : index
    %c0_17 = arith.constant 0 : index
    %32 = vector.load %arg2[%c896, %c0_17] : memref<1152x128xf32, #tpu.memory_space<vmem>>, vector<128x128xf32>
    %cst_18 = arith.constant dense<0.000000e+00> : vector<240x128xf32>
    %33 = tpu.matmul %31, %32, %cst_18 {dimension_numbers = #tpu.dot_dimension_numbers<[1], [0], [0], [1], [0, 0, 1, 1], [], []>} : vector<240x128xf32>, vector<128x128xf32>, vector<240x128xf32> -> vector<240x128xf32>
    %34 = arith.addf %30, %33 : vector<240x128xf32>
    %35 = vector.extract_strided_slice %1 {offsets = [34, 0], sizes = [240, 128], strides = [1, 1]} : vector<280x128xf32> to vector<240x128xf32>
    %c1024 = arith.constant 1024 : index
    %c0_19 = arith.constant 0 : index
    %36 = vector.load %arg2[%c1024, %c0_19] : memref<1152x128xf32, #tpu.memory_space<vmem>>, vector<128x128xf32>
    %cst_20 = arith.constant dense<0.000000e+00> : vector<240x128xf32>
    %37 = tpu.matmul %35, %36, %cst_20 {dimension_numbers = #tpu.dot_dimension_numbers<[1], [0], [0], [1], [0, 0, 1, 1], [], []>} : vector<240x128xf32>, vector<128x128xf32>, vector<240x128xf32> -> vector<240x128xf32>
    %38 = arith.addf %34, %37 : vector<240x128xf32>
    %c0_21 = arith.constant 0 : index
    %c0_22 = arith.constant 0 : index
    %39 = vector.load %arg3[%c0_21, %c0_22] : memref<1x128xf32, #tpu.memory_space<vmem>>, vector<1x128xf32>
    %40 = vector.broadcast %39 : vector<1x128xf32> to vector<240x128xf32>
    %41 = arith.addf %38, %40 : vector<240x128xf32>
    %cst_23 = arith.constant 0.000000e+00 : f32
    %42 = vector.broadcast %cst_23 : f32 to vector<240x128xf32>
    %43 = arith.maximumf %41, %42 : vector<240x128xf32>
    %cst_24 = arith.constant 0.000000e+00 : f32
    %44 = vector.broadcast %cst_24 : f32 to vector<200x128xf32>
    %45 = vector.extract_strided_slice %43 {offsets = [0, 0], sizes = [200, 128], strides = [1, 1]} : vector<240x128xf32> to vector<200x128xf32>
    %c0_25 = arith.constant 0 : index
    %c0_26 = arith.constant 0 : index
    %46 = vector.load %arg4[%c0_25, %c0_26] : memref<1152x128xf32, #tpu.memory_space<vmem>>, vector<128x128xf32>
    %cst_27 = arith.constant dense<0.000000e+00> : vector<200x128xf32>
    %47 = tpu.matmul %45, %46, %cst_27 {dimension_numbers = #tpu.dot_dimension_numbers<[1], [0], [0], [1], [0, 0, 1, 1], [], []>} : vector<200x128xf32>, vector<128x128xf32>, vector<200x128xf32> -> vector<200x128xf32>
    %48 = arith.addf %44, %47 : vector<200x128xf32>
    %49 = vector.extract_strided_slice %43 {offsets = [1, 0], sizes = [200, 128], strides = [1, 1]} : vector<240x128xf32> to vector<200x128xf32>
    %c128_28 = arith.constant 128 : index
    %c0_29 = arith.constant 0 : index
    %50 = vector.load %arg4[%c128_28, %c0_29] : memref<1152x128xf32, #tpu.memory_space<vmem>>, vector<128x128xf32>
    %cst_30 = arith.constant dense<0.000000e+00> : vector<200x128xf32>
    %51 = tpu.matmul %49, %50, %cst_30 {dimension_numbers = #tpu.dot_dimension_numbers<[1], [0], [0], [1], [0, 0, 1, 1], [], []>} : vector<200x128xf32>, vector<128x128xf32>, vector<200x128xf32> -> vector<200x128xf32>
    %52 = arith.addf %48, %51 : vector<200x128xf32>
    %53 = vector.extract_strided_slice %43 {offsets = [2, 0], sizes = [200, 128], strides = [1, 1]} : vector<240x128xf32> to vector<200x128xf32>
    %c256_31 = arith.constant 256 : index
    %c0_32 = arith.constant 0 : index
    %54 = vector.load %arg4[%c256_31, %c0_32] : memref<1152x128xf32, #tpu.memory_space<vmem>>, vector<128x128xf32>
    %cst_33 = arith.constant dense<0.000000e+00> : vector<200x128xf32>
    %55 = tpu.matmul %53, %54, %cst_33 {dimension_numbers = #tpu.dot_dimension_numbers<[1], [0], [0], [1], [0, 0, 1, 1], [], []>} : vector<200x128xf32>, vector<128x128xf32>, vector<200x128xf32> -> vector<200x128xf32>
    %56 = arith.addf %52, %55 : vector<200x128xf32>
    %57 = vector.extract_strided_slice %43 {offsets = [16, 0], sizes = [200, 128], strides = [1, 1]} : vector<240x128xf32> to vector<200x128xf32>
    %c384_34 = arith.constant 384 : index
    %c0_35 = arith.constant 0 : index
    %58 = vector.load %arg4[%c384_34, %c0_35] : memref<1152x128xf32, #tpu.memory_space<vmem>>, vector<128x128xf32>
    %cst_36 = arith.constant dense<0.000000e+00> : vector<200x128xf32>
    %59 = tpu.matmul %57, %58, %cst_36 {dimension_numbers = #tpu.dot_dimension_numbers<[1], [0], [0], [1], [0, 0, 1, 1], [], []>} : vector<200x128xf32>, vector<128x128xf32>, vector<200x128xf32> -> vector<200x128xf32>
    %60 = arith.addf %56, %59 : vector<200x128xf32>
    %61 = vector.extract_strided_slice %43 {offsets = [17, 0], sizes = [200, 128], strides = [1, 1]} : vector<240x128xf32> to vector<200x128xf32>
    %c512_37 = arith.constant 512 : index
    %c0_38 = arith.constant 0 : index
    %62 = vector.load %arg4[%c512_37, %c0_38] : memref<1152x128xf32, #tpu.memory_space<vmem>>, vector<128x128xf32>
    %cst_39 = arith.constant dense<0.000000e+00> : vector<200x128xf32>
    %63 = tpu.matmul %61, %62, %cst_39 {dimension_numbers = #tpu.dot_dimension_numbers<[1], [0], [0], [1], [0, 0, 1, 1], [], []>} : vector<200x128xf32>, vector<128x128xf32>, vector<200x128xf32> -> vector<200x128xf32>
    %64 = arith.addf %60, %63 : vector<200x128xf32>
    %65 = vector.extract_strided_slice %43 {offsets = [18, 0], sizes = [200, 128], strides = [1, 1]} : vector<240x128xf32> to vector<200x128xf32>
    %c640_40 = arith.constant 640 : index
    %c0_41 = arith.constant 0 : index
    %66 = vector.load %arg4[%c640_40, %c0_41] : memref<1152x128xf32, #tpu.memory_space<vmem>>, vector<128x128xf32>
    %cst_42 = arith.constant dense<0.000000e+00> : vector<200x128xf32>
    %67 = tpu.matmul %65, %66, %cst_42 {dimension_numbers = #tpu.dot_dimension_numbers<[1], [0], [0], [1], [0, 0, 1, 1], [], []>} : vector<200x128xf32>, vector<128x128xf32>, vector<200x128xf32> -> vector<200x128xf32>
    %68 = arith.addf %64, %67 : vector<200x128xf32>
    %69 = vector.extract_strided_slice %43 {offsets = [32, 0], sizes = [200, 128], strides = [1, 1]} : vector<240x128xf32> to vector<200x128xf32>
    %c768_43 = arith.constant 768 : index
    %c0_44 = arith.constant 0 : index
    %70 = vector.load %arg4[%c768_43, %c0_44] : memref<1152x128xf32, #tpu.memory_space<vmem>>, vector<128x128xf32>
    %cst_45 = arith.constant dense<0.000000e+00> : vector<200x128xf32>
    %71 = tpu.matmul %69, %70, %cst_45 {dimension_numbers = #tpu.dot_dimension_numbers<[1], [0], [0], [1], [0, 0, 1, 1], [], []>} : vector<200x128xf32>, vector<128x128xf32>, vector<200x128xf32> -> vector<200x128xf32>
    %72 = arith.addf %68, %71 : vector<200x128xf32>
    %73 = vector.extract_strided_slice %43 {offsets = [33, 0], sizes = [200, 128], strides = [1, 1]} : vector<240x128xf32> to vector<200x128xf32>
    %c896_46 = arith.constant 896 : index
    %c0_47 = arith.constant 0 : index
    %74 = vector.load %arg4[%c896_46, %c0_47] : memref<1152x128xf32, #tpu.memory_space<vmem>>, vector<128x128xf32>
    %cst_48 = arith.constant dense<0.000000e+00> : vector<200x128xf32>
    %75 = tpu.matmul %73, %74, %cst_48 {dimension_numbers = #tpu.dot_dimension_numbers<[1], [0], [0], [1], [0, 0, 1, 1], [], []>} : vector<200x128xf32>, vector<128x128xf32>, vector<200x128xf32> -> vector<200x128xf32>
    %76 = arith.addf %72, %75 : vector<200x128xf32>
    %77 = vector.extract_strided_slice %43 {offsets = [34, 0], sizes = [200, 128], strides = [1, 1]} : vector<240x128xf32> to vector<200x128xf32>
    %c1024_49 = arith.constant 1024 : index
    %c0_50 = arith.constant 0 : index
    %78 = vector.load %arg4[%c1024_49, %c0_50] : memref<1152x128xf32, #tpu.memory_space<vmem>>, vector<128x128xf32>
    %cst_51 = arith.constant dense<0.000000e+00> : vector<200x128xf32>
    %79 = tpu.matmul %77, %78, %cst_51 {dimension_numbers = #tpu.dot_dimension_numbers<[1], [0], [0], [1], [0, 0, 1, 1], [], []>} : vector<200x128xf32>, vector<128x128xf32>, vector<200x128xf32> -> vector<200x128xf32>
    %80 = arith.addf %76, %79 : vector<200x128xf32>
    %c0_52 = arith.constant 0 : index
    %c0_53 = arith.constant 0 : index
    %81 = vector.load %arg5[%c0_52, %c0_53] : memref<1x128xf32, #tpu.memory_space<vmem>>, vector<1x128xf32>
    %82 = vector.broadcast %81 : vector<1x128xf32> to vector<200x128xf32>
    %83 = arith.addf %80, %82 : vector<200x128xf32>
    %cst_54 = arith.constant 0.000000e+00 : f32
    %84 = vector.broadcast %cst_54 : f32 to vector<200x128xf32>
    %85 = arith.maximumf %83, %84 : vector<200x128xf32>
    %cst_55 = arith.constant 0.000000e+00 : f32
    %86 = vector.broadcast %cst_55 : f32 to vector<160x128xf32>
    %87 = vector.extract_strided_slice %85 {offsets = [0, 0], sizes = [160, 128], strides = [1, 1]} : vector<200x128xf32> to vector<160x128xf32>
    %c0_56 = arith.constant 0 : index
    %c0_57 = arith.constant 0 : index
    %88 = vector.load %arg6[%c0_56, %c0_57] : memref<1152x128xf32, #tpu.memory_space<vmem>>, vector<128x128xf32>
    %cst_58 = arith.constant dense<0.000000e+00> : vector<160x128xf32>
    %89 = tpu.matmul %87, %88, %cst_58 {dimension_numbers = #tpu.dot_dimension_numbers<[1], [0], [0], [1], [0, 0, 1, 1], [], []>} : vector<160x128xf32>, vector<128x128xf32>, vector<160x128xf32> -> vector<160x128xf32>
    %90 = arith.addf %86, %89 : vector<160x128xf32>
    %91 = vector.extract_strided_slice %85 {offsets = [1, 0], sizes = [160, 128], strides = [1, 1]} : vector<200x128xf32> to vector<160x128xf32>
    %c128_59 = arith.constant 128 : index
    %c0_60 = arith.constant 0 : index
    %92 = vector.load %arg6[%c128_59, %c0_60] : memref<1152x128xf32, #tpu.memory_space<vmem>>, vector<128x128xf32>
    %cst_61 = arith.constant dense<0.000000e+00> : vector<160x128xf32>
    %93 = tpu.matmul %91, %92, %cst_61 {dimension_numbers = #tpu.dot_dimension_numbers<[1], [0], [0], [1], [0, 0, 1, 1], [], []>} : vector<160x128xf32>, vector<128x128xf32>, vector<160x128xf32> -> vector<160x128xf32>
    %94 = arith.addf %90, %93 : vector<160x128xf32>
    %95 = vector.extract_strided_slice %85 {offsets = [2, 0], sizes = [160, 128], strides = [1, 1]} : vector<200x128xf32> to vector<160x128xf32>
    %c256_62 = arith.constant 256 : index
    %c0_63 = arith.constant 0 : index
    %96 = vector.load %arg6[%c256_62, %c0_63] : memref<1152x128xf32, #tpu.memory_space<vmem>>, vector<128x128xf32>
    %cst_64 = arith.constant dense<0.000000e+00> : vector<160x128xf32>
    %97 = tpu.matmul %95, %96, %cst_64 {dimension_numbers = #tpu.dot_dimension_numbers<[1], [0], [0], [1], [0, 0, 1, 1], [], []>} : vector<160x128xf32>, vector<128x128xf32>, vector<160x128xf32> -> vector<160x128xf32>
    %98 = arith.addf %94, %97 : vector<160x128xf32>
    %99 = vector.extract_strided_slice %85 {offsets = [16, 0], sizes = [160, 128], strides = [1, 1]} : vector<200x128xf32> to vector<160x128xf32>
    %c384_65 = arith.constant 384 : index
    %c0_66 = arith.constant 0 : index
    %100 = vector.load %arg6[%c384_65, %c0_66] : memref<1152x128xf32, #tpu.memory_space<vmem>>, vector<128x128xf32>
    %cst_67 = arith.constant dense<0.000000e+00> : vector<160x128xf32>
    %101 = tpu.matmul %99, %100, %cst_67 {dimension_numbers = #tpu.dot_dimension_numbers<[1], [0], [0], [1], [0, 0, 1, 1], [], []>} : vector<160x128xf32>, vector<128x128xf32>, vector<160x128xf32> -> vector<160x128xf32>
    %102 = arith.addf %98, %101 : vector<160x128xf32>
    %103 = vector.extract_strided_slice %85 {offsets = [17, 0], sizes = [160, 128], strides = [1, 1]} : vector<200x128xf32> to vector<160x128xf32>
    %c512_68 = arith.constant 512 : index
    %c0_69 = arith.constant 0 : index
    %104 = vector.load %arg6[%c512_68, %c0_69] : memref<1152x128xf32, #tpu.memory_space<vmem>>, vector<128x128xf32>
    %cst_70 = arith.constant dense<0.000000e+00> : vector<160x128xf32>
    %105 = tpu.matmul %103, %104, %cst_70 {dimension_numbers = #tpu.dot_dimension_numbers<[1], [0], [0], [1], [0, 0, 1, 1], [], []>} : vector<160x128xf32>, vector<128x128xf32>, vector<160x128xf32> -> vector<160x128xf32>
    %106 = arith.addf %102, %105 : vector<160x128xf32>
    %107 = vector.extract_strided_slice %85 {offsets = [18, 0], sizes = [160, 128], strides = [1, 1]} : vector<200x128xf32> to vector<160x128xf32>
    %c640_71 = arith.constant 640 : index
    %c0_72 = arith.constant 0 : index
    %108 = vector.load %arg6[%c640_71, %c0_72] : memref<1152x128xf32, #tpu.memory_space<vmem>>, vector<128x128xf32>
    %cst_73 = arith.constant dense<0.000000e+00> : vector<160x128xf32>
    %109 = tpu.matmul %107, %108, %cst_73 {dimension_numbers = #tpu.dot_dimension_numbers<[1], [0], [0], [1], [0, 0, 1, 1], [], []>} : vector<160x128xf32>, vector<128x128xf32>, vector<160x128xf32> -> vector<160x128xf32>
    %110 = arith.addf %106, %109 : vector<160x128xf32>
    %111 = vector.extract_strided_slice %85 {offsets = [32, 0], sizes = [160, 128], strides = [1, 1]} : vector<200x128xf32> to vector<160x128xf32>
    %c768_74 = arith.constant 768 : index
    %c0_75 = arith.constant 0 : index
    %112 = vector.load %arg6[%c768_74, %c0_75] : memref<1152x128xf32, #tpu.memory_space<vmem>>, vector<128x128xf32>
    %cst_76 = arith.constant dense<0.000000e+00> : vector<160x128xf32>
    %113 = tpu.matmul %111, %112, %cst_76 {dimension_numbers = #tpu.dot_dimension_numbers<[1], [0], [0], [1], [0, 0, 1, 1], [], []>} : vector<160x128xf32>, vector<128x128xf32>, vector<160x128xf32> -> vector<160x128xf32>
    %114 = arith.addf %110, %113 : vector<160x128xf32>
    %115 = vector.extract_strided_slice %85 {offsets = [33, 0], sizes = [160, 128], strides = [1, 1]} : vector<200x128xf32> to vector<160x128xf32>
    %c896_77 = arith.constant 896 : index
    %c0_78 = arith.constant 0 : index
    %116 = vector.load %arg6[%c896_77, %c0_78] : memref<1152x128xf32, #tpu.memory_space<vmem>>, vector<128x128xf32>
    %cst_79 = arith.constant dense<0.000000e+00> : vector<160x128xf32>
    %117 = tpu.matmul %115, %116, %cst_79 {dimension_numbers = #tpu.dot_dimension_numbers<[1], [0], [0], [1], [0, 0, 1, 1], [], []>} : vector<160x128xf32>, vector<128x128xf32>, vector<160x128xf32> -> vector<160x128xf32>
    %118 = arith.addf %114, %117 : vector<160x128xf32>
    %119 = vector.extract_strided_slice %85 {offsets = [34, 0], sizes = [160, 128], strides = [1, 1]} : vector<200x128xf32> to vector<160x128xf32>
    %c1024_80 = arith.constant 1024 : index
    %c0_81 = arith.constant 0 : index
    %120 = vector.load %arg6[%c1024_80, %c0_81] : memref<1152x128xf32, #tpu.memory_space<vmem>>, vector<128x128xf32>
    %cst_82 = arith.constant dense<0.000000e+00> : vector<160x128xf32>
    %121 = tpu.matmul %119, %120, %cst_82 {dimension_numbers = #tpu.dot_dimension_numbers<[1], [0], [0], [1], [0, 0, 1, 1], [], []>} : vector<160x128xf32>, vector<128x128xf32>, vector<160x128xf32> -> vector<160x128xf32>
    %122 = arith.addf %118, %121 : vector<160x128xf32>
    %c0_83 = arith.constant 0 : index
    %c0_84 = arith.constant 0 : index
    %123 = vector.load %arg7[%c0_83, %c0_84] : memref<1x128xf32, #tpu.memory_space<vmem>>, vector<1x128xf32>
    %124 = vector.broadcast %123 : vector<1x128xf32> to vector<160x128xf32>
    %125 = arith.addf %122, %124 : vector<160x128xf32>
    %cst_85 = arith.constant 0.000000e+00 : f32
    %126 = vector.broadcast %cst_85 : f32 to vector<160x128xf32>
    %127 = arith.maximumf %125, %126 : vector<160x128xf32>
    %128 = arith.mulf %127, %127 : vector<160x128xf32>
    %cst_86 = arith.constant dense<0.000000e+00> : vector<160xf32>
    %129 = vector.multi_reduction <add>, %128, %cst_86 [1] : vector<160x128xf32> to vector<160xf32>
    %130 = vector.shape_cast %129 : vector<160xf32> to vector<160x1xf32>
    %cst_87 = arith.constant 1.000000e-24 : f32
    %131 = vector.broadcast %cst_87 : f32 to vector<160x1xf32>
    %132 = arith.maximumf %130, %131 : vector<160x1xf32>
    %133 = math.rsqrt %132 : vector<160x1xf32>
    %134 = vector.broadcast %133 : vector<160x1xf32> to vector<160x128xf32>
    %135 = arith.mulf %127, %134 : vector<160x128xf32>
    %c0_88 = arith.constant 0 : index
    %c0_89 = arith.constant 0 : index
    %c0_90 = arith.constant 0 : index
    %136 = vector.load %arg8[%c0_88, %c0_89, %c0_90] : memref<1x160x128xf32, #tpu.memory_space<vmem>>, vector<1x160x128xf32>
    %137 = vector.shape_cast %136 : vector<1x160x128xf32> to vector<160x128xf32>
    %138 = vector.shape_cast %135 : vector<160x128xf32> to vector<1x160x128xf32>
    tpu.vector_store %arg8[%c0_88, %c0_89, %c0_90], %138 {strides = array<i32>} : memref<1x160x128xf32, #tpu.memory_space<vmem>>, vector<1x160x128xf32>,
    return
  }
  func.func @transform_0(%arg0: i32) -> (i32, i32, i32) {
    %c0_i32 = arith.constant 0 : i32
    %c0_i32_0 = arith.constant 0 : i32
    %c0_i32_1 = arith.constant 0 : i32
    return %arg0, %c0_i32, %c0_i32_0 : i32, i32, i32
  }
  func.func @transform_1(%arg0: i32) -> (i32, i32) {
    %c0_i32 = arith.constant 0 : i32
    %c0_i32_0 = arith.constant 0 : i32
    %c0_i32_1 = arith.constant 0 : i32
    return %c0_i32, %c0_i32_0 : i32, i32
  }
  func.func @transform_2(%arg0: i32) -> (i32, i32) {
    %c0_i32 = arith.constant 0 : i32
    %c0_i32_0 = arith.constant 0 : i32
    %c0_i32_1 = arith.constant 0 : i32
    return %c0_i32, %c0_i32_0 : i32, i32
  }
  func.func @transform_3(%arg0: i32) -> (i32, i32) {
    %c0_i32 = arith.constant 0 : i32
    %c0_i32_0 = arith.constant 0 : i32
    %c0_i32_1 = arith.constant 0 : i32
    return %c0_i32, %c0_i32_0 : i32, i32
  }
  func.func @transform_4(%arg0: i32) -> (i32, i32) {
    %c0_i32 = arith.constant 0 : i32
    %c0_i32_0 = arith.constant 0 : i32
    %c0_i32_1 = arith.constant 0 : i32
    return %c0_i32, %c0_i32_0 : i32, i32
  }
  func.func @transform_5(%arg0: i32) -> (i32, i32) {
    %c0_i32 = arith.constant 0 : i32
    %c0_i32_0 = arith.constant 0 : i32
    %c0_i32_1 = arith.constant 0 : i32
    return %c0_i32, %c0_i32_0 : i32, i32
  }
  func.func @transform_6(%arg0: i32) -> (i32, i32) {
    %c0_i32 = arith.constant 0 : i32
    %c0_i32_0 = arith.constant 0 : i32
    %c0_i32_1 = arith.constant 0 : i32
    return %c0_i32, %c0_i32_0 : i32, i32
  }
  func.func @transform_7(%arg0: i32) -> (i32, i32, i32) {
    %c0_i32 = arith.constant 0 : i32
    %c0_i32_0 = arith.constant 0 : i32
    %c0_i32_1 = arith.constant 0 : i32
    return %arg0, %c0_i32, %c0_i32_0 : i32, i32, i32
  }
}

</mosaic_0001>

<bundles_post_ra>
// kernel: custom_model_forward.1
= control target key start
LH: loop header
LB: loop body
LE: loop exit
PB: predicated region body
PF: predicated region fallthrough
CT: control target
= control target key end

     0   :  { %12 = vsyncpa [#allocation3], 0  ;;  %s15228_s0 = inlined_call_operand.vmem [shape: f32[2,280,128], index: 0, kind: input, shape index: {}]   ;;  %s15229_s1 = inlined_call_operand.vmem [shape: f32[1152,128], index: 1, kind: input, shape index: {}]   ;;  %s15230_s2 = inlined_call_operand.vmem [shape: f32[1,128], index: 2, kind: input, shape index: {}]   ;;  %s15231_s3 = inlined_call_operand.hbm [shape: f32[1152,128], index: 3, kind: input, shape index: {}]   ;;  %s15232_s4 = inlined_call_operand.vmem [shape: f32[1,128], index: 4, kind: input, shape index: {}]   ;;  %s15233_s5 = inlined_call_operand.hbm [shape: f32[1152,128], index: 5, kind: input, shape index: {}]   ;;  %s15234_s6 = inlined_call_operand.vmem [shape: f32[1,128], index: 6, kind: input, shape index: {}]   ;;  %s15235_s7 = inlined_call_operand.vmem [shape: f32[2,160,128], index: 7, kind: output, shape index: {}]  }
   0x1   :  { %13 = vsyncpa [#allocation5], 0  ;;  %s10993_s24 = smov 0  }
   0x2 LB: > { %s10999_s25 = sadd.s32 4294967295, %s10945_s24   ;;  %p7441_p0 = scmp.ge.s32.totalorder %s10945_s24, 1  ;;  %s10945_s24 = sphi %s10993_s24, %s19_s24  }
   0x3   : > { %p202_p1 = scmp.lt.s32.totalorder %s10945_s24, 3  ;;  %s10947_s26 = smov [#allocation2]  }
   0x4   : > { %s220_s27 = sshll.u32 %s10947_s26, 4  ;;  %p10793_p3 = scmp.eq.s32.totalorder %s10999_s25, 0  ;;  %s221_s27 = int_to_ptr.vmem [resolvable:$true] %s220_s27 }
   0x5   : > { %p11003_p2 = pnand %p7441_p0, %p202_p1  ;;  %s10948_s29 = smov [#allocation4]  }
   0x6   : > { %s236_s30 = sshll.u32 %s10948_s29, 4  ;;  %s10890_s9 = scalar_lea.vmem %s221_s27, 18432  ;;  %s237_s30 = int_to_ptr.vmem [resolvable:$true] %s236_s30 }
   0x7   : > { %p10786_p4 = pneg %p11003_p2  ;;  %p10891_p7 = scmp.ne.s32.totalorder %s221_s27, %s10890_s9 }
   0x8   : > { %p10898_p10 = scmp.lt.s32.totalorder %s221_s27, %s221_s27  ;;  %p10899_p11 = scmp.lt.s32.totalorder %s10890_s9, %s10890_s9 }
   0x9   : > { %p11012_p5 = pnand %p10793_p3, %p10786_p4 }
   0xa   : > { %p10900_p12 = por %p10899_p11, %p10898_p10 }
   0xb   : > { %p10881_p6 = pneg %p11012_p5 }
   0xd   : > { %p10893_p8 = pnand %p10891_p7, %p10881_p6 }
   0xf   : > { %p10894_p9 = pneg %p10893_p8 }
  0x11   : > { %p10901_p13 = pnand %p10900_p12, %p10894_p9 }
  0x13   : > { %10904 = shalt.err (!%p10901_p13)
}
  0x14   : > { %s10949_s10 = smov 128   ;;  %s10950_s11 = smov 8  }
  0x15   : > { %10789 = dma.hbm_to_vmem [thread:$0]  (!%p11012_p5), %s15231_s3, 18432, %s221_s27, [#allocation3], %s10949_s10, %s10949_s10, %s10950_s11  }
  0x16   : > { %s10916_s14 = scalar_lea.vmem %s237_s30, 18432  ;;  %p10924_p7 = scmp.lt.s32.totalorder %s237_s30, %s237_s30 }
  0x17   : > { %p10917_p0 = scmp.ne.s32.totalorder %s237_s30, %s10916_s14  ;;  %p10925_p8 = scmp.lt.s32.totalorder %s10916_s14, %s10916_s14 }
  0x19   : > { %p10919_p1 = pnand %p10917_p0, %p10881_p6  ;;  %p10926_p10 = por %p10925_p8, %p10924_p7 }
  0x1b   : > { %p10920_p4 = pneg %p10919_p1 }
  0x1d   : > { %p10927_p9 = pnand %p10926_p10, %p10920_p4 }
  0x1f   : > { %10930 = shalt.err (!%p10927_p9)
}
  0x20   : > { %10792 = dma.hbm_to_vmem [thread:$0]  (!%p11012_p5), %s15233_s5, 18432, %s237_s30, [#allocation5], %s10949_s10, %s10949_s10, %s10950_s11  }
  0x21   : > { %263 = sbr.rel (%p11003_p2) target bundleno = 1758 (0x6de), region = 48 }
  0x26   : > { %10936 = dma.done.wait (%p10793_p3), [#allocation3], 18432  }
  0x27   : > { %10938 = vsyncadd (%p10793_p3), [#allocation3], 4294948864 }
  0x28   : > { %10940 = dma.done.wait (%p10793_p3), [#allocation5], 18432  }
  0x29   : > { %10942 = vsyncadd (%p10793_p3), [#allocation5], 4294948864  ;;  %v375_v0 = vld [vmem:[%s15229_s1 + $0xf8] sm:$0xff]  ;;  %v374_v2 = vld [vmem:[%s15229_s1 + $0xf0] sm:$0xff]  ;;  %p299_p2 = scmp.lt.s32.totalorder %s10999_s25, 1  ;;  %vm407_vm0 = vcmask 1046528  }
  0x2a   : > { %v359_v1 = vld [vmem:[%s15229_s1 + $0x78] sm:$0xff]  ;;  %8562 = vmatprep.subr.mxu0 %v375_v0  ;;  %v358_v3 = vld [vmem:[%s15229_s1 + $0x70] sm:$0xff]  ;;  %v373_v4 = vld [vmem:[%s15229_s1 + $0xe8] sm:$0xff]  ;;  %vm945_vm1 = vcmask 1045504   ;;  %vm10952_vm2 = vmmov 0  }
  0x2b   : > { %8639 = vmatprep.subr.mxu1 %v359_v1  ;;  %8563 = vmatpush3.msra.mxu0 %v375_v0  ;;  %v357_v5 = vld [vmem:[%s15229_s1 + $0x68] sm:$0xff]  ;;  %v372_v6 = vld [vmem:[%s15229_s1 + $0xe0] sm:$0xff]  ;;  %v371_v8 = vld [vmem:[%s15229_s1 + $0xd8] sm:$0xff]  ;;  %s15664_s25 = smov (!%p299_p2, %s10999_s25), 1 }
  0x2c   : > { %8640 = vmatpush3.msra.mxu1 %v359_v1  ;;  %8564 = vmatprep.subr.mxu0 %v374_v2  ;;  %v356_v7 = vld [vmem:[%s15229_s1 + $0x60] sm:$0xff]  ;;  %v355_v9 = vld [vmem:[%s15229_s1 + $0x58] sm:$0xff]  ;;  %v370_v10 = vld [vmem:[%s15229_s1 + $0xd0] sm:$0xff]  ;;  %s10776_s11 = smul.u32 280, %s15664_s25 }
  0x2d   : > { %8641 = vmatprep.subr.mxu1 %v358_v3  ;;  %8565 = vmatpush3.msra.mxu0 %v374_v2  ;;  %v354_v11 = vld [vmem:[%s15229_s1 + $0x50] sm:$0xff]  ;;  %v369_v12 = vld [vmem:[%s15229_s1 + $0xc8] sm:$0xff]  ;;  %v368_v14 = vld [vmem:[%s15229_s1 + $0xc0] sm:$0xff]  ;;  %s10777_s13 = smul.u32 160, %s15664_s25 }
  0x2e   : > { %8642 = vmatpush3.msra.mxu1 %v358_v3  ;;  %8566 = vmatprep.subr.mxu0 %v373_v4  ;;  %v353_v13 = vld [vmem:[%s15229_s1 + $0x48] sm:$0xff]  ;;  %v352_v15 = vld [vmem:[%s15229_s1 + $0x40] sm:$0xff]  ;;  %v367_v16 = vld [vmem:[%s15229_s1 + $0xb8] sm:$0xff]  ;;  %s11118_s22 = scalar_lea.vmem %s15228_s0, %s10776_s11 }
  0x2f   : > { %8643 = vmatprep.subr.mxu1 %v357_v5  ;;  %8567 = vmatpush3.msra.mxu0 %v373_v4  ;;  %v351_v17 = vld [vmem:[%s15229_s1 + $0x38] sm:$0xff]  ;;  %v366_v18 = vld [vmem:[%s15229_s1 + $0xb0] sm:$0xff]  ;;  %v365_v20 = vld [vmem:[%s15229_s1 + $0xa8] sm:$0xff]  ;;  %s15183_s16 = scalar_lea.vmem %s15235_s7, %s10777_s13 }
  0x30   : > { %8644 = vmatpush3.msra.mxu1 %v357_v5  ;;  %8568 = vmatprep.subr.mxu0 %v372_v6  ;;  %v350_v19 = vld [vmem:[%s15229_s1 + $0x30] sm:$0xff]  ;;  %v349_v21 = vld [vmem:[%s15229_s1 + $0x28] sm:$0xff]  ;;  %v364_v22 = vld [vmem:[%s15229_s1 + $0xa0] sm:$0xff] }
  0x31   : > { %8645 = vmatprep.subr.mxu1 %v356_v7  ;;  %8569 = vmatpush3.msra.mxu0 %v372_v6  ;;  %v348_v23 = vld [vmem:[%s15229_s1 + $0x20] sm:$0xff]  ;;  %v363_v24 = vld [vmem:[%s15229_s1 + $0x98] sm:$0xff]  ;;  %v11136_v27 = vld [vmem:[%s11118_s22 + $0x8] sm:$0xff] }
  0x32   : > { %8646 = vmatpush3.msra.mxu1 %v356_v7  ;;  %8570 = vmatprep.subr.mxu0 %v371_v8  ;;  %v347_v25 = vld [vmem:[%s15229_s1 + $0x18] sm:$0xff]  ;;  %v11133_v26 = vld [vmem:[%s11118_s22] sm:$0xff]  ;;  %v362_v28 = vld [vmem:[%s15229_s1 + $0x90] sm:$0xff]  ;;  %v409_v32 = vrot.slane %v11136_v27, 1 }
  0x33   : > { %8647 = vmatprep.subr.mxu1 %v355_v9  ;;  %8571 = vmatpush3.msra.mxu0 %v371_v8  ;;  %v346_v29 = vld [vmem:[%s15229_s1 + $0x10] sm:$0xff]  ;;  %v408_v31 = vrot.slane %v11133_v26, 1  ;;  %v11150_v33 = vld [vmem:[%s11118_s22 + $0x18] sm:$0xff]  ;;  %v361_v34 = vld [vmem:[%s15229_s1 + $0x88] sm:$0xff] }
  0x34   : > { %8648 = vmatpush3.msra.mxu1 %v355_v9  ;;  %8572 = vmatprep.subr.mxu0 %v370_v10  ;;  %v11145_v30 = vld [vmem:[%s11118_s22 + $0x10] sm:$0xff]  ;;  %v345_v35 = vld [vmem:[%s15229_s1 + $0x8] sm:$0xff]  ;;  %v360_v37 = vld [vmem:[%s15229_s1 + $0x80] sm:$0xff]  ;;  %v413_v39 = vrot.slane %v11150_v33, 1 }
  0x35   : > { %8649 = vmatprep.subr.mxu1 %v354_v11  ;;  %8573 = vmatpush3.msra.mxu0 %v370_v10  ;;  %v411_v36 = vrot.slane %v11145_v30, 1  ;;  %v344_v38 = vld [vmem:[%s15229_s1] sm:$0xff]  ;;  %v410_v41 = vsel %vm407_vm0, %v408_v31, %v409_v32  ;;  %v11171_v42 = vld [vmem:[%s11118_s22 + $0x28] sm:$0xff]  ;;  %v944_v45 = vld [vmem:[%s15229_s1 + $0x178] sm:$0xff] }
  0x36   : > { %8650 = vmatpush3.msra.mxu1 %v354_v11  ;;  %8574 = vmatprep.subr.mxu0 %v369_v12  ;;  %v11167_v40 = vld [vmem:[%s11118_s22 + $0x20] sm:$0xff]  ;;  %v417_v47 = vrot.slane %v11171_v42, 1  ;;  %v11183_v48 = vld [vmem:[%s11118_s22 + $0x30] sm:$0xff]  ;;  %v11187_v49 = vld [vmem:[%s11118_s22 + $0x38] sm:$0xff] }
  0x37   : > { %8651 = vmatprep.subr.mxu1 %v353_v13  ;;  %8575 = vmatpush3.msra.mxu0 %v369_v12  ;;  %v412_v43 = vsel %vm407_vm0, %v409_v32, %v411_v36  ;;  %v415_v44 = vrot.slane %v11167_v40, 1  ;;  %v11179_v46 = vsel %vm407_vm0, %v411_v36, %v413_v39  ;;  %v943_v50 = vld [vmem:[%s15229_s1 + $0x170] sm:$0xff]  ;;  %v1297_v51 = vld [vmem:[%s15229_s1 + $0x1f8] sm:$0xff]  ;;  %v419_v53 = vrot.slane %v11183_v48, 1  ;;  %v11207_v56 = vld [vmem:[%s11118_s22 + $0x40] sm:$0xff] }
  0x38   : > { %8652 = vmatpush3.msra.mxu1 %v353_v13  ;;  %8576 = vmatprep.subr.mxu0 %v368_v14  ;;  %v421_v55 = vrot.slane %v11187_v49, 1  ;;  %v942_v57 = vld [vmem:[%s15229_s1 + $0x168] sm:$0xff]  ;;  %v423_v60 = vrot.slane %v11207_v56, 1  ;;  %v11228_v63 = vld [vmem:[%s11118_s22 + $0x50] sm:$0xff]  ;;  %v941_v0 = vld [vmem:[%s15229_s1 + $0x160] sm:$0xff] }
  0x39   : > { %8653 = vmatprep.subr.mxu1 %v352_v15  ;;  %8577 = vmatpush3.msra.mxu0 %v368_v14  ;;  %v11198_v52 = vsel %vm407_vm0, %v413_v39, %v415_v44  ;;  %v11203_v54 = vsel %vm407_vm0, %v415_v44, %v417_v47  ;;  %v11213_v58 = vld [vmem:[%s11118_s22 + $0x48] sm:$0xff]  ;;  %v11219_v59 = vsel %vm407_vm0, %v417_v47, %v419_v53  ;;  %v11234_v1 = vld [vmem:[%s11118_s22 + $0x58] sm:$0xff]  ;;  %v1296_v2 = vld [vmem:[%s15229_s1 + $0x1f0] sm:$0xff]  ;;  %v427_v4 = vrot.slane %v11228_v63, 1 }
  0x3a   : > { %8654 = vmatpush3.msra.mxu1 %v352_v15  ;;  %8578 = vmatprep.subr.mxu0 %v367_v16  ;;  %v11224_v61 = vsel %vm407_vm0, %v419_v53, %v421_v55  ;;  %v425_v62 = vrot.slane %v11213_v58, 1  ;;  %v11244_v3 = vsel %vm407_vm0, %v421_v55, %v423_v60  ;;  %v429_v6 = vrot.slane %v11234_v1, 1  ;;  %v11252_v7 = vld [vmem:[%s11118_s22 + $0x60] sm:$0xff]  ;;  %v940_v8 = vld [vmem:[%s15229_s1 + $0x158] sm:$0xff]  ;;  %v11258_v9 = vld [vmem:[%s11118_s22 + $0x68] sm:$0xff] }
  0x3b   : > { %8655 = vmatprep.subr.mxu1 %v351_v17  ;;  %8579 = vmatpush3.msra.mxu0 %v367_v16  ;;  %v1295_v10 = vld [vmem:[%s15229_s1 + $0x1e8] sm:$0xff]  ;;  %v431_v12 = vrot.slane %v11252_v7, 1  ;;  %v433_v14 = vrot.slane %v11258_v9, 1  ;;  %v11276_v15 = vld [vmem:[%s11118_s22 + $0x70] sm:$0xff]  ;;  %v937_v36 = vld [vmem:[%s15229_s1 + $0x140] sm:$0xff] }
  0x3c   : > { %8656 = vmatpush3.msra.mxu1 %v351_v17  ;;  %8580 = vmatprep.subr.mxu0 %v366_v18  ;;  %v11248_v5 = vsel %vm407_vm0, %v423_v60, %v425_v62  ;;  %v11268_v11 = vsel %vm407_vm0, %v425_v62, %v427_v4  ;;  %v11272_v13 = vsel %vm407_vm0, %v427_v4, %v429_v6  ;;  %v939_v16 = vld [vmem:[%s15229_s1 + $0x150] sm:$0xff]  ;;  %v11282_v17 = vld [vmem:[%s11118_s22 + $0x78] sm:$0xff]  ;;  %v11351_v47 = vld [vmem:[%s11118_s22 + $0xa0] sm:$0xff] }
  0x3d   : > { %8657 = vmatprep.subr.mxu1 %v350_v19  ;;  %8581 = vmatpush3.msra.mxu0 %v366_v18  ;;  %v1294_v18 = vld [vmem:[%s15229_s1 + $0x1e0] sm:$0xff]  ;;  %v1291_v53 = vld [vmem:[%s15229_s1 + $0x1c8] sm:$0xff] }
  0x3e   : > { %8658 = vmatpush3.msra.mxu1 %v350_v19  ;;  %8582 = vmatprep.subr.mxu0 %v365_v20  ;;  %v11292_v19 = vsel %vm407_vm0, %v429_v6, %v431_v12  ;;  %v934_v4 = vld [vmem:[%s15229_s1 + $0x128] sm:$0xff]  ;;  %v1290_v6 = vld [vmem:[%s15229_s1 + $0x1c0] sm:$0xff] }
  0x3f   : > { %8659 = vmatprep.subr.mxu1 %v349_v21  ;;  %8583 = vmatpush3.msra.mxu0 %v365_v20  ;;  %v435_v20 = vrot.slane %v11276_v15, 1 }
  0x40   : > { %8660 = vmatpush3.msra.mxu1 %v349_v21  ;;  %8584 = vmatprep.subr.mxu0 %v364_v22  ;;  %v11296_v21 = vsel %vm407_vm0, %v431_v12, %v433_v14 }
  0x41   : > { %8661 = vmatprep.subr.mxu1 %v348_v23  ;;  %8585 = vmatpush3.msra.mxu0 %v364_v22  ;;  %v437_v22 = vrot.slane %v11282_v17, 1 }
  0x42   : > { %8662 = vmatpush3.msra.mxu1 %v348_v23  ;;  %8586 = vmatprep.subr.mxu0 %v363_v24  ;;  %v11300_v23 = vld [vmem:[%s11118_s22 + $0x80] sm:$0xff] }
  0x43   : > { %8663 = vmatprep.subr.mxu1 %v347_v25  ;;  %8587 = vmatpush3.msra.mxu0 %v363_v24  ;;  %v938_v24 = vld [vmem:[%s15229_s1 + $0x148] sm:$0xff]  ;;  %v439_v31 = vrot.slane %v11300_v23, 1  ;;  %v11320_v32 = vsel %vm407_vm0, %v435_v20, %v437_v22 }
  0x44   : > { %8664 = vmatpush3.msra.mxu1 %v347_v25  ;;  %8588 = vmatprep.subr.mxu0 %v362_v28  ;;  %v11306_v25 = vld [vmem:[%s11118_s22 + $0x88] sm:$0xff] }
  0x45   : > { %8665 = vmatprep.subr.mxu1 %v346_v29  ;;  %8589 = vmatpush3.msra.mxu0 %v362_v28  ;;  %v1293_v28 = vld [vmem:[%s15229_s1 + $0x1d8] sm:$0xff]  ;;  %v11340_v39 = vsel %vm407_vm0, %v437_v22, %v439_v31 }
  0x46   : > { %8666 = vmatpush3.msra.mxu1 %v346_v29  ;;  %8590 = vmatprep.subr.mxu0 %v361_v34  ;;  %v11316_v29 = vsel %vm407_vm0, %v433_v14, %v435_v20  ;;  %v933_v20 = vld [vmem:[%s15229_s1 + $0x120] sm:$0xff]  ;;  %v1289_v22 = vld [vmem:[%s15229_s1 + $0x1b8] sm:$0xff] }
  0x47   : > { %8667 = vmatprep.subr.mxu1 %v345_v35  ;;  %8591 = vmatpush3.msra.mxu0 %v361_v34  ;;  %v441_v34 = vrot.slane %v11306_v25, 1 }
  0x48   : > { %8668 = vmatpush3.msra.mxu1 %v345_v35  ;;  %8592 = vmatprep.subr.mxu0 %v360_v37  ;;  %v11324_v35 = vld [vmem:[%s11118_s22 + $0x90] sm:$0xff] }
  0x49   : > { %8669 = vmatprep.subr.mxu1 %v344_v38  ;;  %8593 = vmatpush3.msra.mxu0 %v360_v37  ;;  %v11330_v37 = vld [vmem:[%s11118_s22 + $0x98] sm:$0xff]  ;;  %v11347_v44 = vsel %vm407_vm0, %v439_v31, %v441_v34 }
  0x4a   : > { %8594 = vmatprep.mubr.f32.mxu0 %v410_v41  ;;  %8670 = vmatpush3.msra.mxu1 %v344_v38  ;;  %v1292_v38 = vld [vmem:[%s15229_s1 + $0x1d0] sm:$0xff]  ;;  %v443_v41 = vrot.slane %v11324_v35, 1 }
  0x4b   : > { %8671 = vmatprep.mubr.f32.mxu1 %v11133_v26  ;;  %8595 = vmatmul.mubr.f32.vlgmr.msra.gmra.mxu0 %v412_v43  ;;  %v936_v43 = vld [vmem:[%s15229_s1 + $0x138] sm:$0xff] }
  0x4c   : > { %8672 = vmatmul.mubr.f32.vlgmr.msra.gmra.mxu1 %v11136_v27  ;;  %8716 = vmatprep.subr.mxu0 %v944_v45  ;;  %v11366_v55 = vsel %vm407_vm0, %v441_v34, %v443_v41 }
  0x4d   : > { %8597 = vmatprep.mubr.f32.mxu0 %v11179_v46  ;;  %8717 = vmatpush3.msra.mxu0 %v944_v45  ;;  %v445_v45 = vrot.slane %v11330_v37, 1 }
  0x4e   : > { %8674 = vmatprep.mubr.f32.mxu1 %v11145_v30  ;;  %8718 = vmatprep.subr.mxu0 %v943_v50 }
  0x4f   : > { %8793 = vmatprep.subr.mxu1 %v1297_v51  ;;  %8598 = vmatmul.mubr.f32.gmra.mxu0 %v11198_v52  ;;  %v11371_v60 = vsel %vm407_vm0, %v443_v41, %v445_v45  ;;  %v932_v41 = vld [vmem:[%s15229_s1 + $0x118] sm:$0xff] }
  0x50   : > { %8675 = vmatmul.mubr.f32.gmra.mxu1 %v11150_v33  ;;  %8719 = vmatpush3.msra.mxu0 %v943_v50  ;;  %v11354_v50 = vld [vmem:[%s11118_s22 + $0xa8] sm:$0xff] }
  0x51   : > { %8600 = vmatprep.mubr.f32.mxu0 %v11203_v54  ;;  %8677 = vmatprep.mubr.f32.mxu1 %v11167_v40  ;;  %v449_v62 = vrot.slane %v11354_v50, 1 }
  0x52   : > { %8720 = vmatprep.subr.mxu0 %v942_v57  ;;  %8794 = vmatpush3.msra.mxu1 %v1297_v51  ;;  %v935_v51 = vld [vmem:[%s15229_s1 + $0x130] sm:$0xff] }
  0x53   : > { %8721 = vmatpush3.msra.mxu0 %v942_v57  ;;  %8795 = vmatprep.subr.mxu1 %v1296_v2  ;;  %v447_v57 = vrot.slane %v11351_v47, 1 }
  0x54   : > { %8601 = vmatmul.mubr.f32.gmra.mxu0 %v11219_v59  ;;  %8678 = vmatmul.mubr.f32.gmra.mxu1 %v11171_v42 }
  0x55   : > { %8603 = vmatprep.mubr.f32.mxu0 %v11224_v61  ;;  %8680 = vmatprep.mubr.f32.mxu1 %v11183_v48  ;;  %v11395_v12 = vsel %vm407_vm0, %v447_v57, %v449_v62 }
  0x56   : > { %8722 = vmatprep.subr.mxu0 %v941_v0  ;;  %8796 = vmatpush3.msra.mxu1 %v1296_v2  ;;  %v11378_v2 = vld [vmem:[%s11118_s22 + $0xb8] sm:$0xff] }
  0x57   : > { %8723 = vmatpush3.msra.mxu0 %v941_v0  ;;  %8797 = vmatprep.subr.mxu1 %v1295_v10  ;;  %v11375_v0 = vld [vmem:[%s11118_s22 + $0xb0] sm:$0xff]  ;;  %v453_v14 = vrot.slane %v11378_v2, 1 }
  0x58   : > { %8604 = vmatmul.mubr.f32.gmra.mxu0 %v11244_v3  ;;  %8681 = vmatmul.mubr.f32.gmra.mxu1 %v11187_v49 }
  0x59   : > { %8606 = vmatprep.mubr.f32.mxu0 %v11248_v5  ;;  %8683 = vmatprep.mubr.f32.mxu1 %v11207_v56 }
  0x5a   : > { %8724 = vmatprep.subr.mxu0 %v940_v8  ;;  %8798 = vmatpush3.msra.mxu1 %v1295_v10  ;;  %v451_v10 = vrot.slane %v11375_v0, 1 }
  0x5b   : > { %8725 = vmatpush3.msra.mxu0 %v940_v8  ;;  %8799 = vmatprep.subr.mxu1 %v1294_v18  ;;  %v11391_v8 = vsel %vm407_vm0, %v445_v45, %v447_v57 }
  0x5c   : > { %8607 = vmatmul.mubr.f32.gmra.mxu0 %v11268_v11  ;;  %8684 = vmatmul.mubr.f32.gmra.mxu1 %v11213_v58  ;;  %v11419_v31 = vsel %vm407_vm0, %v451_v10, %v453_v14 }
  0x5d   : > { %8609 = vmatprep.mubr.f32.mxu0 %v11272_v13  ;;  %8686 = vmatprep.mubr.f32.mxu1 %v11228_v63 }
  0x5e   : > { %8726 = vmatprep.subr.mxu0 %v939_v16  ;;  %8800 = vmatpush3.msra.mxu1 %v1294_v18  ;;  %v11402_v18 = vld [vmem:[%s11118_s22 + $0xc8] sm:$0xff] }
  0x5f   : > { %8727 = vmatpush3.msra.mxu0 %v939_v16  ;;  %8801 = vmatprep.subr.mxu1 %v1293_v28  ;;  %v11399_v16 = vld [vmem:[%s11118_s22 + $0xc0] sm:$0xff]  ;;  %v457_v34 = vrot.slane %v11402_v18, 1 }
  0x60   : > { %8610 = vmatmul.mubr.f32.gmra.mxu0 %v11292_v19  ;;  %8687 = vmatmul.mubr.f32.gmra.mxu1 %v11234_v1 }
  0x61   : > { %8612 = vmatprep.mubr.f32.mxu0 %v11296_v21  ;;  %8689 = vmatprep.mubr.f32.mxu1 %v11252_v7 }
  0x62   : > { %8728 = vmatprep.subr.mxu0 %v938_v24  ;;  %8802 = vmatpush3.msra.mxu1 %v1293_v28  ;;  %v455_v28 = vrot.slane %v11399_v16, 1 }
  0x63   : > { %8729 = vmatpush3.msra.mxu0 %v938_v24  ;;  %8803 = vmatprep.subr.mxu1 %v1292_v38  ;;  %v11415_v24 = vsel %vm407_vm0, %v449_v62, %v451_v10  ;;  %v11447_v62 = vld [vmem:[%s11118_s22 + $0xe0] sm:$0xff] }
  0x64   : > { %8613 = vmatmul.mubr.f32.gmra.mxu0 %v11316_v29  ;;  %8690 = vmatmul.mubr.f32.gmra.mxu1 %v11258_v9  ;;  %v11439_v45 = vsel %vm407_vm0, %v453_v14, %v455_v28  ;;  %v463_v14 = vrot.slane %v11447_v62, 1 }
  0x65   : > { %8615 = vmatprep.mubr.f32.mxu0 %v11320_v32  ;;  %8692 = vmatprep.mubr.f32.mxu1 %v11276_v15  ;;  %15321 = vst [vmem:[#allocation8_spill] sm:$0xff] %v11439_v45 }
  0x66   : > { %8730 = vmatprep.subr.mxu0 %v937_v36  ;;  %8804 = vmatpush3.msra.mxu1 %v1292_v38  ;;  %v11426_v38 = vld [vmem:[%s11118_s22 + $0xd8] sm:$0xff] }
  0x67   : > { %8731 = vmatpush3.msra.mxu0 %v937_v36  ;;  %8805 = vmatprep.subr.mxu1 %v1291_v53  ;;  %v11423_v36 = vld [vmem:[%s11118_s22 + $0xd0] sm:$0xff]  ;;  %v461_v57 = vrot.slane %v11426_v38, 1 }
  0x68   : > { %8616 = vmatmul.mubr.f32.gmra.mxu0 %v11340_v39  ;;  %8693 = vmatmul.mubr.f32.gmra.mxu1 %v11282_v17 }
  0x69   : > { %8732 = vmatprep.subr.mxu0 %v936_v43  ;;  %8618 = vmatprep.mubr.f32.mxu0 %v11347_v44 }
  0x6a   : > { %8695 = vmatprep.mubr.f32.mxu1 %v11300_v23  ;;  %8733 = vmatpush3.msra.mxu0 %v936_v43  ;;  %v1288_v43 = vld [vmem:[%s15229_s1 + $0x1b0] sm:$0xff] }
  0x6b   : > { %8734 = vmatprep.subr.mxu0 %v935_v51  ;;  %8806 = vmatpush3.msra.mxu1 %v1291_v53  ;;  %v11443_v53 = vsel %vm407_vm0, %v455_v28, %v457_v34  ;;  %v11470_v28 = vld [vmem:[%s11118_s22 + $0xf0] sm:$0xff] }
  0x6c   : > { %8619 = vmatmul.mubr.f32.gmra.mxu0 %v11366_v55  ;;  %8696 = vmatmul.mubr.f32.gmra.mxu1 %v11306_v25  ;;  %15322 = vst [vmem:[#allocation9_spill] sm:$0xff] %v11443_v53 }
  0x6d   : > { %8621 = vmatprep.mubr.f32.mxu0 %v11371_v60  ;;  %8698 = vmatprep.mubr.f32.mxu1 %v11324_v35 }
  0x6e   : > { %8735 = vmatpush3.msra.mxu0 %v935_v51  ;;  %8807 = vmatprep.subr.mxu1 %v1290_v6  ;;  %v459_v51 = vrot.slane %v11423_v36, 1 }
  0x6f   : > { %8736 = vmatprep.subr.mxu0 %v934_v4  ;;  %8808 = vmatpush3.msra.mxu1 %v1290_v6  ;;  %v11455_v6 = vld [vmem:[%s11118_s22 + $0xe8] sm:$0xff] }
  0x70   : > { %8622 = vmatmul.mubr.f32.gmra.mxu0 %v11391_v8  ;;  %8699 = vmatmul.mubr.f32.gmra.mxu1 %v11330_v37  ;;  %v11459_v10 = vsel %vm407_vm0, %v457_v34, %v459_v51  ;;  %v1286_v34 = vld [vmem:[%s15229_s1 + $0x1a0] sm:$0xff] }
  0x71   : > { %8624 = vmatprep.mubr.f32.mxu0 %v11395_v12  ;;  %8701 = vmatprep.mubr.f32.mxu1 %v11351_v47  ;;  %15323 = vst [vmem:[#allocation10_spill] sm:$0xff] %v11459_v10 }
  0x72   : > { %8737 = vmatpush3.msra.mxu0 %v934_v4  ;;  %8809 = vmatprep.subr.mxu1 %v1289_v22  ;;  %v931_v4 = vld [vmem:[%s15229_s1 + $0x110] sm:$0xff] }
  0x73   : > { %8738 = vmatprep.subr.mxu0 %v933_v20  ;;  %8810 = vmatpush3.msra.mxu1 %v1289_v22  ;;  %v11467_v22 = vsel %vm407_vm0, %v459_v51, %v461_v57  ;;  %v947_v51 = vrot.slane %v11136_v27, 2  ;;  %v1283_v27 = vld [vmem:[%s15229_s1 + $0x188] sm:$0xff] }
  0x74   : > { %8625 = vmatmul.mubr.f32.gmra.mxu0 %v11415_v24  ;;  %8702 = vmatmul.mubr.f32.gmra.mxu1 %v11354_v50  ;;  %15324 = vst [vmem:[#allocation11_spill] sm:$0xff] %v11467_v22 }
  0x75   : > { %8627 = vmatprep.mubr.f32.mxu0 %v11419_v31  ;;  %8704 = vmatprep.mubr.f32.mxu1 %v11375_v0 }
  0x76   : > { %8739 = vmatpush3.msra.mxu0 %v933_v20  ;;  %8811 = vmatprep.subr.mxu1 %v1288_v43  ;;  %v1287_v20 = vld [vmem:[%s15229_s1 + $0x1a8] sm:$0xff] }
  0x77   : > { %8740 = vmatprep.subr.mxu0 %v932_v41  ;;  %8812 = vmatpush3.msra.mxu1 %v1288_v43  ;;  %v11483_v43 = vsel %vm407_vm0, %v461_v57, %v463_v14  ;;  %v946_v57 = vrot.slane %v11133_v26, 2  ;;  %v929_v26 = vld [vmem:[%s15229_s1 + $0x100] sm:$0xff] }
  0x78   : > { %8628 = vmatmul.mubr.f32.gmra.mxu0 %v11439_v45  ;;  %8705 = vmatmul.mubr.f32.gmra.mxu1 %v11378_v2  ;;  %v949_v45 = vrot.slane %v11145_v30, 2 }
  0x79   : > { %8741 = vmatpush3.msra.mxu0 %v932_v41  ;;  %8630 = vmatprep.mubr.f32.mxu0 %v11443_v53  ;;  %v465_v41 = vrot.slane %v11455_v6, 1  ;;  %v930_v53 = vld [vmem:[%s15229_s1 + $0x108] sm:$0xff] }
  0x7a   : > { %8707 = vmatprep.mubr.f32.mxu1 %v11399_v16  ;;  %8742 = vmatprep.subr.mxu0 %v931_v4 }
  0x7b   : > { %8743 = vmatpush3.msra.mxu0 %v931_v4  ;;  %8813 = vmatprep.subr.mxu1 %v1287_v20  ;;  %v1285_v4 = vld [vmem:[%s15229_s1 + $0x198] sm:$0xff] }
  0x7c   : > { %8631 = vmatmul.mubr.f32.gmra.mxu0 %v11459_v10  ;;  %8708 = vmatmul.mubr.f32.gmra.mxu1 %v11402_v18  ;;  %v11491_v10 = vsel %vm407_vm0, %v463_v14, %v465_v41  ;;  %v1284_v14 = vld [vmem:[%s15229_s1 + $0x190] sm:$0xff] }
  0x7d   : > { %8633 = vmatprep.mubr.f32.mxu0 %v11467_v22  ;;  %8710 = vmatprep.mubr.f32.mxu1 %v11423_v36 }
  0x7e   : > { %8814 = vmatpush3.msra.mxu1 %v1287_v20  ;;  %8744 = vmatprep.subr.mxu0 %v930_v53  ;;  %v15325_v20 = vrot.slane %v11470_v28, 1 }
  0x7f   : > { %8815 = vmatprep.subr.mxu1 %v1286_v34  ;;  %8745 = vmatpush3.msra.mxu0 %v930_v53  ;;  %v948_v53 = vsel %vm945_vm1, %v946_v57, %v947_v51  ;;  %v955_v57 = vrot.slane %v11171_v42, 2 }
  0x80   : > { %8634 = vmatmul.mubr.f32.gmra.mxu0 %v11483_v43  ;;  %8711 = vmatmul.mubr.f32.gmra.mxu1 %v11426_v38  ;;  %v11500_v22 = vsel %vm407_vm0, %v465_v41, %v15325_v20  ;;  %v950_v41 = vsel %vm945_vm1, %v947_v51, %v949_v45  ;;  %v1558_v20 = vld [vmem:[%s15229_s1 + $0x278] sm:$0xff] }
  0x81   : > { %8816 = vmatpush3.msra.mxu1 %v1286_v34  ;;  %15326 = vst [vmem:[#allocation12_spill] sm:$0xff] %v11500_v22  ;;  %8636 = vmatprep.mubr.f32.mxu0 %v11491_v10  ;;  %v951_v34 = vrot.slane %v11150_v33, 2 }
  0x82   : > { %8817 = vmatprep.subr.mxu1 %v1285_v4  ;;  %8713 = vmatprep.mubr.f32.mxu1 %v11447_v62 }
  0x83   : > { %8818 = vmatpush3.msra.mxu1 %v1285_v4  ;;  %8746 = vmatprep.subr.mxu0 %v929_v26  ;;  %v1282_v4 = vld [vmem:[%s15229_s1 + $0x180] sm:$0xff]  ;;  %v11528_v51 = vsel %vm945_vm1, %v949_v45, %v951_v34  ;;  %v959_v45 = vrot.slane %v11187_v49, 2 }
  0x84   : > { %8637 = vmatmul.mubr.f32.gmra.mxu0 %v11500_v22  ;;  %8714 = vmatmul.mubr.f32.gmra.mxu1 %v11455_v6  ;;  %v953_v22 = vrot.slane %v11167_v40, 2 }
  0x85   : > { %8819 = vmatprep.subr.mxu1 %v1284_v14  ;;  %8747 = vmatpush3.msra.mxu0 %v929_v26 }
  0x86   : > { %8820 = vmatpush3.msra.mxu1 %v1284_v14  ;;  %8748 = vmatprep.mubr.f32.mxu0 %v948_v53  ;;  %v1557_v14 = vld [vmem:[%s15229_s1 + $0x270] sm:$0xff]  ;;  %v11535_v26 = vsel %vm945_vm1, %v951_v34, %v953_v22  ;;  %v957_v53 = vrot.slane %v11183_v48, 2 }
  0x87   : > { %8821 = vmatprep.subr.mxu1 %v1283_v27  ;;  %8870 = vmatprep.subr.mxu0 %v1558_v20 }
  0x88   : > { %8822 = vmatpush3.msra.mxu1 %v1283_v27  ;;  %8749 = vmatmul.mubr.f32.vlgmr.msra.gmra.mxu0 %v950_v41  ;;  %v11540_v27 = vsel %vm945_vm1, %v953_v22, %v955_v57  ;;  %v961_v22 = vrot.slane %v11207_v56, 2  ;;  %v1555_v41 = vld [vmem:[%s15229_s1 + $0x260] sm:$0xff]  ;;  %v11559_v34 = vsel %vm945_vm1, %v957_v53, %v959_v45 }
  0x89   : > { %8823 = vmatprep.subr.mxu1 %v1282_v4  ;;  %8825 = vmatprep.mubr.f32.mxu1 %v11145_v30  ;;  %v1556_v30 = vld [vmem:[%s15229_s1 + $0x268] sm:$0xff] }
  0x8a   : > { %8824 = vmatpush3.msra.mxu1 %v1282_v4  ;;  %8871 = vmatpush3.msra.mxu0 %v1558_v20  ;;  %v1554_v4 = vld [vmem:[%s15229_s1 + $0x258] sm:$0xff]  ;;  %v965_v20 = vrot.slane %v11228_v63, 2 }
  0x8b   : > { %8826 = vmatmul.mubr.f32.vlgmr.msra.gmra.mxu1 %v11150_v33  ;;  %8751 = vmatprep.mubr.f32.mxu0 %v11528_v51  ;;  %v11551_v33 = vsel %vm945_vm1, %v955_v57, %v957_v53  ;;  %v1552_v53 = vld [vmem:[%s15229_s1 + $0x248] sm:$0xff] }
  0x8c   : > { %8872 = vmatprep.subr.mxu0 %v1557_v14  ;;  %8752 = vmatmul.mubr.f32.gmra.mxu0 %v11535_v26 }
  0x8d   : > { %8828 = vmatprep.mubr.f32.mxu1 %v11167_v40  ;;  %8873 = vmatpush3.msra.mxu0 %v1557_v14  ;;  %v963_v40 = vrot.slane %v11213_v58, 2  ;;  %v967_v14 = vrot.slane %v11234_v1, 2 }
  0x8e   : > { %8754 = vmatprep.mubr.f32.mxu0 %v11540_v27  ;;  %8874 = vmatprep.subr.mxu0 %v1556_v30 }
  0x8f   : > { %8829 = vmatmul.mubr.f32.gmra.mxu1 %v11171_v42  ;;  %8875 = vmatpush3.msra.mxu0 %v1556_v30  ;;  %v11569_v42 = vsel %vm945_vm1, %v959_v45, %v961_v22  ;;  %v11577_v57 = vsel %vm945_vm1, %v961_v22, %v963_v40  ;;  %v969_v45 = vrot.slane %v11252_v7, 2  ;;  %v11595_v30 = vsel %vm945_vm1, %v965_v20, %v967_v14 }
  0x90   : > { %8831 = vmatprep.mubr.f32.mxu1 %v11183_v48  ;;  %8755 = vmatmul.mubr.f32.gmra.mxu0 %v11551_v33  ;;  %v1553_v48 = vld [vmem:[%s15229_s1 + $0x250] sm:$0xff]  ;;  %v971_v22 = vrot.slane %v11258_v9, 2 }
  0x91   : > { %8876 = vmatprep.subr.mxu0 %v1555_v41  ;;  %8757 = vmatprep.mubr.f32.mxu0 %v11559_v34 }
  0x92   : > { %8877 = vmatpush3.msra.mxu0 %v1555_v41  ;;  %v1550_v41 = vld [vmem:[%s15229_s1 + $0x238] sm:$0xff] }
  0x93   : > { %8832 = vmatmul.mubr.f32.gmra.mxu1 %v11187_v49  ;;  %8878 = vmatprep.subr.mxu0 %v1554_v4  ;;  %v11587_v49 = vsel %vm945_vm1, %v963_v40, %v965_v20  ;;  %v11608_v40 = vsel %vm945_vm1, %v967_v14, %v969_v45  ;;  %v975_v20 = vrot.slane %v11282_v17, 2  ;;  %v977_v14 = vrot.slane %v11300_v23, 2 }
  0x94   : > { %8834 = vmatprep.mubr.f32.mxu1 %v11207_v56  ;;  %8879 = vmatpush3.msra.mxu0 %v1554_v4  ;;  %v1551_v56 = vld [vmem:[%s15229_s1 + $0x240] sm:$0xff]  ;;  %v973_v4 = vrot.slane %v11276_v15, 2 }
  0x95   : > { %8758 = vmatmul.mubr.f32.gmra.mxu0 %v11569_v42  ;;  %8880 = vmatprep.subr.mxu0 %v1553_v48 }
  0x96   : > { %8760 = vmatprep.mubr.f32.mxu0 %v11577_v57  ;;  %8881 = vmatpush3.msra.mxu0 %v1553_v48  ;;  %v1826_v48 = vld [vmem:[%s15229_s1 + $0x2f0] sm:$0xff] }
  0x97   : > { %8835 = vmatmul.mubr.f32.gmra.mxu1 %v11213_v58  ;;  %8882 = vmatprep.subr.mxu0 %v1552_v53  ;;  %v1827_v58 = vld [vmem:[%s15229_s1 + $0x2f8] sm:$0xff] }
  0x98   : > { %8837 = vmatprep.mubr.f32.mxu1 %v11228_v63  ;;  %8883 = vmatpush3.msra.mxu0 %v1552_v53  ;;  %v11613_v63 = vsel %vm945_vm1, %v969_v45, %v971_v22  ;;  %v11631_v53 = vsel %vm945_vm1, %v973_v4, %v975_v20  ;;  %v979_v45 = vrot.slane %v11306_v25, 2 }
  0x99   : > { %8761 = vmatmul.mubr.f32.gmra.mxu0 %v11587_v49  ;;  %8884 = vmatprep.subr.mxu0 %v1551_v56 }
  0x9a   : > { %8763 = vmatprep.mubr.f32.mxu0 %v11595_v30  ;;  %8885 = vmatpush3.msra.mxu0 %v1551_v56  ;;  %v1825_v56 = vld [vmem:[%s15229_s1 + $0x2e8] sm:$0xff] }
  0x9b   : > { %8838 = vmatmul.mubr.f32.gmra.mxu1 %v11234_v1  ;;  %8886 = vmatprep.subr.mxu0 %v1550_v41  ;;  %v11623_v1 = vsel %vm945_vm1, %v971_v22, %v973_v4  ;;  %v981_v22 = vrot.slane %v11324_v35, 2  ;;  %v1548_v4 = vld [vmem:[%s15229_s1 + $0x228] sm:$0xff] }
  0x9c   : > { %8840 = vmatprep.mubr.f32.mxu1 %v11252_v7  ;;  %8947 = vmatprep.subr.mxu1 %v1827_v58  ;;  %v1549_v7 = vld [vmem:[%s15229_s1 + $0x230] sm:$0xff] }
  0x9d   : > { %8764 = vmatmul.mubr.f32.gmra.mxu0 %v11608_v40  ;;  %8948 = vmatpush3.msra.mxu1 %v1827_v58  ;;  %v983_v58 = vrot.slane %v11330_v37, 2 }
  0x9e   : > { %8766 = vmatprep.mubr.f32.mxu0 %v11613_v63  ;;  %8887 = vmatpush3.msra.mxu0 %v1550_v41  ;;  %v1824_v41 = vld [vmem:[%s15229_s1 + $0x2e0] sm:$0xff] }
  0x9f   : > { %8841 = vmatmul.mubr.f32.gmra.mxu1 %v11258_v9  ;;  %8949 = vmatprep.subr.mxu1 %v1826_v48  ;;  %v11641_v9 = vsel %vm945_vm1, %v975_v20, %v977_v14  ;;  %v11662_v20 = vsel %vm945_vm1, %v979_v45, %v981_v22 }
  0xa0   : > { %8843 = vmatprep.mubr.f32.mxu1 %v11276_v15  ;;  %8950 = vmatpush3.msra.mxu1 %v1826_v48  ;;  %v11649_v15 = vsel %vm945_vm1, %v977_v14, %v979_v45  ;;  %v985_v48 = vrot.slane %v11351_v47, 2  ;;  %v987_v14 = vrot.slane %v11354_v50, 2  ;;  %v989_v45 = vrot.slane %v11375_v0, 2 }
  0xa1   : > { %8767 = vmatmul.mubr.f32.gmra.mxu0 %v11623_v1  ;;  %8888 = vmatprep.subr.mxu0 %v1549_v7 }
  0xa2   : > { %8769 = vmatprep.mubr.f32.mxu0 %v11631_v53  ;;  %8951 = vmatprep.subr.mxu1 %v1825_v56 }
  0xa3   : > { %8844 = vmatmul.mubr.f32.gmra.mxu1 %v11282_v17  ;;  %8889 = vmatpush3.msra.mxu0 %v1549_v7  ;;  %v1823_v17 = vld [vmem:[%s15229_s1 + $0x2d8] sm:$0xff]  ;;  %v1822_v7 = vld [vmem:[%s15229_s1 + $0x2d0] sm:$0xff] }
  0xa4   : > { %8846 = vmatprep.mubr.f32.mxu1 %v11300_v23  ;;  %8952 = vmatpush3.msra.mxu1 %v1825_v56  ;;  %v11667_v23 = vsel %vm945_vm1, %v981_v22, %v983_v58  ;;  %v11685_v56 = vsel %vm945_vm1, %v985_v48, %v987_v14  ;;  %v1821_v22 = vld [vmem:[%s15229_s1 + $0x2c8] sm:$0xff] }
  0xa5   : > { %8770 = vmatmul.mubr.f32.gmra.mxu0 %v11641_v9  ;;  %8953 = vmatprep.subr.mxu1 %v1824_v41 }
  0xa6   : > { %8772 = vmatprep.mubr.f32.mxu0 %v11649_v15  ;;  %8954 = vmatpush3.msra.mxu1 %v1824_v41  ;;  %v991_v41 = vrot.slane %v11378_v2, 2 }
  0xa7   : > { %8847 = vmatmul.mubr.f32.gmra.mxu1 %v11306_v25  ;;  %8890 = vmatprep.subr.mxu0 %v1548_v4  ;;  %v11677_v25 = vsel %vm945_vm1, %v983_v58, %v985_v48  ;;  %v993_v58 = vrot.slane %v11399_v16, 2  ;;  %v995_v48 = vrot.slane %v11402_v18, 2 }
  0xa8   : > { %8849 = vmatprep.mubr.f32.mxu1 %v11324_v35  ;;  %8955 = vmatprep.subr.mxu1 %v1823_v17  ;;  %v1547_v35 = vld [vmem:[%s15229_s1 + $0x220] sm:$0xff] }
  0xa9   : > { %8773 = vmatmul.mubr.f32.gmra.mxu0 %v11662_v20  ;;  %8956 = vmatpush3.msra.mxu1 %v1823_v17  ;;  %v1546_v17 = vld [vmem:[%s15229_s1 + $0x218] sm:$0xff] }
  0xaa   : > { %8775 = vmatprep.mubr.f32.mxu0 %v11667_v23  ;;  %8891 = vmatpush3.msra.mxu0 %v1548_v4  ;;  %v1820_v4 = vld [vmem:[%s15229_s1 + $0x2c0] sm:$0xff] }
  0xab   : > { %8850 = vmatmul.mubr.f32.gmra.mxu1 %v11330_v37  ;;  %8957 = vmatprep.subr.mxu1 %v1822_v7  ;;  %v11695_v37 = vsel %vm945_vm1, %v987_v14, %v989_v45  ;;  %v1819_v14 = vld [vmem:[%s15229_s1 + $0x2b8] sm:$0xff] }
  0xac   : > { %8852 = vmatprep.mubr.f32.mxu1 %v11351_v47  ;;  %8958 = vmatpush3.msra.mxu1 %v1822_v7  ;;  %v11703_v47 = vsel %vm945_vm1, %v989_v45, %v991_v41  ;;  %v997_v7 = vrot.slane %v11423_v36, 2  ;;  %v1818_v45 = vld [vmem:[%s15229_s1 + $0x2b0] sm:$0xff] }
  0xad   : > { %8776 = vmatmul.mubr.f32.gmra.mxu0 %v11677_v25  ;;  %8892 = vmatprep.subr.mxu0 %v1547_v35 }
  0xae   : > { %8778 = vmatprep.mubr.f32.mxu0 %v11685_v56  ;;  %8959 = vmatprep.subr.mxu1 %v1821_v22 }
  0xaf   : > { %8853 = vmatmul.mubr.f32.gmra.mxu1 %v11354_v50  ;;  %8893 = vmatpush3.msra.mxu0 %v1547_v35  ;;  %v11713_v50 = vsel %vm945_vm1, %v991_v41, %v993_v58  ;;  %v999_v35 = vrot.slane %v11426_v38, 2  ;;  %v1817_v41 = vld [vmem:[%s15229_s1 + $0x2a8] sm:$0xff] }
  0xb0   : > { %8855 = vmatprep.mubr.f32.mxu1 %v11375_v0  ;;  %8960 = vmatpush3.msra.mxu1 %v1821_v22  ;;  %v11721_v0 = vsel %vm945_vm1, %v993_v58, %v995_v48  ;;  %v11734_v22 = vsel %vm945_vm1, %v995_v48, %v997_v7  ;;  %v1544_v48 = vld [vmem:[%s15229_s1 + $0x208] sm:$0xff] }
  0xb1   : > { %8779 = vmatmul.mubr.f32.gmra.mxu0 %v11695_v37  ;;  %8961 = vmatprep.subr.mxu1 %v1820_v4  ;;  %v11743_v58 = vsel %vm945_vm1, %v997_v7, %v999_v35 }
  0xb2   : > { %8781 = vmatprep.mubr.f32.mxu0 %v11703_v47  ;;  %8894 = vmatprep.subr.mxu0 %v1546_v17  ;;  %15327 = vst [vmem:[#allocation13_spill] sm:$0xff] %v11743_v58 }
  0xb3   : > { %8856 = vmatmul.mubr.f32.gmra.mxu1 %v11378_v2  ;;  %8895 = vmatpush3.msra.mxu0 %v1546_v17  ;;  %v1545_v2 = vld [vmem:[%s15229_s1 + $0x210] sm:$0xff]  ;;  %v1816_v17 = vld [vmem:[%s15229_s1 + $0x2a0] sm:$0xff] }
  0xb4   : > { %8858 = vmatprep.mubr.f32.mxu1 %v11399_v16  ;;  %8962 = vmatpush3.msra.mxu1 %v1820_v4  ;;  %v1001_v16 = vrot.slane %v11447_v62, 2  ;;  %v1003_v4 = vrot.slane %v11455_v6, 2 }
  0xb5   : > { %8782 = vmatmul.mubr.f32.gmra.mxu0 %v11713_v50  ;;  %8963 = vmatprep.subr.mxu1 %v1819_v14 }
  0xb6   : > { %8784 = vmatprep.mubr.f32.mxu0 %v11721_v0  ;;  %8964 = vmatpush3.msra.mxu1 %v1819_v14  ;;  %v1815_v14 = vld [vmem:[%s15229_s1 + $0x298] sm:$0xff]  ;;  %v11765_v7 = vsel %vm945_vm1, %v1001_v16, %v1003_v4 }
  0xb7   : > { %8859 = vmatmul.mubr.f32.gmra.mxu1 %v11402_v18  ;;  %8965 = vmatprep.subr.mxu1 %v1818_v45  ;;  %v11748_v18 = vsel %vm945_vm1, %v999_v35, %v1001_v16  ;;  %15329 = vst [vmem:[#allocation15_spill] sm:$0xff] %v11765_v7  ;;  %v11782_v35 = vld [vmem:[%s11118_s22 + $0xf8] sm:$0xff] }
  0xb8   : > { %8861 = vmatprep.mubr.f32.mxu1 %v11423_v36  ;;  %8896 = vmatprep.subr.mxu0 %v1545_v2  ;;  %15328 = vst [vmem:[#allocation14_spill] sm:$0xff] %v11748_v18  ;;  %v15246_v36 = vrot.slane %v11470_v28, 2  ;;  %v2094_v16 = vld [vmem:[%s15229_s1 + $0x378] sm:$0xff] }
  0xb9   : > { %8785 = vmatmul.mubr.f32.gmra.mxu0 %v11734_v22  ;;  %8966 = vmatpush3.msra.mxu1 %v1818_v45  ;;  %v1543_v45 = vld [vmem:[%s15229_s1 + $0x200] sm:$0xff] }
  0xba   : > { %8897 = vmatpush3.msra.mxu0 %v1545_v2  ;;  %8967 = vmatprep.subr.mxu1 %v1817_v41  ;;  %v1812_v2 = vld [vmem:[%s15229_s1 + $0x280] sm:$0xff] }
  0xbb   : > { %8862 = vmatmul.mubr.f32.gmra.mxu1 %v11426_v38  ;;  %8787 = vmatprep.mubr.f32.mxu0 %v11743_v58  ;;  %v11770_v38 = vsel %vm945_vm1, %v1003_v4, %v15246_v36  ;;  %v2088_v4 = vld [vmem:[%s15229_s1 + $0x348] sm:$0xff] }
  0xbc   : > { %8968 = vmatpush3.msra.mxu1 %v1817_v41  ;;  %8864 = vmatprep.mubr.f32.mxu1 %v11447_v62  ;;  %v1814_v62 = vld [vmem:[%s15229_s1 + $0x290] sm:$0xff] }
  0xbd   : > { %8788 = vmatmul.mubr.f32.gmra.mxu0 %v11748_v18  ;;  %8969 = vmatprep.subr.mxu1 %v1816_v17  ;;  %v2093_v41 = vld [vmem:[%s15229_s1 + $0x370] sm:$0xff] }
  0xbe   : > { %8898 = vmatprep.subr.mxu0 %v1544_v48  ;;  %8970 = vmatpush3.msra.mxu1 %v1816_v17  ;;  %v2087_v17 = vld [vmem:[%s15229_s1 + $0x340] sm:$0xff] }
  0xbf   : > { %8865 = vmatmul.mubr.f32.gmra.mxu1 %v11455_v6  ;;  %8899 = vmatpush3.msra.mxu0 %v1544_v48  ;;  %v1813_v6 = vld [vmem:[%s15229_s1 + $0x288] sm:$0xff]  ;;  %v2086_v48 = vld [vmem:[%s15229_s1 + $0x338] sm:$0xff] }
  0xc0   : > { %8971 = vmatprep.subr.mxu1 %v1815_v14  ;;  %8790 = vmatprep.mubr.f32.mxu0 %v11765_v7 }
  0xc1   : > { %8972 = vmatpush3.msra.mxu1 %v1815_v14  ;;  %8791 = vmatmul.mubr.f32.gmra.mxu0 %v11770_v38  ;;  %v2355_v14 = vld [vmem:[%s15229_s1 + $0x3f8] sm:$0xff] }
  0xc2   : > { %8973 = vmatprep.subr.mxu1 %v1814_v62  ;;  %8867 = vmatprep.mubr.f32.mxu1 %v11470_v28 }
  0xc3   : > { %8900 = vmatprep.subr.mxu0 %v1543_v45  ;;  %8974 = vmatpush3.msra.mxu1 %v1814_v62  ;;  %v2354_v62 = vld [vmem:[%s15229_s1 + $0x3f0] sm:$0xff] }
  0xc4   : > { %8868 = vmatmul.mubr.f32.gmra.mxu1 %v11782_v35  ;;  %8901 = vmatpush3.msra.mxu0 %v1543_v45  ;;  %v2085_v45 = vld [vmem:[%s15229_s1 + $0x330] sm:$0xff] }
  0xc5   : > { %8975 = vmatprep.subr.mxu1 %v1813_v6  ;;  %8902 = vmatprep.mubr.f32.mxu0 %v11179_v46  ;;  %v2092_v46 = vld [vmem:[%s15229_s1 + $0x368] sm:$0xff] }
  0xc6   : > { %8976 = vmatpush3.msra.mxu1 %v1813_v6  ;;  %8903 = vmatmul.mubr.f32.vlgmr.msra.gmra.mxu0 %v11198_v52  ;;  %v2091_v52 = vld [vmem:[%s15229_s1 + $0x360] sm:$0xff]  ;;  %v2353_v6 = vld [vmem:[%s15229_s1 + $0x3e8] sm:$0xff] }
  0xc7   : > { %8977 = vmatprep.subr.mxu1 %v1812_v2  ;;  %9024 = vmatprep.subr.mxu0 %v2094_v16 }
  0xc8   : > { %8978 = vmatpush3.msra.mxu1 %v1812_v2  ;;  %8979 = vmatprep.mubr.f32.mxu1 %v11528_v51  ;;  %v2090_v51 = vld [vmem:[%s15229_s1 + $0x358] sm:$0xff]  ;;  %v2352_v2 = vld [vmem:[%s15229_s1 + $0x3e0] sm:$0xff] }
  0xc9   : > { %9025 = vmatpush3.msra.mxu0 %v2094_v16  ;;  %8980 = vmatmul.mubr.f32.vlgmr.msra.gmra.mxu1 %v11535_v26  ;;  %v2089_v26 = vld [vmem:[%s15229_s1 + $0x350] sm:$0xff]  ;;  %v2084_v16 = vld [vmem:[%s15229_s1 + $0x328] sm:$0xff] }
  0xca   : > { %8905 = vmatprep.mubr.f32.mxu0 %v11203_v54  ;;  %9026 = vmatprep.subr.mxu0 %v2093_v41 }
  0xcb   : > { %8906 = vmatmul.mubr.f32.gmra.mxu0 %v11219_v59  ;;  %8982 = vmatprep.mubr.f32.mxu1 %v11540_v27 }
  0xcc   : > { %9027 = vmatpush3.msra.mxu0 %v2093_v41  ;;  %8908 = vmatprep.mubr.f32.mxu0 %v11224_v61  ;;  %v2351_v41 = vld [vmem:[%s15229_s1 + $0x3d8] sm:$0xff] }
  0xcd   : > { %8983 = vmatmul.mubr.f32.gmra.mxu1 %v11551_v33  ;;  %9028 = vmatprep.subr.mxu0 %v2092_v46 }
  0xce   : > { %8985 = vmatprep.mubr.f32.mxu1 %v11559_v34  ;;  %9029 = vmatpush3.msra.mxu0 %v2092_v46  ;;  %v2350_v46 = vld [vmem:[%s15229_s1 + $0x3d0] sm:$0xff] }
  0xcf   : > { %8909 = vmatmul.mubr.f32.gmra.mxu0 %v11244_v3  ;;  %9030 = vmatprep.subr.mxu0 %v2091_v52 }
  0xd0   : > { %8911 = vmatprep.mubr.f32.mxu0 %v11248_v5  ;;  %9031 = vmatpush3.msra.mxu0 %v2091_v52  ;;  %v2083_v52 = vld [vmem:[%s15229_s1 + $0x320] sm:$0xff] }
  0xd1   : > { %8986 = vmatmul.mubr.f32.gmra.mxu1 %v11569_v42  ;;  %9032 = vmatprep.subr.mxu0 %v2090_v51 }
  0xd2   : > { %8988 = vmatprep.mubr.f32.mxu1 %v11577_v57  ;;  %9033 = vmatpush3.msra.mxu0 %v2090_v51  ;;  %v2349_v51 = vld [vmem:[%s15229_s1 + $0x3c8] sm:$0xff] }
  0xd3   : > { %8912 = vmatmul.mubr.f32.gmra.mxu0 %v11268_v11  ;;  %9034 = vmatprep.subr.mxu0 %v2089_v26 }
  0xd4   : > { %8914 = vmatprep.mubr.f32.mxu0 %v11272_v13  ;;  %9035 = vmatpush3.msra.mxu0 %v2089_v26  ;;  %v2348_v26 = vld [vmem:[%s15229_s1 + $0x3c0] sm:$0xff] }
  0xd5   : > { %8989 = vmatmul.mubr.f32.gmra.mxu1 %v11587_v49  ;;  %9036 = vmatprep.subr.mxu0 %v2088_v4 }
  0xd6   : > { %8991 = vmatprep.mubr.f32.mxu1 %v11595_v30  ;;  %9037 = vmatpush3.msra.mxu0 %v2088_v4  ;;  %v2082_v4 = vld [vmem:[%s15229_s1 + $0x318] sm:$0xff] }
  0xd7   : > { %8915 = vmatmul.mubr.f32.gmra.mxu0 %v11292_v19  ;;  %9038 = vmatprep.subr.mxu0 %v2087_v17 }
  0xd8   : > { %8917 = vmatprep.mubr.f32.mxu0 %v11296_v21  ;;  %9039 = vmatpush3.msra.mxu0 %v2087_v17  ;;  %v15330_v17 = vld [vmem:[#allocation8_spill] sm:$0xff] }
  0xd9   : > { %8992 = vmatmul.mubr.f32.gmra.mxu1 %v11608_v40  ;;  %9040 = vmatprep.subr.mxu0 %v2086_v48 }
  0xda   : > { %8994 = vmatprep.mubr.f32.mxu1 %v11613_v63  ;;  %9101 = vmatprep.subr.mxu1 %v2355_v14 }
  0xdb   : > { %8918 = vmatmul.mubr.f32.gmra.mxu0 %v11316_v29  ;;  %9102 = vmatpush3.msra.mxu1 %v2355_v14  ;;  %v2347_v14 = vld [vmem:[%s15229_s1 + $0x3b8] sm:$0xff] }
  0xdc   : > { %8920 = vmatprep.mubr.f32.mxu0 %v11320_v32  ;;  %9041 = vmatpush3.msra.mxu0 %v2086_v48  ;;  %v15331_v48 = vld [vmem:[#allocation9_spill] sm:$0xff] }
  0xdd   : > { %8995 = vmatmul.mubr.f32.gmra.mxu1 %v11623_v1  ;;  %9103 = vmatprep.subr.mxu1 %v2354_v62 }
  0xde   : > { %8997 = vmatprep.mubr.f32.mxu1 %v11631_v53  ;;  %9104 = vmatpush3.msra.mxu1 %v2354_v62  ;;  %v2346_v62 = vld [vmem:[%s15229_s1 + $0x3b0] sm:$0xff] }
  0xdf   : > { %8921 = vmatmul.mubr.f32.gmra.mxu0 %v11340_v39  ;;  %9042 = vmatprep.subr.mxu0 %v2085_v45 }
  0xe0   : > { %8923 = vmatprep.mubr.f32.mxu0 %v11347_v44  ;;  %9105 = vmatprep.subr.mxu1 %v2353_v6 }
  0xe1   : > { %8998 = vmatmul.mubr.f32.gmra.mxu1 %v11641_v9  ;;  %9043 = vmatpush3.msra.mxu0 %v2085_v45  ;;  %v15332_v45 = vld [vmem:[#allocation10_spill] sm:$0xff] }
  0xe2   : > { %9000 = vmatprep.mubr.f32.mxu1 %v11649_v15  ;;  %9106 = vmatpush3.msra.mxu1 %v2353_v6  ;;  %v2081_v6 = vld [vmem:[%s15229_s1 + $0x310] sm:$0xff] }
  0xe3   : > { %8924 = vmatmul.mubr.f32.gmra.mxu0 %v11366_v55  ;;  %9107 = vmatprep.subr.mxu1 %v2352_v2 }
  0xe4   : > { %8926 = vmatprep.mubr.f32.mxu0 %v11371_v60  ;;  %9108 = vmatpush3.msra.mxu1 %v2352_v2  ;;  %v15333_v2 = vld [vmem:[#allocation11_spill] sm:$0xff] }
  0xe5   : > { %9001 = vmatmul.mubr.f32.gmra.mxu1 %v11662_v20  ;;  %9044 = vmatprep.subr.mxu0 %v2084_v16 }
  0xe6   : > { %9003 = vmatprep.mubr.f32.mxu1 %v11667_v23  ;;  %9109 = vmatprep.subr.mxu1 %v2351_v41 }
  0xe7   : > { %8927 = vmatmul.mubr.f32.gmra.mxu0 %v11391_v8  ;;  %9110 = vmatpush3.msra.mxu1 %v2351_v41  ;;  %v11917_v41 = vld [vmem:[%s11118_s22 + $0x100] sm:$0xff] }
  0xe8   : > { %8929 = vmatprep.mubr.f32.mxu0 %v11395_v12  ;;  %9045 = vmatpush3.msra.mxu0 %v2084_v16  ;;  %v2345_v16 = vld [vmem:[%s15229_s1 + $0x3a8] sm:$0xff] }
  0xe9   : > { %9004 = vmatmul.mubr.f32.gmra.mxu1 %v11677_v25  ;;  %9111 = vmatprep.subr.mxu1 %v2350_v46 }
  0xea   : > { %9006 = vmatprep.mubr.f32.mxu1 %v11685_v56  ;;  %9112 = vmatpush3.msra.mxu1 %v2350_v46  ;;  %v1561_v46 = vrot.slane %v11782_v35, 1 }
  0xeb   : > { %8930 = vmatmul.mubr.f32.gmra.mxu0 %v11415_v24  ;;  %9046 = vmatprep.subr.mxu0 %v2083_v52 }
  0xec   : > { %8932 = vmatprep.mubr.f32.mxu0 %v11419_v31  ;;  %9113 = vmatprep.subr.mxu1 %v2349_v51 }
  0xed   : > { %9007 = vmatmul.mubr.f32.gmra.mxu1 %v11695_v37  ;;  %9047 = vmatpush3.msra.mxu0 %v2083_v52  ;;  %v2344_v52 = vld [vmem:[%s15229_s1 + $0x3a0] sm:$0xff] }
  0xee   : > { %9009 = vmatprep.mubr.f32.mxu1 %v11703_v47  ;;  %9114 = vmatpush3.msra.mxu1 %v2349_v51  ;;  %v15250_v51 = vrot.slane %v11917_v41, 2 }
  0xef   : > { %8933 = vmatmul.mubr.f32.gmra.mxu0 %v15330_v17  ;;  %9115 = vmatprep.subr.mxu1 %v2348_v26 }
  0xf0   : > { %8935 = vmatprep.mubr.f32.mxu0 %v15331_v48  ;;  %9048 = vmatprep.subr.mxu0 %v2082_v4 }
  0xf1   : > { %9010 = vmatmul.mubr.f32.gmra.mxu1 %v11713_v50  ;;  %9049 = vmatpush3.msra.mxu0 %v2082_v4  ;;  %v1828_v4 = vrot.slane %v11782_v35, 2 }
  0xf2   : > { %9012 = vmatprep.mubr.f32.mxu1 %v11721_v0  ;;  %9116 = vmatpush3.msra.mxu1 %v2348_v26  ;;  %v2080_v26 = vld [vmem:[%s15229_s1 + $0x308] sm:$0xff] }
  0xf3   : > { %8936 = vmatmul.mubr.f32.gmra.mxu0 %v15332_v45  ;;  %9117 = vmatprep.subr.mxu1 %v2347_v14 }
  0xf4   : > { %8938 = vmatprep.mubr.f32.mxu0 %v15333_v2  ;;  %9118 = vmatpush3.msra.mxu1 %v2347_v14  ;;  %v15334_v14 = vld [vmem:[#allocation12_spill] sm:$0xff] }
  0xf5   : > { %9013 = vmatmul.mubr.f32.gmra.mxu1 %v11734_v22  ;;  %9119 = vmatprep.subr.mxu1 %v2346_v62 }
  0xf6   : > { %9015 = vmatprep.mubr.f32.mxu1 %v11743_v58  ;;  %9050 = vmatprep.subr.mxu0 %v2081_v6  ;;  %v15337_v58 = vrot.slane %v11470_v28, 2 }
  0xf7   : > { %8939 = vmatmul.mubr.f32.gmra.mxu0 %v11483_v43  ;;  %9120 = vmatpush3.msra.mxu1 %v2346_v62  ;;  %v2343_v62 = vld [vmem:[%s15229_s1 + $0x398] sm:$0xff] }
  0xf8   : > { %9051 = vmatpush3.msra.mxu0 %v2081_v6  ;;  %9121 = vmatprep.subr.mxu1 %v2345_v16  ;;  %v15335_v6 = vrot.slane %v11470_v28, 1  ;;  %v2341_v28 = vld [vmem:[%s15229_s1 + $0x388] sm:$0xff] }
  0xf9   : > { %9016 = vmatmul.mubr.f32.gmra.mxu1 %v11748_v18  ;;  %8941 = vmatprep.mubr.f32.mxu0 %v11491_v10  ;;  %v2342_v18 = vld [vmem:[%s15229_s1 + $0x390] sm:$0xff] }
  0xfa   : > { %9122 = vmatpush3.msra.mxu1 %v2345_v16  ;;  %9018 = vmatprep.mubr.f32.mxu1 %v11765_v7  ;;  %v11940_v36 = vsel %vm407_vm0, %v15335_v6, %v1561_v46  ;;  %v15336_v16 = vrot.slane %v11917_v41, 1  ;;  %v11955_v6 = vsel %vm945_vm1, %v15337_v58, %v1828_v4  ;;  %v2340_v58 = vld [vmem:[%s15229_s1 + $0x380] sm:$0xff] }
  0xfb   : > { %8942 = vmatmul.mubr.f32.gmra.mxu0 %v15334_v14  ;;  %9123 = vmatprep.subr.mxu1 %v2344_v52 }
  0xfc   : > { %9052 = vmatprep.subr.mxu0 %v2080_v26  ;;  %9124 = vmatpush3.msra.mxu1 %v2344_v52  ;;  %v11946_v7 = vsel %vm407_vm0, %v1561_v46, %v15336_v16  ;;  %v2079_v46 = vld [vmem:[%s15229_s1 + $0x300] sm:$0xff]  ;;  %v11965_v52 = vsel %vm945_vm1, %v1828_v4, %v15250_v51  ;;  %v10853_v16 = vld [vmem:[%s11118_s22 + $0x30] sm:$0xff] }
  0xfd   : > { %9019 = vmatmul.mubr.f32.gmra.mxu1 %v11770_v38  ;;  %9053 = vmatpush3.msra.mxu0 %v2080_v26  ;;  %v2624_v26 = vld [vmem:[%s15229_s1 + $0x478] sm:$0xff]  ;;  %v10851_v4 = vld [vmem:[%s11118_s22 + $0x20] sm:$0xff] }
  0xfe   : > { %9125 = vmatprep.subr.mxu1 %v2343_v62  ;;  %8944 = vmatprep.mubr.f32.mxu0 %v11940_v36 }
  0xff   : > { %9126 = vmatpush3.msra.mxu1 %v2343_v62  ;;  %8945 = vmatmul.mubr.f32.gmra.mxu0 %v11946_v7  ;;  %v10852_v62 = vld [vmem:[%s11118_s22 + $0x28] sm:$0xff] }
 0x100   : > { %9127 = vmatprep.subr.mxu1 %v2342_v18  ;;  %9021 = vmatprep.mubr.f32.mxu1 %v11955_v6 }
 0x101   : > { %9054 = vmatprep.subr.mxu0 %v2079_v46  ;;  %9128 = vmatpush3.msra.mxu1 %v2342_v18  ;;  %v2623_v18 = vld [vmem:[%s15229_s1 + $0x470] sm:$0xff] }
 0x102   : > { %9022 = vmatmul.mubr.f32.gmra.mxu1 %v11965_v52  ;;  %9055 = vmatpush3.msra.mxu0 %v2079_v46  ;;  %v2622_v46 = vld [vmem:[%s15229_s1 + $0x468] sm:$0xff] }
 0x103   : > { %9129 = vmatprep.subr.mxu1 %v2341_v28  ;;  %9056 = vmatprep.mubr.f32.mxu0 %v10851_v4  ;;  %v10856_v4 = vld [vmem:[%s11118_s22 + $0x48] sm:$0xff] }
 0x104   : > { %9130 = vmatpush3.msra.mxu1 %v2341_v28  ;;  %9057 = vmatmul.mubr.f32.vlgmr.msra.gmra.mxu0 %v10852_v62  ;;  %v10854_v28 = vld [vmem:[%s11118_s22 + $0x38] sm:$0xff] }
 0x105   : > { %9131 = vmatprep.subr.mxu1 %v2340_v58  ;;  %9178 = vmatprep.subr.mxu0 %v2624_v26 }
 0x106   : > { %9132 = vmatpush3.msra.mxu1 %v2340_v58  ;;  %9133 = vmatprep.mubr.f32.mxu1 %v11203_v54  ;;  %v10855_v58 = vld [vmem:[%s11118_s22 + $0x40] sm:$0xff] }
 0x107   : > { %9179 = vmatpush3.msra.mxu0 %v2624_v26  ;;  %9134 = vmatmul.mubr.f32.vlgmr.msra.gmra.mxu1 %v11219_v59  ;;  %v2621_v54 = vld [vmem:[%s15229_s1 + $0x460] sm:$0xff] }
 0x108   : > { %9059 = vmatprep.mubr.f32.mxu0 %v10853_v16  ;;  %9180 = vmatprep.subr.mxu0 %v2623_v18 }
 0x109   : > { %9060 = vmatmul.mubr.f32.gmra.mxu0 %v10854_v28  ;;  %9136 = vmatprep.mubr.f32.mxu1 %v11224_v61  ;;  %v2620_v61 = vld [vmem:[%s15229_s1 + $0x458] sm:$0xff] }
 0x10a   : > { %9181 = vmatpush3.msra.mxu0 %v2623_v18  ;;  %9062 = vmatprep.mubr.f32.mxu0 %v10855_v58  ;;  %v10857_v18 = vld [vmem:[%s11118_s22 + $0x50] sm:$0xff] }
 0x10b   : > { %9137 = vmatmul.mubr.f32.gmra.mxu1 %v11244_v3  ;;  %9182 = vmatprep.subr.mxu0 %v2622_v46  ;;  %v8596_v59 = vpop.f32.mrf.mxu0 }
 0x10c   : > { %9139 = vmatprep.mubr.f32.mxu1 %v11248_v5  ;;  %9183 = vmatpush3.msra.mxu0 %v2622_v46  ;;  %v8673_v26 = vpop.f32.mrf.mxu1  ;;  %v2619_v5 = vld [vmem:[%s15229_s1 + $0x450] sm:$0xff] }
 0x10d   : > { %9063 = vmatmul.mubr.f32.gmra.mxu0 %v10856_v4  ;;  %v12001_v62 = vadd.f32 %v8673_v26, %v8596_v59  ;;  %9184 = vmatprep.subr.mxu0 %v2621_v54  ;;  %v565_v3 = vpop.f32.mrf.mxu0  ;;  %v10858_v59 = vld [vmem:[%s11118_s22 + $0x58] sm:$0xff]  ;;  %v10859_v4 = vld [vmem:[%s11118_s22 + $0x60] sm:$0xff] }
 0x10e   : > { %9065 = vmatprep.mubr.f32.mxu0 %v10857_v18  ;;  %9185 = vmatpush3.msra.mxu0 %v2621_v54  ;;  %v780_v16 = vpop.f32.mrf.mxu1  ;;  %v2618_v54 = vld [vmem:[%s15229_s1 + $0x448] sm:$0xff] }
 0x10f   : > { %9140 = vmatmul.mubr.f32.gmra.mxu1 %v11268_v11  ;;  %v12008_v46 = vadd.f32 %v780_v16, %v565_v3  ;;  %9186 = vmatprep.subr.mxu0 %v2620_v61  ;;  %v8599_v28 = vpop.f32.mrf.mxu0 }
 0x110   : > { %9142 = vmatprep.mubr.f32.mxu1 %v11272_v13  ;;  %v8676_v58 = vpop.f32.mrf.mxu1  ;;  %9187 = vmatpush3.msra.mxu0 %v2620_v61  ;;  %v2617_v13 = vld [vmem:[%s15229_s1 + $0x440] sm:$0xff] }
 0x111   : > { %9066 = vmatmul.mubr.f32.gmra.mxu0 %v10858_v59  ;;  %v12015_v26 = vadd.f32 %v8676_v58, %v8599_v28  ;;  %9188 = vmatprep.subr.mxu0 %v2619_v5  ;;  %v575_v11 = vpop.f32.mrf.mxu0  ;;  %v2616_v28 = vld [vmem:[%s15229_s1 + $0x438] sm:$0xff]  ;;  %v10860_v58 = vld [vmem:[%s11118_s22 + $0x68] sm:$0xff]  ;;  %v10861_v59 = vld [vmem:[%s11118_s22 + $0x70] sm:$0xff] }
 0x112   : > { %9068 = vmatprep.mubr.f32.mxu0 %v10859_v4  ;;  %v790_v18 = vpop.f32.mrf.mxu1  ;;  %9189 = vmatpush3.msra.mxu0 %v2619_v5 }
 0x113   : > { %9143 = vmatmul.mubr.f32.gmra.mxu1 %v11292_v19  ;;  %v12022_v61 = vadd.f32 %v790_v18, %v575_v11  ;;  %9190 = vmatprep.subr.mxu0 %v2618_v54 }
 0x114   : > { %9145 = vmatprep.mubr.f32.mxu1 %v11296_v21  ;;  %v8602_v3 = vpop.f32.mrf.mxu0  ;;  %v8679_v16 = vpop.f32.mrf.mxu1  ;;  %9191 = vmatpush3.msra.mxu0 %v2618_v54  ;;  %v2615_v21 = vld [vmem:[%s15229_s1 + $0x430] sm:$0xff] }
 0x115   : > { %9069 = vmatmul.mubr.f32.gmra.mxu0 %v10860_v58  ;;  %v12029_v5 = vadd.f32 %v8679_v16, %v8602_v3  ;;  %9192 = vmatprep.subr.mxu0 %v2617_v13  ;;  %v2614_v3 = vld [vmem:[%s15229_s1 + $0x428] sm:$0xff]  ;;  %v10862_v16 = vld [vmem:[%s11118_s22 + $0x78] sm:$0xff]  ;;  %v10863_v58 = vld [vmem:[%s11118_s22 + $0x80] sm:$0xff] }
 0x116   : > { %9071 = vmatprep.mubr.f32.mxu0 %v10861_v59  ;;  %v585_v19 = vpop.f32.mrf.mxu0  ;;  %v800_v4 = vpop.f32.mrf.mxu1  ;;  %9193 = vmatpush3.msra.mxu0 %v2617_v13 }
 0x117   : > { %9146 = vmatmul.mubr.f32.gmra.mxu1 %v11316_v29  ;;  %v12036_v54 = vadd.f32 %v800_v4, %v585_v19  ;;  %9194 = vmatprep.subr.mxu0 %v2616_v28 }
 0x118   : > { %9148 = vmatprep.mubr.f32.mxu1 %v11320_v32  ;;  %v8605_v11 = vpop.f32.mrf.mxu0  ;;  %v8682_v18 = vpop.f32.mrf.mxu1  ;;  %9195 = vmatpush3.msra.mxu0 %v2616_v28  ;;  %v2613_v32 = vld [vmem:[%s15229_s1 + $0x420] sm:$0xff] }
 0x119   : > { %9072 = vmatmul.mubr.f32.gmra.mxu0 %v10862_v16  ;;  %v12043_v13 = vadd.f32 %v8682_v18, %v8605_v11  ;;  %9196 = vmatprep.subr.mxu0 %v2615_v21  ;;  %v2612_v11 = vld [vmem:[%s15229_s1 + $0x418] sm:$0xff]  ;;  %v10864_v18 = vld [vmem:[%s11118_s22 + $0x88] sm:$0xff]  ;;  %v10865_v16 = vld [vmem:[%s11118_s22 + $0x90] sm:$0xff] }
 0x11a   : > { %9074 = vmatprep.mubr.f32.mxu0 %v10863_v58  ;;  %v595_v29 = vpop.f32.mrf.mxu0  ;;  %v810_v59 = vpop.f32.mrf.mxu1  ;;  %9197 = vmatpush3.msra.mxu0 %v2615_v21 }
 0x11b   : > { %9149 = vmatmul.mubr.f32.gmra.mxu1 %v11340_v39  ;;  %v12050_v28 = vadd.f32 %v810_v59, %v595_v29  ;;  %9198 = vmatprep.subr.mxu0 %v2614_v3  ;;  %v2610_v59 = vld [vmem:[%s15229_s1 + $0x408] sm:$0xff] }
 0x11c   : > { %9151 = vmatprep.mubr.f32.mxu1 %v11347_v44  ;;  %v8608_v19 = vpop.f32.mrf.mxu0  ;;  %v8685_v4 = vpop.f32.mrf.mxu1  ;;  %9199 = vmatpush3.msra.mxu0 %v2614_v3  ;;  %v2611_v44 = vld [vmem:[%s15229_s1 + $0x410] sm:$0xff] }
 0x11d   : > { %9075 = vmatmul.mubr.f32.gmra.mxu0 %v10864_v18  ;;  %v12057_v21 = vadd.f32 %v8685_v4, %v8608_v19  ;;  %9200 = vmatprep.subr.mxu0 %v2613_v32  ;;  %v10866_v19 = vld [vmem:[%s11118_s22 + $0x98] sm:$0xff]  ;;  %v10867_v4 = vld [vmem:[%s11118_s22 + $0xa0] sm:$0xff] }
 0x11e   : > { %9077 = vmatprep.mubr.f32.mxu0 %v10865_v16  ;;  %v12060_v39 = vpop.f32.mrf.mxu0  ;;  %v12062_v58 = vpop.f32.mrf.mxu1  ;;  %9201 = vmatpush3.msra.mxu0 %v2613_v32 }
 0x11f   : > { %9152 = vmatmul.mubr.f32.gmra.mxu1 %v11366_v55  ;;  %9202 = vmatprep.subr.mxu0 %v2612_v11 }
 0x120   : > { %9154 = vmatprep.mubr.f32.mxu1 %v11371_v60  ;;  %v8611_v3 = vpop.f32.mrf.mxu0  ;;  %v8688_v29 = vpop.f32.mrf.mxu1  ;;  %9203 = vmatpush3.msra.mxu0 %v2612_v11  ;;  %v2609_v60 = vld [vmem:[%s15229_s1 + $0x400] sm:$0xff] }
 0x121   : > { %9078 = vmatmul.mubr.f32.gmra.mxu0 %v10866_v19  ;;  %v12073_v32 = vadd.f32 %v8688_v29, %v8611_v3  ;;  %9204 = vmatprep.subr.mxu0 %v2611_v44  ;;  %v10868_v3 = vld [vmem:[%s11118_s22 + $0xa8] sm:$0xff] }
 0x122   : > { %9080 = vmatprep.mubr.f32.mxu0 %v10867_v4  ;;  %v12076_v55 = vpop.f32.mrf.mxu0  ;;  %v12078_v18 = vpop.f32.mrf.mxu1  ;;  %9205 = vmatpush3.msra.mxu0 %v2611_v44  ;;  %v10869_v44 = vld [vmem:[%s11118_s22 + $0xb0] sm:$0xff] }
 0x123   : > { %9155 = vmatmul.mubr.f32.gmra.mxu1 %v11391_v8  ;;  %9206 = vmatprep.subr.mxu0 %v2610_v59 }
 0x124   : > { %9157 = vmatprep.mubr.f32.mxu1 %v11395_v12  ;;  %v8614_v11 = vpop.f32.mrf.mxu0  ;;  %v8691_v16 = vpop.f32.mrf.mxu1  ;;  %9207 = vmatpush3.msra.mxu0 %v2610_v59  ;;  %v10870_v59 = vld [vmem:[%s11118_s22 + $0xb8] sm:$0xff] }
 0x125   : > { %9081 = vmatmul.mubr.f32.gmra.mxu0 %v10868_v3  ;;  %v12086_v29 = vadd.f32 %v8691_v16, %v8614_v11  ;;  %9208 = vmatprep.subr.mxu0 %v2609_v60  ;;  %v10871_v16 = vld [vmem:[%s11118_s22 + $0xc0] sm:$0xff] }
 0x126   : > { %9083 = vmatprep.mubr.f32.mxu0 %v10869_v44  ;;  %v12089_v19 = vpop.f32.mrf.mxu0  ;;  %v12091_v4 = vpop.f32.mrf.mxu1  ;;  %9209 = vmatpush3.msra.mxu0 %v2609_v60  ;;  %v10872_v60 = vld [vmem:[%s11118_s22 + $0xc8] sm:$0xff] }
 0x127   : > { %9158 = vmatmul.mubr.f32.gmra.mxu1 %v11415_v24 }
 0x128   : > { %9160 = vmatprep.mubr.f32.mxu1 %v11419_v31  ;;  %v8617_v8 = vpop.f32.mrf.mxu0  ;;  %v8694_v12 = vpop.f32.mrf.mxu1 }
 0x129   : > { %9084 = vmatmul.mubr.f32.gmra.mxu0 %v10870_v59  ;;  %v12096_v11 = vadd.f32 %v8694_v12, %v8617_v8  ;;  %v10873_v8 = vld [vmem:[%s11118_s22 + $0xd0] sm:$0xff] }
 0x12a   : > { %9086 = vmatprep.mubr.f32.mxu0 %v10871_v16  ;;  %v12099_v3 = vpop.f32.mrf.mxu0  ;;  %v12101_v44 = vpop.f32.mrf.mxu1  ;;  %v10874_v16 = vld [vmem:[%s11118_s22 + $0xd8] sm:$0xff] }
 0x12b   : > { %15338 = vst [vmem:[#allocation8_spill] sm:$0xff] %v12101_v44  ;;  %9161 = vmatmul.mubr.f32.gmra.mxu1 %v15330_v17 }
 0x12c   : > { %9163 = vmatprep.mubr.f32.mxu1 %v15331_v48  ;;  %v8620_v24 = vpop.f32.mrf.mxu0  ;;  %v8697_v31 = vpop.f32.mrf.mxu1 }
 0x12d   : > { %9087 = vmatmul.mubr.f32.gmra.mxu0 %v10872_v60  ;;  %v12106_v51 = vadd.f32 %v8697_v31, %v8620_v24  ;;  %v10875_v31 = vld [vmem:[%s11118_s22 + $0xe0] sm:$0xff] }
 0x12e   : > { %9089 = vmatprep.mubr.f32.mxu0 %v10873_v8  ;;  %v12109_v12 = vpop.f32.mrf.mxu0  ;;  %v12111_v59 = vpop.f32.mrf.mxu1 }
 0x12f   : > { %15339 = vst [vmem:[#allocation9_spill] sm:$0xff] %v12109_v12  ;;  %15340 = vst [vmem:[#allocation10_spill] sm:$0xff] %v12111_v59  ;;  %9164 = vmatmul.mubr.f32.gmra.mxu1 %v15332_v45  ;;  %v12124_v59 = vld [vmem:[%s11118_s22 + $0x108] sm:$0xff] }
 0x130   : > { %9166 = vmatprep.mubr.f32.mxu1 %v15333_v2  ;;  %v8623_v17 = vpop.f32.mrf.mxu0  ;;  %v8700_v48 = vpop.f32.mrf.mxu1  ;;  %v10876_v12 = vld [vmem:[%s11118_s22 + $0xe8] sm:$0xff] }
 0x131   : > { %9090 = vmatmul.mubr.f32.gmra.mxu0 %v10874_v16  ;;  %v12116_v24 = vadd.f32 %v8700_v48, %v8623_v17  ;;  %v2358_v17 = vrot.slane %v12124_v59, 1  ;;  %v12133_v48 = vld [vmem:[%s11118_s22 + $0x110] sm:$0xff] }
 0x132   : > { %9092 = vmatprep.mubr.f32.mxu0 %v10875_v31  ;;  %v12119_v60 = vpop.f32.mrf.mxu0  ;;  %v12121_v8 = vpop.f32.mrf.mxu1  ;;  %v10877_v31 = vld [vmem:[%s11118_s22 + $0xf0] sm:$0xff] }
 0x133   : > { %15341 = vst [vmem:[#allocation11_spill] sm:$0xff] %v12119_v60  ;;  %15342 = vst [vmem:[#allocation12_spill] sm:$0xff] %v12121_v8  ;;  %9167 = vmatmul.mubr.f32.gmra.mxu1 %v11483_v43 }
 0x134   : > { %9169 = vmatprep.mubr.f32.mxu1 %v11491_v10  ;;  %v8626_v45 = vpop.f32.mrf.mxu0  ;;  %v8703_v2 = vpop.f32.mrf.mxu1 }
 0x135   : > { %9093 = vmatmul.mubr.f32.gmra.mxu0 %v10876_v12  ;;  %v12129_v16 = vadd.f32 %v8703_v2, %v8626_v45  ;;  %v2360_v12 = vrot.slane %v12133_v48, 1  ;;  %v15345_v2 = vrot.slane %v11917_v41, 1 }
 0x136   : > { %9095 = vmatprep.mubr.f32.mxu0 %v10877_v31  ;;  %v12136_v60 = vpop.f32.mrf.mxu0  ;;  %v12138_v8 = vpop.f32.mrf.mxu1 }
 0x137   : > { %15343 = vst [vmem:[#allocation16_spill] sm:$0xff] %v12136_v60  ;;  %15344 = vst [vmem:[#allocation17_spill] sm:$0xff] %v12138_v8  ;;  %9170 = vmatmul.mubr.f32.gmra.mxu1 %v15334_v14  ;;  %v2359_v31 = vsel %vm407_vm0, %v15345_v2, %v2358_v17 }
 0x138   : > { %9172 = vmatprep.mubr.f32.mxu1 %v11940_v36  ;;  %v8629_v10 = vpop.f32.mrf.mxu0  ;;  %v8706_v43 = vpop.f32.mrf.mxu1  ;;  %v2361_v36 = vsel %vm407_vm0, %v2358_v17, %v2360_v12 }
 0x139   : > { %9096 = vmatmul.mubr.f32.gmra.mxu0 %v11782_v35  ;;  %v12144_v45 = vadd.f32 %v8706_v43, %v8629_v10 }
 0x13a   : > { %9098 = vmatprep.mubr.f32.mxu0 %v11917_v41  ;;  %v12150_v60 = vpop.f32.mrf.mxu0  ;;  %v12152_v8 = vpop.f32.mrf.mxu1 }
 0x13b   : > { %15346 = vst [vmem:[#allocation18_spill] sm:$0xff] %v12152_v8  ;;  %9173 = vmatmul.mubr.f32.gmra.mxu1 %v11946_v7 }
 0x13c   : > { %9175 = vmatprep.mubr.f32.mxu1 %v2359_v31  ;;  %v8632_v14 = vpop.f32.mrf.mxu0  ;;  %v8709_v44 = vpop.f32.mrf.mxu1 }
 0x13d   : > { %9099 = vmatmul.mubr.f32.gmra.mxu0 %v12124_v59  ;;  %v12157_v35 = vadd.f32 %v8709_v44, %v8632_v14 }
 0x13e   : > { %9210 = vmatprep.mubr.f32.mxu0 %v11540_v27  ;;  %v12160_v10 = vpop.f32.mrf.mxu0  ;;  %v12162_v43 = vpop.f32.mrf.mxu1 }
 0x13f   : > { %9176 = vmatmul.mubr.f32.gmra.mxu1 %v2361_v36 }
 0x140   : > { %v8635_v2 = vpop.f32.mrf.mxu0  ;;  %v8712_v8 = vpop.f32.mrf.mxu1 }
 0x141   : > { %9211 = vmatmul.mubr.f32.vlgmr.msra.gmra.mxu0 %v11551_v33  ;;  %v12165_v7 = vadd.f32 %v8712_v8, %v8635_v2 }
 0x142   : > { %9213 = vmatprep.mubr.f32.mxu0 %v11559_v34  ;;  %v12168_v17 = vpop.f32.mrf.mxu0  ;;  %v12170_v12 = vpop.f32.mrf.mxu1 }
 0x143   : > { %15347 = vst [vmem:[#allocation19_spill] sm:$0xff] %v12168_v17  ;;  %15348 = vst [vmem:[#allocation20_spill] sm:$0xff] %v12170_v12 }
 0x144   : > { %v8638_v44 = vpop.f32.mrf.mxu0  ;;  %v8715_v31 = vpop.f32.mrf.mxu1 }
 0x145   : > { %9214 = vmatmul.mubr.f32.gmra.mxu0 %v11569_v42  ;;  %v12173_v27 = vadd.f32 %v8715_v31, %v8638_v44 }
 0x146   : > { %9216 = vmatprep.mubr.f32.mxu0 %v11577_v57  ;;  %v12176_v36 = vpop.f32.mrf.mxu0  ;;  %v12179_v33 = vpop.f32.mrf.mxu1 }
 0x147   : > { %15349 = vst [vmem:[#allocation21_spill] sm:$0xff] %v12176_v36  ;;  %15350 = vst [vmem:[#allocation22_spill] sm:$0xff] %v12179_v33 }
 0x148   : > { %v8750_v14 = vpop.f32.mrf.mxu0 }
 0x149   : > { %9217 = vmatmul.mubr.f32.gmra.mxu0 %v11587_v49  ;;  %v1253_v34 = vadd.f32 %v8750_v14, %v12001_v62 }
 0x14a   : > { %9219 = vmatprep.mubr.f32.mxu0 %v11595_v30  ;;  %v1103_v8 = vpop.f32.mrf.mxu0 }
 0x14b   : > { %v12184_v2 = vadd.f32 %v1103_v8, %v12008_v46  ;;  %v8827_v42 = vpop.f32.mrf.mxu1  ;;  %v2974_v8 = vld [vmem:[#allocation2 + $0xf8] sm:$0xff] }
 0x14c   : > { %v12186_v44 = vadd.f32 %v8827_v42, %v1253_v34  ;;  %v8753_v57 = vpop.f32.mrf.mxu0 }
 0x14d   : > { %9220 = vmatmul.mubr.f32.gmra.mxu0 %v11608_v40  ;;  %v12189_v31 = vpop.f32.mrf.mxu1  ;;  %v1255_v49 = vadd.f32 %v8753_v57, %v12015_v26  ;;  %v15251_v26 = vmov 0.0   ;;  %v2973_v57 = vld [vmem:[#allocation2 + $0xf0] sm:$0xff] }
 0x14e   : > { %9222 = vmatprep.mubr.f32.mxu0 %v11613_v63  ;;  %v1113_v33 = vpop.f32.mrf.mxu0  ;;  %9255 = vmatprep.subr.mxu1 %v15251_v26 }
 0x14f   : > { %v8830_v62 = vpop.f32.mrf.mxu1  ;;  %v12194_v30 = vadd.f32 %v1113_v33, %v12022_v61  ;;  %9362 = vmatprep.subr.mxu0 %v15251_v26  ;;  %9256 = vmatpush3.msra.mxu1 %v2974_v8 }
 0x150   : > { %v12196_v14 = vadd.f32 %v8830_v62, %v1255_v49  ;;  %v8756_v46 = vpop.f32.mrf.mxu0  ;;  %9257 = vmatprep.subr.mxu1 %v15251_v26  ;;  %9287 = vmatprep.mubr.msk.f32.mxu1 %vm10952_vm2, %v15251_v26 }
 0x151   : > { %9223 = vmatmul.mubr.f32.gmra.mxu0 %v11623_v1  ;;  %v12199_v34 = vpop.f32.mrf.mxu1  ;;  %v1257_v40 = vadd.f32 %v8756_v46, %v12029_v5  ;;  %9258 = vmatpush3.msra.mxu1 %v2973_v57 }
 0x152   : > { %9225 = vmatprep.mubr.f32.mxu0 %v11631_v53  ;;  %v1123_v63 = vpop.f32.mrf.mxu0  ;;  %9259 = vmatprep.subr.mxu1 %v15251_v26 }
 0x153   : > { %v8833_v42 = vpop.f32.mrf.mxu1  ;;  %v12206_v61 = vadd.f32 %v1123_v63, %v12036_v54 }
 0x154   : > { %v12208_v33 = vadd.f32 %v8833_v42, %v1257_v40 }
 0x155   : > { %9226 = vmatmul.mubr.f32.gmra.mxu0 %v11641_v9  ;;  %v8759_v1 = vpop.f32.mrf.mxu0  ;;  %v12211_v53 = vpop.f32.mrf.mxu1 }
 0x156   : > { %9228 = vmatprep.mubr.f32.mxu0 %v11649_v15  ;;  %v1259_v5 = vadd.f32 %v8759_v1, %v12043_v13  ;;  %v2972_v13 = vld [vmem:[#allocation2 + $0xe8] sm:$0xff]  ;;  %v2971_v1 = vld [vmem:[#allocation2 + $0xe0] sm:$0xff] }
 0x157   : > { %v1133_v49 = vpop.f32.mrf.mxu0  ;;  %v8836_v62 = vpop.f32.mrf.mxu1  ;;  %9260 = vmatpush3.msra.mxu1 %v2972_v13 }
 0x158   : > { %v12217_v54 = vadd.f32 %v1133_v49, %v12050_v28  ;;  %v12219_v46 = vadd.f32 %v8836_v62, %v1259_v5  ;;  %9261 = vmatprep.subr.mxu1 %v15251_v26  ;;  %v2970_v62 = vld [vmem:[#allocation2 + $0xd8] sm:$0xff] }
 0x159   : > { %9229 = vmatmul.mubr.f32.gmra.mxu0 %v11662_v20  ;;  %v8762_v9 = vpop.f32.mrf.mxu0  ;;  %v12223_v40 = vpop.f32.mrf.mxu1  ;;  %9262 = vmatpush3.msra.mxu1 %v2971_v1 }
 0x15a   : > { %9231 = vmatprep.mubr.f32.mxu0 %v11667_v23  ;;  %v1261_v15 = vadd.f32 %v8762_v9, %v12057_v21  ;;  %9263 = vmatprep.subr.mxu1 %v15251_v26 }
 0x15b   : > { %v12227_v8 = vpop.f32.mrf.mxu0  ;;  %v8839_v63 = vpop.f32.mrf.mxu1  ;;  %9264 = vmatpush3.msra.mxu1 %v2970_v62 }
 0x15c   : > { %v12229_v28 = vadd.f32 %v8839_v63, %v1261_v15  ;;  %9265 = vmatprep.subr.mxu1 %v15251_v26  ;;  %v2969_v63 = vld [vmem:[#allocation2 + $0xd0] sm:$0xff] }
 0x15d   : > { %9232 = vmatmul.mubr.f32.gmra.mxu0 %v11677_v25  ;;  %v8765_v42 = vpop.f32.mrf.mxu0  ;;  %v12233_v20 = vpop.f32.mrf.mxu1  ;;  %9266 = vmatpush3.msra.mxu1 %v2969_v63 }
 0x15e   : > { %9234 = vmatprep.mubr.f32.mxu0 %v11685_v56  ;;  %v1263_v23 = vadd.f32 %v8765_v42, %v12073_v32  ;;  %9267 = vmatprep.subr.mxu1 %v15251_v26 }
 0x15f   : > { %v12237_v21 = vpop.f32.mrf.mxu0  ;;  %v8842_v5 = vpop.f32.mrf.mxu1 }
 0x160   : > { %15351 = vst [vmem:[#allocation23_spill] sm:$0xff] %v12237_v21  ;;  %v12239_v57 = vadd.f32 %v8842_v5, %v1263_v23  ;;  %v15357_v5 = vld [vmem:[#allocation13_spill] sm:$0xff] }
 0x161   : > { %9235 = vmatmul.mubr.f32.gmra.mxu0 %v11695_v37  ;;  %v8768_v49 = vpop.f32.mrf.mxu0  ;;  %v12243_v25 = vpop.f32.mrf.mxu1 }
 0x162   : > { %15352 = vst [vmem:[#allocation24_spill] sm:$0xff] %v12243_v25  ;;  %9237 = vmatprep.mubr.f32.mxu0 %v11703_v47  ;;  %v1265_v56 = vadd.f32 %v8768_v49, %v12086_v29  ;;  %v2968_v49 = vld [vmem:[#allocation2 + $0xc8] sm:$0xff] }
 0x163   : > { %v12247_v32 = vpop.f32.mrf.mxu0  ;;  %v8845_v9 = vpop.f32.mrf.mxu1  ;;  %9268 = vmatpush3.msra.mxu1 %v2968_v49 }
 0x164   : > { %15353 = vst [vmem:[#allocation25_spill] sm:$0xff] %v12247_v32  ;;  %v12249_v15 = vadd.f32 %v8845_v9, %v1265_v56  ;;  %9269 = vmatprep.subr.mxu1 %v15251_v26 }
 0x165   : > { %9238 = vmatmul.mubr.f32.gmra.mxu0 %v11713_v50  ;;  %v8771_v13 = vpop.f32.mrf.mxu0  ;;  %v12253_v37 = vpop.f32.mrf.mxu1 }
 0x166   : > { %15354 = vst [vmem:[#allocation26_spill] sm:$0xff] %v12253_v37  ;;  %9240 = vmatprep.mubr.f32.mxu0 %v11721_v0  ;;  %v1267_v47 = vadd.f32 %v8771_v13, %v12096_v11  ;;  %v2958_v11 = vld [vmem:[#allocation2 + $0x78] sm:$0xff]  ;;  %v15359_v13 = vld [vmem:[#allocation14_spill] sm:$0xff] }
 0x167   : > { %v12257_v29 = vpop.f32.mrf.mxu0  ;;  %v8848_v42 = vpop.f32.mrf.mxu1  ;;  %9363 = vmatpush3.msra.mxu0 %v2958_v11 }
 0x168   : > { %15355 = vst [vmem:[#allocation27_spill] sm:$0xff] %v12257_v29  ;;  %v12259_v23 = vadd.f32 %v8848_v42, %v1267_v47  ;;  %9364 = vmatprep.subr.mxu0 %v15251_v26 }
 0x169   : > { %9241 = vmatmul.mubr.f32.gmra.mxu0 %v11734_v22  ;;  %v8774_v1 = vpop.f32.mrf.mxu0  ;;  %v12263_v50 = vpop.f32.mrf.mxu1  ;;  %v2957_v22 = vld [vmem:[#allocation2 + $0x70] sm:$0xff] }
 0x16a   : > { %15356 = vst [vmem:[#allocation28_spill] sm:$0xff] %v12263_v50  ;;  %9243 = vmatprep.mubr.f32.mxu0 %v15357_v5  ;;  %v1269_v0 = vadd.f32 %v8774_v1, %v12106_v51  ;;  %v15361_v51 = vld [vmem:[#allocation15_spill] sm:$0xff]  ;;  %v2967_v1 = vld [vmem:[#allocation2 + $0xc0] sm:$0xff]  ;;  %9365 = vmatpush3.msra.mxu0 %v2957_v22  ;;  %v2956_v5 = vld [vmem:[#allocation2 + $0x68] sm:$0xff] }
 0x16b   : > { %v12267_v56 = vpop.f32.mrf.mxu0  ;;  %v8851_v62 = vpop.f32.mrf.mxu1  ;;  %9270 = vmatpush3.msra.mxu1 %v2967_v1  ;;  %9366 = vmatprep.subr.mxu0 %v15251_v26 }
 0x16c   : > { %15358 = vst [vmem:[#allocation13_spill] sm:$0xff] %v12267_v56  ;;  %v12269_v9 = vadd.f32 %v8851_v62, %v1269_v0  ;;  %v2625_v0 = vrot.slane %v12124_v59, 2  ;;  %9271 = vmatprep.subr.mxu1 %v15251_v26  ;;  %9367 = vmatpush3.msra.mxu0 %v2956_v5  ;;  %v15365_v5 = vrot.slane %v11917_v41, 2 }
 0x16d   : > { %9244 = vmatmul.mubr.f32.gmra.mxu0 %v15359_v13  ;;  %v8777_v47 = vpop.f32.mrf.mxu0  ;;  %v12274_v63 = vpop.f32.mrf.mxu1  ;;  %v2966_v13 = vld [vmem:[#allocation2 + $0xb8] sm:$0xff]  ;;  %9368 = vmatprep.subr.mxu0 %v15251_v26 }
 0x16e   : > { %15360 = vst [vmem:[#allocation14_spill] sm:$0xff] %v12274_v63  ;;  %9246 = vmatprep.mubr.f32.mxu0 %v15361_v51  ;;  %v1271_v42 = vadd.f32 %v8777_v47, %v12116_v24  ;;  %v2955_v51 = vld [vmem:[#allocation2 + $0x60] sm:$0xff]  ;;  %9272 = vmatpush3.msra.mxu1 %v2966_v13  ;;  %v2627_v47 = vrot.slane %v12133_v48, 2 }
 0x16f   : > { %v12279_v49 = vpop.f32.mrf.mxu0  ;;  %v8854_v11 = vpop.f32.mrf.mxu1  ;;  %9369 = vmatpush3.msra.mxu0 %v2955_v51  ;;  %9273 = vmatprep.subr.mxu1 %v15251_v26 }
 0x170   : > { %15362 = vst [vmem:[#allocation15_spill] sm:$0xff] %v12279_v49  ;;  %v12282_v62 = vadd.f32 %v8854_v11, %v1271_v42  ;;  %v2626_v11 = vsel %vm945_vm1, %v15365_v5, %v2625_v0  ;;  %9370 = vmatprep.subr.mxu0 %v15251_v26  ;;  %v2628_v51 = vsel %vm945_vm1, %v2625_v0, %v2627_v47 }
 0x171   : > { %9247 = vmatmul.mubr.f32.gmra.mxu0 %v11770_v38  ;;  %v8780_v24 = vpop.f32.mrf.mxu0  ;;  %v12286_v22 = vpop.f32.mrf.mxu1  ;;  %v2954_v38 = vld [vmem:[#allocation2 + $0x58] sm:$0xff] }
 0x172   : > { %15363 = vst [vmem:[#allocation29_spill] sm:$0xff] %v12286_v22  ;;  %9249 = vmatprep.mubr.f32.mxu0 %v11955_v6  ;;  %v1273_v59 = vadd.f32 %v8780_v24, %v12129_v16  ;;  %v2965_v6 = vld [vmem:[#allocation2 + $0xb0] sm:$0xff]  ;;  %9371 = vmatpush3.msra.mxu0 %v2954_v38 }
 0x173   : > { %v12292_v42 = vpop.f32.mrf.mxu0  ;;  %v8857_v1 = vpop.f32.mrf.mxu1  ;;  %9274 = vmatpush3.msra.mxu1 %v2965_v6  ;;  %v2953_v24 = vld [vmem:[#allocation2 + $0x50] sm:$0xff]  ;;  %9372 = vmatprep.subr.mxu0 %v15251_v26 }
 0x174   : > { %15364 = vst [vmem:[#allocation30_spill] sm:$0xff] %v12292_v42  ;;  %v12298_v13 = vadd.f32 %v8857_v1, %v1273_v59  ;;  %9275 = vmatprep.subr.mxu1 %v15251_v26  ;;  %v2952_v1 = vld [vmem:[#allocation2 + $0x48] sm:$0xff]  ;;  %9373 = vmatpush3.msra.mxu0 %v2953_v24 }
 0x175   : > { %9250 = vmatmul.mubr.f32.gmra.mxu0 %v11965_v52  ;;  %v8783_v16 = vpop.f32.mrf.mxu0  ;;  %v12302_v48 = vpop.f32.mrf.mxu1  ;;  %9374 = vmatprep.subr.mxu0 %v15251_v26 }
 0x176   : > { %15366 = vst [vmem:[#allocation31_spill] sm:$0xff] %v12302_v48  ;;  %9252 = vmatprep.mubr.f32.mxu0 %v2626_v11  ;;  %v1275_v41 = vadd.f32 %v8783_v16, %v12144_v45  ;;  %v2964_v48 = vld [vmem:[#allocation2 + $0xa8] sm:$0xff]  ;;  %v2951_v45 = vld [vmem:[#allocation2 + $0x40] sm:$0xff]  ;;  %9375 = vmatpush3.msra.mxu0 %v2952_v1  ;;  %v2950_v16 = vld [vmem:[#allocation2 + $0x38] sm:$0xff] }
 0x177   : > { %v12306_v5 = vpop.f32.mrf.mxu0  ;;  %v8860_v59 = vpop.f32.mrf.mxu1  ;;  %9276 = vmatpush3.msra.mxu1 %v2964_v48  ;;  %9376 = vmatprep.subr.mxu0 %v15251_v26 }
 0x178   : > { %15367 = vst [vmem:[#allocation32_spill] sm:$0xff] %v12306_v5  ;;  %v12310_v52 = vadd.f32 %v8860_v59, %v1275_v41  ;;  %9277 = vmatprep.subr.mxu1 %v15251_v26  ;;  %9377 = vmatpush3.msra.mxu0 %v2951_v45  ;;  %v2963_v41 = vld [vmem:[#allocation2 + $0xa0] sm:$0xff] }
 0x179   : > { %9253 = vmatmul.mubr.f32.gmra.mxu0 %v2628_v51  ;;  %v8786_v6 = vpop.f32.mrf.mxu0  ;;  %v12312_v11 = vpop.f32.mrf.mxu1  ;;  %9378 = vmatprep.subr.mxu0 %v15251_v26 }
 0x17a   : > { %15368 = vst [vmem:[#allocation33_spill] sm:$0xff] %v12312_v11  ;;  %v1277_v0 = vadd.f32 %v8786_v6, %v12157_v35  ;;  %9278 = vmatpush3.msra.mxu1 %v2963_v41  ;;  %v2949_v35 = vld [vmem:[#allocation2 + $0x30] sm:$0xff]  ;;  %9379 = vmatpush3.msra.mxu0 %v2950_v16 }
 0x17b   : > { %v12316_v47 = vpop.f32.mrf.mxu0  ;;  %v8863_v38 = vpop.f32.mrf.mxu1  ;;  %9279 = vmatprep.subr.mxu1 %v15251_v26  ;;  %9380 = vmatprep.subr.mxu0 %v15251_v26 }
 0x17c   : > { %15369 = vst [vmem:[#allocation34_spill] sm:$0xff] %v12316_v47  ;;  %v12320_v24 = vadd.f32 %v8863_v38, %v1277_v0  ;;  %v2948_v0 = vld [vmem:[#allocation2 + $0x28] sm:$0xff]  ;;  %9381 = vmatpush3.msra.mxu0 %v2949_v35  ;;  %v2962_v38 = vld [vmem:[#allocation2 + $0x98] sm:$0xff]  ;;  %9394 = vmatprep.mubr.msk.f32.mxu0 %vm10952_vm2, %v15251_v26 }
 0x17d   : > { %v8789_v51 = vpop.f32.mrf.mxu0  ;;  %v12322_v59 = vpop.f32.mrf.mxu1  ;;  %9382 = vmatprep.subr.mxu0 %v15251_v26  ;;  %9280 = vmatpush3.msra.mxu1 %v2962_v38 }
 0x17e   : > { %15370 = vst [vmem:[#allocation35_spill] sm:$0xff] %v12322_v59  ;;  %v1279_v48 = vadd.f32 %v8789_v51, %v12165_v7  ;;  %v2947_v7 = vld [vmem:[#allocation2 + $0x20] sm:$0xff]  ;;  %9383 = vmatpush3.msra.mxu0 %v2948_v0  ;;  %9281 = vmatprep.subr.mxu1 %v15251_v26  ;;  %v2946_v51 = vld [vmem:[#allocation2 + $0x18] sm:$0xff]  ;;  %v2944_v0 = vld [vmem:[#allocation2 + $0x8] sm:$0xff] }
 0x17f   : > { %v12327_v1 = vpop.f32.mrf.mxu0  ;;  %v8866_v6 = vpop.f32.mrf.mxu1  ;;  %9384 = vmatprep.subr.mxu0 %v15251_v26 }
 0x180   : > { %15371 = vst [vmem:[#allocation36_spill] sm:$0xff] %v12327_v1  ;;  %v12330_v45 = vadd.f32 %v8866_v6, %v1279_v48  ;;  %9385 = vmatpush3.msra.mxu0 %v2947_v7  ;;  %v2945_v6 = vld [vmem:[#allocation2 + $0x10] sm:$0xff] }
 0x181   : > { %v8792_v59 = vpop.f32.mrf.mxu0  ;;  %v12332_v11 = vpop.f32.mrf.mxu1  ;;  %9386 = vmatprep.subr.mxu0 %v15251_v26 }
 0x182   : > { %15372 = vst [vmem:[#allocation37_spill] sm:$0xff] %v12332_v11  ;;  %v1281_v16 = vadd.f32 %v8792_v59, %v12173_v27  ;;  %9387 = vmatpush3.msra.mxu0 %v2946_v51  ;;  %v2961_v59 = vld [vmem:[#allocation2 + $0x90] sm:$0xff] }
 0x183   : > { %v12337_v41 = vpop.f32.mrf.mxu0  ;;  %9388 = vmatprep.subr.mxu0 %v15251_v26  ;;  %9282 = vmatpush3.msra.mxu1 %v2961_v59 }
 0x184   : > { %15373 = vst [vmem:[#allocation38_spill] sm:$0xff] %v12337_v41  ;;  %v8869_v48 = vpop.f32.mrf.mxu1  ;;  %9389 = vmatpush3.msra.mxu0 %v2945_v6  ;;  %9283 = vmatprep.subr.mxu1 %v15251_v26 }
 0x185   : > { %v12340_v35 = vadd.f32 %v8869_v48, %v1281_v16  ;;  %9390 = vmatprep.subr.mxu0 %v15251_v26  ;;  %v2943_v16 = vld [vmem:[#allocation2] sm:$0xff]  ;;  %v2960_v48 = vld [vmem:[#allocation2 + $0x88] sm:$0xff] }
 0x186   : > { %v12343_v11 = vpop.f32.mrf.mxu1  ;;  %v8904_v38 = vpop.f32.mrf.mxu0  ;;  %9391 = vmatpush3.msra.mxu0 %v2944_v0  ;;  %9284 = vmatpush3.msra.mxu1 %v2960_v48 }
 0x187   : > { %15374 = vst [vmem:[#allocation39_spill] sm:$0xff] %v12343_v11  ;;  %v12346_v27 = vadd.f32 %v8904_v38, %v12186_v44  ;;  %9392 = vmatprep.subr.mxu0 %v15251_v26  ;;  %9285 = vmatprep.subr.mxu1 %v15251_v26  ;;  %v2959_v38 = vld [vmem:[#allocation2 + $0x80] sm:$0xff] }
 0x188   : > { %v12349_v41 = vpop.f32.mrf.mxu0  ;;  %9393 = vmatpush3.msra.mxu0 %v2943_v16  ;;  %9286 = vmatpush3.msra.mxu1 %v2959_v38 }
 0x189   : > { %v12351_v7 = vpop.f32.mrf.mxu1  ;;  %9469 = vmatprep.subr.mxu1 %v15251_v26  ;;  %9576 = vmatprep.subr.mxu0 %v15251_v26 }
 0x18b   : > { %v8907_v44 = vpop.f32.mrf.mxu0  ;;  %v12357_v51 = vpop.f32.mrf.mxu1 }
 0x18c   : > { %v12361_v6 = vadd.f32 %v8907_v44, %v12196_v14 }
 0x18d   : > { %v12364_v59 = vpop.f32.mrf.mxu0  ;;  %v12366_v0 = vpop.f32.mrf.mxu1 }
 0x18f   : > { %v8910_v48 = vpop.f32.mrf.mxu0  ;;  %v12372_v11 = vpop.f32.mrf.mxu1 }
 0x190   : > { %v1787_v14 = vadd.f32 %v8910_v48, %v12208_v33 }
 0x191   : > { %v12375_v16 = vpop.f32.mrf.mxu0  ;;  %v8987_v44 = vpop.f32.mrf.mxu1 }
 0x192   : > { %v12377_v22 = vadd.f32 %v8987_v44, %v1787_v14 }
 0x193   : > { %v8913_v63 = vpop.f32.mrf.mxu0  ;;  %v12379_v50 = vpop.f32.mrf.mxu1 }
 0x194   : > { %v1789_v38 = vadd.f32 %v8913_v63, %v12219_v46 }
 0x195   : > { %v12382_v1 = vpop.f32.mrf.mxu0  ;;  %v8990_v47 = vpop.f32.mrf.mxu1 }
 0x196   : > { %v12384_v5 = vadd.f32 %v8990_v47, %v1789_v38 }
 0x197   : > { %v8916_v26 = vpop.f32.mrf.mxu0  ;;  %v12386_v42 = vpop.f32.mrf.mxu1 }
 0x198   : > { %15375 = vst [vmem:[#allocation40_spill] sm:$0xff] %v12386_v42  ;;  %v1791_v33 = vadd.f32 %v8916_v26, %v12229_v28 }
 0x199   : > { %v12389_v48 = vpop.f32.mrf.mxu0  ;;  %v8993_v49 = vpop.f32.mrf.mxu1 }
 0x19a   : > { %15376 = vst [vmem:[#allocation41_spill] sm:$0xff] %v12389_v48  ;;  %v12391_v14 = vadd.f32 %v8993_v49, %v1791_v33 }
 0x19b   : > { %v8919_v44 = vpop.f32.mrf.mxu0  ;;  %v12393_v56 = vpop.f32.mrf.mxu1 }
 0x19c   : > { %15377 = vst [vmem:[#allocation42_spill] sm:$0xff] %v12393_v56  ;;  %v1793_v46 = vadd.f32 %v8919_v44, %v12239_v57 }
 0x19d   : > { %v12396_v63 = vpop.f32.mrf.mxu0  ;;  %v8996_v29 = vpop.f32.mrf.mxu1 }
 0x19e   : > { %15378 = vst [vmem:[#allocation43_spill] sm:$0xff] %v12396_v63  ;;  %v12398_v47 = vadd.f32 %v8996_v29, %v1793_v46 }
 0x19f   : > { %v8922_v38 = vpop.f32.mrf.mxu0  ;;  %v12400_v37 = vpop.f32.mrf.mxu1 }
 0x1a0   : > { %15379 = vst [vmem:[#allocation44_spill] sm:$0xff] %v12400_v37  ;;  %v1795_v26 = vadd.f32 %v8922_v38, %v12249_v15 }
 0x1a1   : > { %v12403_v28 = vpop.f32.mrf.mxu0  ;;  %v8999_v25 = vpop.f32.mrf.mxu1 }
 0x1a2   : > { %15380 = vst [vmem:[#allocation45_spill] sm:$0xff] %v12403_v28  ;;  %v12405_v49 = vadd.f32 %v8999_v25, %v1795_v26 }
 0x1a3   : > { %v8925_v33 = vpop.f32.mrf.mxu0  ;;  %v12407_v36 = vpop.f32.mrf.mxu1 }
 0x1a4   : > { %15381 = vst [vmem:[#allocation46_spill] sm:$0xff] %v12407_v36  ;;  %v1797_v57 = vadd.f32 %v8925_v33, %v12259_v23 }
 0x1a5   : > { %v12410_v44 = vpop.f32.mrf.mxu0  ;;  %v9002_v63 = vpop.f32.mrf.mxu1 }
 0x1a6   : > { %15382 = vst [vmem:[#allocation47_spill] sm:$0xff] %v12410_v44  ;;  %v12412_v29 = vadd.f32 %v9002_v63, %v1797_v57 }
 0x1a7   : > { %v8928_v46 = vpop.f32.mrf.mxu0  ;;  %v12414_v56 = vpop.f32.mrf.mxu1 }
 0x1a8   : > { %15383 = vst [vmem:[#allocation48_spill] sm:$0xff] %v12414_v56  ;;  %v1799_v15 = vadd.f32 %v8928_v46, %v12269_v9 }
 0x1a9   : > { %v12417_v38 = vpop.f32.mrf.mxu0  ;;  %v9005_v28 = vpop.f32.mrf.mxu1 }
 0x1aa   : > { %15384 = vst [vmem:[#allocation49_spill] sm:$0xff] %v12417_v38  ;;  %v12419_v25 = vadd.f32 %v9005_v28, %v1799_v15 }
 0x1ab   : > { %v8931_v26 = vpop.f32.mrf.mxu0  ;;  %v12421_v37 = vpop.f32.mrf.mxu1 }
 0x1ac   : > { %15385 = vst [vmem:[#allocation50_spill] sm:$0xff] %v12421_v37  ;;  %v1801_v23 = vadd.f32 %v8931_v26, %v12282_v62 }
 0x1ad   : > { %v12424_v33 = vpop.f32.mrf.mxu0  ;;  %v9008_v36 = vpop.f32.mrf.mxu1 }
 0x1ae   : > { %15386 = vst [vmem:[#allocation51_spill] sm:$0xff] %v12424_v33  ;;  %v12426_v63 = vadd.f32 %v9008_v36, %v1801_v23 }
 0x1af   : > { %v8934_v57 = vpop.f32.mrf.mxu0  ;;  %v12428_v44 = vpop.f32.mrf.mxu1 }
 0x1b0   : > { %15387 = vst [vmem:[#allocation52_spill] sm:$0xff] %v12428_v44  ;;  %v1803_v9 = vadd.f32 %v8934_v57, %v12298_v13 }
 0x1b1   : > { %v12431_v46 = vpop.f32.mrf.mxu0  ;;  %v9011_v56 = vpop.f32.mrf.mxu1 }
 0x1b2   : > { %15388 = vst [vmem:[#allocation53_spill] sm:$0xff] %v12431_v46  ;;  %v12433_v28 = vadd.f32 %v9011_v56, %v1803_v9 }
 0x1b3   : > { %v8937_v15 = vpop.f32.mrf.mxu0  ;;  %v12435_v38 = vpop.f32.mrf.mxu1 }
 0x1b4   : > { %15389 = vst [vmem:[#allocation54_spill] sm:$0xff] %v12435_v38  ;;  %v1805_v62 = vadd.f32 %v8937_v15, %v12310_v52 }
 0x1b5   : > { %v12438_v26 = vpop.f32.mrf.mxu0  ;;  %v9014_v37 = vpop.f32.mrf.mxu1 }
 0x1b6   : > { %15390 = vst [vmem:[#allocation55_spill] sm:$0xff] %v12438_v26  ;;  %v12440_v36 = vadd.f32 %v9014_v37, %v1805_v62 }
 0x1b7   : > { %v8940_v23 = vpop.f32.mrf.mxu0  ;;  %v12442_v33 = vpop.f32.mrf.mxu1 }
 0x1b8   : > { %15391 = vst [vmem:[#allocation56_spill] sm:$0xff] %v12442_v33  ;;  %v1807_v13 = vadd.f32 %v8940_v23, %v12320_v24 }
 0x1b9   : > { %v12445_v57 = vpop.f32.mrf.mxu0  ;;  %v9017_v44 = vpop.f32.mrf.mxu1 }
 0x1ba   : > { %15392 = vst [vmem:[#allocation57_spill] sm:$0xff] %v12445_v57  ;;  %v12447_v56 = vadd.f32 %v9017_v44, %v1807_v13 }
 0x1bb   : > { %v8943_v9 = vpop.f32.mrf.mxu0  ;;  %v12449_v46 = vpop.f32.mrf.mxu1 }
 0x1bc   : > { %15393 = vst [vmem:[#allocation58_spill] sm:$0xff] %v12449_v46  ;;  %v1809_v52 = vadd.f32 %v8943_v9, %v12330_v45 }
 0x1bd   : > { %v12452_v15 = vpop.f32.mrf.mxu0  ;;  %v9020_v38 = vpop.f32.mrf.mxu1 }
 0x1be   : > { %15394 = vst [vmem:[#allocation59_spill] sm:$0xff] %v12452_v15  ;;  %v12454_v37 = vadd.f32 %v9020_v38, %v1809_v52 }
 0x1bf   : > { %v8946_v62 = vpop.f32.mrf.mxu0  ;;  %v12456_v26 = vpop.f32.mrf.mxu1 }
 0x1c0   : > { %15395 = vst [vmem:[#allocation60_spill] sm:$0xff] %v12456_v26  ;;  %v1811_v24 = vadd.f32 %v8946_v62, %v12340_v35 }
 0x1c1   : > { %v12459_v23 = vpop.f32.mrf.mxu0 }
 0x1c2   : > { %15396 = vst [vmem:[#allocation61_spill] sm:$0xff] %v12459_v23  ;;  %v9023_v57 = vpop.f32.mrf.mxu1 }
 0x1c3   : > { %v12461_v44 = vadd.f32 %v9023_v57, %v1811_v24 }
 0x1c4   : > { %v12463_v13 = vpop.f32.mrf.mxu1  ;;  %v12465_v46 = vpop.f32.mrf.mxu0 }
 0x1c5   : > { %15397 = vst [vmem:[#allocation62_spill] sm:$0xff] %v12463_v13 }
 0x1c6   : > { %v12467_v45 = vpop.f32.mrf.mxu0 }
 0x1c7   : > { %v12469_v9 = vpop.f32.mrf.mxu1 }
 0x1c9   : > { %v12471_v38 = vpop.f32.mrf.mxu0  ;;  %v12473_v52 = vpop.f32.mrf.mxu1 }
 0x1cb   : > { %v12475_v26 = vpop.f32.mrf.mxu0  ;;  %v12477_v35 = vpop.f32.mrf.mxu1 }
 0x1cd   : > { %v9064_v62 = vpop.f32.mrf.mxu0  ;;  %v12479_v23 = vpop.f32.mrf.mxu1 }
 0x1ce   : > { %v12482_v57 = vadd.f32 %v9064_v62, %v12377_v22 }
 0x1cf   : > { %v12484_v24 = vpop.f32.mrf.mxu0  ;;  %v12486_v13 = vpop.f32.mrf.mxu1 }
 0x1d0   : > { %15398 = vst [vmem:[#allocation63_spill] sm:$0xff] %v12482_v57  ;;  %15399 = vst [vmem:[#allocation64_spill] sm:$0xff] %v12486_v13 }
 0x1d1   : > { %v9067_v15 = vpop.f32.mrf.mxu0  ;;  %v12488_v33 = vpop.f32.mrf.mxu1 }
 0x1d2   : > { %v12491_v12 = vadd.f32 %v9067_v15, %v12384_v5 }
 0x1d3   : > { %v12493_v17 = vpop.f32.mrf.mxu0  ;;  %v12495_v48 = vpop.f32.mrf.mxu1 }
 0x1d4   : > { %15400 = vst [vmem:[#allocation65_spill] sm:$0xff] %v12491_v12  ;;  %15401 = vst [vmem:[#allocation66_spill] sm:$0xff] %v12493_v17 }
 0x1d5   : > { %15402 = vst [vmem:[#allocation67_spill] sm:$0xff] %v12495_v48  ;;  %v9070_v32 = vpop.f32.mrf.mxu0  ;;  %v12497_v21 = vpop.f32.mrf.mxu1 }
 0x1d6   : > { %v12500_v22 = vadd.f32 %v9070_v32, %v12391_v14 }
 0x1d7   : > { %v12502_v62 = vpop.f32.mrf.mxu0  ;;  %v12504_v57 = vpop.f32.mrf.mxu1 }
 0x1d8   : > { %15403 = vst [vmem:[#allocation68_spill] sm:$0xff] %v12500_v22  ;;  %15404 = vst [vmem:[#allocation69_spill] sm:$0xff] %v12502_v62 }
 0x1d9   : > { %15405 = vst [vmem:[#allocation70_spill] sm:$0xff] %v12504_v57  ;;  %v9073_v13 = vpop.f32.mrf.mxu0  ;;  %v12506_v42 = vpop.f32.mrf.mxu1 }
 0x1da   : > { %v12509_v5 = vadd.f32 %v9073_v13, %v12398_v47 }
 0x1db   : > { %v12511_v15 = vpop.f32.mrf.mxu0  ;;  %v12513_v12 = vpop.f32.mrf.mxu1 }
 0x1dc   : > { %15406 = vst [vmem:[#allocation71_spill] sm:$0xff] %v12509_v5  ;;  %15407 = vst [vmem:[#allocation72_spill] sm:$0xff] %v12511_v15 }
 0x1dd   : > { %15408 = vst [vmem:[#allocation73_spill] sm:$0xff] %v12513_v12  ;;  %v9076_v48 = vpop.f32.mrf.mxu0  ;;  %v12515_v17 = vpop.f32.mrf.mxu1 }
 0x1de   : > { %v12518_v32 = vadd.f32 %v9076_v48, %v12405_v49 }
 0x1df   : > { %v12520_v14 = vpop.f32.mrf.mxu0  ;;  %v12522_v22 = vpop.f32.mrf.mxu1 }
 0x1e0   : > { %15409 = vst [vmem:[#allocation74_spill] sm:$0xff] %v12518_v32  ;;  %15410 = vst [vmem:[#allocation75_spill] sm:$0xff] %v12520_v14 }
 0x1e1   : > { %15411 = vst [vmem:[#allocation76_spill] sm:$0xff] %v12522_v22  ;;  %v9079_v57 = vpop.f32.mrf.mxu0  ;;  %v12524_v62 = vpop.f32.mrf.mxu1 }
 0x1e2   : > { %15412 = vst [vmem:[#allocation77_spill] sm:$0xff] %v12524_v62  ;;  %v12527_v47 = vadd.f32 %v9079_v57, %v12412_v29 }
 0x1e3   : > { %v12529_v13 = vpop.f32.mrf.mxu0  ;;  %v12531_v5 = vpop.f32.mrf.mxu1 }
 0x1e4   : > { %15413 = vst [vmem:[#allocation78_spill] sm:$0xff] %v12527_v47  ;;  %15414 = vst [vmem:[#allocation79_spill] sm:$0xff] %v12529_v13 }
 0x1e5   : > { %15415 = vst [vmem:[#allocation80_spill] sm:$0xff] %v12531_v5  ;;  %v9082_v12 = vpop.f32.mrf.mxu0  ;;  %v12533_v15 = vpop.f32.mrf.mxu1 }
 0x1e6   : > { %15416 = vst [vmem:[#allocation81_spill] sm:$0xff] %v12533_v15  ;;  %v12536_v48 = vadd.f32 %v9082_v12, %v12419_v25 }
 0x1e7   : > { %v12538_v49 = vpop.f32.mrf.mxu0  ;;  %v12540_v32 = vpop.f32.mrf.mxu1 }
 0x1e8   : > { %15417 = vst [vmem:[#allocation82_spill] sm:$0xff] %v12538_v49 }
 0x1e9   : > { %v9085_v22 = vpop.f32.mrf.mxu0  ;;  %v12542_v14 = vpop.f32.mrf.mxu1 }
 0x1ea   : > { %15418 = vst [vmem:[#allocation83_spill] sm:$0xff] %v12542_v14  ;;  %v12545_v29 = vadd.f32 %v9085_v22, %v12426_v63 }
 0x1eb   : > { %v12547_v57 = vpop.f32.mrf.mxu0  ;;  %v12549_v47 = vpop.f32.mrf.mxu1 }
 0x1ec   : > { %15419 = vst [vmem:[#allocation84_spill] sm:$0xff] %v12545_v29  ;;  %15420 = vst [vmem:[#allocation85_spill] sm:$0xff] %v12549_v47 }
 0x1ed   : > { %v9088_v5 = vpop.f32.mrf.mxu0  ;;  %v12551_v13 = vpop.f32.mrf.mxu1 }
 0x1ee   : > { %v12554_v12 = vadd.f32 %v9088_v5, %v12433_v28  ;;  %v1513_v28 = vadd.f32 %v12189_v31, %v12184_v2  ;;  %v1515_v2 = vadd.f32 %v12199_v34, %v12194_v30  ;;  %v2052_v34 = vadd.f32 %v12366_v0, %v12361_v6 }
 0x1ef   : > { %v12556_v25 = vpop.f32.mrf.mxu0  ;;  %v12558_v49 = vpop.f32.mrf.mxu1 }
 0x1f0   : > { %15421 = vst [vmem:[#allocation86_spill] sm:$0xff] %v12554_v12  ;;  %15422 = vst [vmem:[#allocation87_spill] sm:$0xff] %v12558_v49 }
 0x1f1   : > { %v9091_v15 = vpop.f32.mrf.mxu0  ;;  %v12560_v62 = vpop.f32.mrf.mxu1 }
 0x1f2   : > { %v12563_v63 = vadd.f32 %v9091_v15, %v12440_v36  ;;  %v1782_v36 = vadd.f32 %v12349_v41, %v1513_v28  ;;  %v1784_v41 = vadd.f32 %v12364_v59, %v1515_v2 }
 0x1f3   : > { %v12565_v22 = vpop.f32.mrf.mxu0  ;;  %v12567_v14 = vpop.f32.mrf.mxu1 }
 0x1f4   : > { %15423 = vst [vmem:[#allocation88_spill] sm:$0xff] %v12563_v63  ;;  %15424 = vst [vmem:[#allocation89_spill] sm:$0xff] %v12567_v14  ;;  %v2050_v14 = vadd.f32 %v12351_v7, %v12346_v27  ;;  %v1517_v27 = vadd.f32 %v12211_v53, %v12206_v61  ;;  %v2313_v61 = vadd.f32 %v12471_v38, %v2052_v34 }
 0x1f5   : > { %v9094_v47 = vpop.f32.mrf.mxu0  ;;  %v12569_v29 = vpop.f32.mrf.mxu1 }
 0x1f6   : > { %15425 = vst [vmem:[#allocation90_spill] sm:$0xff] %v12569_v29  ;;  %v12574_v5 = vadd.f32 %v9094_v47, %v12447_v56  ;;  %v2049_v47 = vadd.f32 %v12357_v51, %v1782_v36 }
 0x1f7   : > { %v12576_v49 = vpop.f32.mrf.mxu0  ;;  %v12578_v12 = vpop.f32.mrf.mxu1 }
 0x1f8   : > { %15426 = vst [vmem:[#allocation91_spill] sm:$0xff] %v12574_v5  ;;  %15427 = vst [vmem:[#allocation92_spill] sm:$0xff] %v12578_v12  ;;  %v2311_v12 = vadd.f32 %v12465_v46, %v2050_v14  ;;  %v2310_v7 = vadd.f32 %v12467_v45, %v2049_v47  ;;  %v1519_v45 = vadd.f32 %v12223_v40, %v12217_v54 }
 0x1f9   : > { %v9097_v15 = vpop.f32.mrf.mxu0  ;;  %v12581_v63 = vpop.f32.mrf.mxu1  ;;  %v841_v54 = vadd.f32 %v12091_v4, %v12089_v19  ;;  %v15434_v4 = vld [vmem:[#allocation16_spill] sm:$0xff] }
 0x1fa   : > { %15428 = vst [vmem:[#allocation93_spill] sm:$0xff] %v12581_v63  ;;  %v2337_v29 = vadd.f32 %v9097_v15, %v12454_v37  ;;  %v1786_v37 = vadd.f32 %v12375_v16, %v1517_v27  ;;  %v2580_v59 = vadd.f32 %v12469_v9, %v2311_v12  ;;  %v2579_v6 = vadd.f32 %v12473_v52, %v2310_v7  ;;  %v15433_v27 = vld [vmem:[#allocation12_spill] sm:$0xff] }
 0x1fb   : > { %v12588_v31 = vpop.f32.mrf.mxu0  ;;  %v9174_v56 = vpop.f32.mrf.mxu1  ;;  %v821_v16 = vadd.f32 %v12062_v58, %v12060_v39  ;;  %v831_v15 = vadd.f32 %v12078_v18, %v12076_v55  ;;  %v1788_v2 = vadd.f32 %v12382_v1, %v1519_v45  ;;  %v2582_v39 = vadd.f32 %v12477_v35, %v2313_v61  ;;  %v15430_v55 = vld [vmem:[#allocation9_spill] sm:$0xff]  ;;  %v15431_v18 = vld [vmem:[#allocation10_spill] sm:$0xff] }
 0x1fc   : > { %v12592_v5 = vadd.f32 %v9174_v56, %v2337_v29  ;;  %v2051_v29 = vadd.f32 %v12372_v11, %v1784_v41  ;;  %v2053_v38 = vadd.f32 %v12379_v50, %v1786_v37  ;;  %v15429_v56 = vld [vmem:[#allocation8_spill] sm:$0xff]  ;;  %v12656_v37 = vadd.f32 %v12162_v43, %v12160_v10 }
 0x1fd   : > { %v9100_v28 = vpop.f32.mrf.mxu0  ;;  %v12595_v63 = vpop.f32.mrf.mxu1  ;;  %v1260_v52 = vadd.f32 %v12227_v8, %v821_v16  ;;  %v851_v47 = vadd.f32 %v15429_v56, %v12099_v3  ;;  %v12639_v8 = vadd.f32 %v15431_v18, %v15430_v55  ;;  %v15443_v55 = vld [vmem:[#allocation63_spill] sm:$0xff]  ;;  %v15444_v18 = vld [vmem:[#allocation64_spill] sm:$0xff] }
 0x1fe   : > { %v2339_v30 = vadd.f32 %v9100_v28, %v12461_v44  ;;  %v12614_v44 = vld [vmem:[%s15230_s2] ss:$0 sm:$0xff]  ;;  %v2312_v9 = vadd.f32 %v12475_v26, %v2051_v29  ;;  %v2314_v40 = vadd.f32 %v12484_v24, %v2053_v38  ;;  %v15432_v28 = vld [vmem:[#allocation11_spill] sm:$0xff]  ;;  %v15435_v24 = vld [vmem:[#allocation17_spill] sm:$0xff] }
 0x1ff   : > { %v12603_v51 = vpop.f32.mrf.mxu0  ;;  %v9177_v46 = vpop.f32.mrf.mxu1  ;;  %v12644_v19 = vadd.f32 %v15433_v27, %v15432_v28  ;;  %v12648_v7 = vadd.f32 %v15435_v24, %v15434_v4  ;;  %v15446_v28 = vld [vmem:[#allocation20_spill] sm:$0xff]  ;;  %v15447_v4 = vld [vmem:[#allocation21_spill] sm:$0xff]  ;;  %v15448_v24 = vld [vmem:[#allocation22_spill] sm:$0xff] }
 0x200   : > { %v12607_v14 = vadd.f32 %v9177_v46, %v2339_v30  ;;  %v2581_v1 = vadd.f32 %v12479_v23, %v2312_v9  ;;  %v15436_v30 = vld [vmem:[#allocation18_spill] sm:$0xff]  ;;  %v3779_v46 = vld [vmem:[#allocation2 + $0x1f8] sm:$0xff]  ;;  %v1521_v23 = vadd.f32 %v12233_v20, %v1260_v52 }
 0x201   : > { %v9212_v53 = vpop.f32.mrf.mxu0  ;;  %v12652_v34 = vadd.f32 %v15436_v30, %v12150_v60  ;;  %v3778_v60 = vld [vmem:[#allocation2 + $0x1f0] sm:$0xff]  ;;  %v12688_v30 = vadd.f32 %v15448_v24, %v15447_v4  ;;  %v15459_v24 = vld [vmem:[#allocation36_spill] sm:$0xff] }
 0x202   : > { %v2847_v0 = vadd.f32 %v9212_v53, %v2580_v59  ;;  %v15437_v59 = vld [vmem:[#allocation40_spill] sm:$0xff]  ;;  %v15438_v9 = vld [vmem:[#allocation66_spill] sm:$0xff] }
 0x203   : > { %v2697_v11 = vpop.f32.mrf.mxu0  ;;  %v2055_v29 = vadd.f32 %v15437_v59, %v1788_v2  ;;  %v15441_v2 = vld [vmem:[#allocation25_spill] sm:$0xff] }
 0x204   : > { %v2884_v12 = vadd.f32 %v12614_v44, %v2847_v0  ;;  %v2846_v36 = vadd.f32 %v2697_v11, %v2579_v6  ;;  %v2583_v6 = vadd.f32 %v12488_v33, %v2314_v40  ;;  %v15440_v33 = vld [vmem:[#allocation23_spill] sm:$0xff] }
 0x205   : > { %v9215_v58 = vpop.f32.mrf.mxu0  ;;  %v2316_v11 = vadd.f32 %v15438_v9, %v2055_v29  ;;  %v1262_v52 = vadd.f32 %v15440_v33, %v831_v15  ;;  %v15450_v9 = vld [vmem:[#allocation26_spill] sm:$0xff] }
 0x206   : > { %v12632_v26 = vmax.f32 %v2884_v12, 0.0  ;;  %v2883_v50 = vadd.f32 %v12614_v44, %v2846_v36  ;;  %v2849_v35 = vadd.f32 %v9215_v58, %v2582_v39  ;;  %v15439_v12 = vmov 0.0   ;;  %v3472_v36 = vld [vmem:[#allocation2 + $0x178] sm:$0xff] }
 0x207   : > { %v2707_v41 = vpop.f32.mrf.mxu0  ;;  %v1264_v39 = vadd.f32 %v15441_v2, %v841_v54  ;;  %v15445_v54 = vld [vmem:[#allocation19_spill] sm:$0xff]  ;;  %v2585_v59 = vadd.f32 %v12497_v21, %v2316_v11  ;;  %v15452_v21 = vld [vmem:[#allocation42_spill] sm:$0xff] }
 0x208   : > { %v2913_v3 = vmax.f32 %v2883_v50, 0.0  ;;  %v2848_v61 = vadd.f32 %v2707_v41, %v2581_v1  ;;  %v3002_v0 = vrot.slane %v12632_v26, 1  ;;  %v3474_v38 = vrot.slane %v12632_v26, 2  ;;  %v15442_v50 = vld [vmem:[#allocation41_spill] sm:$0xff] }
 0x209   : > { %v9218_v53 = vpop.f32.mrf.mxu0  ;;  %v2886_v10 = vadd.f32 %v12614_v44, %v2849_v35  ;;  %v1790_v56 = vadd.f32 %v15442_v50, %v1521_v23  ;;  %v2584_v1 = vadd.f32 %v15444_v18, %v15443_v55  ;;  %v911_v27 = vadd.f32 %v15446_v28, %v15445_v54  ;;  %v3777_v23 = vld [vmem:[#allocation2 + $0x1e8] sm:$0xff]  ;;  %v3776_v55 = vld [vmem:[#allocation2 + $0x1e0] sm:$0xff] }
 0x20a   : > { %v3001_v16 = vrot.slane %v2913_v3, 1  ;;  %v3473_v45 = vrot.slane %v2913_v3, 2  ;;  %9395 = vmatmul.mubr.f32.vlgmr.msra.gmra.mxu0 %v2913_v3  ;;  %v2885_v43 = vadd.f32 %v12614_v44, %v2848_v61  ;;  %v15456_v18 = vld [vmem:[#allocation32_spill] sm:$0xff] }
 0x20b   : > { %v2717_v20 = vpop.f32.mrf.mxu0  ;;  %9397 = vmatprep.mubr.msk.f32.mxu0 %vm10952_vm2, %v15439_v12  ;;  %9577 = vmatpush3.msra.mxu0 %v3779_v46  ;;  %v3471_v46 = vld [vmem:[#allocation2 + $0x170] sm:$0xff]  ;;  %v12693_v29 = vmax.f32 %v2886_v10, 0.0  ;;  %v2851_v61 = vadd.f32 %v9218_v53, %v2584_v1  ;;  %v2057_v53 = vadd.f32 %v15452_v21, %v1790_v56  ;;  %v3470_v56 = vld [vmem:[#allocation2 + $0x168] sm:$0xff]  ;;  %v1274_v1 = vadd.f32 %v15456_v18, %v12652_v34 }
 0x20c   : > { %v2850_v58 = vadd.f32 %v2717_v20, %v2583_v6  ;;  %v3003_v40 = vsel %vm407_vm0, %v3001_v16, %v3002_v0  ;;  %9578 = vmatprep.subr.mxu0 %v15439_v12  ;;  %v12675_v35 = vmax.f32 %v2885_v43, 0.0  ;;  %v12682_v15 = vsel %vm945_vm1, %v3473_v45, %v3474_v38  ;;  %v15449_v45 = vld [vmem:[#allocation24_spill] sm:$0xff]  ;;  %v15451_v20 = vld [vmem:[#allocation27_spill] sm:$0xff] }
 0x20d   : > { %v12677_v41 = vpop.f32.mrf.mxu0  ;;  %9288 = vmatmul.mubr.f32.vlgmr.msra.gmra.mxu1 %v3003_v40  ;;  %9579 = vmatpush3.msra.mxu0 %v3778_v60  ;;  %v1523_v60 = vadd.f32 %v15449_v45, %v1262_v52  ;;  %v12702_v43 = vadd.f32 %v15450_v9, %v1264_v39  ;;  %v15453_v52 = vld [vmem:[#allocation13_spill] sm:$0xff]  ;;  %v15455_v40 = vld [vmem:[#allocation30_spill] sm:$0xff]  ;;  %v2888_v28 = vadd.f32 %v12614_v44, %v2851_v61 }
 0x20e   : > { %v2887_v3 = vadd.f32 %v12614_v44, %v2850_v58  ;;  %9398 = vmatmul.mubr.f32.gmra.mxu0 %v12632_v26  ;;  %9470 = vmatpush3.msra.mxu1 %v3472_v36  ;;  %v3004_v16 = vrot.slane %v12675_v35, 1  ;;  %v1266_v36 = vadd.f32 %v15451_v20, %v851_v47  ;;  %v1268_v39 = vadd.f32 %v15453_v52, %v12639_v8  ;;  %v15454_v47 = vld [vmem:[#allocation15_spill] sm:$0xff]  ;;  %v15464_v20 = vld [vmem:[#allocation14_spill] sm:$0xff] }
 0x20f   : > { %v2727_v6 = vpop.f32.mrf.mxu0  ;;  %9290 = vmatprep.mubr.msk.f32.mxu1 %vm10952_vm2, %v15439_v12  ;;  %9400 = vmatprep.mubr.msk.f32.mxu0 %vm10952_vm2, %v15439_v12  ;;  %v1270_v58 = vadd.f32 %v15454_v47, %v12644_v19  ;;  %v1272_v50 = vadd.f32 %v15455_v40, %v12648_v7  ;;  %v3006_v8 = vrot.slane %v12693_v29, 1  ;;  %v15458_v19 = vld [vmem:[#allocation34_spill] sm:$0xff]  ;;  %v3775_v52 = vld [vmem:[#allocation2 + $0x1d8] sm:$0xff]  ;;  %v12751_v18 = vmax.f32 %v2888_v28, 0.0 }
 0x210   : > { %9471 = vmatprep.subr.mxu1 %v15439_v12  ;;  %9580 = vmatprep.subr.mxu0 %v15439_v12  ;;  %v12708_v11 = vmax.f32 %v2887_v3, 0.0  ;;  %v2852_v10 = vadd.f32 %v2727_v6, %v2585_v59  ;;  %v3005_v2 = vsel %vm407_vm0, %v3002_v0, %v3004_v16  ;;  %v15457_v0 = vld [vmem:[#allocation69_spill] sm:$0xff]  ;;  %v1276_v7 = vadd.f32 %v15458_v19, %v12656_v37  ;;  %v15462_v59 = vld [vmem:[#allocation67_spill] sm:$0xff] }
 0x211   : > { %v12710_v33 = vpop.f32.mrf.mxu0  ;;  %9472 = vmatpush3.msra.mxu1 %v3471_v46  ;;  %9581 = vmatpush3.msra.mxu0 %v3777_v23  ;;  %v2318_v54 = vadd.f32 %v15457_v0, %v2057_v53  ;;  %v1278_v3 = vadd.f32 %v15459_v24, %v911_v27  ;;  %v15460_v46 = vld [vmem:[#allocation43_spill] sm:$0xff]  ;;  %v15461_v23 = vld [vmem:[#allocation65_spill] sm:$0xff]  ;;  %v12741_v9 = vsel %vm407_vm0, %v3004_v16, %v3006_v8  ;;  %v15463_v27 = vld [vmem:[#allocation28_spill] sm:$0xff] }
 0x212   : > { %9291 = vmatmul.mubr.f32.gmra.mxu1 %v3005_v2  ;;  %9401 = vmatmul.mubr.f32.gmra.mxu0 %v12675_v35  ;;  %v1792_v34 = vadd.f32 %v15460_v46, %v1523_v60  ;;  %v2586_v61 = vadd.f32 %v15462_v59, %v15461_v23  ;;  %v2889_v6 = vadd.f32 %v12614_v44, %v2852_v10  ;;  %v3008_v37 = vrot.slane %v12708_v11, 1  ;;  %v15465_v53 = vld [vmem:[#allocation29_spill] sm:$0xff]  ;;  %v3469_v10 = vld [vmem:[#allocation2 + $0x160] sm:$0xff]  ;;  %v15466_v47 = vld [vmem:[#allocation31_spill] sm:$0xff] }
 0x213   : > { %v2737_v4 = vpop.f32.mrf.mxu0  ;;  %9293 = vmatprep.mubr.msk.f32.mxu1 %vm10952_vm2, %v15439_v12  ;;  %9403 = vmatprep.mubr.msk.f32.mxu0 %vm10952_vm2, %v15439_v12  ;;  %v1527_v60 = vadd.f32 %v15463_v27, %v1266_v36  ;;  %v1529_v21 = vadd.f32 %v15464_v20, %v1268_v39  ;;  %v1531_v2 = vadd.f32 %v15465_v53, %v1270_v58  ;;  %v15467_v36 = vld [vmem:[#allocation33_spill] sm:$0xff]  ;;  %v15468_v58 = vld [vmem:[#allocation35_spill] sm:$0xff] }
 0x214   : > { %9473 = vmatprep.subr.mxu1 %v15439_v12  ;;  %9582 = vmatprep.subr.mxu0 %v15439_v12  ;;  %v1533_v40 = vadd.f32 %v15466_v47, %v1272_v50  ;;  %v2587_v16 = vadd.f32 %v12506_v42, %v2318_v54  ;;  %v1535_v39 = vadd.f32 %v15467_v36, %v1274_v1  ;;  %v15469_v19 = vld [vmem:[#allocation37_spill] sm:$0xff]  ;;  %v15470_v42 = vld [vmem:[#allocation44_spill] sm:$0xff]  ;;  %v12768_v54 = vmax.f32 %v2889_v6, 0.0  ;;  %v15471_v1 = vld [vmem:[#allocation38_spill] sm:$0xff] }
 0x215   : > { %v12738_v45 = vpop.f32.mrf.mxu0  ;;  %9474 = vmatpush3.msra.mxu1 %v3470_v56  ;;  %9583 = vmatpush3.msra.mxu0 %v3776_v55  ;;  %v2853_v56 = vadd.f32 %v12677_v41, %v2586_v61  ;;  %v12760_v0 = vadd.f32 %v15468_v58, %v1276_v7  ;;  %v12763_v50 = vadd.f32 %v15469_v19, %v1278_v3  ;;  %v15472_v3 = vld [vmem:[#allocation45_spill] sm:$0xff]  ;;  %v15473_v59 = vld [vmem:[#allocation47_spill] sm:$0xff]  ;;  %v15480_v36 = vld [vmem:[#allocation70_spill] sm:$0xff] }
 0x216   : > { %9294 = vmatmul.mubr.f32.gmra.mxu1 %v12741_v9  ;;  %9404 = vmatmul.mubr.f32.gmra.mxu0 %v12693_v29  ;;  %v2059_v41 = vadd.f32 %v15470_v42, %v1792_v34  ;;  %v2854_v28 = vadd.f32 %v2737_v4, %v2587_v16  ;;  %v12773_v46 = vsel %vm407_vm0, %v3006_v8, %v3008_v37  ;;  %v3468_v4 = vld [vmem:[#allocation2 + $0x158] sm:$0xff]  ;;  %v3774_v34 = vld [vmem:[#allocation2 + $0x1d0] sm:$0xff]  ;;  %v15474_v6 = vld [vmem:[#allocation49_spill] sm:$0xff] }
 0x217   : > { %v2747_v55 = vpop.f32.mrf.mxu0  ;;  %9296 = vmatprep.mubr.msk.f32.mxu1 %vm10952_vm2, %v15439_v12  ;;  %9406 = vmatprep.mubr.msk.f32.mxu0 %vm10952_vm2, %v15439_v12  ;;  %v1280_v7 = vadd.f32 %v15471_v1, %v12688_v30  ;;  %v1794_v23 = vadd.f32 %v15472_v3, %v12702_v43  ;;  %v1796_v61 = vadd.f32 %v15473_v59, %v1527_v60  ;;  %v15475_v8 = vld [vmem:[#allocation72_spill] sm:$0xff]  ;;  %v3010_v30 = vrot.slane %v12751_v18, 1  ;;  %v15476_v43 = vld [vmem:[#allocation51_spill] sm:$0xff]  ;;  %v15482_v1 = vld [vmem:[#allocation46_spill] sm:$0xff] }
 0x218   : > { %9475 = vmatprep.subr.mxu1 %v15439_v12  ;;  %9584 = vmatprep.subr.mxu0 %v15439_v12  ;;  %v1798_v27 = vadd.f32 %v15474_v6, %v1529_v21  ;;  %v2320_v20 = vadd.f32 %v15475_v8, %v2059_v41  ;;  %v2890_v53 = vadd.f32 %v12614_v44, %v2853_v56  ;;  %v15478_v16 = vld [vmem:[#allocation55_spill] sm:$0xff]  ;;  %v15479_v56 = vld [vmem:[#allocation68_spill] sm:$0xff]  ;;  %v3773_v8 = vld [vmem:[#allocation2 + $0x1c8] sm:$0xff] }
 0x219   : > { %v12770_v24 = vpop.f32.mrf.mxu0  ;;  %9476 = vmatpush3.msra.mxu1 %v3469_v10  ;;  %9585 = vmatpush3.msra.mxu0 %v3775_v52  ;;  %v1800_v60 = vadd.f32 %v15476_v43, %v1531_v2  ;;  %v15477_v52 = vld [vmem:[#allocation53_spill] sm:$0xff]  ;;  %v1804_v21 = vadd.f32 %v15478_v16, %v1535_v39  ;;  %v2588_v58 = vadd.f32 %v15480_v36, %v15479_v56  ;;  %v3012_v2 = vrot.slane %v12768_v54, 1  ;;  %v15483_v59 = vld [vmem:[#allocation48_spill] sm:$0xff]  ;;  %v15487_v16 = vld [vmem:[#allocation54_spill] sm:$0xff] }
 0x21a   : > { %9297 = vmatmul.mubr.f32.gmra.mxu1 %v12773_v46  ;;  %9407 = vmatmul.mubr.f32.gmra.mxu0 %v12708_v11  ;;  %v1802_v47 = vadd.f32 %v15477_v52, %v1533_v40  ;;  %v2891_v19 = vadd.f32 %v12614_v44, %v2854_v28  ;;  %v12803_v41 = vsel %vm407_vm0, %v3008_v37, %v3010_v30  ;;  %v15481_v40 = vld [vmem:[#allocation39_spill] sm:$0xff]  ;;  %v3467_v28 = vld [vmem:[#allocation2 + $0x150] sm:$0xff] }
 0x21b   : > { %v12785_v10 = vpop.f32.mrf.mxu0  ;;  %9299 = vmatprep.mubr.msk.f32.mxu1 %vm10952_vm2, %v15439_v12  ;;  %9409 = vmatprep.mubr.msk.f32.mxu0 %vm10952_vm2, %v15439_v12  ;;  %v12807_v39 = vadd.f32 %v15481_v40, %v1280_v7  ;;  %v2061_v3 = vadd.f32 %v15482_v1, %v1794_v23  ;;  %v12811_v6 = vadd.f32 %v15483_v59, %v1796_v61  ;;  %v15484_v37 = vld [vmem:[#allocation50_spill] sm:$0xff]  ;;  %v15486_v23 = vld [vmem:[#allocation52_spill] sm:$0xff]  ;;  %v15492_v1 = vld [vmem:[#allocation75_spill] sm:$0xff] }
 0x21c   : > { %9477 = vmatprep.subr.mxu1 %v15439_v12  ;;  %9586 = vmatprep.subr.mxu0 %v15439_v12  ;;  %v12816_v43 = vadd.f32 %v15484_v37, %v1798_v27  ;;  %v2855_v7 = vadd.f32 %v12710_v33, %v2588_v58  ;;  %v2067_v61 = vadd.f32 %v15486_v23, %v1800_v60  ;;  %v15490_v60 = vld [vmem:[#allocation57_spill] sm:$0xff] }
 0x21d   : > { %v12800_v42 = vpop.f32.mrf.mxu0  ;;  %9478 = vmatpush3.msra.mxu1 %v3468_v4  ;;  %9587 = vmatpush3.msra.mxu0 %v3774_v34  ;;  %v2589_v4 = vadd.f32 %v12515_v17, %v2320_v20  ;;  %v12819_v34 = vmax.f32 %v2890_v53, 0.0  ;;  %v2069_v56 = vadd.f32 %v15487_v16, %v1802_v47  ;;  %v2596_v27 = vadd.f32 %v12540_v32, %v12536_v48  ;;  %v15488_v17 = vld [vmem:[#allocation56_spill] sm:$0xff]  ;;  %v15496_v23 = vld [vmem:[#allocation85_spill] sm:$0xff] }
 0x21e   : > { %9300 = vmatmul.mubr.f32.gmra.mxu1 %v12803_v41  ;;  %9410 = vmatmul.mubr.f32.gmra.mxu0 %v12751_v18  ;;  %v2071_v33 = vadd.f32 %v15488_v17, %v1804_v21  ;;  %v12835_v20 = vmax.f32 %v2891_v19, 0.0  ;;  %v12838_v58 = vsel %vm407_vm0, %v3010_v30, %v3012_v2  ;;  %v1806_v47 = vadd.f32 %v15490_v60, %v12760_v0  ;;  %v3466_v21 = vld [vmem:[#allocation2 + $0x148] sm:$0xff]  ;;  %v3772_v19 = vld [vmem:[#allocation2 + $0x1c0] sm:$0xff]  ;;  %v15493_v0 = vld [vmem:[#allocation71_spill] sm:$0xff] }
 0x21f   : > { %15485 = vst [vmem:[#allocation8_spill] sm:$0xff] %v12819_v34  ;;  %v12822_v52 = vpop.f32.mrf.mxu0  ;;  %9302 = vmatprep.mubr.msk.f32.mxu1 %vm10952_vm2, %v15439_v12  ;;  %9412 = vmatprep.mubr.msk.f32.mxu0 %vm10952_vm2, %v15439_v12  ;;  %v2856_v53 = vadd.f32 %v2747_v55, %v2589_v4  ;;  %v2328_v32 = vadd.f32 %v12547_v57, %v2067_v61  ;;  %v15491_v55 = vld [vmem:[#allocation59_spill] sm:$0xff]  ;;  %v3014_v57 = vrot.slane %v12819_v34, 1  ;;  %v15495_v4 = vld [vmem:[#allocation84_spill] sm:$0xff] }
 0x220   : > { %9479 = vmatprep.subr.mxu1 %v15439_v12  ;;  %9588 = vmatprep.subr.mxu0 %v15439_v12  ;;  %15489 = vst [vmem:[#allocation9_spill] sm:$0xff] %v12835_v20  ;;  %v1808_v40 = vadd.f32 %v15491_v55, %v12763_v50  ;;  %v2322_v30 = vadd.f32 %v15492_v1, %v2061_v3  ;;  %v3016_v17 = vrot.slane %v12835_v20, 1 }
 0x221   : > { %v9236_v36 = vpop.f32.mrf.mxu0  ;;  %9480 = vmatpush3.msra.mxu1 %v3467_v28  ;;  %9589 = vmatpush3.msra.mxu0 %v3773_v8  ;;  %v2892_v59 = vadd.f32 %v12614_v44, %v2855_v7  ;;  %v15494_v8 = vld [vmem:[#allocation73_spill] sm:$0xff]  ;;  %v2598_v50 = vadd.f32 %v15496_v23, %v15495_v4  ;;  %v2330_v7 = vadd.f32 %v12556_v25, %v2069_v56  ;;  %v3465_v25 = vld [vmem:[#allocation2 + $0x140] sm:$0xff]  ;;  %v3771_v56 = vld [vmem:[#allocation2 + $0x1b8] sm:$0xff] }
 0x222   : > { %v2863_v48 = vadd.f32 %v9236_v36, %v2596_v27  ;;  %9303 = vmatmul.mubr.f32.gmra.mxu1 %v12838_v58  ;;  %9413 = vmatmul.mubr.f32.gmra.mxu0 %v12768_v54  ;;  %v2590_v37 = vadd.f32 %v15494_v8, %v15493_v0  ;;  %v2893_v61 = vadd.f32 %v12614_v44, %v2856_v53  ;;  %v15497_v36 = vld [vmem:[#allocation58_spill] sm:$0xff]  ;;  %v15498_v53 = vld [vmem:[#allocation60_spill] sm:$0xff] }
 0x223   : > { %v12849_v28 = vpop.f32.mrf.mxu0  ;;  %9305 = vmatprep.mubr.msk.f32.mxu1 %vm10952_vm2, %v15439_v12  ;;  %9415 = vmatprep.mubr.msk.f32.mxu0 %vm10952_vm2, %v15439_v12  ;;  %v12868_v27 = vsel %vm407_vm0, %v3012_v2, %v3014_v57  ;;  %v2073_v60 = vadd.f32 %v15497_v36, %v1806_v47  ;;  %v12876_v1 = vadd.f32 %v15498_v53, %v1808_v40  ;;  %v15499_v2 = vld [vmem:[#allocation77_spill] sm:$0xff]  ;;  %v12879_v8 = vmax.f32 %v2892_v59, 0.0  ;;  %v15502_v47 = vld [vmem:[#allocation87_spill] sm:$0xff] }
 0x224   : > { %v12861_v3 = vadd.f32 %v12614_v44, %v2863_v48  ;;  %9481 = vmatprep.subr.mxu1 %v15439_v12  ;;  %9590 = vmatprep.subr.mxu0 %v15439_v12  ;;  %v2597_v48 = vadd.f32 %v12551_v13, %v2328_v32  ;;  %v2591_v0 = vadd.f32 %v15499_v2, %v2322_v30  ;;  %v15501_v13 = vld [vmem:[#allocation86_spill] sm:$0xff]  ;;  %v12894_v30 = vmax.f32 %v2893_v61, 0.0  ;;  %v15508_v53 = vld [vmem:[#allocation89_spill] sm:$0xff] }
 0x225   : > { %v9239_v16 = vpop.f32.mrf.mxu0  ;;  %9482 = vmatpush3.msra.mxu1 %v3466_v21  ;;  %9591 = vmatpush3.msra.mxu0 %v3772_v19  ;;  %15500 = vst [vmem:[#allocation10_spill] sm:$0xff] %v12879_v8  ;;  %v2857_v21 = vadd.f32 %v12738_v45, %v2590_v37  ;;  %v2600_v32 = vadd.f32 %v15502_v47, %v15501_v13  ;;  %v15504_v61 = vld [vmem:[#allocation74_spill] sm:$0xff] }
 0x226   : > { %v2865_v55 = vadd.f32 %v9239_v16, %v2598_v50  ;;  %9306 = vmatmul.mubr.f32.gmra.mxu1 %v12868_v27  ;;  %9416 = vmatmul.mubr.f32.gmra.mxu0 %v12819_v34  ;;  %v2599_v45 = vadd.f32 %v12560_v62, %v2330_v7  ;;  %15503 = vst [vmem:[#allocation11_spill] sm:$0xff] %v12894_v30  ;;  %v3464_v62 = vld [vmem:[#allocation2 + $0x138] sm:$0xff]  ;;  %v3770_v7 = vld [vmem:[#allocation2 + $0x1b0] sm:$0xff] }
 0x227   : > { %v2787_v19 = vpop.f32.mrf.mxu0  ;;  %9308 = vmatprep.mubr.msk.f32.mxu1 %vm10952_vm2, %v15439_v12  ;;  %9418 = vmatprep.mubr.msk.f32.mxu0 %vm10952_vm2, %v15439_v12  ;;  %v2858_v59 = vadd.f32 %v12785_v10, %v2591_v0  ;;  %v12898_v23 = vsel %vm407_vm0, %v3014_v57, %v3016_v17  ;;  %v2332_v50 = vadd.f32 %v12565_v22, %v2071_v33  ;;  %v15505_v10 = vld [vmem:[#allocation76_spill] sm:$0xff]  ;;  %v15506_v57 = vld [vmem:[#allocation79_spill] sm:$0xff]  ;;  %v3018_v22 = vrot.slane %v12879_v8, 1 }
 0x228   : > { %v12889_v4 = vadd.f32 %v12614_v44, %v2865_v55  ;;  %v2864_v40 = vadd.f32 %v2787_v19, %v2597_v48  ;;  %9483 = vmatprep.subr.mxu1 %v15439_v12  ;;  %9592 = vmatprep.subr.mxu0 %v15439_v12  ;;  %v2592_v48 = vadd.f32 %v15505_v10, %v15504_v61  ;;  %v15507_v33 = vld [vmem:[#allocation88_spill] sm:$0xff]  ;;  %v15511_v61 = vld [vmem:[#allocation81_spill] sm:$0xff] }
 0x229   : > { %v9242_v37 = vpop.f32.mrf.mxu0  ;;  %9484 = vmatpush3.msra.mxu1 %v3465_v25  ;;  %9593 = vmatpush3.msra.mxu0 %v3771_v56  ;;  %v2324_v55 = vadd.f32 %v15506_v57, %v12811_v6  ;;  %v2894_v25 = vadd.f32 %v12614_v44, %v2857_v21  ;;  %v2602_v2 = vadd.f32 %v15508_v53, %v15507_v33 }
 0x22a   : > { %v12902_v16 = vadd.f32 %v12614_v44, %v2864_v40  ;;  %v2867_v36 = vadd.f32 %v9242_v37, %v2600_v32  ;;  %9309 = vmatmul.mubr.f32.gmra.mxu1 %v12898_v23  ;;  %9419 = vmatmul.mubr.f32.gmra.mxu0 %v12835_v20  ;;  %v2334_v6 = vadd.f32 %v12576_v49, %v2073_v60  ;;  %v3020_v32 = vrot.slane %v12894_v30, 1  ;;  %v15509_v40 = vld [vmem:[#allocation90_spill] sm:$0xff]  ;;  %v3769_v60 = vld [vmem:[#allocation2 + $0x1a8] sm:$0xff] }
 0x22b   : > { %v2797_v56 = vpop.f32.mrf.mxu0  ;;  %9311 = vmatprep.mubr.msk.f32.mxu1 %vm10952_vm2, %v15439_v12  ;;  %9421 = vmatprep.mubr.msk.f32.mxu0 %vm10952_vm2, %v15439_v12  ;;  %v2895_v21 = vadd.f32 %v12614_v44, %v2858_v59  ;;  %v12926_v47 = vsel %vm407_vm0, %v3016_v17, %v3018_v22  ;;  %v2601_v37 = vadd.f32 %v15509_v40, %v2332_v50  ;;  %v3463_v49 = vld [vmem:[#allocation2 + $0x130] sm:$0xff]  ;;  %v15510_v59 = vld [vmem:[#allocation61_spill] sm:$0xff]  ;;  %v12938_v57 = vmax.f32 %v2894_v25, 0.0 }
 0x22c   : > { %v12919_v0 = vadd.f32 %v12614_v44, %v2867_v36  ;;  %v2866_v19 = vadd.f32 %v2797_v56, %v2599_v45  ;;  %9485 = vmatprep.subr.mxu1 %v15439_v12  ;;  %9594 = vmatprep.subr.mxu0 %v15439_v12  ;;  %v1810_v17 = vadd.f32 %v15510_v59, %v12807_v39  ;;  %v15514_v56 = vld [vmem:[#allocation92_spill] sm:$0xff] }
 0x22d   : > { %v9245_v13 = vpop.f32.mrf.mxu0  ;;  %9486 = vmatpush3.msra.mxu1 %v3464_v62  ;;  %9595 = vmatpush3.msra.mxu0 %v3770_v7  ;;  %v2593_v10 = vadd.f32 %v15511_v61, %v2324_v55  ;;  %15512 = vst [vmem:[#allocation12_spill] sm:$0xff] %v12938_v57  ;;  %v2859_v62 = vadd.f32 %v12770_v24, %v2592_v48  ;;  %v15513_v7 = vld [vmem:[#allocation91_spill] sm:$0xff]  ;;  %v15515_v55 = vld [vmem:[#allocation93_spill] sm:$0xff]  ;;  %v12953_v48 = vmax.f32 %v2895_v21, 0.0  ;;  %v3768_v21 = vld [vmem:[#allocation2 + $0x1a0] sm:$0xff] }
 0x22e   : > { %v12931_v45 = vadd.f32 %v12614_v44, %v2866_v19  ;;  %v2869_v36 = vadd.f32 %v9245_v13, %v2602_v2  ;;  %9312 = vmatmul.mubr.f32.gmra.mxu1 %v12926_v47  ;;  %9422 = vmatmul.mubr.f32.gmra.mxu0 %v12879_v8  ;;  %v2604_v33 = vadd.f32 %v15514_v56, %v15513_v7 }
 0x22f   : > { %v2807_v50 = vpop.f32.mrf.mxu0  ;;  %9314 = vmatprep.mubr.msk.f32.mxu1 %vm10952_vm2, %v15439_v12  ;;  %9424 = vmatprep.mubr.msk.f32.mxu0 %vm10952_vm2, %v15439_v12  ;;  %v2603_v24 = vadd.f32 %v15515_v55, %v2334_v6  ;;  %15516 = vst [vmem:[#allocation16_spill] sm:$0xff] %v12953_v48  ;;  %v2860_v25 = vadd.f32 %v12822_v52, %v2593_v10  ;;  %v3462_v6 = vld [vmem:[#allocation2 + $0x128] sm:$0xff]  ;;  %v15517_v52 = vld [vmem:[#allocation82_spill] sm:$0xff]  ;;  %v15520_v10 = vld [vmem:[#allocation80_spill] sm:$0xff] }
 0x230   : > { %v12948_v53 = vadd.f32 %v12614_v44, %v2869_v36  ;;  %v2868_v39 = vadd.f32 %v2807_v50, %v2601_v37  ;;  %9487 = vmatprep.subr.mxu1 %v15439_v12  ;;  %9596 = vmatprep.subr.mxu0 %v15439_v12  ;;  %v12957_v19 = vsel %vm407_vm0, %v3018_v22, %v3020_v32 }
 0x231   : > { %v9248_v2 = vpop.f32.mrf.mxu0  ;;  %9488 = vmatpush3.msra.mxu1 %v3463_v49  ;;  %9597 = vmatpush3.msra.mxu0 %v3769_v60  ;;  %v2336_v13 = vadd.f32 %v12588_v31, %v12876_v1  ;;  %v2326_v36 = vadd.f32 %v15517_v52, %v12816_v43  ;;  %v2896_v22 = vadd.f32 %v12614_v44, %v2859_v62  ;;  %v3022_v31 = vrot.slane %v12938_v57, 1  ;;  %v15518_v1 = vld [vmem:[#allocation62_spill] sm:$0xff] }
 0x232   : > { %v12962_v40 = vadd.f32 %v12614_v44, %v2868_v39  ;;  %v2871_v37 = vadd.f32 %v9248_v2, %v2604_v33  ;;  %9315 = vmatmul.mubr.f32.gmra.mxu1 %v12957_v19  ;;  %9425 = vmatmul.mubr.f32.gmra.mxu0 %v12894_v30  ;;  %v2077_v60 = vadd.f32 %v15518_v1, %v1810_v17  ;;  %v15519_v43 = vld [vmem:[#allocation78_spill] sm:$0xff]  ;;  %v3024_v33 = vrot.slane %v12953_v48, 1  ;;  %v15521_v2 = vld [vmem:[#allocation83_spill] sm:$0xff] }
 0x233   : > { %v2817_v49 = vpop.f32.mrf.mxu0  ;;  %9317 = vmatprep.mubr.msk.f32.mxu1 %vm10952_vm2, %v15439_v12  ;;  %9427 = vmatprep.mubr.msk.f32.mxu0 %vm10952_vm2, %v15439_v12  ;;  %v2594_v62 = vadd.f32 %v15520_v10, %v15519_v43  ;;  %v2897_v50 = vadd.f32 %v12614_v44, %v2860_v25  ;;  %v12984_v56 = vsel %vm407_vm0, %v3020_v32, %v3022_v31  ;;  %v3767_v25 = vld [vmem:[#allocation2 + $0x198] sm:$0xff]  ;;  %v12996_v52 = vmax.f32 %v2896_v22, 0.0 }
 0x234   : > { %v12976_v59 = vadd.f32 %v12614_v44, %v2871_v37  ;;  %v2870_v61 = vadd.f32 %v2817_v49, %v2603_v24  ;;  %9489 = vmatprep.subr.mxu1 %v15439_v12  ;;  %9598 = vmatprep.subr.mxu0 %v15439_v12  ;;  %v2605_v17 = vadd.f32 %v12595_v63, %v2336_v13  ;;  %v3461_v24 = vld [vmem:[#allocation2 + $0x120] sm:$0xff] }
 0x235   : > { %v9251_v7 = vpop.f32.mrf.mxu0  ;;  %9490 = vmatpush3.msra.mxu1 %v3462_v6  ;;  %9599 = vmatpush3.msra.mxu0 %v3768_v21  ;;  %v2595_v32 = vadd.f32 %v15521_v2, %v2326_v36  ;;  %v2338_v37 = vadd.f32 %v12603_v51, %v2077_v60  ;;  %15522 = vst [vmem:[#allocation17_spill] sm:$0xff] %v12996_v52  ;;  %v13008_v51 = vmax.f32 %v2897_v50, 0.0  ;;  %v3460_v60 = vld [vmem:[#allocation2 + $0x118] sm:$0xff] }
 0x236   : > { %v12989_v39 = vadd.f32 %v12614_v44, %v2870_v61  ;;  %v2873_v55 = vadd.f32 %v9251_v7, %v12592_v5  ;;  %9318 = vmatmul.mubr.f32.gmra.mxu1 %v12984_v56  ;;  %9428 = vmatmul.mubr.f32.gmra.mxu0 %v12938_v57  ;;  %v2861_v6 = vadd.f32 %v12800_v42, %v2594_v62  ;;  %v2570_v5 = vpop.f32.mrf.mxu1  ;;  %v3766_v61 = vld [vmem:[#allocation2 + $0x190] sm:$0xff] }
 0x237   : > { %v2827_v63 = vpop.f32.mrf.mxu0  ;;  %9320 = vmatprep.mubr.msk.f32.mxu1 %vm10952_vm2, %v15439_v12  ;;  %9430 = vmatprep.mubr.msk.f32.mxu0 %vm10952_vm2, %v15439_v12  ;;  %15523 = vst [vmem:[#allocation18_spill] sm:$0xff] %v13008_v51  ;;  %v2862_v42 = vadd.f32 %v12849_v28, %v2595_v32  ;;  %v13012_v22 = vsel %vm407_vm0, %v3022_v31, %v3024_v33  ;;  %v3026_v31 = vrot.slane %v12996_v52, 1 }
 0x238   : > { %v13004_v13 = vadd.f32 %v12614_v44, %v2873_v55  ;;  %v2872_v21 = vadd.f32 %v2827_v63, %v2605_v17  ;;  %9491 = vmatprep.subr.mxu1 %v15439_v12  ;;  %9600 = vmatprep.subr.mxu0 %v15439_v12  ;;  %v2607_v43 = vadd.f32 %v2570_v5, %v2338_v37  ;;  %v3028_v17 = vrot.slane %v13008_v51, 1  ;;  %v3459_v55 = vld [vmem:[#allocation2 + $0x110] sm:$0xff]  ;;  %v3764_v37 = vld [vmem:[#allocation2 + $0x180] sm:$0xff] }
 0x239   : > { %v9254_v36 = vpop.f32.mrf.mxu0  ;;  %9492 = vmatpush3.msra.mxu1 %v3461_v24  ;;  %9601 = vmatpush3.msra.mxu0 %v3767_v25  ;;  %v2898_v28 = vadd.f32 %v12614_v44, %v2861_v6  ;;  %v2899_v62 = vadd.f32 %v12614_v44, %v2862_v42  ;;  %v13033_v7 = vsel %vm407_vm0, %v3024_v33, %v3026_v31  ;;  %v3765_v24 = vld [vmem:[#allocation2 + $0x188] sm:$0xff]  ;;  %v13070_v42 = vmax.f32 %v12861_v3, 0.0 }
 0x23a   : > { %v13015_v49 = vadd.f32 %v12614_v44, %v2872_v21  ;;  %v2875_v1 = vadd.f32 %v9254_v36, %v12607_v14  ;;  %9321 = vmatmul.mubr.f32.gmra.mxu1 %v13012_v22  ;;  %9431 = vmatmul.mubr.f32.gmra.mxu0 %v12953_v48  ;;  %v13052_v32 = vsel %vm407_vm0, %v3026_v31, %v3028_v17  ;;  %v3457_v21 = vld [vmem:[#allocation2 + $0x100] sm:$0xff]  ;;  %v13079_v36 = vmax.f32 %v12902_v16, 0.0 }
 0x23b   : > { %v2837_v10 = vpop.f32.mrf.mxu0  ;;  %9323 = vmatprep.mubr.msk.f32.mxu1 %vm10952_vm2, %v15439_v12  ;;  %9433 = vmatprep.mubr.msk.f32.mxu0 %vm10952_vm2, %v15439_v12  ;;  %v13038_v25 = vmax.f32 %v2898_v28, 0.0  ;;  %v13049_v33 = vmax.f32 %v2899_v62, 0.0  ;;  %15528 = vst [vmem:[#allocation41_spill] sm:$0xff] %v13070_v42  ;;  %v3034_v3 = vrot.slane %v13070_v42, 1  ;;  %v13125_v31 = vmax.f32 %v12919_v0, 0.0 }
 0x23c   : > { %v13027_v14 = vadd.f32 %v12614_v44, %v2875_v1  ;;  %9493 = vmatprep.subr.mxu1 %v15439_v12  ;;  %9602 = vmatprep.subr.mxu0 %v15439_v12  ;;  %v2874_v50 = vadd.f32 %v2837_v10, %v2607_v43  ;;  %15529 = vst [vmem:[#allocation63_spill] sm:$0xff] %v13079_v36  ;;  %v13106_v43 = vmax.f32 %v12931_v45, 0.0  ;;  %v13132_v62 = vmax.f32 %v12962_v40, 0.0 }
 0x23d   : > { %9494 = vmatpush3.msra.mxu1 %v3460_v60  ;;  %9603 = vmatpush3.msra.mxu0 %v3766_v61  ;;  %15525 = vst [vmem:[#allocation66_spill] sm:$0xff] %v13038_v25  ;;  %15527 = vst [vmem:[#allocation25_spill] sm:$0xff] %v13049_v33  ;;  %v3030_v6 = vrot.slane %v13038_v25, 1  ;;  %v3032_v5 = vrot.slane %v13049_v33, 1  ;;  %v3036_v60 = vrot.slane %v13079_v36, 1  ;;  %v13099_v61 = vmax.f32 %v12889_v4, 0.0 }
 0x23e   : > { %15524 = vst [vmem:[#allocation40_spill] sm:$0xff] %v13027_v14  ;;  %9324 = vmatmul.mubr.f32.gmra.mxu1 %v13033_v7  ;;  %9434 = vmatmul.mubr.f32.gmra.mxu0 %v12996_v52  ;;  %v13041_v2 = vadd.f32 %v12614_v44, %v2874_v50  ;;  %v3458_v44 = vld [vmem:[#allocation2 + $0x108] sm:$0xff]  ;;  %15531 = vst [vmem:[#allocation19_spill] sm:$0xff] %v13106_v43  ;;  %v3040_v45 = vrot.slane %v13106_v43, 1  ;;  %v3042_v0 = vrot.slane %v13125_v31, 1  ;;  %v3044_v40 = vrot.slane %v13132_v62, 1 }
 0x23f   : > { %9326 = vmatprep.mubr.msk.f32.mxu1 %vm10952_vm2, %v15439_v12  ;;  %9436 = vmatprep.mubr.msk.f32.mxu0 %vm10952_vm2, %v15439_v12  ;;  %v13064_v63 = vsel %vm407_vm0, %v3028_v17, %v3030_v6  ;;  %v13082_v1 = vsel %vm407_vm0, %v3030_v6, %v3032_v5  ;;  %v13093_v16 = vsel %vm407_vm0, %v3032_v5, %v3034_v3  ;;  %v3038_v4 = vrot.slane %v13099_v61, 1 }
 0x240   : > { %15526 = vst [vmem:[#allocation23_spill] sm:$0xff] %v13041_v2  ;;  %9495 = vmatprep.subr.mxu1 %v15439_v12  ;;  %9604 = vmatprep.subr.mxu0 %v15439_v12  ;;  %15530 = vst [vmem:[#allocation64_spill] sm:$0xff] %v13099_v61  ;;  %v13109_v28 = vsel %vm407_vm0, %v3034_v3, %v3036_v60  ;;  %v13145_v17 = vsel %vm407_vm0, %v3040_v45, %v3042_v0  ;;  %v13177_v6 = vmax.f32 %v12976_v59, 0.0  ;;  %v4249_v3 = vld [vmem:[#allocation2 + $0x2f8] sm:$0xff]  ;;  %v4238_v2 = vld [vmem:[#allocation2 + $0x2a0] sm:$0xff] }
 0x241   : > { %9496 = vmatpush3.msra.mxu1 %v3459_v55  ;;  %9605 = vmatpush3.msra.mxu0 %v3765_v24  ;;  %v13119_v10 = vsel %vm407_vm0, %v3036_v60, %v3038_v4  ;;  %15532 = vst [vmem:[#allocation20_spill] sm:$0xff] %v13125_v31  ;;  %15533 = vst [vmem:[#allocation21_spill] sm:$0xff] %v13132_v62  ;;  %v13135_v50 = vsel %vm407_vm0, %v3038_v4, %v3040_v45  ;;  %v13151_v55 = vmax.f32 %v12948_v53, 0.0  ;;  %v4010_v60 = vld [vmem:[#allocation2 + $0x278] sm:$0xff]  ;;  %v4009_v45 = vld [vmem:[#allocation2 + $0x270] sm:$0xff] }
 0x242   : > { %9327 = vmatmul.mubr.f32.gmra.mxu1 %v13052_v32  ;;  %9437 = vmatmul.mubr.f32.gmra.mxu0 %v13008_v51  ;;  %v13158_v24 = vmax.f32 %v12989_v39, 0.0  ;;  %v3476_v4 = vrot.slane %v12675_v35, 2  ;;  %v3494_v14 = vrot.slane %v12938_v57, 2 }
 0x243   : > { %9329 = vmatprep.mubr.msk.f32.mxu1 %vm10952_vm2, %v15439_v12  ;;  %9439 = vmatprep.mubr.msk.f32.mxu0 %vm10952_vm2, %v15439_v12  ;;  %15534 = vst [vmem:[#allocation22_spill] sm:$0xff] %v13151_v55  ;;  %v3046_v53 = vrot.slane %v13151_v55, 1 }
 0x244   : > { %9497 = vmatprep.subr.mxu1 %v15439_v12  ;;  %9606 = vmatprep.subr.mxu0 %v15439_v12  ;;  %15535 = vst [vmem:[#allocation24_spill] sm:$0xff] %v13158_v24  ;;  %v3048_v39 = vrot.slane %v13158_v24, 1 }
 0x245   : > { %9498 = vmatpush3.msra.mxu1 %v3458_v44  ;;  %9607 = vmatpush3.msra.mxu0 %v3764_v37  ;;  %v13161_v44 = vsel %vm407_vm0, %v3042_v0, %v3044_v40  ;;  %v13171_v37 = vsel %vm407_vm0, %v3044_v40, %v3046_v53  ;;  %v4248_v0 = vld [vmem:[#allocation2 + $0x2f0] sm:$0xff]  ;;  %v4247_v40 = vld [vmem:[#allocation2 + $0x2e8] sm:$0xff] }
 0x246   : > { %9330 = vmatmul.mubr.f32.gmra.mxu1 %v13064_v63  ;;  %9440 = vmatmul.mubr.f32.gmra.mxu0 %v13038_v25  ;;  %v13184_v5 = vsel %vm407_vm0, %v3046_v53, %v3048_v39  ;;  %v3478_v53 = vrot.slane %v12693_v29, 2 }
 0x247   : > { %9332 = vmatprep.mubr.msk.f32.mxu1 %vm10952_vm2, %v15439_v12  ;;  %9442 = vmatprep.mubr.msk.f32.mxu0 %vm10952_vm2, %v15439_v12 }
 0x248   : > { %9499 = vmatprep.subr.mxu1 %v15439_v12  ;;  %9790 = vmatprep.subr.mxu0 %v15439_v12  ;;  %v13225_v26 = vsel %vm945_vm1, %v3476_v4, %v3478_v53 }
 0x249   : > { %9500 = vmatpush3.msra.mxu1 %v3457_v21  ;;  %v15253_v21 = vrot.slane %v13177_v6, 1 }
 0x24a   : > { %9333 = vmatmul.mubr.f32.gmra.mxu1 %v13082_v1  ;;  %9443 = vmatmul.mubr.f32.gmra.mxu0 %v13049_v33 }
 0x24b   : > { %9335 = vmatprep.mubr.msk.f32.mxu1 %vm10952_vm2, %v15439_v12  ;;  %9445 = vmatprep.mubr.msk.f32.mxu0 %vm10952_vm2, %v15439_v12  ;;  %v13196_v59 = vsel %vm407_vm0, %v3048_v39, %v15253_v21  ;;  %v4007_v39 = vld [vmem:[#allocation2 + $0x260] sm:$0xff]  ;;  %v4240_v21 = vld [vmem:[#allocation2 + $0x2b0] sm:$0xff] }
 0x24c   : > { %9683 = vmatprep.subr.mxu1 %v15439_v12 }
 0x24e   : > { %9336 = vmatmul.mubr.f32.gmra.mxu1 %v13093_v16  ;;  %9446 = vmatmul.mubr.f32.gmra.mxu0 %v13070_v42 }
 0x24f   : > { %9338 = vmatprep.mubr.msk.f32.mxu1 %vm10952_vm2, %v15439_v12  ;;  %9448 = vmatprep.mubr.msk.f32.mxu0 %vm10952_vm2, %v15439_v12 }
 0x252   : > { %9339 = vmatmul.mubr.f32.gmra.mxu1 %v13109_v28  ;;  %9449 = vmatmul.mubr.f32.gmra.mxu0 %v13079_v36 }
 0x253   : > { %9341 = vmatprep.mubr.msk.f32.mxu1 %vm10952_vm2, %v15439_v12  ;;  %9451 = vmatprep.mubr.msk.f32.mxu0 %vm10952_vm2, %v15439_v12 }
 0x256   : > { %9342 = vmatmul.mubr.f32.gmra.mxu1 %v13119_v10  ;;  %9452 = vmatmul.mubr.f32.gmra.mxu0 %v13099_v61 }
 0x257   : > { %9344 = vmatprep.mubr.msk.f32.mxu1 %vm10952_vm2, %v15439_v12  ;;  %9454 = vmatprep.mubr.msk.f32.mxu0 %vm10952_vm2, %v15439_v12 }
 0x25a   : > { %9345 = vmatmul.mubr.f32.gmra.mxu1 %v13135_v50  ;;  %9455 = vmatmul.mubr.f32.gmra.mxu0 %v13106_v43 }
 0x25b   : > { %9347 = vmatprep.mubr.msk.f32.mxu1 %vm10952_vm2, %v15439_v12  ;;  %9457 = vmatprep.mubr.msk.f32.mxu0 %vm10952_vm2, %v15439_v12 }
 0x25e   : > { %9348 = vmatmul.mubr.f32.gmra.mxu1 %v13145_v17  ;;  %9458 = vmatmul.mubr.f32.gmra.mxu0 %v13125_v31 }
 0x25f   : > { %9350 = vmatprep.mubr.msk.f32.mxu1 %vm10952_vm2, %v15439_v12  ;;  %9460 = vmatprep.mubr.msk.f32.mxu0 %vm10952_vm2, %v15439_v12 }
 0x262   : > { %9351 = vmatmul.mubr.f32.gmra.mxu1 %v13161_v44  ;;  %9461 = vmatmul.mubr.f32.gmra.mxu0 %v13132_v62 }
 0x263   : > { %9353 = vmatprep.mubr.msk.f32.mxu1 %vm10952_vm2, %v15439_v12  ;;  %9463 = vmatprep.mubr.msk.f32.mxu0 %vm10952_vm2, %v15439_v12 }
 0x266   : > { %9354 = vmatmul.mubr.f32.gmra.mxu1 %v13171_v37  ;;  %9464 = vmatmul.mubr.f32.gmra.mxu0 %v13151_v55 }
 0x267   : > { %9356 = vmatprep.mubr.msk.f32.mxu1 %vm10952_vm2, %v15439_v12  ;;  %9466 = vmatprep.mubr.msk.f32.mxu0 %vm10952_vm2, %v15439_v12 }
 0x26a   : > { %9357 = vmatmul.mubr.f32.gmra.mxu1 %v13184_v5  ;;  %9467 = vmatmul.mubr.f32.gmra.mxu0 %v13158_v24 }
 0x26b   : > { %9359 = vmatprep.mubr.msk.f32.mxu1 %vm10952_vm2, %v15439_v12  ;;  %9608 = vmatprep.mubr.msk.f32.mxu0 %vm10952_vm2, %v15439_v12 }
 0x26e   : > { %9360 = vmatmul.mubr.f32.gmra.mxu1 %v13196_v59  ;;  %9609 = vmatmul.mubr.f32.vlgmr.msra.gmra.mxu0 %v12675_v35  ;;  %v3477_v35 = vsel %vm945_vm1, %v3474_v38, %v3476_v4  ;;  %v3480_v38 = vrot.slane %v12708_v11, 2  ;;  %v4245_v4 = vld [vmem:[#allocation2 + $0x2d8] sm:$0xff] }
 0x26f   : > { %9501 = vmatprep.mubr.msk.f32.mxu1 %vm10952_vm2, %v15439_v12  ;;  %9611 = vmatprep.mubr.msk.f32.mxu0 %vm10952_vm2, %v15439_v12 }
 0x270   : > { %9791 = vmatpush3.msra.mxu0 %v4249_v3  ;;  %v13237_v3 = vsel %vm945_vm1, %v3478_v53, %v3480_v38 }
 0x271   : > { %9792 = vmatprep.subr.mxu0 %v15439_v12 }
 0x272   : > { %9502 = vmatmul.mubr.f32.vlgmr.msra.gmra.mxu1 %v12682_v15  ;;  %9612 = vmatmul.mubr.f32.gmra.mxu0 %v12693_v29  ;;  %v4008_v15 = vld [vmem:[#allocation2 + $0x268] sm:$0xff]  ;;  %v4246_v29 = vld [vmem:[#allocation2 + $0x2e0] sm:$0xff] }
 0x273   : > { %9684 = vmatpush3.msra.mxu1 %v4010_v60  ;;  %9504 = vmatprep.mubr.msk.f32.mxu1 %vm10952_vm2, %v15439_v12  ;;  %v4006_v60 = vld [vmem:[#allocation2 + $0x258] sm:$0xff] }
 0x274   : > { %9614 = vmatprep.mubr.msk.f32.mxu0 %vm10952_vm2, %v15439_v12  ;;  %9685 = vmatprep.subr.mxu1 %v15439_v12 }
 0x275   : > { %9686 = vmatpush3.msra.mxu1 %v4009_v45  ;;  %9793 = vmatpush3.msra.mxu0 %v4248_v0  ;;  %v3482_v45 = vrot.slane %v12751_v18, 2 }
 0x276   : > { %9505 = vmatmul.mubr.f32.gmra.mxu1 %v3477_v35  ;;  %9615 = vmatmul.mubr.f32.gmra.mxu0 %v12708_v11  ;;  %v3484_v35 = vrot.slane %v12768_v54, 2 }
 0x277   : > { %9507 = vmatprep.mubr.msk.f32.mxu1 %vm10952_vm2, %v15439_v12  ;;  %9617 = vmatprep.mubr.msk.f32.mxu0 %vm10952_vm2, %v15439_v12  ;;  %v13249_v0 = vsel %vm945_vm1, %v3480_v38, %v3482_v45  ;;  %v4004_v38 = vld [vmem:[#allocation2 + $0x248] sm:$0xff] }
 0x278   : > { %9687 = vmatprep.subr.mxu1 %v15439_v12  ;;  %9794 = vmatprep.subr.mxu0 %v15439_v12  ;;  %15536 = vst [vmem:[#allocation26_spill] sm:$0xff] %v13249_v0  ;;  %v13261_v53 = vsel %vm945_vm1, %v3482_v45, %v3484_v35  ;;  %v4003_v45 = vld [vmem:[#allocation2 + $0x240] sm:$0xff] }
 0x279   : > { %9688 = vmatpush3.msra.mxu1 %v4008_v15  ;;  %9795 = vmatpush3.msra.mxu0 %v4247_v40  ;;  %v4005_v15 = vld [vmem:[#allocation2 + $0x250] sm:$0xff]  ;;  %15537 = vst [vmem:[#allocation27_spill] sm:$0xff] %v13261_v53 }
 0x27a   : > { %9508 = vmatmul.mubr.f32.gmra.mxu1 %v13225_v26  ;;  %9618 = vmatmul.mubr.f32.gmra.mxu0 %v12751_v18  ;;  %v4244_v40 = vld [vmem:[#allocation2 + $0x2d0] sm:$0xff] }
 0x27b   : > { %9510 = vmatprep.mubr.msk.f32.mxu1 %vm10952_vm2, %v15439_v12  ;;  %9620 = vmatprep.mubr.msk.f32.mxu0 %vm10952_vm2, %v15439_v12 }
 0x27c   : > { %9689 = vmatprep.subr.mxu1 %v15439_v12  ;;  %9796 = vmatprep.subr.mxu0 %v15439_v12 }
 0x27d   : > { %9690 = vmatpush3.msra.mxu1 %v4007_v39  ;;  %9797 = vmatpush3.msra.mxu0 %v4246_v29  ;;  %v4243_v39 = vld [vmem:[#allocation2 + $0x2c8] sm:$0xff]  ;;  %v3486_v29 = vrot.slane %v12819_v34, 2 }
 0x27e   : > { %9511 = vmatmul.mubr.f32.gmra.mxu1 %v13237_v3  ;;  %9621 = vmatmul.mubr.f32.gmra.mxu0 %v12768_v54 }
 0x27f   : > { %9513 = vmatprep.mubr.msk.f32.mxu1 %vm10952_vm2, %v15439_v12  ;;  %9623 = vmatprep.mubr.msk.f32.mxu0 %vm10952_vm2, %v15439_v12 }
 0x280   : > { %9691 = vmatprep.subr.mxu1 %v15439_v12  ;;  %9798 = vmatprep.subr.mxu0 %v15439_v12 }
 0x281   : > { %9692 = vmatpush3.msra.mxu1 %v4006_v60  ;;  %9799 = vmatpush3.msra.mxu0 %v4245_v4  ;;  %v13273_v60 = vsel %vm945_vm1, %v3484_v35, %v3486_v29  ;;  %v3488_v4 = vrot.slane %v12835_v20, 2 }
 0x282   : > { %9514 = vmatmul.mubr.f32.gmra.mxu1 %v13249_v0  ;;  %9624 = vmatmul.mubr.f32.gmra.mxu0 %v12819_v34  ;;  %15538 = vst [vmem:[#allocation42_spill] sm:$0xff] %v13273_v60  ;;  %v4486_v34 = vld [vmem:[#allocation2 + $0x378] sm:$0xff] }
 0x283   : > { %9516 = vmatprep.mubr.msk.f32.mxu1 %vm10952_vm2, %v15439_v12  ;;  %9626 = vmatprep.mubr.msk.f32.mxu0 %vm10952_vm2, %v15439_v12  ;;  %v13285_v35 = vsel %vm945_vm1, %v3486_v29, %v3488_v4 }
 0x284   : > { %9693 = vmatprep.subr.mxu1 %v15439_v12  ;;  %9800 = vmatprep.subr.mxu0 %v15439_v12  ;;  %15539 = vst [vmem:[#allocation13_spill] sm:$0xff] %v13285_v35 }
 0x285   : > { %9694 = vmatpush3.msra.mxu1 %v4005_v15  ;;  %9801 = vmatpush3.msra.mxu0 %v4244_v40  ;;  %v4242_v15 = vld [vmem:[#allocation2 + $0x2c0] sm:$0xff]  ;;  %v4002_v40 = vld [vmem:[#allocation2 + $0x238] sm:$0xff] }
 0x286   : > { %9517 = vmatmul.mubr.f32.gmra.mxu1 %v13261_v53  ;;  %9627 = vmatmul.mubr.f32.gmra.mxu0 %v12835_v20 }
 0x287   : > { %9519 = vmatprep.mubr.msk.f32.mxu1 %vm10952_vm2, %v15439_v12  ;;  %9629 = vmatprep.mubr.msk.f32.mxu0 %vm10952_vm2, %v15439_v12 }
 0x288   : > { %9695 = vmatprep.subr.mxu1 %v15439_v12  ;;  %9802 = vmatprep.subr.mxu0 %v15439_v12 }
 0x289   : > { %9696 = vmatpush3.msra.mxu1 %v4004_v38  ;;  %9803 = vmatpush3.msra.mxu0 %v4243_v39  ;;  %v4241_v38 = vld [vmem:[#allocation2 + $0x2b8] sm:$0xff]  ;;  %v3490_v39 = vrot.slane %v12879_v8, 2 }
 0x28a   : > { %9520 = vmatmul.mubr.f32.gmra.mxu1 %v13273_v60  ;;  %9630 = vmatmul.mubr.f32.gmra.mxu0 %v12879_v8  ;;  %v15273_v8 = vrot.slane %v13177_v6, 2 }
 0x28b   : > { %9522 = vmatprep.mubr.msk.f32.mxu1 %vm10952_vm2, %v15439_v12  ;;  %9632 = vmatprep.mubr.msk.f32.mxu0 %vm10952_vm2, %v15439_v12  ;;  %v13297_v29 = vsel %vm945_vm1, %v3488_v4, %v3490_v39 }
 0x28c   : > { %9697 = vmatprep.subr.mxu1 %v15439_v12  ;;  %9804 = vmatprep.subr.mxu0 %v15439_v12  ;;  %15540 = vst [vmem:[#allocation15_spill] sm:$0xff] %v13297_v29 }
 0x28d   : > { %9698 = vmatpush3.msra.mxu1 %v4003_v45  ;;  %9805 = vmatpush3.msra.mxu0 %v4242_v15  ;;  %v3492_v45 = vrot.slane %v12894_v30, 2  ;;  %v4001_v15 = vld [vmem:[#allocation2 + $0x230] sm:$0xff] }
 0x28e   : > { %9523 = vmatmul.mubr.f32.gmra.mxu1 %v13285_v35  ;;  %9633 = vmatmul.mubr.f32.gmra.mxu0 %v12894_v30 }
 0x28f   : > { %9525 = vmatprep.mubr.msk.f32.mxu1 %vm10952_vm2, %v15439_v12  ;;  %9635 = vmatprep.mubr.msk.f32.mxu0 %vm10952_vm2, %v15439_v12  ;;  %v13309_v4 = vsel %vm945_vm1, %v3490_v39, %v3492_v45  ;;  %v3496_v39 = vrot.slane %v12953_v48, 2 }
 0x290   : > { %9699 = vmatprep.subr.mxu1 %v15439_v12  ;;  %9806 = vmatprep.subr.mxu0 %v15439_v12  ;;  %15541 = vst [vmem:[#allocation30_spill] sm:$0xff] %v13309_v4 }
 0x291   : > { %9700 = vmatpush3.msra.mxu1 %v4002_v40  ;;  %9807 = vmatpush3.msra.mxu0 %v4241_v38  ;;  %v4000_v40 = vld [vmem:[#allocation2 + $0x228] sm:$0xff] }
 0x292   : > { %9526 = vmatmul.mubr.f32.gmra.mxu1 %v13297_v29  ;;  %9636 = vmatmul.mubr.f32.gmra.mxu0 %v12938_v57  ;;  %v4239_v38 = vld [vmem:[#allocation2 + $0x2a8] sm:$0xff] }
 0x293   : > { %9528 = vmatprep.mubr.msk.f32.mxu1 %vm10952_vm2, %v15439_v12  ;;  %9638 = vmatprep.mubr.msk.f32.mxu0 %vm10952_vm2, %v15439_v12 }
 0x294   : > { %9701 = vmatprep.subr.mxu1 %v15439_v12  ;;  %9808 = vmatprep.subr.mxu0 %v15439_v12 }
 0x295   : > { %9702 = vmatpush3.msra.mxu1 %v4001_v15  ;;  %9809 = vmatpush3.msra.mxu0 %v4240_v21  ;;  %v13321_v21 = vsel %vm945_vm1, %v3492_v45, %v3494_v14  ;;  %v3999_v15 = vld [vmem:[#allocation2 + $0x220] sm:$0xff]  ;;  %v13333_v45 = vsel %vm945_vm1, %v3494_v14, %v3496_v39 }
 0x296   : > { %9529 = vmatmul.mubr.f32.gmra.mxu1 %v13309_v4  ;;  %9639 = vmatmul.mubr.f32.gmra.mxu0 %v12953_v48  ;;  %15542 = vst [vmem:[#allocation32_spill] sm:$0xff] %v13321_v21  ;;  %15543 = vst [vmem:[#allocation69_spill] sm:$0xff] %v13333_v45  ;;  %v3498_v48 = vrot.slane %v12996_v52, 2 }
 0x297   : > { %9531 = vmatprep.mubr.msk.f32.mxu1 %vm10952_vm2, %v15439_v12  ;;  %9641 = vmatprep.mubr.msk.f32.mxu0 %vm10952_vm2, %v15439_v12 }
 0x298   : > { %9703 = vmatprep.subr.mxu1 %v15439_v12  ;;  %9810 = vmatprep.subr.mxu0 %v15439_v12  ;;  %v13345_v14 = vsel %vm945_vm1, %v3496_v39, %v3498_v48 }
 0x299   : > { %9704 = vmatpush3.msra.mxu1 %v4000_v40  ;;  %9811 = vmatpush3.msra.mxu0 %v4239_v38  ;;  %v3998_v40 = vld [vmem:[#allocation2 + $0x218] sm:$0xff]  ;;  %15544 = vst [vmem:[#allocation34_spill] sm:$0xff] %v13345_v14 }
 0x29a   : > { %9532 = vmatmul.mubr.f32.gmra.mxu1 %v13321_v21  ;;  %9642 = vmatmul.mubr.f32.gmra.mxu0 %v12996_v52  ;;  %v4237_v38 = vld [vmem:[#allocation2 + $0x298] sm:$0xff]  ;;  %v4236_v52 = vld [vmem:[#allocation2 + $0x290] sm:$0xff] }
 0x29b   : > { %9534 = vmatprep.mubr.msk.f32.mxu1 %vm10952_vm2, %v15439_v12  ;;  %9644 = vmatprep.mubr.msk.f32.mxu0 %vm10952_vm2, %v15439_v12 }
 0x29c   : > { %9705 = vmatprep.subr.mxu1 %v15439_v12  ;;  %9812 = vmatprep.subr.mxu0 %v15439_v12 }
 0x29d   : > { %9706 = vmatpush3.msra.mxu1 %v3999_v15  ;;  %9813 = vmatpush3.msra.mxu0 %v4238_v2  ;;  %v3500_v2 = vrot.slane %v13008_v51, 2  ;;  %v3997_v15 = vld [vmem:[#allocation2 + $0x210] sm:$0xff] }
 0x29e   : > { %9535 = vmatmul.mubr.f32.gmra.mxu1 %v13333_v45  ;;  %9645 = vmatmul.mubr.f32.gmra.mxu0 %v13008_v51  ;;  %v3502_v51 = vrot.slane %v13038_v25, 2 }
 0x29f   : > { %9537 = vmatprep.mubr.msk.f32.mxu1 %vm10952_vm2, %v15439_v12  ;;  %9647 = vmatprep.mubr.msk.f32.mxu0 %vm10952_vm2, %v15439_v12  ;;  %v13357_v39 = vsel %vm945_vm1, %v3498_v48, %v3500_v2 }
 0x2a0   : > { %9707 = vmatprep.subr.mxu1 %v15439_v12  ;;  %9814 = vmatprep.subr.mxu0 %v15439_v12  ;;  %15545 = vst [vmem:[#allocation36_spill] sm:$0xff] %v13357_v39  ;;  %v13369_v48 = vsel %vm945_vm1, %v3500_v2, %v3502_v51 }
 0x2a1   : > { %9708 = vmatpush3.msra.mxu1 %v3998_v40  ;;  %9815 = vmatpush3.msra.mxu0 %v4237_v38  ;;  %v3996_v40 = vld [vmem:[#allocation2 + $0x208] sm:$0xff]  ;;  %15546 = vst [vmem:[#allocation43_spill] sm:$0xff] %v13369_v48 }
 0x2a2   : > { %9538 = vmatmul.mubr.f32.gmra.mxu1 %v13345_v14  ;;  %9648 = vmatmul.mubr.f32.gmra.mxu0 %v13038_v25  ;;  %v4235_v38 = vld [vmem:[#allocation2 + $0x288] sm:$0xff]  ;;  %v4234_v25 = vld [vmem:[#allocation2 + $0x280] sm:$0xff] }
 0x2a3   : > { %9540 = vmatprep.mubr.msk.f32.mxu1 %vm10952_vm2, %v15439_v12  ;;  %9650 = vmatprep.mubr.msk.f32.mxu0 %vm10952_vm2, %v15439_v12 }
 0x2a4   : > { %9709 = vmatprep.subr.mxu1 %v15439_v12  ;;  %9816 = vmatprep.subr.mxu0 %v15439_v12 }
 0x2a5   : > { %9710 = vmatpush3.msra.mxu1 %v3997_v15  ;;  %9817 = vmatpush3.msra.mxu0 %v4236_v52  ;;  %v3504_v52 = vrot.slane %v13049_v33, 2  ;;  %v3995_v15 = vld [vmem:[#allocation2 + $0x200] sm:$0xff] }
 0x2a6   : > { %9541 = vmatmul.mubr.f32.gmra.mxu1 %v13357_v39  ;;  %9651 = vmatmul.mubr.f32.gmra.mxu0 %v13049_v33 }
 0x2a7   : > { %9543 = vmatprep.mubr.msk.f32.mxu1 %vm10952_vm2, %v15439_v12  ;;  %9653 = vmatprep.mubr.msk.f32.mxu0 %vm10952_vm2, %v15439_v12  ;;  %v13381_v2 = vsel %vm945_vm1, %v3502_v51, %v3504_v52 }
 0x2a8   : > { %9711 = vmatprep.subr.mxu1 %v15439_v12  ;;  %9818 = vmatprep.subr.mxu0 %v15439_v12  ;;  %15547 = vst [vmem:[#allocation65_spill] sm:$0xff] %v13381_v2 }
 0x2a9   : > { %9712 = vmatpush3.msra.mxu1 %v3996_v40  ;;  %9819 = vmatpush3.msra.mxu0 %v4235_v38  ;;  %v3506_v40 = vrot.slane %v13070_v42, 2 }
 0x2aa   : > { %9544 = vmatmul.mubr.f32.gmra.mxu1 %v13369_v48  ;;  %9654 = vmatmul.mubr.f32.gmra.mxu0 %v13070_v42 }
 0x2ab   : > { %9546 = vmatprep.mubr.msk.f32.mxu1 %vm10952_vm2, %v15439_v12  ;;  %9656 = vmatprep.mubr.msk.f32.mxu0 %vm10952_vm2, %v15439_v12  ;;  %v13393_v51 = vsel %vm945_vm1, %v3504_v52, %v3506_v40  ;;  %v3510_v52 = vrot.slane %v13099_v61, 2 }
 0x2ac   : > { %9713 = vmatprep.subr.mxu1 %v15439_v12  ;;  %9820 = vmatprep.subr.mxu0 %v15439_v12  ;;  %15548 = vst [vmem:[#allocation67_spill] sm:$0xff] %v13393_v51 }
 0x2ad   : > { %9714 = vmatpush3.msra.mxu1 %v3995_v15  ;;  %9821 = vmatpush3.msra.mxu0 %v4234_v25  ;;  %v3508_v25 = vrot.slane %v13079_v36, 2 }
 0x2ae   : > { %9547 = vmatmul.mubr.f32.gmra.mxu1 %v13381_v2  ;;  %9657 = vmatmul.mubr.f32.gmra.mxu0 %v13079_v36  ;;  %v3512_v36 = vrot.slane %v13106_v43, 2 }
 0x2af   : > { %9549 = vmatprep.mubr.msk.f32.mxu1 %vm10952_vm2, %v15439_v12  ;;  %9659 = vmatprep.mubr.msk.f32.mxu0 %vm10952_vm2, %v15439_v12  ;;  %v13403_v38 = vsel %vm945_vm1, %v3506_v40, %v3508_v25  ;;  %v13413_v15 = vsel %vm945_vm1, %v3508_v25, %v3510_v52  ;;  %v3514_v25 = vrot.slane %v13125_v31, 2 }
 0x2b0   : > { %9897 = vmatprep.subr.mxu1 %v15439_v12  ;;  %10004 = vmatprep.subr.mxu0 %v15439_v12  ;;  %15549 = vst [vmem:[#allocation28_spill] sm:$0xff] %v13403_v38  ;;  %15550 = vst [vmem:[#allocation14_spill] sm:$0xff] %v13413_v15  ;;  %v13423_v40 = vsel %vm945_vm1, %v3510_v52, %v3512_v36 }
 0x2b1   : > { %15551 = vst [vmem:[#allocation29_spill] sm:$0xff] %v13423_v40 }
 0x2b2   : > { %9550 = vmatmul.mubr.f32.gmra.mxu1 %v13393_v51  ;;  %9660 = vmatmul.mubr.f32.gmra.mxu0 %v13099_v61  ;;  %v3516_v61 = vrot.slane %v13132_v62, 2 }
 0x2b3   : > { %9552 = vmatprep.mubr.msk.f32.mxu1 %vm10952_vm2, %v15439_v12  ;;  %9662 = vmatprep.mubr.msk.f32.mxu0 %vm10952_vm2, %v15439_v12 }
 0x2b4   : > { %v13443_v52 = vsel %vm945_vm1, %v3514_v25, %v3516_v61 }
 0x2b5   : > { %15553 = vst [vmem:[#allocation33_spill] sm:$0xff] %v13443_v52 }
 0x2b6   : > { %9553 = vmatmul.mubr.f32.gmra.mxu1 %v13403_v38  ;;  %9663 = vmatmul.mubr.f32.gmra.mxu0 %v13106_v43  ;;  %v13433_v43 = vsel %vm945_vm1, %v3512_v36, %v3514_v25  ;;  %v3518_v36 = vrot.slane %v13151_v55, 2 }
 0x2b7   : > { %9555 = vmatprep.mubr.msk.f32.mxu1 %vm10952_vm2, %v15439_v12  ;;  %9665 = vmatprep.mubr.msk.f32.mxu0 %vm10952_vm2, %v15439_v12  ;;  %15552 = vst [vmem:[#allocation31_spill] sm:$0xff] %v13433_v43 }
 0x2ba   : > { %9556 = vmatmul.mubr.f32.gmra.mxu1 %v13413_v15  ;;  %9666 = vmatmul.mubr.f32.gmra.mxu0 %v13125_v31  ;;  %v3520_v31 = vrot.slane %v13158_v24, 2 }
 0x2bb   : > { %9558 = vmatprep.mubr.msk.f32.mxu1 %vm10952_vm2, %v15439_v12  ;;  %9668 = vmatprep.mubr.msk.f32.mxu0 %vm10952_vm2, %v15439_v12 }
 0x2be   : > { %9559 = vmatmul.mubr.f32.gmra.mxu1 %v13423_v40  ;;  %9669 = vmatmul.mubr.f32.gmra.mxu0 %v13132_v62  ;;  %v13453_v62 = vsel %vm945_vm1, %v3516_v61, %v3518_v36  ;;  %v13466_v61 = vsel %vm945_vm1, %v3518_v36, %v3520_v31 }
 0x2bf   : > { %9561 = vmatprep.mubr.msk.f32.mxu1 %vm10952_vm2, %v15439_v12  ;;  %9671 = vmatprep.mubr.msk.f32.mxu0 %vm10952_vm2, %v15439_v12  ;;  %15554 = vst [vmem:[#allocation35_spill] sm:$0xff] %v13453_v62  ;;  %15556 = vst [vmem:[#allocation44_spill] sm:$0xff] %v13466_v61 }
 0x2c2   : > { %9562 = vmatmul.mubr.f32.gmra.mxu1 %v13433_v43  ;;  %9672 = vmatmul.mubr.f32.gmra.mxu0 %v13151_v55  ;;  %v13463_v55 = vmax.f32 %v13015_v49, 0.0 }
 0x2c3   : > { %9564 = vmatprep.mubr.msk.f32.mxu1 %vm10952_vm2, %v15439_v12  ;;  %9674 = vmatprep.mubr.msk.f32.mxu0 %vm10952_vm2, %v15439_v12 }
 0x2c4   : > { %15555 = vst [vmem:[#allocation37_spill] sm:$0xff] %v13463_v55 }
 0x2c6   : > { %9565 = vmatmul.mubr.f32.gmra.mxu1 %v13443_v52  ;;  %9675 = vmatmul.mubr.f32.gmra.mxu0 %v13158_v24 }
 0x2c7   : > { %9567 = vmatprep.mubr.msk.f32.mxu1 %vm10952_vm2, %v15439_v12  ;;  %9677 = vmatprep.mubr.msk.f32.mxu0 %vm10952_vm2, %v15439_v12 }
 0x2ca   : > { %9568 = vmatmul.mubr.f32.gmra.mxu1 %v13453_v62  ;;  %v3333_v25 = vpop.f32.mrf.mxu0  ;;  %9678 = vmatmul.mubr.f32.gmra.mxu0 %v13177_v6 }
 0x2cb   : > { %9570 = vmatprep.mubr.msk.f32.mxu1 %vm10952_vm2, %v15439_v12  ;;  %9680 = vmatprep.mubr.msk.f32.mxu0 %vm10952_vm2, %v15439_v12 }
 0x2cc   : > { %v9396_v42 = vpop.f32.mrf.mxu0 }
 0x2cd   : > { %v3143_v33 = vpop.f32.mrf.mxu1  ;;  %v4717_v42 = vld [vmem:[#allocation2 + $0x3f8] sm:$0xff] }
 0x2ce   : > { %v13468_v24 = vadd.f32 %v3333_v25, %v3143_v33  ;;  %9571 = vmatmul.mubr.f32.gmra.mxu1 %v13466_v61  ;;  %v3338_v57 = vpop.f32.mrf.mxu0  ;;  %9681 = vmatmul.mubr.f32.gmra.mxu0 %v13463_v55  ;;  %v13480_v33 = vsel %vm945_vm1, %v3520_v31, %v15273_v8 }
 0x2cf   : > { %v9289_v30 = vpop.f32.mrf.mxu1  ;;  %9573 = vmatprep.mubr.msk.f32.mxu1 %vm10952_vm2, %v15439_v12  ;;  %9822 = vmatprep.mubr.msk.f32.mxu0 %vm10952_vm2, %v15439_v12  ;;  %15557 = vst [vmem:[#allocation38_spill] sm:$0xff] %v13480_v33 }
 0x2d0   : > { %v9399_v49 = vpop.f32.mrf.mxu0 }
 0x2d2   : > { %v3148_v36 = vpop.f32.mrf.mxu1  ;;  %9574 = vmatmul.mubr.f32.gmra.mxu1 %v13480_v33  ;;  %v3343_v25 = vpop.f32.mrf.mxu0  ;;  %9823 = vmatmul.mubr.f32.vlgmr.msra.gmra.mxu0 %v13225_v26  ;;  %v4716_v26 = vld [vmem:[#allocation2 + $0x3f0] sm:$0xff] }
 0x2d3   : > { %v13484_v30 = vadd.f32 %v3338_v57, %v3148_v36  ;;  %9715 = vmatprep.mubr.msk.f32.mxu1 %vm10952_vm2, %v15439_v12  ;;  %9825 = vmatprep.mubr.msk.f32.mxu0 %vm10952_vm2, %v15439_v12  ;;  %v4485_v57 = vld [vmem:[#allocation2 + $0x370] sm:$0xff] }
 0x2d4   : > { %v9292_v49 = vpop.f32.mrf.mxu1  ;;  %v9402_v20 = vpop.f32.mrf.mxu0  ;;  %10005 = vmatpush3.msra.mxu0 %v4717_v42  ;;  %v4484_v42 = vld [vmem:[#allocation2 + $0x368] sm:$0xff] }
 0x2d5   : > { %10006 = vmatprep.subr.mxu0 %v15439_v12 }
 0x2d6   : > { %v3153_v31 = vpop.f32.mrf.mxu1  ;;  %9716 = vmatmul.mubr.f32.vlgmr.msra.gmra.mxu1 %v12741_v9  ;;  %v3348_v8 = vpop.f32.mrf.mxu0  ;;  %9826 = vmatmul.mubr.f32.gmra.mxu0 %v13237_v3 }
 0x2d7   : > { %v13493_v36 = vadd.f32 %v3343_v25, %v3153_v31  ;;  %9898 = vmatpush3.msra.mxu1 %v4486_v34  ;;  %9718 = vmatprep.mubr.msk.f32.mxu1 %vm10952_vm2, %v15439_v12  ;;  %v4715_v34 = vld [vmem:[#allocation2 + $0x3e8] sm:$0xff] }
 0x2d8   : > { %v9295_v49 = vpop.f32.mrf.mxu1  ;;  %v9405_v20 = vpop.f32.mrf.mxu0  ;;  %9828 = vmatprep.mubr.msk.f32.mxu0 %vm10952_vm2, %v15439_v12  ;;  %9899 = vmatprep.subr.mxu1 %v15439_v12 }
 0x2d9   : > { %9900 = vmatpush3.msra.mxu1 %v4485_v57  ;;  %10007 = vmatpush3.msra.mxu0 %v4716_v26  ;;  %v4714_v26 = vld [vmem:[#allocation2 + $0x3e0] sm:$0xff] }
 0x2da   : > { %v3158_v9 = vpop.f32.mrf.mxu1  ;;  %9719 = vmatmul.mubr.f32.gmra.mxu1 %v12773_v46  ;;  %v3353_v3 = vpop.f32.mrf.mxu0  ;;  %9829 = vmatmul.mubr.f32.gmra.mxu0 %v13249_v0 }
 0x2db   : > { %v13502_v25 = vadd.f32 %v3348_v8, %v3158_v9  ;;  %9721 = vmatprep.mubr.msk.f32.mxu1 %vm10952_vm2, %v15439_v12  ;;  %9831 = vmatprep.mubr.msk.f32.mxu0 %vm10952_vm2, %v15439_v12  ;;  %v4483_v8 = vld [vmem:[#allocation2 + $0x360] sm:$0xff] }
 0x2dc   : > { %v9298_v31 = vpop.f32.mrf.mxu1  ;;  %v9408_v49 = vpop.f32.mrf.mxu0  ;;  %9901 = vmatprep.subr.mxu1 %v15439_v12  ;;  %10008 = vmatprep.subr.mxu0 %v15439_v12 }
 0x2dd   : > { %9902 = vmatpush3.msra.mxu1 %v4484_v42  ;;  %10009 = vmatpush3.msra.mxu0 %v4715_v34  ;;  %v4713_v49 = vld [vmem:[#allocation2 + $0x3d8] sm:$0xff] }
 0x2de   : > { %v3163_v46 = vpop.f32.mrf.mxu1  ;;  %9722 = vmatmul.mubr.f32.gmra.mxu1 %v12803_v41  ;;  %v3358_v57 = vpop.f32.mrf.mxu0  ;;  %9832 = vmatmul.mubr.f32.gmra.mxu0 %v13261_v53 }
 0x2df   : > { %v13512_v20 = vadd.f32 %v3353_v3, %v3163_v46  ;;  %9724 = vmatprep.mubr.msk.f32.mxu1 %vm10952_vm2, %v15439_v12  ;;  %9834 = vmatprep.mubr.msk.f32.mxu0 %vm10952_vm2, %v15439_v12  ;;  %v4482_v3 = vld [vmem:[#allocation2 + $0x358] sm:$0xff] }
 0x2e0   : > { %v9301_v9 = vpop.f32.mrf.mxu1  ;;  %v9411_v31 = vpop.f32.mrf.mxu0  ;;  %9903 = vmatprep.subr.mxu1 %v15439_v12  ;;  %10010 = vmatprep.subr.mxu0 %v15439_v12 }
 0x2e1   : > { %9904 = vmatpush3.msra.mxu1 %v4483_v8  ;;  %10011 = vmatpush3.msra.mxu0 %v4714_v26 }
 0x2e2   : > { %v3168_v42 = vpop.f32.mrf.mxu1  ;;  %9725 = vmatmul.mubr.f32.gmra.mxu1 %v12838_v58  ;;  %v3363_v34 = vpop.f32.mrf.mxu0  ;;  %9835 = vmatmul.mubr.f32.gmra.mxu0 %v13273_v60 }
 0x2e3   : > { %v13522_v46 = vadd.f32 %v3358_v57, %v3168_v42  ;;  %9727 = vmatprep.mubr.msk.f32.mxu1 %vm10952_vm2, %v15439_v12  ;;  %9837 = vmatprep.mubr.msk.f32.mxu0 %vm10952_vm2, %v15439_v12  ;;  %v4481_v57 = vld [vmem:[#allocation2 + $0x350] sm:$0xff] }
 0x2e4   : > { %v9304_v9 = vpop.f32.mrf.mxu1  ;;  %v9414_v31 = vpop.f32.mrf.mxu0  ;;  %9905 = vmatprep.subr.mxu1 %v15439_v12  ;;  %10012 = vmatprep.subr.mxu0 %v15439_v12  ;;  %v4712_v42 = vld [vmem:[#allocation2 + $0x3d0] sm:$0xff] }
 0x2e5   : > { %9906 = vmatpush3.msra.mxu1 %v4482_v3  ;;  %10013 = vmatpush3.msra.mxu0 %v4713_v49 }
 0x2e6   : > { %v3173_v8 = vpop.f32.mrf.mxu1  ;;  %9728 = vmatmul.mubr.f32.gmra.mxu1 %v12868_v27  ;;  %v3368_v26 = vpop.f32.mrf.mxu0  ;;  %9838 = vmatmul.mubr.f32.gmra.mxu0 %v13285_v35 }
 0x2e7   : > { %v13532_v60 = vadd.f32 %v3363_v34, %v3173_v8  ;;  %9730 = vmatprep.mubr.msk.f32.mxu1 %vm10952_vm2, %v15439_v12  ;;  %9840 = vmatprep.mubr.msk.f32.mxu0 %vm10952_vm2, %v15439_v12  ;;  %v4480_v34 = vld [vmem:[#allocation2 + $0x348] sm:$0xff] }
 0x2e8   : > { %v9307_v9 = vpop.f32.mrf.mxu1  ;;  %v9417_v31 = vpop.f32.mrf.mxu0  ;;  %9907 = vmatprep.subr.mxu1 %v15439_v12  ;;  %10014 = vmatprep.subr.mxu0 %v15439_v12  ;;  %v4711_v8 = vld [vmem:[#allocation2 + $0x3c8] sm:$0xff] }
 0x2e9   : > { %9908 = vmatpush3.msra.mxu1 %v4481_v57  ;;  %10015 = vmatpush3.msra.mxu0 %v4712_v42 }
 0x2ea   : > { %v3178_v3 = vpop.f32.mrf.mxu1  ;;  %9731 = vmatmul.mubr.f32.gmra.mxu1 %v12898_v23  ;;  %v3373_v49 = vpop.f32.mrf.mxu0  ;;  %9841 = vmatmul.mubr.f32.gmra.mxu0 %v13297_v29 }
 0x2eb   : > { %v13542_v35 = vadd.f32 %v3368_v26, %v3178_v3  ;;  %9733 = vmatprep.mubr.msk.f32.mxu1 %vm10952_vm2, %v15439_v12  ;;  %9843 = vmatprep.mubr.msk.f32.mxu0 %vm10952_vm2, %v15439_v12  ;;  %v4479_v26 = vld [vmem:[#allocation2 + $0x340] sm:$0xff] }
 0x2ec   : > { %v9310_v9 = vpop.f32.mrf.mxu1  ;;  %v9420_v31 = vpop.f32.mrf.mxu0  ;;  %9909 = vmatprep.subr.mxu1 %v15439_v12  ;;  %10016 = vmatprep.subr.mxu0 %v15439_v12  ;;  %v4710_v3 = vld [vmem:[#allocation2 + $0x3c0] sm:$0xff] }
 0x2ed   : > { %9910 = vmatpush3.msra.mxu1 %v4480_v34  ;;  %10017 = vmatpush3.msra.mxu0 %v4711_v8 }
 0x2ee   : > { %v3183_v57 = vpop.f32.mrf.mxu1  ;;  %9734 = vmatmul.mubr.f32.gmra.mxu1 %v12926_v47  ;;  %v3378_v42 = vpop.f32.mrf.mxu0  ;;  %9844 = vmatmul.mubr.f32.gmra.mxu0 %v13309_v4 }
 0x2ef   : > { %v13552_v29 = vadd.f32 %v3373_v49, %v3183_v57  ;;  %9736 = vmatprep.mubr.msk.f32.mxu1 %vm10952_vm2, %v15439_v12  ;;  %9846 = vmatprep.mubr.msk.f32.mxu0 %vm10952_vm2, %v15439_v12  ;;  %v4478_v49 = vld [vmem:[#allocation2 + $0x338] sm:$0xff] }
 0x2f0   : > { %v9313_v9 = vpop.f32.mrf.mxu1  ;;  %v9423_v31 = vpop.f32.mrf.mxu0  ;;  %9911 = vmatprep.subr.mxu1 %v15439_v12  ;;  %10018 = vmatprep.subr.mxu0 %v15439_v12  ;;  %v4709_v57 = vld [vmem:[#allocation2 + $0x3b8] sm:$0xff] }
 0x2f1   : > { %9912 = vmatpush3.msra.mxu1 %v4479_v26  ;;  %10019 = vmatpush3.msra.mxu0 %v4710_v3 }
 0x2f2   : > { %v3188_v34 = vpop.f32.mrf.mxu1  ;;  %9737 = vmatmul.mubr.f32.gmra.mxu1 %v12957_v19  ;;  %v3383_v8 = vpop.f32.mrf.mxu0  ;;  %9847 = vmatmul.mubr.f32.gmra.mxu0 %v13321_v21 }
 0x2f3   : > { %v13562_v4 = vadd.f32 %v3378_v42, %v3188_v34  ;;  %9739 = vmatprep.mubr.msk.f32.mxu1 %vm10952_vm2, %v15439_v12  ;;  %9849 = vmatprep.mubr.msk.f32.mxu0 %vm10952_vm2, %v15439_v12  ;;  %v4477_v42 = vld [vmem:[#allocation2 + $0x330] sm:$0xff] }
 0x2f4   : > { %v9316_v9 = vpop.f32.mrf.mxu1  ;;  %v9426_v31 = vpop.f32.mrf.mxu0  ;;  %9913 = vmatprep.subr.mxu1 %v15439_v12  ;;  %10020 = vmatprep.subr.mxu0 %v15439_v12  ;;  %v4708_v34 = vld [vmem:[#allocation2 + $0x3b0] sm:$0xff] }
 0x2f5   : > { %9914 = vmatpush3.msra.mxu1 %v4478_v49  ;;  %10021 = vmatpush3.msra.mxu0 %v4709_v57 }
 0x2f6   : > { %v3193_v26 = vpop.f32.mrf.mxu1  ;;  %9740 = vmatmul.mubr.f32.gmra.mxu1 %v12984_v56  ;;  %v3388_v3 = vpop.f32.mrf.mxu0  ;;  %9850 = vmatmul.mubr.f32.gmra.mxu0 %v13333_v45 }
 0x2f7   : > { %v13572_v21 = vadd.f32 %v3383_v8, %v3193_v26  ;;  %9742 = vmatprep.mubr.msk.f32.mxu1 %vm10952_vm2, %v15439_v12  ;;  %9852 = vmatprep.mubr.msk.f32.mxu0 %vm10952_vm2, %v15439_v12  ;;  %v4476_v8 = vld [vmem:[#allocation2 + $0x328] sm:$0xff] }
 0x2f8   : > { %v9319_v9 = vpop.f32.mrf.mxu1  ;;  %v9429_v31 = vpop.f32.mrf.mxu0  ;;  %9915 = vmatprep.subr.mxu1 %v15439_v12  ;;  %10022 = vmatprep.subr.mxu0 %v15439_v12  ;;  %v4707_v26 = vld [vmem:[#allocation2 + $0x3a8] sm:$0xff] }
 0x2f9   : > { %9916 = vmatpush3.msra.mxu1 %v4477_v42  ;;  %10023 = vmatpush3.msra.mxu0 %v4708_v34 }
 0x2fa   : > { %v3198_v49 = vpop.f32.mrf.mxu1  ;;  %9743 = vmatmul.mubr.f32.gmra.mxu1 %v13012_v22  ;;  %v3393_v57 = vpop.f32.mrf.mxu0  ;;  %9853 = vmatmul.mubr.f32.gmra.mxu0 %v13345_v14 }
 0x2fb   : > { %v13582_v45 = vadd.f32 %v3388_v3, %v3198_v49  ;;  %9745 = vmatprep.mubr.msk.f32.mxu1 %vm10952_vm2, %v15439_v12  ;;  %9855 = vmatprep.mubr.msk.f32.mxu0 %vm10952_vm2, %v15439_v12  ;;  %v4475_v3 = vld [vmem:[#allocation2 + $0x320] sm:$0xff] }
 0x2fc   : > { %v9322_v9 = vpop.f32.mrf.mxu1  ;;  %v9432_v31 = vpop.f32.mrf.mxu0  ;;  %9917 = vmatprep.subr.mxu1 %v15439_v12  ;;  %10024 = vmatprep.subr.mxu0 %v15439_v12  ;;  %v4706_v49 = vld [vmem:[#allocation2 + $0x3a0] sm:$0xff] }
 0x2fd   : > { %9918 = vmatpush3.msra.mxu1 %v4476_v8  ;;  %10025 = vmatpush3.msra.mxu0 %v4707_v26 }
 0x2fe   : > { %v3203_v42 = vpop.f32.mrf.mxu1  ;;  %9746 = vmatmul.mubr.f32.gmra.mxu1 %v13033_v7  ;;  %v3398_v34 = vpop.f32.mrf.mxu0  ;;  %9856 = vmatmul.mubr.f32.gmra.mxu0 %v13357_v39 }
 0x2ff   : > { %v13592_v14 = vadd.f32 %v3393_v57, %v3203_v42  ;;  %9748 = vmatprep.mubr.msk.f32.mxu1 %vm10952_vm2, %v15439_v12  ;;  %9858 = vmatprep.mubr.msk.f32.mxu0 %vm10952_vm2, %v15439_v12  ;;  %v4474_v57 = vld [vmem:[#allocation2 + $0x318] sm:$0xff] }
 0x300   : > { %v9325_v9 = vpop.f32.mrf.mxu1  ;;  %v9435_v31 = vpop.f32.mrf.mxu0  ;;  %9919 = vmatprep.subr.mxu1 %v15439_v12  ;;  %10026 = vmatprep.subr.mxu0 %v15439_v12  ;;  %v4705_v42 = vld [vmem:[#allocation2 + $0x398] sm:$0xff] }
 0x301   : > { %9920 = vmatpush3.msra.mxu1 %v4475_v3  ;;  %10027 = vmatpush3.msra.mxu0 %v4706_v49 }
 0x302   : > { %v3208_v8 = vpop.f32.mrf.mxu1  ;;  %9749 = vmatmul.mubr.f32.gmra.mxu1 %v13052_v32  ;;  %v3403_v26 = vpop.f32.mrf.mxu0  ;;  %9859 = vmatmul.mubr.f32.gmra.mxu0 %v13369_v48 }
 0x303   : > { %v13602_v39 = vadd.f32 %v3398_v34, %v3208_v8  ;;  %9751 = vmatprep.mubr.msk.f32.mxu1 %vm10952_vm2, %v15439_v12  ;;  %9861 = vmatprep.mubr.msk.f32.mxu0 %vm10952_vm2, %v15439_v12  ;;  %v4473_v34 = vld [vmem:[#allocation2 + $0x310] sm:$0xff] }
 0x304   : > { %v9328_v9 = vpop.f32.mrf.mxu1  ;;  %v9438_v31 = vpop.f32.mrf.mxu0  ;;  %9921 = vmatprep.subr.mxu1 %v15439_v12  ;;  %10028 = vmatprep.subr.mxu0 %v15439_v12  ;;  %v4704_v8 = vld [vmem:[#allocation2 + $0x390] sm:$0xff] }
 0x305   : > { %9922 = vmatpush3.msra.mxu1 %v4474_v57  ;;  %10029 = vmatpush3.msra.mxu0 %v4705_v42 }
 0x306   : > { %v3213_v3 = vpop.f32.mrf.mxu1  ;;  %9752 = vmatmul.mubr.f32.gmra.mxu1 %v13064_v63  ;;  %v3408_v49 = vpop.f32.mrf.mxu0  ;;  %9862 = vmatmul.mubr.f32.gmra.mxu0 %v13381_v2 }
 0x307   : > { %v13612_v48 = vadd.f32 %v3403_v26, %v3213_v3  ;;  %9754 = vmatprep.mubr.msk.f32.mxu1 %vm10952_vm2, %v15439_v12  ;;  %9864 = vmatprep.mubr.msk.f32.mxu0 %vm10952_vm2, %v15439_v12  ;;  %v4472_v26 = vld [vmem:[#allocation2 + $0x308] sm:$0xff] }
 0x308   : > { %v9331_v9 = vpop.f32.mrf.mxu1  ;;  %v9441_v31 = vpop.f32.mrf.mxu0  ;;  %9923 = vmatprep.subr.mxu1 %v15439_v12  ;;  %10030 = vmatprep.subr.mxu0 %v15439_v12  ;;  %v4703_v3 = vld [vmem:[#allocation2 + $0x388] sm:$0xff] }
 0x309   : > { %9924 = vmatpush3.msra.mxu1 %v4473_v34  ;;  %10031 = vmatpush3.msra.mxu0 %v4704_v8 }
 0x30a   : > { %v3218_v57 = vpop.f32.mrf.mxu1  ;;  %9755 = vmatmul.mubr.f32.gmra.mxu1 %v13082_v1  ;;  %v3413_v42 = vpop.f32.mrf.mxu0  ;;  %9865 = vmatmul.mubr.f32.gmra.mxu0 %v13393_v51 }
 0x30b   : > { %v13622_v2 = vadd.f32 %v3408_v49, %v3218_v57  ;;  %9757 = vmatprep.mubr.msk.f32.mxu1 %vm10952_vm2, %v15439_v12  ;;  %9867 = vmatprep.mubr.msk.f32.mxu0 %vm10952_vm2, %v15439_v12  ;;  %v4471_v49 = vld [vmem:[#allocation2 + $0x300] sm:$0xff] }
 0x30c   : > { %v9334_v9 = vpop.f32.mrf.mxu1  ;;  %v9444_v31 = vpop.f32.mrf.mxu0  ;;  %9925 = vmatprep.subr.mxu1 %v15439_v12  ;;  %10032 = vmatprep.subr.mxu0 %v15439_v12  ;;  %v4702_v57 = vld [vmem:[#allocation2 + $0x380] sm:$0xff] }
 0x30d   : > { %9926 = vmatpush3.msra.mxu1 %v4472_v26  ;;  %10033 = vmatpush3.msra.mxu0 %v4703_v3 }
 0x30e   : > { %v3223_v34 = vpop.f32.mrf.mxu1  ;;  %9758 = vmatmul.mubr.f32.gmra.mxu1 %v13093_v16  ;;  %v3418_v8 = vpop.f32.mrf.mxu0  ;;  %9868 = vmatmul.mubr.f32.gmra.mxu0 %v13403_v38 }
 0x30f   : > { %v13632_v51 = vadd.f32 %v3413_v42, %v3223_v34  ;;  %9760 = vmatprep.mubr.msk.f32.mxu1 %vm10952_vm2, %v15439_v12  ;;  %9870 = vmatprep.mubr.msk.f32.mxu0 %vm10952_vm2, %v15439_v12 }
 0x310   : > { %v9337_v9 = vpop.f32.mrf.mxu1  ;;  %v9447_v31 = vpop.f32.mrf.mxu0  ;;  %9927 = vmatprep.subr.mxu1 %v15439_v12  ;;  %10034 = vmatprep.subr.mxu0 %v15439_v12 }
 0x311   : > { %9928 = vmatpush3.msra.mxu1 %v4471_v49  ;;  %10035 = vmatpush3.msra.mxu0 %v4702_v57 }
 0x312   : > { %v3228_v26 = vpop.f32.mrf.mxu1  ;;  %9761 = vmatmul.mubr.f32.gmra.mxu1 %v13109_v28  ;;  %v3423_v3 = vpop.f32.mrf.mxu0  ;;  %9871 = vmatmul.mubr.f32.gmra.mxu0 %v13413_v15 }
 0x313   : > { %v13642_v42 = vadd.f32 %v3418_v8, %v3228_v26  ;;  %9763 = vmatprep.mubr.msk.f32.mxu1 %vm10952_vm2, %v15439_v12  ;;  %9873 = vmatprep.mubr.msk.f32.mxu0 %vm10952_vm2, %v15439_v12 }
 0x314   : > { %v9340_v34 = vpop.f32.mrf.mxu1  ;;  %v9450_v9 = vpop.f32.mrf.mxu0  ;;  %10111 = vmatprep.subr.mxu1 %v15439_v12 }
 0x316   : > { %v3233_v49 = vpop.f32.mrf.mxu1  ;;  %9764 = vmatmul.mubr.f32.gmra.mxu1 %v13119_v10  ;;  %v3428_v57 = vpop.f32.mrf.mxu0  ;;  %9874 = vmatmul.mubr.f32.gmra.mxu0 %v13423_v40 }
 0x317   : > { %v13651_v31 = vadd.f32 %v3423_v3, %v3233_v49  ;;  %9766 = vmatprep.mubr.msk.f32.mxu1 %vm10952_vm2, %v15439_v12  ;;  %9876 = vmatprep.mubr.msk.f32.mxu0 %vm10952_vm2, %v15439_v12 }
 0x318   : > { %v9343_v8 = vpop.f32.mrf.mxu1  ;;  %v9453_v26 = vpop.f32.mrf.mxu0 }
 0x31a   : > { %v3238_v34 = vpop.f32.mrf.mxu1  ;;  %9767 = vmatmul.mubr.f32.gmra.mxu1 %v13135_v50  ;;  %v3433_v9 = vpop.f32.mrf.mxu0  ;;  %9877 = vmatmul.mubr.f32.gmra.mxu0 %v13433_v43 }
 0x31b   : > { %v13659_v15 = vadd.f32 %v3428_v57, %v3238_v34  ;;  %9769 = vmatprep.mubr.msk.f32.mxu1 %vm10952_vm2, %v15439_v12  ;;  %9879 = vmatprep.mubr.msk.f32.mxu0 %vm10952_vm2, %v15439_v12 }
 0x31c   : > { %v9346_v3 = vpop.f32.mrf.mxu1  ;;  %v9456_v49 = vpop.f32.mrf.mxu0 }
 0x31e   : > { %v3243_v40 = vpop.f32.mrf.mxu1  ;;  %9770 = vmatmul.mubr.f32.gmra.mxu1 %v13145_v17  ;;  %v3438_v8 = vpop.f32.mrf.mxu0  ;;  %9880 = vmatmul.mubr.f32.gmra.mxu0 %v13443_v52 }
 0x31f   : > { %v13667_v26 = vadd.f32 %v3433_v9, %v3243_v40  ;;  %9772 = vmatprep.mubr.msk.f32.mxu1 %vm10952_vm2, %v15439_v12  ;;  %9882 = vmatprep.mubr.msk.f32.mxu0 %vm10952_vm2, %v15439_v12 }
 0x320   : > { %v9349_v57 = vpop.f32.mrf.mxu1  ;;  %v9459_v34 = vpop.f32.mrf.mxu0 }
 0x322   : > { %v3248_v43 = vpop.f32.mrf.mxu1  ;;  %9773 = vmatmul.mubr.f32.gmra.mxu1 %v13161_v44  ;;  %v3443_v3 = vpop.f32.mrf.mxu0  ;;  %9883 = vmatmul.mubr.f32.gmra.mxu0 %v13453_v62  ;;  %v4250_v62 = vrot.slane %v13463_v55, 2 }
 0x323   : > { %v13675_v49 = vadd.f32 %v3438_v8, %v3248_v43  ;;  %9775 = vmatprep.mubr.msk.f32.mxu1 %vm10952_vm2, %v15439_v12  ;;  %9885 = vmatprep.mubr.msk.f32.mxu0 %vm10952_vm2, %v15439_v12 }
 0x324   : > { %v9352_v40 = vpop.f32.mrf.mxu1  ;;  %v9462_v9 = vpop.f32.mrf.mxu0 }
 0x326   : > { %v3253_v52 = vpop.f32.mrf.mxu1  ;;  %9776 = vmatmul.mubr.f32.gmra.mxu1 %v13171_v37  ;;  %v3448_v57 = vpop.f32.mrf.mxu0  ;;  %9886 = vmatmul.mubr.f32.gmra.mxu0 %v13466_v61  ;;  %v13693_v61 = vmax.f32 %v13004_v13, 0.0 }
 0x327   : > { %v13683_v34 = vadd.f32 %v3443_v3, %v3253_v52  ;;  %9778 = vmatprep.mubr.msk.f32.mxu1 %vm10952_vm2, %v15439_v12  ;;  %9888 = vmatprep.mubr.msk.f32.mxu0 %vm10952_vm2, %v15439_v12 }
 0x328   : > { %v9355_v43 = vpop.f32.mrf.mxu1  ;;  %v9465_v8 = vpop.f32.mrf.mxu0 }
 0x329   : > { %v15558_v8 = vrot.slane %v13177_v6, 2 }
 0x32a   : > { %v3258_v40 = vpop.f32.mrf.mxu1  ;;  %9779 = vmatmul.mubr.f32.gmra.mxu1 %v13184_v5  ;;  %v3453_v9 = vpop.f32.mrf.mxu0  ;;  %9889 = vmatmul.mubr.f32.gmra.mxu0 %v13480_v33  ;;  %v4013_v33 = vrot.slane %v13463_v55, 1 }
 0x32b   : > { %v13695_v52 = vadd.f32 %v3448_v57, %v3258_v40  ;;  %9781 = vmatprep.mubr.msk.f32.mxu1 %vm10952_vm2, %v15439_v12  ;;  %9891 = vmatprep.mubr.msk.f32.mxu0 %vm10952_vm2, %v15439_v12  ;;  %v13704_v38 = vsel %vm945_vm1, %v15558_v8, %v4250_v62  ;;  %v15296_v57 = vrot.slane %v13693_v61, 2  ;;  %v15561_v8 = vrot.slane %v13177_v6, 1 }
 0x32c   : > { %v9358_v3 = vpop.f32.mrf.mxu1  ;;  %v9468_v43 = vpop.f32.mrf.mxu0  ;;  %15559 = vst [vmem:[#allocation45_spill] sm:$0xff] %v13704_v38 }
 0x32d   : > { %v13719_v0 = vsel %vm407_vm0, %v15561_v8, %v4013_v33 }
 0x32e   : > { %v3263_v53 = vpop.f32.mrf.mxu1  ;;  %9782 = vmatmul.mubr.f32.gmra.mxu1 %v13196_v59  ;;  %v3846_v13 = vpop.f32.mrf.mxu0  ;;  %9892 = vmatmul.mubr.f32.gmra.mxu0 %v13704_v38  ;;  %v13724_v38 = vsel %vm945_vm1, %v4250_v62, %v15296_v57 }
 0x32f   : > { %v13710_v40 = vadd.f32 %v3453_v9, %v3263_v53  ;;  %9784 = vmatprep.mubr.msk.f32.mxu1 %vm10952_vm2, %v15439_v12  ;;  %9894 = vmatprep.mubr.msk.f32.mxu0 %vm10952_vm2, %v15439_v12  ;;  %15562 = vst [vmem:[#allocation49_spill] sm:$0xff] %v13724_v38 }
 0x330   : > { %v9361_v3 = vpop.f32.mrf.mxu1  ;;  %v9610_v43 = vpop.f32.mrf.mxu0 }
 0x331   : > { %15560 = vst [vmem:[#allocation47_spill] sm:$0xff] %v13710_v40  ;;  %v15299_v40 = vrot.slane %v13693_v61, 1 }
 0x332   : > { %v3615_v53 = vpop.f32.mrf.mxu1  ;;  %9785 = vmatmul.mubr.f32.gmra.mxu1 %v13719_v0  ;;  %v3851_v9 = vpop.f32.mrf.mxu0  ;;  %9895 = vmatmul.mubr.f32.gmra.mxu0 %v13724_v38 }
 0x333   : > { %v3739_v3 = vadd.f32 %v3615_v53, %v13468_v24  ;;  %9787 = vmatprep.mubr.msk.f32.mxu1 %vm10952_vm2, %v15439_v12  ;;  %10036 = vmatprep.mubr.msk.f32.mxu0 %vm10952_vm2, %v15439_v12  ;;  %v13737_v62 = vsel %vm407_vm0, %v4013_v33, %v15299_v40  ;;  %v4956_v33 = vld [vmem:[#allocation2 + $0x478] sm:$0xff] }
 0x334   : > { %v9503_v43 = vpop.f32.mrf.mxu1  ;;  %v9613_v8 = vpop.f32.mrf.mxu0 }
 0x335   : > { %v13739_v57 = vadd.f32 %v3846_v13, %v3739_v3 }
 0x336   : > { %v3620_v38 = vpop.f32.mrf.mxu1  ;;  %9788 = vmatmul.mubr.f32.gmra.mxu1 %v13737_v62  ;;  %v3856_v55 = vpop.f32.mrf.mxu0  ;;  %10037 = vmatmul.mubr.f32.vlgmr.msra.gmra.mxu0 %v12803_v41  ;;  %v4955_v41 = vld [vmem:[#allocation2 + $0x470] sm:$0xff] }
 0x337   : > { %v3740_v24 = vadd.f32 %v3620_v38, %v13484_v30  ;;  %9929 = vmatprep.mubr.msk.f32.mxu1 %vm10952_vm2, %v15439_v12  ;;  %10039 = vmatprep.mubr.msk.f32.mxu0 %vm10952_vm2, %v15439_v12 }
 0x338   : > { %v9506_v53 = vpop.f32.mrf.mxu1  ;;  %v9616_v43 = vpop.f32.mrf.mxu0 }
 0x339   : > { %v13748_v8 = vadd.f32 %v3851_v9, %v3740_v24 }
 0x33a   : > { %v3625_v13 = vpop.f32.mrf.mxu1  ;;  %9930 = vmatmul.mubr.f32.vlgmr.msra.gmra.mxu1 %v12708_v11  ;;  %v3861_v3 = vpop.f32.mrf.mxu0  ;;  %10040 = vmatmul.mubr.f32.gmra.mxu0 %v12838_v58 }
 0x33b   : > { %v3741_v38 = vadd.f32 %v3625_v13, %v13493_v36  ;;  %10112 = vmatpush3.msra.mxu1 %v4956_v33  ;;  %9932 = vmatprep.mubr.msk.f32.mxu1 %vm10952_vm2, %v15439_v12  ;;  %v4954_v36 = vld [vmem:[#allocation2 + $0x468] sm:$0xff] }
 0x33c   : > { %v9509_v30 = vpop.f32.mrf.mxu1  ;;  %v9619_v40 = vpop.f32.mrf.mxu0  ;;  %10042 = vmatprep.mubr.msk.f32.mxu0 %vm10952_vm2, %v15439_v12  ;;  %10113 = vmatprep.subr.mxu1 %v15439_v12 }
 0x33d   : > { %10114 = vmatpush3.msra.mxu1 %v4955_v41  ;;  %v13758_v9 = vadd.f32 %v3856_v55, %v3741_v38  ;;  %v15563_v41 = vld [vmem:[#allocation8_spill] sm:$0xff] }
 0x33e   : > { %v3630_v11 = vpop.f32.mrf.mxu1  ;;  %9933 = vmatmul.mubr.f32.gmra.mxu1 %v12751_v18  ;;  %v3866_v58 = vpop.f32.mrf.mxu0  ;;  %10043 = vmatmul.mubr.f32.gmra.mxu0 %v12868_v27 }
 0x33f   : > { %v3742_v24 = vadd.f32 %v3630_v11, %v13502_v25  ;;  %9935 = vmatprep.mubr.msk.f32.mxu1 %vm10952_vm2, %v15439_v12  ;;  %10045 = vmatprep.mubr.msk.f32.mxu0 %vm10952_vm2, %v15439_v12  ;;  %v4953_v25 = vld [vmem:[#allocation2 + $0x460] sm:$0xff] }
 0x340   : > { %v9512_v40 = vpop.f32.mrf.mxu1  ;;  %v9622_v53 = vpop.f32.mrf.mxu0  ;;  %10115 = vmatprep.subr.mxu1 %v15439_v12 }
 0x341   : > { %10116 = vmatpush3.msra.mxu1 %v4954_v36  ;;  %v13768_v55 = vadd.f32 %v3861_v3, %v3742_v24  ;;  %v15564_v24 = vld [vmem:[#allocation9_spill] sm:$0xff] }
 0x342   : > { %v3635_v18 = vpop.f32.mrf.mxu1  ;;  %9936 = vmatmul.mubr.f32.gmra.mxu1 %v12768_v54  ;;  %v3871_v27 = vpop.f32.mrf.mxu0  ;;  %10046 = vmatmul.mubr.f32.gmra.mxu0 %v12898_v23 }
 0x343   : > { %v3743_v43 = vadd.f32 %v3635_v18, %v13512_v20  ;;  %9938 = vmatprep.mubr.msk.f32.mxu1 %vm10952_vm2, %v15439_v12  ;;  %10048 = vmatprep.mubr.msk.f32.mxu0 %vm10952_vm2, %v15439_v12  ;;  %v4952_v20 = vld [vmem:[#allocation2 + $0x458] sm:$0xff] }
 0x344   : > { %v9515_v33 = vpop.f32.mrf.mxu1  ;;  %v9625_v13 = vpop.f32.mrf.mxu0  ;;  %10117 = vmatprep.subr.mxu1 %v15439_v12 }
 0x345   : > { %10118 = vmatpush3.msra.mxu1 %v4953_v25  ;;  %v13778_v3 = vadd.f32 %v3866_v58, %v3743_v43  ;;  %v15565_v43 = vld [vmem:[#allocation10_spill] sm:$0xff] }
 0x346   : > { %v3640_v54 = vpop.f32.mrf.mxu1  ;;  %9939 = vmatmul.mubr.f32.gmra.mxu1 %v15563_v41  ;;  %v3876_v23 = vpop.f32.mrf.mxu0  ;;  %10049 = vmatmul.mubr.f32.gmra.mxu0 %v12926_v47 }
 0x347   : > { %v3744_v38 = vadd.f32 %v3640_v54, %v13522_v46  ;;  %9941 = vmatprep.mubr.msk.f32.mxu1 %vm10952_vm2, %v15439_v12  ;;  %10051 = vmatprep.mubr.msk.f32.mxu0 %vm10952_vm2, %v15439_v12  ;;  %v4951_v46 = vld [vmem:[#allocation2 + $0x450] sm:$0xff] }
 0x348   : > { %v9518_v30 = vpop.f32.mrf.mxu1  ;;  %v9628_v11 = vpop.f32.mrf.mxu0  ;;  %10119 = vmatprep.subr.mxu1 %v15439_v12 }
 0x349   : > { %10120 = vmatpush3.msra.mxu1 %v4952_v20  ;;  %v13788_v58 = vadd.f32 %v3871_v27, %v3744_v38  ;;  %v15566_v20 = vld [vmem:[#allocation11_spill] sm:$0xff] }
 0x34a   : > { %v3645_v36 = vpop.f32.mrf.mxu1  ;;  %9942 = vmatmul.mubr.f32.gmra.mxu1 %v15564_v24  ;;  %v3881_v47 = vpop.f32.mrf.mxu0  ;;  %10052 = vmatmul.mubr.f32.gmra.mxu0 %v12957_v19 }
 0x34b   : > { %v3745_v40 = vadd.f32 %v3645_v36, %v13532_v60  ;;  %9944 = vmatprep.mubr.msk.f32.mxu1 %vm10952_vm2, %v15439_v12  ;;  %10054 = vmatprep.mubr.msk.f32.mxu0 %vm10952_vm2, %v15439_v12  ;;  %v4950_v60 = vld [vmem:[#allocation2 + $0x448] sm:$0xff] }
 0x34c   : > { %v9521_v53 = vpop.f32.mrf.mxu1  ;;  %v9631_v18 = vpop.f32.mrf.mxu0  ;;  %10121 = vmatprep.subr.mxu1 %v15439_v12 }
 0x34d   : > { %10122 = vmatpush3.msra.mxu1 %v4951_v46  ;;  %v13798_v27 = vadd.f32 %v3876_v23, %v3745_v40 }
 0x34e   : > { %v3650_v25 = vpop.f32.mrf.mxu1  ;;  %9945 = vmatmul.mubr.f32.gmra.mxu1 %v15565_v43  ;;  %v3886_v19 = vpop.f32.mrf.mxu0  ;;  %10055 = vmatmul.mubr.f32.gmra.mxu0 %v12984_v56  ;;  %v15568_v43 = vld [vmem:[#allocation16_spill] sm:$0xff] }
 0x34f   : > { %v3746_v33 = vadd.f32 %v3650_v25, %v13542_v35  ;;  %9947 = vmatprep.mubr.msk.f32.mxu1 %vm10952_vm2, %v15439_v12  ;;  %10057 = vmatprep.mubr.msk.f32.mxu0 %vm10952_vm2, %v15439_v12  ;;  %v4949_v35 = vld [vmem:[#allocation2 + $0x440] sm:$0xff] }
 0x350   : > { %v9524_v13 = vpop.f32.mrf.mxu1  ;;  %v9634_v54 = vpop.f32.mrf.mxu0  ;;  %10123 = vmatprep.subr.mxu1 %v15439_v12 }
 0x351   : > { %10124 = vmatpush3.msra.mxu1 %v4950_v60  ;;  %v13808_v41 = vadd.f32 %v3881_v47, %v3746_v33  ;;  %v15567_v47 = vld [vmem:[#allocation12_spill] sm:$0xff] }
 0x352   : > { %v3655_v23 = vpop.f32.mrf.mxu1  ;;  %9948 = vmatmul.mubr.f32.gmra.mxu1 %v15566_v20  ;;  %v3891_v56 = vpop.f32.mrf.mxu0  ;;  %10058 = vmatmul.mubr.f32.gmra.mxu0 %v13012_v22 }
 0x353   : > { %v3747_v38 = vadd.f32 %v3655_v23, %v13552_v29  ;;  %9950 = vmatprep.mubr.msk.f32.mxu1 %vm10952_vm2, %v15439_v12  ;;  %10060 = vmatprep.mubr.msk.f32.mxu0 %vm10952_vm2, %v15439_v12  ;;  %v4948_v29 = vld [vmem:[#allocation2 + $0x438] sm:$0xff]  ;;  %v15569_v23 = vld [vmem:[#allocation17_spill] sm:$0xff] }
 0x354   : > { %v9527_v30 = vpop.f32.mrf.mxu1  ;;  %v9637_v11 = vpop.f32.mrf.mxu0  ;;  %10125 = vmatprep.subr.mxu1 %v15439_v12 }
 0x355   : > { %10126 = vmatpush3.msra.mxu1 %v4949_v35  ;;  %v13818_v36 = vadd.f32 %v3886_v19, %v3747_v38  ;;  %v15570_v11 = vld [vmem:[#allocation18_spill] sm:$0xff] }
 0x356   : > { %v3660_v24 = vpop.f32.mrf.mxu1  ;;  %9951 = vmatmul.mubr.f32.gmra.mxu1 %v15567_v47  ;;  %v3896_v22 = vpop.f32.mrf.mxu0  ;;  %10061 = vmatmul.mubr.f32.gmra.mxu0 %v13033_v7 }
 0x357   : > { %v3748_v46 = vadd.f32 %v3660_v24, %v13562_v4  ;;  %9953 = vmatprep.mubr.msk.f32.mxu1 %vm10952_vm2, %v15439_v12  ;;  %10063 = vmatprep.mubr.msk.f32.mxu0 %vm10952_vm2, %v15439_v12  ;;  %v4947_v4 = vld [vmem:[#allocation2 + $0x430] sm:$0xff] }
 0x358   : > { %v9530_v40 = vpop.f32.mrf.mxu1  ;;  %v9640_v53 = vpop.f32.mrf.mxu0  ;;  %10127 = vmatprep.subr.mxu1 %v15439_v12 }
 0x359   : > { %10128 = vmatpush3.msra.mxu1 %v4948_v29  ;;  %v13828_v18 = vadd.f32 %v3891_v56, %v3748_v46  ;;  %v15571_v40 = vld [vmem:[#allocation66_spill] sm:$0xff] }
 0x35a   : > { %v3665_v25 = vpop.f32.mrf.mxu1  ;;  %9954 = vmatmul.mubr.f32.gmra.mxu1 %v15568_v43  ;;  %v3901_v7 = vpop.f32.mrf.mxu0  ;;  %10064 = vmatmul.mubr.f32.gmra.mxu0 %v13052_v32 }
 0x35b   : > { %v3749_v19 = vadd.f32 %v3665_v25, %v13572_v21  ;;  %9956 = vmatprep.mubr.msk.f32.mxu1 %vm10952_vm2, %v15439_v12  ;;  %10066 = vmatprep.mubr.msk.f32.mxu0 %vm10952_vm2, %v15439_v12  ;;  %v4946_v21 = vld [vmem:[#allocation2 + $0x428] sm:$0xff] }
 0x35c   : > { %v9533_v60 = vpop.f32.mrf.mxu1  ;;  %v9643_v33 = vpop.f32.mrf.mxu0  ;;  %10129 = vmatprep.subr.mxu1 %v15439_v12 }
 0x35d   : > { %10130 = vmatpush3.msra.mxu1 %v4947_v4  ;;  %v13838_v13 = vadd.f32 %v3896_v22, %v3749_v19  ;;  %v15572_v19 = vld [vmem:[#allocation25_spill] sm:$0xff] }
 0x35e   : > { %v3670_v54 = vpop.f32.mrf.mxu1  ;;  %9957 = vmatmul.mubr.f32.gmra.mxu1 %v15569_v23  ;;  %v3906_v32 = vpop.f32.mrf.mxu0  ;;  %10067 = vmatmul.mubr.f32.gmra.mxu0 %v13064_v63 }
 0x35f   : > { %v3750_v20 = vadd.f32 %v3670_v54, %v13582_v45  ;;  %9959 = vmatprep.mubr.msk.f32.mxu1 %vm10952_vm2, %v15439_v12  ;;  %10069 = vmatprep.mubr.msk.f32.mxu0 %vm10952_vm2, %v15439_v12  ;;  %v4945_v45 = vld [vmem:[#allocation2 + $0x420] sm:$0xff] }
 0x360   : > { %v9536_v56 = vpop.f32.mrf.mxu1  ;;  %v9646_v35 = vpop.f32.mrf.mxu0  ;;  %10131 = vmatprep.subr.mxu1 %v15439_v12 }
 0x361   : > { %10132 = vmatpush3.msra.mxu1 %v4946_v21  ;;  %v13848_v38 = vadd.f32 %v3901_v7, %v3750_v20  ;;  %v15573_v21 = vld [vmem:[#allocation41_spill] sm:$0xff] }
 0x362   : > { %v3675_v30 = vpop.f32.mrf.mxu1  ;;  %9960 = vmatmul.mubr.f32.gmra.mxu1 %v15570_v11  ;;  %v3911_v63 = vpop.f32.mrf.mxu0  ;;  %10070 = vmatmul.mubr.f32.gmra.mxu0 %v13082_v1 }
 0x363   : > { %v3751_v24 = vadd.f32 %v3675_v30, %v13592_v14  ;;  %9962 = vmatprep.mubr.msk.f32.mxu1 %vm10952_vm2, %v15439_v12  ;;  %10072 = vmatprep.mubr.msk.f32.mxu0 %vm10952_vm2, %v15439_v12  ;;  %v4944_v14 = vld [vmem:[#allocation2 + $0x418] sm:$0xff] }
 0x364   : > { %v9539_v47 = vpop.f32.mrf.mxu1  ;;  %v9649_v22 = vpop.f32.mrf.mxu0  ;;  %10133 = vmatprep.subr.mxu1 %v15439_v12 }
 0x365   : > { %10134 = vmatpush3.msra.mxu1 %v4945_v45  ;;  %v13858_v29 = vadd.f32 %v3906_v32, %v3751_v24 }
 0x366   : > { %v3680_v46 = vpop.f32.mrf.mxu1  ;;  %9963 = vmatmul.mubr.f32.gmra.mxu1 %v15571_v40  ;;  %v3916_v1 = vpop.f32.mrf.mxu0  ;;  %10073 = vmatmul.mubr.f32.gmra.mxu0 %v13093_v16  ;;  %v15575_v40 = vld [vmem:[#allocation64_spill] sm:$0xff] }
 0x367   : > { %v3752_v53 = vadd.f32 %v3680_v46, %v13602_v39  ;;  %9965 = vmatprep.mubr.msk.f32.mxu1 %vm10952_vm2, %v15439_v12  ;;  %10075 = vmatprep.mubr.msk.f32.mxu0 %vm10952_vm2, %v15439_v12  ;;  %v4943_v39 = vld [vmem:[#allocation2 + $0x410] sm:$0xff] }
 0x368   : > { %v9542_v25 = vpop.f32.mrf.mxu1  ;;  %v9652_v43 = vpop.f32.mrf.mxu0  ;;  %10135 = vmatprep.subr.mxu1 %v15439_v12 }
 0x369   : > { %10136 = vmatpush3.msra.mxu1 %v4944_v14  ;;  %v13868_v7 = vadd.f32 %v3911_v63, %v3752_v53  ;;  %v15574_v63 = vld [vmem:[#allocation63_spill] sm:$0xff] }
 0x36a   : > { %v3685_v4 = vpop.f32.mrf.mxu1  ;;  %9966 = vmatmul.mubr.f32.gmra.mxu1 %v15572_v19  ;;  %v3921_v16 = vpop.f32.mrf.mxu0  ;;  %10076 = vmatmul.mubr.f32.gmra.mxu0 %v13109_v28  ;;  %v15576_v43 = vld [vmem:[#allocation19_spill] sm:$0xff] }
 0x36b   : > { %v3753_v60 = vadd.f32 %v3685_v4, %v13612_v48  ;;  %9968 = vmatprep.mubr.msk.f32.mxu1 %vm10952_vm2, %v15439_v12  ;;  %10078 = vmatprep.mubr.msk.f32.mxu0 %vm10952_vm2, %v15439_v12  ;;  %v4942_v48 = vld [vmem:[#allocation2 + $0x408] sm:$0xff] }
 0x36c   : > { %v9545_v33 = vpop.f32.mrf.mxu1  ;;  %v9655_v54 = vpop.f32.mrf.mxu0  ;;  %10137 = vmatprep.subr.mxu1 %v15439_v12 }
 0x36d   : > { %10138 = vmatpush3.msra.mxu1 %v4943_v39  ;;  %v13878_v23 = vadd.f32 %v3916_v1, %v3753_v60  ;;  %v15577_v60 = vld [vmem:[#allocation20_spill] sm:$0xff] }
 0x36e   : > { %v3690_v32 = vpop.f32.mrf.mxu1  ;;  %9969 = vmatmul.mubr.f32.gmra.mxu1 %v15573_v21  ;;  %v3926_v28 = vpop.f32.mrf.mxu0  ;;  %10079 = vmatmul.mubr.f32.gmra.mxu0 %v13119_v10 }
 0x36f   : > { %v3754_v20 = vadd.f32 %v3690_v32, %v13622_v2  ;;  %9971 = vmatprep.mubr.msk.f32.mxu1 %vm10952_vm2, %v15439_v12  ;;  %10081 = vmatprep.mubr.msk.f32.mxu0 %vm10952_vm2, %v15439_v12  ;;  %v4941_v2 = vld [vmem:[#allocation2 + $0x400] sm:$0xff] }
 0x370   : > { %v9548_v56 = vpop.f32.mrf.mxu1  ;;  %v9658_v35 = vpop.f32.mrf.mxu0  ;;  %10139 = vmatprep.subr.mxu1 %v15439_v12 }
 0x371   : > { %10140 = vmatpush3.msra.mxu1 %v4942_v48  ;;  %v13888_v30 = vadd.f32 %v3921_v16, %v3754_v20 }
 0x372   : > { %v3695_v11 = vpop.f32.mrf.mxu1  ;;  %9972 = vmatmul.mubr.f32.gmra.mxu1 %v15574_v63  ;;  %v3931_v10 = vpop.f32.mrf.mxu0  ;;  %10082 = vmatmul.mubr.f32.gmra.mxu0 %v13135_v50 }
 0x373   : > { %v3755_v45 = vadd.f32 %v3695_v11, %v13632_v51  ;;  %9974 = vmatprep.mubr.msk.f32.mxu1 %vm10952_vm2, %v15439_v12  ;;  %10084 = vmatprep.mubr.msk.f32.mxu0 %vm10952_vm2, %v15439_v12  ;;  %v15579_v11 = vld [vmem:[#allocation22_spill] sm:$0xff] }
 0x374   : > { %v9551_v24 = vpop.f32.mrf.mxu1  ;;  %v9661_v47 = vpop.f32.mrf.mxu0  ;;  %10141 = vmatprep.subr.mxu1 %v15439_v12 }
 0x375   : > { %10142 = vmatpush3.msra.mxu1 %v4941_v2  ;;  %v13898_v22 = vadd.f32 %v3926_v28, %v3755_v45  ;;  %v15578_v28 = vld [vmem:[#allocation21_spill] sm:$0xff]  ;;  %v15580_v2 = vld [vmem:[#allocation23_spill] sm:$0xff] }
 0x376   : > { %v3700_v46 = vpop.f32.mrf.mxu1  ;;  %9975 = vmatmul.mubr.f32.gmra.mxu1 %v15575_v40  ;;  %v3936_v50 = vpop.f32.mrf.mxu0  ;;  %10085 = vmatmul.mubr.f32.gmra.mxu0 %v13145_v17  ;;  %v13944_v45 = vmax.f32 %v15580_v2, 0.0 }
 0x377   : > { %v3756_v51 = vadd.f32 %v3700_v46, %v13642_v42  ;;  %9977 = vmatprep.mubr.msk.f32.mxu1 %vm10952_vm2, %v15439_v12  ;;  %10087 = vmatprep.mubr.msk.f32.mxu0 %vm10952_vm2, %v15439_v12  ;;  %v15581_v46 = vld [vmem:[#allocation24_spill] sm:$0xff] }
 0x378   : > { %v9554_v1 = vpop.f32.mrf.mxu1  ;;  %v9664_v14 = vpop.f32.mrf.mxu0 }
 0x379   : > { %v13907_v53 = vadd.f32 %v3931_v10, %v3756_v51  ;;  %v4720_v51 = vrot.slane %v13944_v45, 1 }
 0x37a   : > { %v3705_v25 = vpop.f32.mrf.mxu1  ;;  %9978 = vmatmul.mubr.f32.gmra.mxu1 %v15576_v43  ;;  %v3941_v4 = vpop.f32.mrf.mxu0  ;;  %10088 = vmatmul.mubr.f32.gmra.mxu0 %v13161_v44 }
 0x37b   : > { %v3757_v17 = vadd.f32 %v3705_v25, %v13651_v31  ;;  %9980 = vmatprep.mubr.msk.f32.mxu1 %vm10952_vm2, %v15439_v12  ;;  %10090 = vmatprep.mubr.msk.f32.mxu0 %vm10952_vm2, %v15439_v12 }
 0x37c   : > { %v9557_v42 = vpop.f32.mrf.mxu1  ;;  %v9667_v19 = vpop.f32.mrf.mxu0 }
 0x37d   : > { %v13916_v16 = vadd.f32 %v3936_v50, %v3757_v17  ;;  %v15583_v42 = vrot.slane %v13693_v61, 1 }
 0x37e   : > { %v3710_v39 = vpop.f32.mrf.mxu1  ;;  %9981 = vmatmul.mubr.f32.gmra.mxu1 %v15577_v60  ;;  %v3946_v33 = vpop.f32.mrf.mxu0  ;;  %10091 = vmatmul.mubr.f32.gmra.mxu0 %v13171_v37 }
 0x37f   : > { %v3758_v44 = vadd.f32 %v3710_v39, %v13659_v15  ;;  %9983 = vmatprep.mubr.msk.f32.mxu1 %vm10952_vm2, %v15439_v12  ;;  %10093 = vmatprep.mubr.msk.f32.mxu0 %vm10952_vm2, %v15439_v12  ;;  %v4721_v19 = vsel %vm407_vm0, %v15583_v42, %v4720_v51 }
 0x380   : > { %v9560_v31 = vpop.f32.mrf.mxu1  ;;  %v9670_v54 = vpop.f32.mrf.mxu0 }
 0x381   : > { %v13925_v32 = vadd.f32 %v3941_v4, %v3758_v44 }
 0x382   : > { %v3715_v21 = vpop.f32.mrf.mxu1  ;;  %9984 = vmatmul.mubr.f32.gmra.mxu1 %v15578_v28  ;;  %v3951_v48 = vpop.f32.mrf.mxu0  ;;  %10094 = vmatmul.mubr.f32.gmra.mxu0 %v13184_v5 }
 0x383   : > { %v3759_v37 = vadd.f32 %v3715_v21, %v13667_v26  ;;  %9986 = vmatprep.mubr.msk.f32.mxu1 %vm10952_vm2, %v15439_v12  ;;  %10096 = vmatprep.mubr.msk.f32.mxu0 %vm10952_vm2, %v15439_v12 }
 0x384   : > { %v9563_v15 = vpop.f32.mrf.mxu1  ;;  %v9673_v20 = vpop.f32.mrf.mxu0 }
 0x385   : > { %v13934_v56 = vadd.f32 %v3946_v33, %v3759_v37  ;;  %v15585_v33 = vld [vmem:[#allocation47_spill] sm:$0xff] }
 0x386   : > { %v3720_v35 = vpop.f32.mrf.mxu1  ;;  %9987 = vmatmul.mubr.f32.gmra.mxu1 %v15579_v11  ;;  %v3956_v63 = vpop.f32.mrf.mxu0  ;;  %10097 = vmatmul.mubr.f32.gmra.mxu0 %v13196_v59 }
 0x387   : > { %v3760_v5 = vadd.f32 %v3720_v35, %v13675_v49  ;;  %9989 = vmatprep.mubr.msk.f32.mxu1 %vm10952_vm2, %v15439_v12  ;;  %10099 = vmatprep.mubr.msk.f32.mxu0 %vm10952_vm2, %v15439_v12 }
 0x388   : > { %v9566_v26 = vpop.f32.mrf.mxu1  ;;  %v9676_v10 = vpop.f32.mrf.mxu0 }
 0x389   : > { %v13946_v24 = vadd.f32 %v3951_v48, %v3760_v5 }
 0x38a   : > { %v3725_v47 = vpop.f32.mrf.mxu1  ;;  %9990 = vmatmul.mubr.f32.gmra.mxu1 %v15581_v46  ;;  %v3961_v40 = vpop.f32.mrf.mxu0  ;;  %10100 = vmatmul.mubr.f32.gmra.mxu0 %v13719_v0  ;;  %v15582_v0 = vld [vmem:[#allocation40_spill] sm:$0xff]  ;;  %v15586_v46 = vld [vmem:[#allocation26_spill] sm:$0xff] }
 0x38b   : > { %v3761_v59 = vadd.f32 %v3725_v47, %v13683_v34  ;;  %9992 = vmatprep.mubr.msk.f32.mxu1 %vm10952_vm2, %v15439_v12  ;;  %10102 = vmatprep.mubr.msk.f32.mxu0 %vm10952_vm2, %v15439_v12  ;;  %v2942_v34 = vmax.f32 %v15582_v0, 0.0 }
 0x38c   : > { %v9569_v49 = vpop.f32.mrf.mxu1  ;;  %v9679_v50 = vpop.f32.mrf.mxu0 }
 0x38d   : > { %v13956_v1 = vadd.f32 %v3956_v63, %v3761_v59 }
 0x38e   : > { %v3730_v14 = vpop.f32.mrf.mxu1  ;;  %9993 = vmatmul.mubr.f32.gmra.mxu1 %v13177_v6  ;;  %v3966_v25 = vpop.f32.mrf.mxu0  ;;  %10103 = vmatmul.mubr.f32.gmra.mxu0 %v13737_v62  ;;  %v15584_v62 = vld [vmem:[#allocation37_spill] sm:$0xff] }
 0x38f   : > { %v3762_v43 = vadd.f32 %v3730_v14, %v13695_v52  ;;  %9995 = vmatprep.mubr.msk.f32.mxu1 %vm10952_vm2, %v15439_v12  ;;  %10105 = vmatprep.mubr.msk.f32.mxu0 %vm10952_vm2, %v15439_v12  ;;  %v4722_v52 = vrot.slane %v2942_v34, 1  ;;  %v15587_v14 = vld [vmem:[#allocation27_spill] sm:$0xff] }
 0x390   : > { %v9572_v4 = vpop.f32.mrf.mxu1  ;;  %v9682_v17 = vpop.f32.mrf.mxu0 }
 0x391   : > { %v13969_v6 = vadd.f32 %v3961_v40, %v3762_v43  ;;  %v4723_v21 = vsel %vm407_vm0, %v4720_v51, %v4722_v52 }
 0x392   : > { %v3735_v39 = vpop.f32.mrf.mxu1  ;;  %9996 = vmatmul.mubr.f32.gmra.mxu1 %v15584_v62  ;;  %v4322_v60 = vpop.f32.mrf.mxu0  ;;  %10106 = vmatmul.mubr.f32.gmra.mxu0 %v4721_v19  ;;  %v15588_v19 = vld [vmem:[#allocation42_spill] sm:$0xff] }
 0x393   : > { %v3763_v44 = vadd.f32 %v3735_v39, %v15585_v33  ;;  %9998 = vmatprep.mubr.msk.f32.mxu1 %vm10952_vm2, %v15439_v12  ;;  %10108 = vmatprep.mubr.msk.f32.mxu0 %vm10952_vm2, %v15439_v12 }
 0x394   : > { %v9575_v31 = vpop.f32.mrf.mxu1  ;;  %v9824_v54 = vpop.f32.mrf.mxu0 }
 0x395   : > { %v13980_v28 = vadd.f32 %v3966_v25, %v3763_v44  ;;  %v15589_v44 = vld [vmem:[#allocation13_spill] sm:$0xff] }
 0x396   : > { %v4085_v48 = vpop.f32.mrf.mxu1  ;;  %9999 = vmatmul.mubr.f32.gmra.mxu1 %v13693_v61  ;;  %v4327_v37 = vpop.f32.mrf.mxu0  ;;  %10109 = vmatmul.mubr.f32.gmra.mxu0 %v4723_v21 }
 0x397   : > { %v4209_v15 = vadd.f32 %v4085_v48, %v13739_v57  ;;  %10001 = vmatprep.mubr.msk.f32.mxu1 %vm10952_vm2, %v15439_v12 }
 0x398   : > { %v9717_v20 = vpop.f32.mrf.mxu1  ;;  %v9827_v35 = vpop.f32.mrf.mxu0 }
 0x399   : > { %v13986_v11 = vadd.f32 %v4322_v60, %v4209_v15  ;;  %v15590_v15 = vld [vmem:[#allocation15_spill] sm:$0xff] }
 0x39a   : > { %v4090_v63 = vpop.f32.mrf.mxu1  ;;  %10002 = vmatmul.mubr.f32.gmra.mxu1 %v13944_v45  ;;  %v4332_v5 = vpop.f32.mrf.mxu0 }
 0x39b   : > { %v4210_v26 = vadd.f32 %v4090_v63, %v13748_v8  ;;  %10143 = vmatprep.mubr.msk.f32.mxu1 %vm10952_vm2, %v15439_v12 }
 0x39c   : > { %v9720_v10 = vpop.f32.mrf.mxu1  ;;  %v9830_v2 = vpop.f32.mrf.mxu0 }
 0x39d   : > { %v13992_v47 = vadd.f32 %v4327_v37, %v4210_v26  ;;  %v5266_v26 = vld [vmem:[#allocation4 + $0xf8] sm:$0xff]  ;;  %v15591_v2 = vld [vmem:[#allocation30_spill] sm:$0xff] }
 0x39e   : > { %v4095_v57 = vpop.f32.mrf.mxu1  ;;  %10144 = vmatmul.mubr.f32.vlgmr.msra.gmra.mxu1 %v15586_v46  ;;  %v4337_v40 = vpop.f32.mrf.mxu0  ;;  %10218 = vmatprep.subr.mxu0 %v5266_v26 }
 0x39f   : > { %v4211_v59 = vadd.f32 %v4095_v57, %v13758_v9  ;;  %10146 = vmatprep.mubr.msk.f32.mxu1 %vm10952_vm2, %v15439_v12  ;;  %10219 = vmatpush3.msra.mxu0 %v5266_v26 }
 0x3a0   : > { %v9723_v49 = vpop.f32.mrf.mxu1  ;;  %v9833_v50 = vpop.f32.mrf.mxu0 }
 0x3a1   : > { %v13998_v51 = vadd.f32 %v4332_v5, %v4211_v59  ;;  %v15592_v50 = vld [vmem:[#allocation32_spill] sm:$0xff] }
 0x3a2   : > { %v4100_v8 = vpop.f32.mrf.mxu1  ;;  %10147 = vmatmul.mubr.f32.gmra.mxu1 %v15587_v14  ;;  %v4342_v25 = vpop.f32.mrf.mxu0 }
 0x3a3   : > { %v4212_v43 = vadd.f32 %v4100_v8, %v13768_v55  ;;  %10149 = vmatprep.mubr.msk.f32.mxu1 %vm10952_vm2, %v15439_v12 }
 0x3a4   : > { %v9726_v4 = vpop.f32.mrf.mxu1  ;;  %v9836_v17 = vpop.f32.mrf.mxu0 }
 0x3a5   : > { %v14004_v42 = vadd.f32 %v4337_v40, %v4212_v43 }
 0x3a6   : > { %v4105_v9 = vpop.f32.mrf.mxu1  ;;  %10150 = vmatmul.mubr.f32.gmra.mxu1 %v15588_v19  ;;  %v4347_v39 = vpop.f32.mrf.mxu0 }
 0x3a7   : > { %v4213_v62 = vadd.f32 %v4105_v9, %v13778_v3  ;;  %10152 = vmatprep.mubr.msk.f32.mxu1 %vm10952_vm2, %v15439_v12  ;;  %v15593_v9 = vld [vmem:[#allocation69_spill] sm:$0xff] }
 0x3a8   : > { %v9729_v60 = vpop.f32.mrf.mxu1  ;;  %v9839_v52 = vpop.f32.mrf.mxu0 }
 0x3a9   : > { %v14010_v33 = vadd.f32 %v4342_v25, %v4213_v62  ;;  %v5265_v25 = vld [vmem:[#allocation4 + $0xf0] sm:$0xff]  ;;  %v5264_v60 = vld [vmem:[#allocation4 + $0xe8] sm:$0xff] }
 0x3aa   : > { %v4110_v55 = vpop.f32.mrf.mxu1  ;;  %10153 = vmatmul.mubr.f32.gmra.mxu1 %v15589_v44  ;;  %v4352_v31 = vpop.f32.mrf.mxu0  ;;  %10220 = vmatprep.subr.mxu0 %v5265_v25  ;;  %v15594_v44 = vld [vmem:[#allocation34_spill] sm:$0xff] }
 0x3ab   : > { %v4214_v54 = vadd.f32 %v4110_v55, %v13788_v58  ;;  %10155 = vmatprep.mubr.msk.f32.mxu1 %vm10952_vm2, %v15439_v12  ;;  %10221 = vmatpush3.msra.mxu0 %v5265_v25 }
 0x3ac   : > { %v9732_v21 = vpop.f32.mrf.mxu1  ;;  %v9842_v48 = vpop.f32.mrf.mxu0  ;;  %10222 = vmatprep.subr.mxu0 %v5264_v60 }
 0x3ad   : > { %v14016_v37 = vadd.f32 %v4347_v39, %v4214_v54  ;;  %10223 = vmatpush3.msra.mxu0 %v5264_v60  ;;  %v5261_v60 = vld [vmem:[#allocation4 + $0xd0] sm:$0xff] }
 0x3ae   : > { %v4115_v3 = vpop.f32.mrf.mxu1  ;;  %10156 = vmatmul.mubr.f32.gmra.mxu1 %v15590_v15  ;;  %v4357_v20 = vpop.f32.mrf.mxu0  ;;  %v15595_v15 = vld [vmem:[#allocation36_spill] sm:$0xff] }
 0x3af   : > { %v4215_v35 = vadd.f32 %v4115_v3, %v13798_v27  ;;  %10158 = vmatprep.mubr.msk.f32.mxu1 %vm10952_vm2, %v15439_v12 }
 0x3b0   : > { %v9735_v63 = vpop.f32.mrf.mxu1  ;;  %v9845_v5 = vpop.f32.mrf.mxu0 }
 0x3b1   : > { %v14022_v58 = vadd.f32 %v4352_v31, %v4215_v35  ;;  %v5263_v63 = vld [vmem:[#allocation4 + $0xe0] sm:$0xff] }
 0x3b2   : > { %v4120_v10 = vpop.f32.mrf.mxu1  ;;  %10159 = vmatmul.mubr.f32.gmra.mxu1 %v15591_v2  ;;  %v4362_v57 = vpop.f32.mrf.mxu0  ;;  %10224 = vmatprep.subr.mxu0 %v5263_v63  ;;  %v15596_v2 = vld [vmem:[#allocation43_spill] sm:$0xff] }
 0x3b3   : > { %v4216_v46 = vadd.f32 %v4120_v10, %v13808_v41  ;;  %10161 = vmatprep.mubr.msk.f32.mxu1 %vm10952_vm2, %v15439_v12  ;;  %10225 = vmatpush3.msra.mxu0 %v5263_v63  ;;  %v15600_v63 = vld [vmem:[#allocation14_spill] sm:$0xff] }
 0x3b4   : > { %v9738_v27 = vpop.f32.mrf.mxu1  ;;  %v9848_v40 = vpop.f32.mrf.mxu0 }
 0x3b5   : > { %v14028_v59 = vadd.f32 %v4357_v20, %v4216_v46  ;;  %v5262_v40 = vld [vmem:[#allocation4 + $0xd8] sm:$0xff] }
 0x3b6   : > { %v4125_v49 = vpop.f32.mrf.mxu1  ;;  %10162 = vmatmul.mubr.f32.gmra.mxu1 %v15592_v50  ;;  %v4367_v8 = vpop.f32.mrf.mxu0  ;;  %10226 = vmatprep.subr.mxu0 %v5262_v40 }
 0x3b7   : > { %v4217_v14 = vadd.f32 %v4125_v49, %v13818_v36  ;;  %10164 = vmatprep.mubr.msk.f32.mxu1 %vm10952_vm2, %v15439_v12  ;;  %10227 = vmatpush3.msra.mxu0 %v5262_v40  ;;  %v15601_v40 = vld [vmem:[#allocation29_spill] sm:$0xff] }
 0x3b8   : > { %v9741_v43 = vpop.f32.mrf.mxu1  ;;  %v9851_v4 = vpop.f32.mrf.mxu0  ;;  %10228 = vmatprep.subr.mxu0 %v5261_v60 }
 0x3b9   : > { %v14034_v41 = vadd.f32 %v4362_v57, %v4217_v14  ;;  %10229 = vmatpush3.msra.mxu0 %v5261_v60 }
 0x3ba   : > { %v4130_v17 = vpop.f32.mrf.mxu1  ;;  %10165 = vmatmul.mubr.f32.gmra.mxu1 %v15593_v9  ;;  %v4372_v19 = vpop.f32.mrf.mxu0  ;;  %v15598_v9 = vld [vmem:[#allocation67_spill] sm:$0xff] }
 0x3bb   : > { %v4218_v39 = vadd.f32 %v4130_v17, %v13828_v18  ;;  %10167 = vmatprep.mubr.msk.f32.mxu1 %vm10952_vm2, %v15439_v12 }
 0x3bc   : > { %v9744_v36 = vpop.f32.mrf.mxu1  ;;  %v9854_v62 = vpop.f32.mrf.mxu0 }
 0x3bd   : > { %v14040_v52 = vadd.f32 %v4367_v8, %v4218_v39  ;;  %v15597_v8 = vld [vmem:[#allocation65_spill] sm:$0xff] }
 0x3be   : > { %v4135_v55 = vpop.f32.mrf.mxu1  ;;  %10168 = vmatmul.mubr.f32.gmra.mxu1 %v15594_v44  ;;  %v4377_v31 = vpop.f32.mrf.mxu0 }
 0x3bf   : > { %v4219_v54 = vadd.f32 %v4135_v55, %v13838_v13  ;;  %10170 = vmatprep.mubr.msk.f32.mxu1 %vm10952_vm2, %v15439_v12 }
 0x3c0   : > { %v9747_v18 = vpop.f32.mrf.mxu1  ;;  %v9857_v21 = vpop.f32.mrf.mxu0 }
 0x3c1   : > { %v14046_v48 = vadd.f32 %v4372_v19, %v4219_v54 }
 0x3c2   : > { %v4140_v3 = vpop.f32.mrf.mxu1  ;;  %10171 = vmatmul.mubr.f32.gmra.mxu1 %v15595_v15  ;;  %v4382_v20 = vpop.f32.mrf.mxu0  ;;  %v5692_v15 = vld [vmem:[#allocation4 + $0x168] sm:$0xff] }
 0x3c3   : > { %v4220_v35 = vadd.f32 %v4140_v3, %v13848_v38  ;;  %10173 = vmatprep.mubr.msk.f32.mxu1 %vm10952_vm2, %v15439_v12 }
 0x3c4   : > { %v9750_v5 = vpop.f32.mrf.mxu1  ;;  %v9860_v26 = vpop.f32.mrf.mxu0 }
 0x3c5   : > { %v14052_v13 = vadd.f32 %v4377_v31, %v4220_v35  ;;  %v15599_v31 = vld [vmem:[#allocation28_spill] sm:$0xff] }
 0x3c6   : > { %v4145_v10 = vpop.f32.mrf.mxu1  ;;  %10174 = vmatmul.mubr.f32.gmra.mxu1 %v15596_v2  ;;  %v4387_v57 = vpop.f32.mrf.mxu0 }
 0x3c7   : > { %v4221_v46 = vadd.f32 %v4145_v10, %v13858_v29  ;;  %10176 = vmatprep.mubr.msk.f32.mxu1 %vm10952_vm2, %v15439_v12  ;;  %v5691_v10 = vld [vmem:[#allocation4 + $0x160] sm:$0xff] }
 0x3c8   : > { %v9753_v38 = vpop.f32.mrf.mxu1  ;;  %v9863_v27 = vpop.f32.mrf.mxu0 }
 0x3c9   : > { %v14058_v49 = vadd.f32 %v4382_v20, %v4221_v46  ;;  %v5690_v46 = vld [vmem:[#allocation4 + $0x158] sm:$0xff] }
 0x3ca   : > { %v4150_v50 = vpop.f32.mrf.mxu1  ;;  %10177 = vmatmul.mubr.f32.gmra.mxu1 %v15597_v8  ;;  %v4392_v14 = vpop.f32.mrf.mxu0  ;;  %v5689_v8 = vld [vmem:[#allocation4 + $0x150] sm:$0xff] }
 0x3cb   : > { %v4222_v25 = vadd.f32 %v4150_v50, %v13868_v7  ;;  %10179 = vmatprep.mubr.msk.f32.mxu1 %vm10952_vm2, %v15439_v12  ;;  %v5694_v7 = vld [vmem:[#allocation4 + $0x178] sm:$0xff] }
 0x3cc   : > { %v9756_v29 = vpop.f32.mrf.mxu1  ;;  %v9866_v43 = vpop.f32.mrf.mxu0  ;;  %10342 = vmatprep.subr.mxu1 %v5694_v7 }
 0x3cd   : > { %v14064_v4 = vadd.f32 %v4387_v57, %v4222_v25  ;;  %10343 = vmatpush3.msra.mxu1 %v5694_v7  ;;  %v5259_v29 = vld [vmem:[#allocation4 + $0xc0] sm:$0xff]  ;;  %v5688_v43 = vld [vmem:[#allocation4 + $0x148] sm:$0xff] }
 0x3ce   : > { %v4155_v17 = vpop.f32.mrf.mxu1  ;;  %10180 = vmatmul.mubr.f32.gmra.mxu1 %v15598_v9  ;;  %v4397_v19 = vpop.f32.mrf.mxu0 }
 0x3cf   : > { %v4223_v39 = vadd.f32 %v4155_v17, %v13878_v23  ;;  %10182 = vmatprep.mubr.msk.f32.mxu1 %vm10952_vm2, %v15439_v12  ;;  %v5693_v23 = vld [vmem:[#allocation4 + $0x170] sm:$0xff] }
 0x3d0   : > { %v9759_v36 = vpop.f32.mrf.mxu1  ;;  %v9869_v62 = vpop.f32.mrf.mxu0  ;;  %10344 = vmatprep.subr.mxu1 %v5693_v23 }
 0x3d1   : > { %v14070_v55 = vadd.f32 %v4392_v14, %v4223_v39  ;;  %10345 = vmatpush3.msra.mxu1 %v5693_v23  ;;  %v5687_v36 = vld [vmem:[#allocation4 + $0x140] sm:$0xff] }
 0x3d2   : > { %v4160_v44 = vpop.f32.mrf.mxu1  ;;  %10183 = vmatmul.mubr.f32.gmra.mxu1 %v15599_v31  ;;  %v4402_v54 = vpop.f32.mrf.mxu0  ;;  %10346 = vmatprep.subr.mxu1 %v5692_v15  ;;  %v5686_v31 = vld [vmem:[#allocation4 + $0x138] sm:$0xff] }
 0x3d3   : > { %v4224_v18 = vadd.f32 %v4160_v44, %v13888_v30  ;;  %10185 = vmatprep.mubr.msk.f32.mxu1 %vm10952_vm2, %v15439_v12  ;;  %10347 = vmatpush3.msra.mxu1 %v5692_v15  ;;  %v5260_v30 = vld [vmem:[#allocation4 + $0xc8] sm:$0xff]  ;;  %v5258_v44 = vld [vmem:[#allocation4 + $0xb8] sm:$0xff] }
 0x3d4   : > { %v9762_v21 = vpop.f32.mrf.mxu1  ;;  %v9872_v3 = vpop.f32.mrf.mxu0  ;;  %10230 = vmatprep.subr.mxu0 %v5260_v30  ;;  %10348 = vmatprep.subr.mxu1 %v5691_v10 }
 0x3d5   : > { %v14076_v20 = vadd.f32 %v4397_v19, %v4224_v18  ;;  %10231 = vmatpush3.msra.mxu0 %v5260_v30  ;;  %10349 = vmatpush3.msra.mxu1 %v5691_v10  ;;  %v15602_v19 = vld [vmem:[#allocation31_spill] sm:$0xff]  ;;  %v15603_v18 = vld [vmem:[#allocation33_spill] sm:$0xff]  ;;  %v5257_v21 = vld [vmem:[#allocation4 + $0xb0] sm:$0xff] }
 0x3d6   : > { %v4165_v35 = vpop.f32.mrf.mxu1  ;;  %10186 = vmatmul.mubr.f32.gmra.mxu1 %v15600_v63  ;;  %v4407_v5 = vpop.f32.mrf.mxu0  ;;  %10350 = vmatprep.subr.mxu1 %v5690_v46  ;;  %v5685_v3 = vld [vmem:[#allocation4 + $0x130] sm:$0xff]  ;;  %v15604_v30 = vld [vmem:[#allocation35_spill] sm:$0xff] }
 0x3d7   : > { %v4225_v26 = vadd.f32 %v4165_v35, %v13898_v22  ;;  %10188 = vmatprep.mubr.msk.f32.mxu1 %vm10952_vm2, %v15439_v12  ;;  %10351 = vmatpush3.msra.mxu1 %v5690_v46 }
 0x3d8   : > { %v9765_v2 = vpop.f32.mrf.mxu1  ;;  %v9875_v57 = vpop.f32.mrf.mxu0  ;;  %10352 = vmatprep.subr.mxu1 %v5689_v8  ;;  %10232 = vmatprep.subr.mxu0 %v5259_v29 }
 0x3d9   : > { %v14082_v38 = vadd.f32 %v4402_v54, %v4225_v26  ;;  %10353 = vmatpush3.msra.mxu1 %v5689_v8  ;;  %10233 = vmatpush3.msra.mxu0 %v5259_v29  ;;  %v5255_v57 = vld [vmem:[#allocation4 + $0xa0] sm:$0xff]  ;;  %v5682_v29 = vld [vmem:[#allocation4 + $0x118] sm:$0xff] }
 0x3da   : > { %v4170_v27 = vpop.f32.mrf.mxu1  ;;  %10189 = vmatmul.mubr.f32.gmra.mxu1 %v15601_v40  ;;  %v4412_v50 = vpop.f32.mrf.mxu0  ;;  %10354 = vmatprep.subr.mxu1 %v5688_v43  ;;  %v15605_v8 = vld [vmem:[#allocation44_spill] sm:$0xff] }
 0x3db   : > { %v4226_v22 = vadd.f32 %v4170_v27, %v13907_v53  ;;  %10191 = vmatprep.mubr.msk.f32.mxu1 %vm10952_vm2, %v15439_v12  ;;  %10355 = vmatpush3.msra.mxu1 %v5688_v43 }
 0x3dc   : > { %v9768_v14 = vpop.f32.mrf.mxu1  ;;  %v9878_v25 = vpop.f32.mrf.mxu0  ;;  %10356 = vmatprep.subr.mxu1 %v5687_v36  ;;  %10234 = vmatprep.subr.mxu0 %v5258_v44 }
 0x3dd   : > { %v14088_v17 = vadd.f32 %v4407_v5, %v4226_v22  ;;  %10357 = vmatpush3.msra.mxu1 %v5687_v36  ;;  %10235 = vmatpush3.msra.mxu0 %v5258_v44  ;;  %v5256_v5 = vld [vmem:[#allocation4 + $0xa8] sm:$0xff]  ;;  %v15606_v36 = vld [vmem:[#allocation38_spill] sm:$0xff] }
 0x3de   : > { %v4175_v9 = vpop.f32.mrf.mxu1  ;;  %10192 = vmatmul.mubr.f32.gmra.mxu1 %v15602_v19  ;;  %v4417_v39 = vpop.f32.mrf.mxu0  ;;  %10358 = vmatprep.subr.mxu1 %v5686_v31  ;;  %v5252_v44 = vld [vmem:[#allocation4 + $0x88] sm:$0xff] }
 0x3df   : > { %v4227_v53 = vadd.f32 %v4175_v9, %v13916_v16  ;;  %10194 = vmatprep.mubr.msk.f32.mxu1 %vm10952_vm2, %v15439_v12  ;;  %10359 = vmatpush3.msra.mxu1 %v5686_v31 }
 0x3e0   : > { %v9771_v62 = vpop.f32.mrf.mxu1  ;;  %v9881_v60 = vpop.f32.mrf.mxu0  ;;  %10236 = vmatprep.subr.mxu0 %v5257_v21  ;;  %10360 = vmatprep.subr.mxu1 %v5685_v3 }
 0x3e1   : > { %v14094_v7 = vadd.f32 %v4412_v50, %v4227_v53  ;;  %10237 = vmatpush3.msra.mxu0 %v5257_v21  ;;  %10361 = vmatpush3.msra.mxu1 %v5685_v3  ;;  %v5683_v50 = vld [vmem:[#allocation4 + $0x120] sm:$0xff]  ;;  %v15607_v21 = vld [vmem:[#allocation45_spill] sm:$0xff] }
 0x3e2   : > { %v4180_v54 = vpop.f32.mrf.mxu1  ;;  %10195 = vmatmul.mubr.f32.gmra.mxu1 %v15603_v18  ;;  %v4422_v23 = vpop.f32.mrf.mxu0  ;;  %10238 = vmatprep.subr.mxu0 %v5256_v5 }
 0x3e3   : > { %v4228_v16 = vadd.f32 %v4180_v54, %v13925_v32  ;;  %10197 = vmatprep.mubr.msk.f32.mxu1 %vm10952_vm2, %v15439_v12  ;;  %v5684_v32 = vld [vmem:[#allocation4 + $0x128] sm:$0xff]  ;;  %10239 = vmatpush3.msra.mxu0 %v5256_v5 }
 0x3e4   : > { %v9774_v15 = vpop.f32.mrf.mxu1  ;;  %v9884_v35 = vpop.f32.mrf.mxu0  ;;  %10362 = vmatprep.subr.mxu1 %v5684_v32  ;;  %10240 = vmatprep.subr.mxu0 %v5255_v57 }
 0x3e5   : > { %v14100_v63 = vadd.f32 %v4417_v39, %v4228_v16  ;;  %10363 = vmatpush3.msra.mxu1 %v5684_v32  ;;  %10241 = vmatpush3.msra.mxu0 %v5255_v57  ;;  %v5253_v39 = vld [vmem:[#allocation4 + $0x90] sm:$0xff]  ;;  %v5679_v35 = vld [vmem:[#allocation4 + $0x100] sm:$0xff] }
 0x3e6   : > { %v4185_v26 = vpop.f32.mrf.mxu1  ;;  %10198 = vmatmul.mubr.f32.gmra.mxu1 %v15604_v30  ;;  %v4427_v10 = vpop.f32.mrf.mxu0  ;;  %10364 = vmatprep.subr.mxu1 %v5683_v50  ;;  %v4957_v30 = vrot.slane %v13944_v45, 2  ;;  %v15609_v45 = vrot.slane %v13693_v61, 2 }
 0x3e7   : > { %v4229_v2 = vadd.f32 %v4185_v26, %v13934_v56  ;;  %10200 = vmatprep.mubr.msk.f32.mxu1 %vm10952_vm2, %v15439_v12  ;;  %v5254_v56 = vld [vmem:[#allocation4 + $0x98] sm:$0xff]  ;;  %10365 = vmatpush3.msra.mxu1 %v5683_v50 }
 0x3e8   : > { %v9777_v46 = vpop.f32.mrf.mxu1  ;;  %v9887_v27 = vpop.f32.mrf.mxu0  ;;  %10242 = vmatprep.subr.mxu0 %v5254_v56  ;;  %10366 = vmatprep.subr.mxu1 %v5682_v29  ;;  %v4958_v50 = vsel %vm945_vm1, %v15609_v45, %v4957_v30 }
 0x3e9   : > { %v14106_v40 = vadd.f32 %v4422_v23, %v4229_v2  ;;  %10243 = vmatpush3.msra.mxu0 %v5254_v56  ;;  %10367 = vmatpush3.msra.mxu1 %v5682_v29  ;;  %v5680_v23 = vld [vmem:[#allocation4 + $0x108] sm:$0xff]  ;;  %v4959_v56 = vrot.slane %v2942_v34, 2 }
 0x3ea   : > { %v4190_v22 = vpop.f32.mrf.mxu1  ;;  %10201 = vmatmul.mubr.f32.gmra.mxu1 %v15605_v8  ;;  %v4432_v14 = vpop.f32.mrf.mxu0  ;;  %10244 = vmatprep.subr.mxu0 %v5253_v39  ;;  %v15608_v2 = vld [vmem:[#allocation49_spill] sm:$0xff] }
 0x3eb   : > { %v4230_v25 = vadd.f32 %v4190_v22, %v13946_v24  ;;  %10203 = vmatprep.mubr.msk.f32.mxu1 %vm10952_vm2, %v15439_v12  ;;  %v5681_v24 = vld [vmem:[#allocation4 + $0x110] sm:$0xff]  ;;  %10245 = vmatpush3.msra.mxu0 %v5253_v39 }
 0x3ec   : > { %v9780_v43 = vpop.f32.mrf.mxu1  ;;  %v9890_v9 = vpop.f32.mrf.mxu0  ;;  %10368 = vmatprep.subr.mxu1 %v5681_v24  ;;  %10246 = vmatprep.subr.mxu0 %v5252_v44 }
 0x3ed   : > { %v14112_v19 = vadd.f32 %v4427_v10, %v4230_v25  ;;  %10369 = vmatpush3.msra.mxu1 %v5681_v24  ;;  %10247 = vmatpush3.msra.mxu0 %v5252_v44  ;;  %v4960_v43 = vsel %vm945_vm1, %v4957_v30, %v4959_v56 }
 0x3ee   : > { %v4195_v53 = vpop.f32.mrf.mxu1  ;;  %10204 = vmatmul.mubr.f32.gmra.mxu1 %v15606_v36  ;;  %v4437_v62 = vpop.f32.mrf.mxu0  ;;  %10370 = vmatprep.subr.mxu1 %v5680_v23 }
 0x3ef   : > { %v4231_v60 = vadd.f32 %v4195_v53, %v13956_v1  ;;  %10206 = vmatprep.mubr.msk.f32.mxu1 %vm10952_vm2, %v15439_v12  ;;  %v5251_v1 = vld [vmem:[#allocation4 + $0x80] sm:$0xff]  ;;  %10371 = vmatpush3.msra.mxu1 %v5680_v23 }
 0x3f0   : > { %v9783_v31 = vpop.f32.mrf.mxu1  ;;  %v9893_v54 = vpop.f32.mrf.mxu0  ;;  %10248 = vmatprep.subr.mxu0 %v5251_v1  ;;  %10372 = vmatprep.subr.mxu1 %v5679_v35 }
 0x3f1   : > { %v14118_v18 = vadd.f32 %v4432_v14, %v4231_v60  ;;  %10249 = vmatpush3.msra.mxu0 %v5251_v1  ;;  %10373 = vmatpush3.msra.mxu1 %v5679_v35 }
 0x3f2   : > { %v4200_v16 = vpop.f32.mrf.mxu1  ;;  %10207 = vmatmul.mubr.f32.gmra.mxu1 %v15607_v21  ;;  %v4442_v3 = vpop.f32.mrf.mxu0 }
 0x3f3   : > { %v4232_v15 = vadd.f32 %v4200_v16, %v13969_v6  ;;  %10209 = vmatprep.mubr.msk.f32.mxu1 %vm10952_vm2, %v15439_v12 }
 0x3f4   : > { %v9786_v5 = vpop.f32.mrf.mxu1  ;;  %v9896_v26 = vpop.f32.mrf.mxu0 }
 0x3f5   : > { %v14125_v10 = vadd.f32 %v4437_v62, %v4232_v15 }
 0x3f6   : > { %v4205_v32 = vpop.f32.mrf.mxu1  ;;  %10210 = vmatmul.mubr.f32.gmra.mxu1 %v15608_v2  ;;  %v4792_v57 = vpop.f32.mrf.mxu0 }
 0x3f7   : > { %v4233_v6 = vadd.f32 %v4205_v32, %v13980_v28  ;;  %10212 = vmatprep.mubr.msk.f32.mxu1 %vm10952_vm2, %v15439_v12 }
 0x3f8   : > { %v9789_v46 = vpop.f32.mrf.mxu1  ;;  %v10038_v27 = vpop.f32.mrf.mxu0 }
 0x3f9   : > { %v14134_v22 = vadd.f32 %v4442_v3, %v4233_v6 }
 0x3fa   : > { %v4553_v8 = vpop.f32.mrf.mxu1  ;;  %10213 = vmatmul.mubr.f32.gmra.mxu1 %v4958_v50  ;;  %v4797_v14 = vpop.f32.mrf.mxu0 }
 0x3fb   : > { %v4677_v28 = vadd.f32 %v4553_v8, %v13986_v11  ;;  %10215 = vmatprep.mubr.msk.f32.mxu1 %vm10952_vm2, %v15439_v12 }
 0x3fc   : > { %v9931_v25 = vpop.f32.mrf.mxu1  ;;  %v10041_v29 = vpop.f32.mrf.mxu0 }
 0x3fd   : > { %v14142_v61 = vadd.f32 %v4792_v57, %v4677_v28  ;;  %v14163_v28 = vld [vmem:[#allocation4 + $0x78] sm:$0xff] }
 0x3fe   : > { %v4558_v9 = vpop.f32.mrf.mxu1  ;;  %10216 = vmatmul.mubr.f32.gmra.mxu1 %v4960_v43  ;;  %v4802_v39 = vpop.f32.mrf.mxu0  ;;  %10280 = vmatprep.subr.mxu0 %v14163_v28 }
 0x3ff   : > { %v4678_v53 = vadd.f32 %v4558_v9, %v13992_v47 }
 0x400   : > { %v9934_v36 = vpop.f32.mrf.mxu1  ;;  %v10044_v62 = vpop.f32.mrf.mxu0 }
 0x401   : > { %v14145_v0 = vadd.f32 %v4797_v14, %v4678_v53  ;;  %v14171_v62 = vld [vmem:[#allocation4 + $0x278] sm:$0xff] }
 0x402   : > { %v4563_v34 = vpop.f32.mrf.mxu1  ;;  %v4807_v11 = vpop.f32.mrf.mxu0  ;;  %10466 = vmatprep.subr.mxu1 %v14171_v62 }
 0x403   : > { %v4679_v24 = vadd.f32 %v4563_v34, %v13998_v51 }
 0x404   : > { %v9937_v12 = vpop.f32.mrf.mxu1  ;;  %v10047_v60 = vpop.f32.mrf.mxu0 }
 0x405   : > { %v14148_v44 = vadd.f32 %v4802_v39, %v4679_v24 }
 0x406   : > { %v4568_v31 = vpop.f32.mrf.mxu1  ;;  %v4812_v54 = vpop.f32.mrf.mxu0 }
 0x407   : > { %v4680_v23 = vadd.f32 %v4568_v31, %v14004_v42 }
 0x408   : > { %v9940_v16 = vpop.f32.mrf.mxu1  ;;  %v10050_v21 = vpop.f32.mrf.mxu0 }
 0x409   : > { %v14151_v3 = vadd.f32 %v4807_v11, %v4680_v23 }
 0x40a   : > { %v4573_v47 = vpop.f32.mrf.mxu1  ;;  %v4817_v1 = vpop.f32.mrf.mxu0 }
 0x40b   : > { %v4681_v15 = vadd.f32 %v4573_v47, %v14010_v33 }
 0x40c   : > { %v9943_v35 = vpop.f32.mrf.mxu1  ;;  %v10053_v5 = vpop.f32.mrf.mxu0 }
 0x40d   : > { %v14154_v26 = vadd.f32 %v4812_v54, %v4681_v15 }
 0x40e   : > { %v4578_v51 = vpop.f32.mrf.mxu1  ;;  %v4822_v30 = vpop.f32.mrf.mxu0 }
 0x40f   : > { %v4682_v32 = vadd.f32 %v4578_v51, %v14016_v37 }
 0x410   : > { %v9946_v2 = vpop.f32.mrf.mxu1  ;;  %v10056_v57 = vpop.f32.mrf.mxu0 }
 0x411   : > { %v14157_v6 = vadd.f32 %v4817_v1, %v4682_v32 }
 0x412   : > { %v4583_v42 = vpop.f32.mrf.mxu1  ;;  %v4827_v46 = vpop.f32.mrf.mxu0 }
 0x413   : > { %v4683_v27 = vadd.f32 %v4583_v42, %v14022_v58 }
 0x414   : > { %v9949_v45 = vpop.f32.mrf.mxu1  ;;  %v10059_v50 = vpop.f32.mrf.mxu0 }
 0x415   : > { %v14160_v8 = vadd.f32 %v4822_v30, %v4683_v27 }
 0x416   : > { %v4588_v33 = vpop.f32.mrf.mxu1  ;;  %v4832_v14 = vpop.f32.mrf.mxu0 }
 0x417   : > { %v4684_v56 = vadd.f32 %v4588_v33, %v14028_v59 }
 0x418   : > { %v9952_v25 = vpop.f32.mrf.mxu1  ;;  %v10062_v37 = vpop.f32.mrf.mxu0 }
 0x419   : > { %v14166_v29 = vadd.f32 %v4827_v46, %v4684_v56 }
 0x41a   : > { %v4593_v43 = vpop.f32.mrf.mxu1  ;;  %v4837_v9 = vpop.f32.mrf.mxu0 }
 0x41b   : > { %v4685_v58 = vadd.f32 %v4593_v43, %v14034_v41 }
 0x41c   : > { %v9955_v39 = vpop.f32.mrf.mxu1  ;;  %v10065_v53 = vpop.f32.mrf.mxu0 }
 0x41d   : > { %v14169_v36 = vadd.f32 %v4832_v14, %v4685_v58 }
 0x41e   : > { %v4598_v34 = vpop.f32.mrf.mxu1  ;;  %v4842_v59 = vpop.f32.mrf.mxu0 }
 0x41f   : > { %v4686_v11 = vadd.f32 %v4598_v34, %v14040_v52 }
 0x420   : > { %v9958_v24 = vpop.f32.mrf.mxu1  ;;  %v10068_v12 = vpop.f32.mrf.mxu0 }
 0x421   : > { %v14175_v60 = vadd.f32 %v4837_v9, %v4686_v11 }
 0x422   : > { %v4603_v31 = vpop.f32.mrf.mxu1  ;;  %v4847_v54 = vpop.f32.mrf.mxu0 }
 0x423   : > { %v4687_v41 = vadd.f32 %v4603_v31, %v14046_v48 }
 0x424   : > { %v9961_v23 = vpop.f32.mrf.mxu1  ;;  %v10071_v16 = vpop.f32.mrf.mxu0 }
 0x425   : > { %v14178_v21 = vadd.f32 %v4842_v59, %v4687_v41 }
 0x426   : > { %v4608_v47 = vpop.f32.mrf.mxu1  ;;  %v4852_v1 = vpop.f32.mrf.mxu0 }
 0x427   : > { %v4688_v15 = vadd.f32 %v4608_v47, %v14052_v13 }
 0x428   : > { %v9964_v35 = vpop.f32.mrf.mxu1  ;;  %v10074_v5 = vpop.f32.mrf.mxu0 }
 0x429   : > { %v14181_v51 = vadd.f32 %v4847_v54, %v4688_v15 }
 0x42a   : > { %v4613_v52 = vpop.f32.mrf.mxu1  ;;  %v4857_v30 = vpop.f32.mrf.mxu0 }
 0x42b   : > { %v4689_v32 = vadd.f32 %v4613_v52, %v14058_v49 }
 0x42c   : > { %v9967_v2 = vpop.f32.mrf.mxu1  ;;  %v10077_v57 = vpop.f32.mrf.mxu0 }
 0x42d   : > { %v14184_v42 = vadd.f32 %v4852_v1, %v4689_v32 }
 0x42e   : > { %v4618_v48 = vpop.f32.mrf.mxu1  ;;  %v4862_v46 = vpop.f32.mrf.mxu0 }
 0x42f   : > { %v4690_v27 = vadd.f32 %v4618_v48, %v14064_v4 }
 0x430   : > { %v9970_v45 = vpop.f32.mrf.mxu1  ;;  %v10080_v50 = vpop.f32.mrf.mxu0 }
 0x431   : > { %v14187_v33 = vadd.f32 %v4857_v30, %v4690_v27 }
 0x432   : > { %v4623_v13 = vpop.f32.mrf.mxu1  ;;  %v4867_v14 = vpop.f32.mrf.mxu0 }
 0x433   : > { %v4691_v56 = vadd.f32 %v4623_v13, %v14070_v55 }
 0x434   : > { %v9973_v25 = vpop.f32.mrf.mxu1  ;;  %v10083_v37 = vpop.f32.mrf.mxu0 }
 0x435   : > { %v14190_v43 = vadd.f32 %v4862_v46, %v4691_v56 }
 0x436   : > { %v4628_v49 = vpop.f32.mrf.mxu1  ;;  %v4872_v9 = vpop.f32.mrf.mxu0 }
 0x437   : > { %v4692_v58 = vadd.f32 %v4628_v49, %v14076_v20 }
 0x438   : > { %v9976_v39 = vpop.f32.mrf.mxu1  ;;  %v10086_v53 = vpop.f32.mrf.mxu0 }
 0x439   : > { %v14193_v34 = vadd.f32 %v4867_v14, %v4692_v58 }
 0x43a   : > { %v4633_v4 = vpop.f32.mrf.mxu1  ;;  %v4877_v59 = vpop.f32.mrf.mxu0 }
 0x43b   : > { %v4693_v11 = vadd.f32 %v4633_v4, %v14082_v38 }
 0x43c   : > { %v9979_v24 = vpop.f32.mrf.mxu1  ;;  %v10089_v12 = vpop.f32.mrf.mxu0 }
 0x43d   : > { %v14196_v31 = vadd.f32 %v4872_v9, %v4693_v11 }
 0x43e   : > { %v4638_v55 = vpop.f32.mrf.mxu1  ;;  %v4882_v54 = vpop.f32.mrf.mxu0 }
 0x43f   : > { %v4694_v41 = vadd.f32 %v4638_v55, %v14088_v17 }
 0x440   : > { %v9982_v23 = vpop.f32.mrf.mxu1  ;;  %v10092_v16 = vpop.f32.mrf.mxu0 }
 0x441   : > { %v14199_v47 = vadd.f32 %v4877_v59, %v4694_v41 }
 0x442   : > { %v4643_v20 = vpop.f32.mrf.mxu1  ;;  %v4887_v1 = vpop.f32.mrf.mxu0 }
 0x443   : > { %v4695_v15 = vadd.f32 %v4643_v20, %v14094_v7 }
 0x444   : > { %v9985_v35 = vpop.f32.mrf.mxu1  ;;  %v10095_v5 = vpop.f32.mrf.mxu0 }
 0x445   : > { %v14202_v52 = vadd.f32 %v4882_v54, %v4695_v15 }
 0x446   : > { %v4648_v38 = vpop.f32.mrf.mxu1  ;;  %v4892_v30 = vpop.f32.mrf.mxu0 }
 0x447   : > { %v4696_v32 = vadd.f32 %v4648_v38, %v14100_v63 }
 0x448   : > { %v9988_v2 = vpop.f32.mrf.mxu1  ;;  %v10098_v57 = vpop.f32.mrf.mxu0 }
 0x449   : > { %v14205_v48 = vadd.f32 %v4887_v1, %v4696_v32 }
 0x44a   : > { %v4653_v17 = vpop.f32.mrf.mxu1  ;;  %v4897_v46 = vpop.f32.mrf.mxu0 }
 0x44b   : > { %v4697_v27 = vadd.f32 %v4653_v17, %v14106_v40 }
 0x44c   : > { %v9991_v45 = vpop.f32.mrf.mxu1  ;;  %v10101_v50 = vpop.f32.mrf.mxu0 }
 0x44d   : > { %v14208_v13 = vadd.f32 %v4892_v30, %v4697_v27 }
 0x44e   : > { %v4658_v7 = vpop.f32.mrf.mxu1  ;;  %v4902_v14 = vpop.f32.mrf.mxu0 }
 0x44f   : > { %v4698_v56 = vadd.f32 %v4658_v7, %v14112_v19 }
 0x450   : > { %v9994_v25 = vpop.f32.mrf.mxu1  ;;  %v10104_v37 = vpop.f32.mrf.mxu0 }
 0x451   : > { %v14211_v49 = vadd.f32 %v4897_v46, %v4698_v56 }
 0x452   : > { %v4663_v63 = vpop.f32.mrf.mxu1  ;;  %v4907_v9 = vpop.f32.mrf.mxu0 }
 0x453   : > { %v4699_v58 = vadd.f32 %v4663_v63, %v14118_v18  ;;  %v14225_v18 = vld [vmem:[%s15232_s4] ss:$0 sm:$0xff] }
 0x454   : > { %v9997_v39 = vpop.f32.mrf.mxu1  ;;  %v10107_v53 = vpop.f32.mrf.mxu0 }
 0x455   : > { %v14214_v4 = vadd.f32 %v4902_v14, %v4699_v58 }
 0x456   : > { %v4668_v40 = vpop.f32.mrf.mxu1  ;;  %v4912_v59 = vpop.f32.mrf.mxu0 }
 0x457   : > { %v4700_v11 = vadd.f32 %v4668_v40, %v14125_v10  ;;  %v5249_v40 = vld [vmem:[#allocation4 + $0x70] sm:$0xff] }
 0x458   : > { %v10000_v24 = vpop.f32.mrf.mxu1  ;;  %v10110_v12 = vpop.f32.mrf.mxu0 }
 0x459   : > { %v14217_v55 = vadd.f32 %v4907_v9, %v4700_v11 }
 0x45a   : > { %v4673_v19 = vpop.f32.mrf.mxu1 }
 0x45b   : > { %v4701_v54 = vadd.f32 %v4673_v19, %v14134_v22 }
 0x45c   : > { %v10003_v41 = vpop.f32.mrf.mxu1 }
 0x45d   : > { %v14220_v23 = vadd.f32 %v4912_v59, %v4701_v54  ;;  %v6156_v59 = vld [vmem:[#allocation4 + $0x270] sm:$0xff]  ;;  %v5248_v54 = vld [vmem:[#allocation4 + $0x68] sm:$0xff] }
 0x45e   : > { %v5029_v16 = vpop.f32.mrf.mxu1  ;;  %v6155_v41 = vld [vmem:[#allocation4 + $0x268] sm:$0xff] }
 0x45f   : > { %v5153_v20 = vadd.f32 %v5029_v16, %v14142_v61 }
 0x460   : > { %v10145_v1 = vpop.f32.mrf.mxu1 }
 0x461   : > { %v5185_v10 = vadd.f32 %v14225_v18, %v5153_v20 }
 0x462   : > { %v5034_v15 = vpop.f32.mrf.mxu1 }
 0x463   : > { %v5154_v35 = vadd.f32 %v5034_v15, %v14145_v0  ;;  %v14230_v5 = vmax.f32 %v5185_v10, 0.0  ;;  %v6154_v15 = vld [vmem:[#allocation4 + $0x260] sm:$0xff] }
 0x464   : > { %v10148_v22 = vpop.f32.mrf.mxu1 }
 0x465   : > { %v5186_v38 = vadd.f32 %v14225_v18, %v5154_v35  ;;  %v5288_v17 = vrot.slane %v14230_v5, 1  ;;  %v5695_v27 = vrot.slane %v14230_v5, 2 }
 0x466   : > { %v5039_v30 = vpop.f32.mrf.mxu1 }
 0x467   : > { %v14233_v32 = vmax.f32 %v5186_v38, 0.0  ;;  %v5155_v2 = vadd.f32 %v5039_v30, %v14148_v44 }
 0x468   : > { %v10151_v57 = vpop.f32.mrf.mxu1 }
 0x469   : > { %v5187_v61 = vadd.f32 %v14225_v18, %v5155_v2  ;;  %v5289_v46 = vrot.slane %v14233_v32, 1  ;;  %v5696_v0 = vrot.slane %v14233_v32, 2 }
 0x46a   : > { %v5044_v45 = vpop.f32.mrf.mxu1 }
 0x46b   : > { %v14241_v50 = vmax.f32 %v5187_v61, 0.0  ;;  %v5156_v7 = vadd.f32 %v5044_v45, %v14151_v3  ;;  %v5290_v14 = vsel %vm407_vm0, %v5288_v17, %v5289_v46  ;;  %v5697_v44 = vsel %vm945_vm1, %v5695_v27, %v5696_v0  ;;  %v5246_v61 = vld [vmem:[#allocation4 + $0x58] sm:$0xff] }
 0x46c   : > { %v10154_v56 = vpop.f32.mrf.mxu1  ;;  %10250 = vmatprep.mubr.f32.mxu0 %v5290_v14  ;;  %10374 = vmatprep.mubr.f32.mxu1 %v5697_v44  ;;  %v5245_v14 = vld [vmem:[#allocation4 + $0x50] sm:$0xff] }
 0x46d   : > { %v5291_v25 = vrot.slane %v14241_v50, 1  ;;  %v5698_v37 = vrot.slane %v14241_v50, 2  ;;  %v5188_v63 = vadd.f32 %v14225_v18, %v5156_v7  ;;  %v6152_v44 = vld [vmem:[#allocation4 + $0x250] sm:$0xff] }
 0x46e   : > { %v5049_v9 = vpop.f32.mrf.mxu1 }
 0x46f   : > { %v14249_v58 = vmax.f32 %v5188_v63, 0.0  ;;  %v5157_v39 = vadd.f32 %v5049_v9, %v14154_v26  ;;  %v5292_v3 = vsel %vm407_vm0, %v5289_v46, %v5291_v25  ;;  %v5699_v53 = vsel %vm945_vm1, %v5696_v0, %v5698_v37  ;;  %v6153_v46 = vld [vmem:[#allocation4 + $0x258] sm:$0xff] }
 0x470   : > { %v10157_v11 = vpop.f32.mrf.mxu1  ;;  %10251 = vmatmul.mubr.f32.vlgmr.msra.gmra.mxu0 %v5292_v3  ;;  %10375 = vmatmul.mubr.f32.vlgmr.msra.gmra.mxu1 %v5699_v53  ;;  %v6151_v3 = vld [vmem:[#allocation4 + $0x248] sm:$0xff] }
 0x471   : > { %v5189_v24 = vadd.f32 %v14225_v18, %v5157_v39  ;;  %v5293_v12 = vrot.slane %v14249_v58, 1  ;;  %v5700_v19 = vrot.slane %v14249_v58, 2  ;;  %10281 = vmatpush3.msra.mxu0 %v14163_v28  ;;  %10467 = vmatpush3.msra.mxu1 %v14171_v62  ;;  %v5247_v62 = vld [vmem:[#allocation4 + $0x60] sm:$0xff]  ;;  %v5244_v39 = vld [vmem:[#allocation4 + $0x48] sm:$0xff] }
 0x472   : > { %v5054_v26 = vpop.f32.mrf.mxu1  ;;  %10282 = vmatprep.subr.mxu0 %v5249_v40  ;;  %10468 = vmatprep.subr.mxu1 %v6156_v59 }
 0x473   : > { %v14259_v16 = vmax.f32 %v5189_v24, 0.0  ;;  %v5158_v20 = vadd.f32 %v5054_v26, %v14157_v6  ;;  %v14263_v1 = vsel %vm407_vm0, %v5291_v25, %v5293_v12  ;;  %v14266_v10 = vsel %vm945_vm1, %v5698_v37, %v5700_v19  ;;  %10283 = vmatpush3.msra.mxu0 %v5249_v40  ;;  %10469 = vmatpush3.msra.mxu1 %v6156_v59  ;;  %v5243_v26 = vld [vmem:[#allocation4 + $0x40] sm:$0xff] }
 0x474   : > { %v10160_v28 = vpop.f32.mrf.mxu1  ;;  %10253 = vmatprep.mubr.f32.mxu0 %v14263_v1  ;;  %10377 = vmatprep.mubr.f32.mxu1 %v14266_v10 }
 0x475   : > { %v5190_v35 = vadd.f32 %v14225_v18, %v5158_v20  ;;  %v5295_v22 = vrot.slane %v14259_v16, 1  ;;  %v5702_v6 = vrot.slane %v14259_v16, 2  ;;  %10284 = vmatprep.subr.mxu0 %v5248_v54  ;;  %10470 = vmatprep.subr.mxu1 %v6155_v41 }
 0x476   : > { %v5059_v38 = vpop.f32.mrf.mxu1  ;;  %10285 = vmatpush3.msra.mxu0 %v5248_v54  ;;  %10471 = vmatpush3.msra.mxu1 %v6155_v41  ;;  %v6150_v54 = vld [vmem:[#allocation4 + $0x240] sm:$0xff] }
 0x477   : > { %v14273_v30 = vmax.f32 %v5190_v35, 0.0  ;;  %v5159_v2 = vadd.f32 %v5059_v38, %v14160_v8  ;;  %v14277_v57 = vsel %vm407_vm0, %v5293_v12, %v5295_v22  ;;  %v14280_v17 = vsel %vm945_vm1, %v5700_v19, %v5702_v6  ;;  %10286 = vmatprep.subr.mxu0 %v5247_v62  ;;  %10472 = vmatprep.subr.mxu1 %v6154_v15  ;;  %v6149_v35 = vld [vmem:[#allocation4 + $0x238] sm:$0xff] }
 0x478   : > { %v10163_v27 = vpop.f32.mrf.mxu1  ;;  %10254 = vmatmul.mubr.f32.gmra.mxu0 %v14277_v57  ;;  %10378 = vmatmul.mubr.f32.gmra.mxu1 %v14280_v17 }
 0x479   : > { %v5191_v0 = vadd.f32 %v14225_v18, %v5159_v2  ;;  %v5297_v45 = vrot.slane %v14273_v30, 1  ;;  %v5704_v8 = vrot.slane %v14273_v30, 2  ;;  %10287 = vmatpush3.msra.mxu0 %v5247_v62  ;;  %10473 = vmatpush3.msra.mxu1 %v6154_v15  ;;  %v5242_v15 = vld [vmem:[#allocation4 + $0x38] sm:$0xff]  ;;  %v6148_v27 = vld [vmem:[#allocation4 + $0x230] sm:$0xff] }
 0x47a   : > { %v5064_v7 = vpop.f32.mrf.mxu1  ;;  %10288 = vmatprep.subr.mxu0 %v5246_v61  ;;  %10474 = vmatprep.subr.mxu1 %v6153_v46 }
 0x47b   : > { %v14287_v56 = vmax.f32 %v5191_v0, 0.0  ;;  %v5160_v25 = vadd.f32 %v5064_v7, %v14166_v29  ;;  %v14291_v37 = vsel %vm407_vm0, %v5295_v22, %v5297_v45  ;;  %v14294_v63 = vsel %vm945_vm1, %v5702_v6, %v5704_v8  ;;  %10289 = vmatpush3.msra.mxu0 %v5246_v61  ;;  %10475 = vmatpush3.msra.mxu1 %v6153_v46  ;;  %v5241_v46 = vld [vmem:[#allocation4 + $0x30] sm:$0xff] }
 0x47c   : > { %v10166_v9 = vpop.f32.mrf.mxu1  ;;  %10256 = vmatprep.mubr.f32.mxu0 %v14291_v37  ;;  %10380 = vmatprep.mubr.f32.mxu1 %v14294_v63 }
 0x47d   : > { %v5192_v53 = vadd.f32 %v14225_v18, %v5160_v25  ;;  %v5299_v40 = vrot.slane %v14287_v56, 1  ;;  %v5706_v29 = vrot.slane %v14287_v56, 2  ;;  %10290 = vmatprep.subr.mxu0 %v5245_v14  ;;  %10476 = vmatprep.subr.mxu1 %v6152_v44  ;;  %v5240_v9 = vld [vmem:[#allocation4 + $0x28] sm:$0xff] }
 0x47e   : > { %v5069_v59 = vpop.f32.mrf.mxu1  ;;  %10291 = vmatpush3.msra.mxu0 %v5245_v14  ;;  %10477 = vmatpush3.msra.mxu1 %v6152_v44 }
 0x47f   : > { %v14301_v11 = vmax.f32 %v5192_v53, 0.0  ;;  %v5161_v24 = vadd.f32 %v5069_v59, %v14169_v36  ;;  %v14305_v12 = vsel %vm407_vm0, %v5297_v45, %v5299_v40  ;;  %v14308_v19 = vsel %vm945_vm1, %v5704_v8, %v5706_v29  ;;  %10292 = vmatprep.subr.mxu0 %v5244_v39  ;;  %10478 = vmatprep.subr.mxu1 %v6151_v3  ;;  %v5239_v59 = vld [vmem:[#allocation4 + $0x20] sm:$0xff] }
 0x480   : > { %v10169_v41 = vpop.f32.mrf.mxu1  ;;  %10257 = vmatmul.mubr.f32.gmra.mxu0 %v14305_v12  ;;  %10381 = vmatmul.mubr.f32.gmra.mxu1 %v14308_v19 }
 0x481   : > { %v5193_v20 = vadd.f32 %v14225_v18, %v5161_v24  ;;  %v5301_v28 = vrot.slane %v14301_v11, 1  ;;  %v5708_v36 = vrot.slane %v14301_v11, 2  ;;  %10293 = vmatpush3.msra.mxu0 %v5244_v39  ;;  %10479 = vmatpush3.msra.mxu1 %v6151_v3  ;;  %v6147_v39 = vld [vmem:[#allocation4 + $0x228] sm:$0xff]  ;;  %v6146_v24 = vld [vmem:[#allocation4 + $0x220] sm:$0xff] }
 0x482   : > { %v5074_v62 = vpop.f32.mrf.mxu1  ;;  %10294 = vmatprep.subr.mxu0 %v5243_v26  ;;  %10480 = vmatprep.subr.mxu1 %v6150_v54 }
 0x483   : > { %v14315_v22 = vmax.f32 %v5193_v20, 0.0  ;;  %v5162_v6 = vadd.f32 %v5074_v62, %v14175_v60  ;;  %v14319_v38 = vsel %vm407_vm0, %v5299_v40, %v5301_v28  ;;  %v14322_v2 = vsel %vm945_vm1, %v5706_v29, %v5708_v36  ;;  %10295 = vmatpush3.msra.mxu0 %v5243_v26  ;;  %10481 = vmatpush3.msra.mxu1 %v6150_v54  ;;  %v6145_v62 = vld [vmem:[#allocation4 + $0x218] sm:$0xff] }
 0x484   : > { %v10172_v61 = vpop.f32.mrf.mxu1  ;;  %10259 = vmatprep.mubr.f32.mxu0 %v14319_v38  ;;  %10383 = vmatprep.mubr.f32.mxu1 %v14322_v2 }
 0x485   : > { %v5194_v0 = vadd.f32 %v14225_v18, %v5162_v6  ;;  %v5303_v45 = vrot.slane %v14315_v22, 1  ;;  %v5710_v60 = vrot.slane %v14315_v22, 2  ;;  %10296 = vmatprep.subr.mxu0 %v5242_v15  ;;  %10482 = vmatprep.subr.mxu1 %v6149_v35 }
 0x486   : > { %v5079_v8 = vpop.f32.mrf.mxu1  ;;  %10297 = vmatpush3.msra.mxu0 %v5242_v15  ;;  %10483 = vmatpush3.msra.mxu1 %v6149_v35 }
 0x487   : > { %v14329_v7 = vmax.f32 %v5194_v0, 0.0  ;;  %v5163_v14 = vadd.f32 %v5079_v8, %v14178_v21  ;;  %v14333_v44 = vsel %vm407_vm0, %v5301_v28, %v5303_v45  ;;  %v14336_v25 = vsel %vm945_vm1, %v5708_v36, %v5710_v60  ;;  %10298 = vmatprep.subr.mxu0 %v5241_v46  ;;  %10484 = vmatprep.subr.mxu1 %v6148_v27  ;;  %v5238_v36 = vld [vmem:[#allocation4 + $0x18] sm:$0xff] }
 0x488   : > { %v10175_v3 = vpop.f32.mrf.mxu1  ;;  %10260 = vmatmul.mubr.f32.gmra.mxu0 %v14333_v44  ;;  %10384 = vmatmul.mubr.f32.gmra.mxu1 %v14336_v25 }
 0x489   : > { %v5195_v53 = vadd.f32 %v14225_v18, %v5163_v14  ;;  %v5305_v40 = vrot.slane %v14329_v7, 1  ;;  %v5712_v21 = vrot.slane %v14329_v7, 2  ;;  %10299 = vmatpush3.msra.mxu0 %v5241_v46  ;;  %10485 = vmatpush3.msra.mxu1 %v6148_v27  ;;  %v5236_v3 = vld [vmem:[#allocation4 + $0x8] sm:$0xff] }
 0x48a   : > { %v5084_v29 = vpop.f32.mrf.mxu1  ;;  %10300 = vmatprep.subr.mxu0 %v5240_v9  ;;  %10486 = vmatprep.subr.mxu1 %v6147_v39 }
 0x48b   : > { %v14343_v26 = vmax.f32 %v5195_v53, 0.0  ;;  %v5164_v54 = vadd.f32 %v5084_v29, %v14181_v51  ;;  %v14347_v41 = vsel %vm407_vm0, %v5303_v45, %v5305_v40  ;;  %v14350_v20 = vsel %vm945_vm1, %v5710_v60, %v5712_v21  ;;  %10301 = vmatpush3.msra.mxu0 %v5240_v9  ;;  %10487 = vmatpush3.msra.mxu1 %v6147_v39  ;;  %v5237_v45 = vld [vmem:[#allocation4 + $0x10] sm:$0xff]  ;;  %v6143_v53 = vld [vmem:[#allocation4 + $0x208] sm:$0xff] }
 0x48c   : > { %v10178_v28 = vpop.f32.mrf.mxu1  ;;  %10262 = vmatprep.mubr.f32.mxu0 %v14347_v41  ;;  %10386 = vmatprep.mubr.f32.mxu1 %v14350_v20  ;;  %v6144_v60 = vld [vmem:[#allocation4 + $0x210] sm:$0xff] }
 0x48d   : > { %v5196_v15 = vadd.f32 %v14225_v18, %v5164_v54  ;;  %v5307_v35 = vrot.slane %v14343_v26, 1  ;;  %v5714_v51 = vrot.slane %v14343_v26, 2  ;;  %10302 = vmatprep.subr.mxu0 %v5239_v59  ;;  %10488 = vmatprep.subr.mxu1 %v6146_v24  ;;  %v5235_v54 = vld [vmem:[#allocation4] sm:$0xff] }
 0x48e   : > { %v5089_v6 = vpop.f32.mrf.mxu1  ;;  %10303 = vmatpush3.msra.mxu0 %v5239_v59  ;;  %10489 = vmatpush3.msra.mxu1 %v6146_v24  ;;  %v6142_v28 = vld [vmem:[#allocation4 + $0x200] sm:$0xff] }
 0x48f   : > { %v14357_v61 = vmax.f32 %v5196_v15, 0.0  ;;  %v5165_v46 = vadd.f32 %v5089_v6, %v14184_v42  ;;  %v14361_v27 = vsel %vm407_vm0, %v5305_v40, %v5307_v35  ;;  %v14364_v0 = vsel %vm945_vm1, %v5712_v21, %v5714_v51  ;;  %10304 = vmatprep.subr.mxu0 %v5238_v36  ;;  %10490 = vmatprep.subr.mxu1 %v6145_v62 }
 0x490   : > { %v10181_v8 = vpop.f32.mrf.mxu1  ;;  %10263 = vmatmul.mubr.f32.gmra.mxu0 %v14361_v27  ;;  %10387 = vmatmul.mubr.f32.gmra.mxu1 %v14364_v0 }
 0x491   : > { %v5197_v14 = vadd.f32 %v14225_v18, %v5165_v46  ;;  %v5309_v9 = vrot.slane %v14357_v61, 1  ;;  %v5716_v42 = vrot.slane %v14357_v61, 2  ;;  %10305 = vmatpush3.msra.mxu0 %v5238_v36  ;;  %10491 = vmatpush3.msra.mxu1 %v6145_v62 }
 0x492   : > { %v5094_v39 = vpop.f32.mrf.mxu1  ;;  %10306 = vmatprep.subr.mxu0 %v5237_v45  ;;  %10492 = vmatprep.subr.mxu1 %v6144_v60 }
 0x493   : > { %v14371_v40 = vmax.f32 %v5197_v14, 0.0  ;;  %v5166_v21 = vadd.f32 %v5094_v39, %v14187_v33  ;;  %v14375_v29 = vsel %vm407_vm0, %v5307_v35, %v5309_v9  ;;  %v14378_v59 = vsel %vm945_vm1, %v5714_v51, %v5716_v42  ;;  %10307 = vmatpush3.msra.mxu0 %v5237_v45  ;;  %10493 = vmatpush3.msra.mxu1 %v6144_v60  ;;  %v14394_v45 = vld [vmem:[#allocation4 + $0x1f8] sm:$0xff] }
 0x494   : > { %15610 = vst [vmem:[#allocation72_spill] sm:$0xff] %v14378_v59  ;;  %v10184_v24 = vpop.f32.mrf.mxu1  ;;  %10265 = vmatprep.mubr.f32.mxu0 %v14375_v29  ;;  %10389 = vmatprep.mubr.f32.mxu1 %v14378_v59  ;;  %v14396_v60 = vld [vmem:[#allocation4 + $0x378] sm:$0xff] }
 0x495   : > { %v5198_v36 = vadd.f32 %v14225_v18, %v5166_v21  ;;  %v5311_v62 = vrot.slane %v14371_v40, 1  ;;  %v5718_v33 = vrot.slane %v14371_v40, 2  ;;  %10308 = vmatprep.subr.mxu0 %v5236_v3  ;;  %10494 = vmatprep.subr.mxu1 %v6143_v53 }
 0x496   : > { %v5099_v15 = vpop.f32.mrf.mxu1  ;;  %10309 = vmatpush3.msra.mxu0 %v5236_v3  ;;  %10495 = vmatpush3.msra.mxu1 %v6143_v53 }
 0x497   : > { %v14385_v35 = vmax.f32 %v5198_v36, 0.0  ;;  %v5167_v51 = vadd.f32 %v5099_v15, %v14190_v43  ;;  %v14389_v6 = vsel %vm407_vm0, %v5309_v9, %v5311_v62  ;;  %v14392_v46 = vsel %vm945_vm1, %v5716_v42, %v5718_v33  ;;  %10310 = vmatprep.subr.mxu0 %v5235_v54  ;;  %10496 = vmatprep.subr.mxu1 %v6142_v28 }
 0x498   : > { %15611 = vst [vmem:[#allocation51_spill] sm:$0xff] %v14392_v46  ;;  %v10187_v8 = vpop.f32.mrf.mxu1  ;;  %10266 = vmatmul.mubr.f32.gmra.mxu0 %v14389_v6  ;;  %10390 = vmatmul.mubr.f32.gmra.mxu1 %v14392_v46 }
 0x499   : > { %v5199_v14 = vadd.f32 %v14225_v18, %v5167_v51  ;;  %v5313_v43 = vrot.slane %v14385_v35, 1  ;;  %v5720_v9 = vrot.slane %v14385_v35, 2  ;;  %10311 = vmatpush3.msra.mxu0 %v5235_v54  ;;  %10497 = vmatpush3.msra.mxu1 %v6142_v28 }
 0x49a   : > { %v5104_v42 = vpop.f32.mrf.mxu1  ;;  %10404 = vmatprep.subr.mxu0 %v14394_v45  ;;  %10590 = vmatprep.subr.mxu1 %v14396_v60 }
 0x49b   : > { %v14405_v39 = vmax.f32 %v5199_v14, 0.0  ;;  %v5168_v3 = vadd.f32 %v5104_v42, %v14193_v34  ;;  %v14409_v53 = vsel %vm407_vm0, %v5311_v62, %v5313_v43  ;;  %v14412_v21 = vsel %vm945_vm1, %v5718_v33, %v5720_v9 }
 0x49c   : > { %15612 = vst [vmem:[#allocation53_spill] sm:$0xff] %v14412_v21  ;;  %v10190_v24 = vpop.f32.mrf.mxu1  ;;  %10268 = vmatprep.mubr.f32.mxu0 %v14409_v53  ;;  %10392 = vmatprep.mubr.f32.mxu1 %v14412_v21 }
 0x49d   : > { %v5200_v54 = vadd.f32 %v14225_v18, %v5168_v3  ;;  %v5315_v28 = vrot.slane %v14405_v39, 1  ;;  %v5722_v36 = vrot.slane %v14405_v39, 2 }
 0x49e   : > { %v5109_v15 = vpop.f32.mrf.mxu1 }
 0x49f   : > { %v14419_v51 = vmax.f32 %v5200_v54, 0.0  ;;  %v5169_v34 = vadd.f32 %v5109_v15, %v14196_v31  ;;  %v14423_v62 = vsel %vm407_vm0, %v5313_v43, %v5315_v28  ;;  %v14426_v33 = vsel %vm945_vm1, %v5720_v9, %v5722_v36 }
 0x4a0   : > { %15613 = vst [vmem:[#allocation55_spill] sm:$0xff] %v14426_v33  ;;  %v10193_v8 = vpop.f32.mrf.mxu1  ;;  %10269 = vmatmul.mubr.f32.gmra.mxu0 %v14423_v62  ;;  %10393 = vmatmul.mubr.f32.gmra.mxu1 %v14426_v33 }
 0x4a1   : > { %v5201_v14 = vadd.f32 %v14225_v18, %v5169_v34  ;;  %v5317_v42 = vrot.slane %v14419_v51, 1  ;;  %v5724_v3 = vrot.slane %v14419_v51, 2 }
 0x4a2   : > { %v5114_v24 = vpop.f32.mrf.mxu1 }
 0x4a3   : > { %v14433_v54 = vmax.f32 %v5201_v14, 0.0  ;;  %v5170_v31 = vadd.f32 %v5114_v24, %v14199_v47  ;;  %v14437_v43 = vsel %vm407_vm0, %v5315_v28, %v5317_v42  ;;  %v14440_v9 = vsel %vm945_vm1, %v5722_v36, %v5724_v3 }
 0x4a4   : > { %15614 = vst [vmem:[#allocation68_spill] sm:$0xff] %v14440_v9  ;;  %v10196_v15 = vpop.f32.mrf.mxu1  ;;  %10271 = vmatprep.mubr.f32.mxu0 %v14437_v43  ;;  %10395 = vmatprep.mubr.f32.mxu1 %v14440_v9 }
 0x4a5   : > { %v5202_v34 = vadd.f32 %v14225_v18, %v5170_v31  ;;  %v5319_v8 = vrot.slane %v14433_v54, 1  ;;  %v5726_v14 = vrot.slane %v14433_v54, 2 }
 0x4a6   : > { %v5119_v33 = vpop.f32.mrf.mxu1 }
 0x4a7   : > { %v14447_v21 = vmax.f32 %v5202_v34, 0.0  ;;  %v5171_v47 = vadd.f32 %v5119_v33, %v14202_v52  ;;  %v14451_v28 = vsel %vm407_vm0, %v5317_v42, %v5319_v8  ;;  %v14454_v36 = vsel %vm945_vm1, %v5724_v3, %v5726_v14 }
 0x4a8   : > { %15615 = vst [vmem:[#allocation70_spill] sm:$0xff] %v14454_v36  ;;  %v10199_v24 = vpop.f32.mrf.mxu1  ;;  %10272 = vmatmul.mubr.f32.gmra.mxu0 %v14451_v28  ;;  %10396 = vmatmul.mubr.f32.gmra.mxu1 %v14454_v36 }
 0x4a9   : > { %v5203_v31 = vadd.f32 %v14225_v18, %v5171_v47  ;;  %v5321_v15 = vrot.slane %v14447_v21, 1  ;;  %v5728_v34 = vrot.slane %v14447_v21, 2 }
 0x4aa   : > { %v5124_v9 = vpop.f32.mrf.mxu1 }
 0x4ab   : > { %v14461_v46 = vmax.f32 %v5203_v31, 0.0  ;;  %v5172_v52 = vadd.f32 %v5124_v9, %v14205_v48  ;;  %v14465_v33 = vsel %vm407_vm0, %v5319_v8, %v5321_v15  ;;  %v14468_v42 = vsel %vm945_vm1, %v5726_v14, %v5728_v34 }
 0x4ac   : > { %15616 = vst [vmem:[#allocation39_spill] sm:$0xff] %v14468_v42  ;;  %v10202_v3 = vpop.f32.mrf.mxu1  ;;  %10274 = vmatprep.mubr.f32.mxu0 %v14465_v33  ;;  %10398 = vmatprep.mubr.f32.mxu1 %v14468_v42 }
 0x4ad   : > { %v5204_v47 = vadd.f32 %v14225_v18, %v5172_v52  ;;  %v5323_v24 = vrot.slane %v14461_v46, 1  ;;  %v5730_v31 = vrot.slane %v14461_v46, 2 }
 0x4ae   : > { %v5129_v36 = vpop.f32.mrf.mxu1 }
 0x4af   : > { %v14475_v59 = vmax.f32 %v5204_v47, 0.0  ;;  %v5173_v48 = vadd.f32 %v5129_v36, %v14208_v13  ;;  %v14479_v9 = vsel %vm407_vm0, %v5321_v15, %v5323_v24  ;;  %v14482_v8 = vsel %vm945_vm1, %v5728_v34, %v5730_v31 }
 0x4b0   : > { %15617 = vst [vmem:[#allocation46_spill] sm:$0xff] %v14482_v8  ;;  %v10205_v14 = vpop.f32.mrf.mxu1  ;;  %10275 = vmatmul.mubr.f32.gmra.mxu0 %v14479_v9  ;;  %10399 = vmatmul.mubr.f32.gmra.mxu1 %v14482_v8 }
 0x4b1   : > { %v5205_v52 = vadd.f32 %v14225_v18, %v5173_v48  ;;  %v5325_v3 = vrot.slane %v14475_v59, 1  ;;  %v5732_v47 = vrot.slane %v14475_v59, 2 }
 0x4b2   : > { %v14489_v42 = vpop.f32.mrf.mxu1 }
 0x4b3   : > { %v14491_v13 = vmax.f32 %v5205_v52, 0.0  ;;  %v14494_v36 = vsel %vm407_vm0, %v5323_v24, %v5325_v3  ;;  %v14497_v15 = vsel %vm945_vm1, %v5730_v31, %v5732_v47 }
 0x4b4   : > { %15618 = vst [vmem:[#allocation48_spill] sm:$0xff] %v14497_v15  ;;  %v10208_v34 = vpop.f32.mrf.mxu1  ;;  %10277 = vmatprep.mubr.f32.mxu0 %v14494_v36  ;;  %10401 = vmatprep.mubr.f32.mxu1 %v14497_v15 }
 0x4b5   : > { %v15318_v48 = vrot.slane %v14491_v13, 1  ;;  %v5734_v14 = vrot.slane %v14491_v13, 2 }
 0x4b6   : > { %v14503_v8 = vpop.f32.mrf.mxu1 }
 0x4b7   : > { %v14508_v52 = vsel %vm407_vm0, %v5325_v3, %v15318_v48  ;;  %v14513_v24 = vsel %vm945_vm1, %v5732_v47, %v5734_v14  ;;  %v5955_v3 = vld [vmem:[#allocation4 + $0x1f0] sm:$0xff] }
 0x4b8   : > { %v10211_v31 = vpop.f32.mrf.mxu1  ;;  %10278 = vmatmul.mubr.f32.gmra.mxu0 %v14508_v52  ;;  %10402 = vmatmul.mubr.f32.gmra.mxu1 %v14513_v24 }
 0x4b9   : > { %10312 = vmatprep.mubr.f32.mxu0 %v14230_v5  ;;  %10498 = vmatprep.mubr.f32.mxu1 %v14263_v1  ;;  %v5954_v5 = vld [vmem:[#allocation4 + $0x1e8] sm:$0xff] }
 0x4ba   : > { %v5144_v34 = vpop.f32.mrf.mxu1  ;;  %v5950_v31 = vld [vmem:[#allocation4 + $0x1c8] sm:$0xff] }
 0x4bb   : > { %v14520_v15 = vadd.f32 %v5144_v34, %v14217_v55  ;;  %v6569_v34 = vld [vmem:[#allocation4 + $0x358] sm:$0xff] }
 0x4bc   : > { %v10214_v48 = vpop.f32.mrf.mxu1  ;;  %10313 = vmatmul.mubr.f32.vlgmr.msra.gmra.mxu0 %v14233_v32  ;;  %10499 = vmatmul.mubr.f32.vlgmr.msra.gmra.mxu1 %v14277_v57  ;;  %v5953_v32 = vld [vmem:[#allocation4 + $0x1e0] sm:$0xff]  ;;  %v6572_v57 = vld [vmem:[#allocation4 + $0x370] sm:$0xff] }
 0x4bd   : > { %10315 = vmatprep.mubr.f32.mxu0 %v14241_v50  ;;  %10405 = vmatpush3.msra.mxu0 %v14394_v45  ;;  %v5952_v45 = vld [vmem:[#allocation4 + $0x1d8] sm:$0xff]  ;;  %v6570_v48 = vld [vmem:[#allocation4 + $0x360] sm:$0xff] }
 0x4be   : > { %10501 = vmatprep.mubr.f32.mxu1 %v14291_v37  ;;  %v5149_v47 = vpop.f32.mrf.mxu1  ;;  %10406 = vmatprep.subr.mxu0 %v5955_v3 }
 0x4bf   : > { %v14528_v1 = vadd.f32 %v5149_v47, %v14220_v23  ;;  %10407 = vmatpush3.msra.mxu0 %v5955_v3  ;;  %10591 = vmatpush3.msra.mxu1 %v14396_v60  ;;  %v6571_v23 = vld [vmem:[#allocation4 + $0x368] sm:$0xff]  ;;  %v5951_v60 = vld [vmem:[#allocation4 + $0x1d0] sm:$0xff]  ;;  %v5949_v3 = vld [vmem:[#allocation4 + $0x1c0] sm:$0xff] }
 0x4c0   : > { %v10217_v55 = vpop.f32.mrf.mxu1  ;;  %10316 = vmatmul.mubr.f32.gmra.mxu0 %v14249_v58  ;;  %10502 = vmatmul.mubr.f32.gmra.mxu1 %v14305_v12  ;;  %v6568_v47 = vld [vmem:[#allocation4 + $0x350] sm:$0xff] }
 0x4c1   : > { %10318 = vmatprep.mubr.f32.mxu0 %v14259_v16  ;;  %10408 = vmatprep.subr.mxu0 %v5954_v5  ;;  %v6567_v55 = vld [vmem:[#allocation4 + $0x348] sm:$0xff] }
 0x4c2   : > { %10504 = vmatprep.mubr.f32.mxu1 %v14319_v38  ;;  %10409 = vmatpush3.msra.mxu0 %v5954_v5  ;;  %v5948_v5 = vld [vmem:[#allocation4 + $0x1b8] sm:$0xff] }
 0x4c3   : > { %10410 = vmatprep.subr.mxu0 %v5953_v32  ;;  %10592 = vmatprep.subr.mxu1 %v6572_v57 }
 0x4c4   : > { %10319 = vmatmul.mubr.f32.gmra.mxu0 %v14273_v30  ;;  %10505 = vmatmul.mubr.f32.gmra.mxu1 %v14333_v44 }
 0x4c5   : > { %10321 = vmatprep.mubr.f32.mxu0 %v14287_v56  ;;  %10411 = vmatpush3.msra.mxu0 %v5953_v32  ;;  %v6566_v32 = vld [vmem:[#allocation4 + $0x340] sm:$0xff] }
 0x4c6   : > { %10507 = vmatprep.mubr.f32.mxu1 %v14347_v41  ;;  %10412 = vmatprep.subr.mxu0 %v5952_v45 }
 0x4c7   : > { %10413 = vmatpush3.msra.mxu0 %v5952_v45  ;;  %10593 = vmatpush3.msra.mxu1 %v6572_v57  ;;  %v5947_v57 = vld [vmem:[#allocation4 + $0x1b0] sm:$0xff]  ;;  %v5174_v45 = vadd.f32 %v14489_v42, %v14211_v49  ;;  %v5945_v42 = vld [vmem:[#allocation4 + $0x1a0] sm:$0xff] }
 0x4c8   : > { %10322 = vmatmul.mubr.f32.gmra.mxu0 %v14301_v11  ;;  %10508 = vmatmul.mubr.f32.gmra.mxu1 %v14361_v27  ;;  %v6564_v49 = vld [vmem:[#allocation4 + $0x330] sm:$0xff] }
 0x4c9   : > { %10594 = vmatprep.subr.mxu1 %v6571_v23  ;;  %10324 = vmatprep.mubr.f32.mxu0 %v14315_v22 }
 0x4ca   : > { %10414 = vmatprep.subr.mxu0 %v5951_v60  ;;  %10510 = vmatprep.mubr.f32.mxu1 %v14375_v29 }
 0x4cb   : > { %10595 = vmatpush3.msra.mxu1 %v6571_v23  ;;  %10415 = vmatpush3.msra.mxu0 %v5951_v60  ;;  %v6565_v23 = vld [vmem:[#allocation4 + $0x338] sm:$0xff]  ;;  %v5946_v60 = vld [vmem:[#allocation4 + $0x1a8] sm:$0xff] }
 0x4cc   : > { %10596 = vmatprep.subr.mxu1 %v6570_v48  ;;  %10416 = vmatprep.subr.mxu0 %v5950_v31 }
 0x4cd   : > { %10597 = vmatpush3.msra.mxu1 %v6570_v48  ;;  %10325 = vmatmul.mubr.f32.gmra.mxu0 %v14329_v7  ;;  %v5206_v48 = vadd.f32 %v14225_v18, %v5174_v45  ;;  %v15619_v45 = vrot.slane %v14491_v13, 1 }
 0x4ce   : > { %10417 = vmatpush3.msra.mxu0 %v5950_v31  ;;  %10511 = vmatmul.mubr.f32.gmra.mxu1 %v14389_v6  ;;  %v5175_v31 = vadd.f32 %v14503_v8, %v14214_v4  ;;  %v5944_v4 = vld [vmem:[#allocation4 + $0x198] sm:$0xff]  ;;  %v6562_v8 = vld [vmem:[#allocation4 + $0x320] sm:$0xff] }
 0x4cf   : > { %10598 = vmatprep.subr.mxu1 %v6569_v34  ;;  %10327 = vmatprep.mubr.f32.mxu0 %v14343_v26 }
 0x4d0   : > { %10513 = vmatprep.mubr.f32.mxu1 %v14409_v53  ;;  %10599 = vmatpush3.msra.mxu1 %v6569_v34  ;;  %v6563_v34 = vld [vmem:[#allocation4 + $0x328] sm:$0xff] }
 0x4d1   : > { %10418 = vmatprep.subr.mxu0 %v5949_v3  ;;  %10600 = vmatprep.subr.mxu1 %v6568_v47 }
 0x4d2   : > { %10419 = vmatpush3.msra.mxu0 %v5949_v3  ;;  %10601 = vmatpush3.msra.mxu1 %v6568_v47  ;;  %v14560_v3 = vmax.f32 %v5206_v48, 0.0  ;;  %v5207_v47 = vadd.f32 %v14225_v18, %v5175_v31  ;;  %v5942_v48 = vld [vmem:[#allocation4 + $0x188] sm:$0xff] }
 0x4d3   : > { %10328 = vmatmul.mubr.f32.gmra.mxu0 %v14357_v61  ;;  %10420 = vmatprep.subr.mxu0 %v5948_v5  ;;  %v6559_v31 = vld [vmem:[#allocation4 + $0x308] sm:$0xff] }
 0x4d4   : > { %10514 = vmatmul.mubr.f32.gmra.mxu1 %v14423_v62  ;;  %10602 = vmatprep.subr.mxu1 %v6567_v55  ;;  %v6160_v18 = vrot.slane %v14560_v3, 1 }
 0x4d5   : > { %10330 = vmatprep.mubr.f32.mxu0 %v14371_v40  ;;  %10421 = vmatpush3.msra.mxu0 %v5948_v5  ;;  %v14566_v5 = vmax.f32 %v5207_v47, 0.0  ;;  %v6366_v47 = vld [vmem:[#allocation4 + $0x2f8] sm:$0xff] }
 0x4d6   : > { %10516 = vmatprep.mubr.f32.mxu1 %v14437_v43  ;;  %10603 = vmatpush3.msra.mxu1 %v6567_v55  ;;  %v6561_v55 = vld [vmem:[#allocation4 + $0x318] sm:$0xff] }
 0x4d7   : > { %10604 = vmatprep.subr.mxu1 %v6566_v32  ;;  %10422 = vmatprep.subr.mxu0 %v5947_v57 }
 0x4d8   : > { %10605 = vmatpush3.msra.mxu1 %v6566_v32  ;;  %10331 = vmatmul.mubr.f32.gmra.mxu0 %v14385_v35  ;;  %v5943_v32 = vld [vmem:[#allocation4 + $0x190] sm:$0xff] }
 0x4d9   : > { %10423 = vmatpush3.msra.mxu0 %v5947_v57  ;;  %10517 = vmatmul.mubr.f32.gmra.mxu1 %v14451_v28  ;;  %v6162_v57 = vrot.slane %v14566_v5, 1 }
 0x4da   : > { %10606 = vmatprep.subr.mxu1 %v6565_v23  ;;  %10333 = vmatprep.mubr.f32.mxu0 %v14405_v39 }
 0x4db   : > { %10424 = vmatprep.subr.mxu0 %v5946_v60  ;;  %10519 = vmatprep.mubr.f32.mxu1 %v14465_v33 }
 0x4dc   : > { %10607 = vmatpush3.msra.mxu1 %v6565_v23  ;;  %10425 = vmatpush3.msra.mxu0 %v5946_v60  ;;  %v14577_v23 = vsel %vm407_vm0, %v15619_v45, %v6160_v18  ;;  %v6560_v60 = vld [vmem:[#allocation4 + $0x310] sm:$0xff]  ;;  %v6977_v45 = vld [vmem:[#allocation4 + $0x448] sm:$0xff] }
 0x4dd   : > { %10608 = vmatprep.subr.mxu1 %v6564_v49  ;;  %10334 = vmatmul.mubr.f32.gmra.mxu0 %v14419_v51 }
 0x4de   : > { %10609 = vmatpush3.msra.mxu1 %v6564_v49  ;;  %10426 = vmatprep.subr.mxu0 %v5945_v42  ;;  %v14584_v49 = vsel %vm407_vm0, %v6160_v18, %v6162_v57  ;;  %v6982_v18 = vld [vmem:[#allocation4 + $0x470] sm:$0xff] }
 0x4df   : > { %10520 = vmatmul.mubr.f32.gmra.mxu1 %v14479_v9  ;;  %10610 = vmatprep.subr.mxu1 %v6563_v34 }
 0x4e0   : > { %10336 = vmatprep.mubr.f32.mxu0 %v14433_v54  ;;  %10427 = vmatpush3.msra.mxu0 %v5945_v42  ;;  %v5941_v42 = vld [vmem:[#allocation4 + $0x180] sm:$0xff] }
 0x4e1   : > { %10522 = vmatprep.mubr.f32.mxu1 %v14494_v36  ;;  %10611 = vmatpush3.msra.mxu1 %v6563_v34  ;;  %v6558_v34 = vld [vmem:[#allocation4 + $0x300] sm:$0xff] }
 0x4e2   : > { %10428 = vmatprep.subr.mxu0 %v5944_v4  ;;  %10612 = vmatprep.subr.mxu1 %v6562_v8 }
 0x4e3   : > { %10429 = vmatpush3.msra.mxu0 %v5944_v4  ;;  %10613 = vmatpush3.msra.mxu1 %v6562_v8  ;;  %v6365_v4 = vld [vmem:[#allocation4 + $0x2f0] sm:$0xff]  ;;  %v6983_v8 = vld [vmem:[#allocation4 + $0x478] sm:$0xff] }
 0x4e4   : > { %10337 = vmatmul.mubr.f32.gmra.mxu0 %v14447_v21  ;;  %10523 = vmatmul.mubr.f32.gmra.mxu1 %v14508_v52 }
 0x4e5   : > { %10614 = vmatprep.subr.mxu1 %v6561_v55  ;;  %10339 = vmatprep.mubr.f32.mxu0 %v14461_v46 }
 0x4e6   : > { %10430 = vmatprep.subr.mxu0 %v5943_v32  ;;  %10525 = vmatprep.mubr.f32.mxu1 %v14577_v23 }
 0x4e7   : > { %10615 = vmatpush3.msra.mxu1 %v6561_v55  ;;  %10431 = vmatpush3.msra.mxu0 %v5943_v32  ;;  %v6360_v55 = vld [vmem:[#allocation4 + $0x2c8] sm:$0xff]  ;;  %v6978_v32 = vld [vmem:[#allocation4 + $0x450] sm:$0xff] }
 0x4e8   : > { %10616 = vmatprep.subr.mxu1 %v6560_v60  ;;  %10432 = vmatprep.subr.mxu0 %v5942_v48 }
 0x4e9   : > { %10617 = vmatpush3.msra.mxu1 %v6560_v60  ;;  %10340 = vmatmul.mubr.f32.gmra.mxu0 %v14475_v59  ;;  %v6357_v60 = vld [vmem:[#allocation4 + $0x2b0] sm:$0xff] }
 0x4ea   : > { %10433 = vmatpush3.msra.mxu0 %v5942_v48  ;;  %10526 = vmatmul.mubr.f32.gmra.mxu1 %v14584_v49  ;;  %v6356_v48 = vld [vmem:[#allocation4 + $0x2a8] sm:$0xff] }
 0x4eb   : > { %10618 = vmatprep.subr.mxu1 %v6559_v31  ;;  %10436 = vmatprep.mubr.f32.mxu0 %v14241_v50  ;;  %v6364_v50 = vld [vmem:[#allocation4 + $0x2e8] sm:$0xff] }
 0x4ec   : > { %10619 = vmatpush3.msra.mxu1 %v6559_v31  ;;  %10622 = vmatprep.mubr.f32.mxu1 %v14259_v16  ;;  %v6973_v31 = vld [vmem:[#allocation4 + $0x428] sm:$0xff] }
 0x4ed   : > { %10434 = vmatprep.subr.mxu0 %v5941_v42  ;;  %10620 = vmatprep.subr.mxu1 %v6558_v34 }
 0x4ee   : > { %10435 = vmatpush3.msra.mxu0 %v5941_v42  ;;  %10621 = vmatpush3.msra.mxu1 %v6558_v34  ;;  %v6972_v42 = vld [vmem:[#allocation4 + $0x420] sm:$0xff]  ;;  %v6353_v34 = vld [vmem:[#allocation4 + $0x290] sm:$0xff] }
 0x4ef   : > { %10437 = vmatmul.mubr.f32.vlgmr.msra.gmra.mxu0 %v14249_v58  ;;  %10528 = vmatprep.subr.mxu0 %v6366_v47  ;;  %v6363_v58 = vld [vmem:[#allocation4 + $0x2e0] sm:$0xff] }
 0x4f0   : > { %10623 = vmatmul.mubr.f32.vlgmr.msra.gmra.mxu1 %v14273_v30  ;;  %10439 = vmatprep.mubr.f32.mxu0 %v14259_v16  ;;  %v6362_v16 = vld [vmem:[#allocation4 + $0x2d8] sm:$0xff] }
 0x4f1   : > { %10529 = vmatpush3.msra.mxu0 %v6366_v47  ;;  %10625 = vmatprep.mubr.f32.mxu1 %v14287_v56 }
 0x4f2   : > { %10530 = vmatprep.subr.mxu0 %v6365_v4  ;;  %10714 = vmatprep.subr.mxu1 %v6983_v8 }
 0x4f3   : > { %10440 = vmatmul.mubr.f32.gmra.mxu0 %v14273_v30  ;;  %10715 = vmatpush3.msra.mxu1 %v6983_v8  ;;  %v6981_v30 = vld [vmem:[#allocation4 + $0x468] sm:$0xff] }
 0x4f4   : > { %10531 = vmatpush3.msra.mxu0 %v6365_v4  ;;  %10626 = vmatmul.mubr.f32.gmra.mxu1 %v14301_v11  ;;  %v6352_v4 = vld [vmem:[#allocation4 + $0x288] sm:$0xff] }
 0x4f5   : > { %10442 = vmatprep.mubr.f32.mxu0 %v14287_v56  ;;  %10532 = vmatprep.subr.mxu0 %v6364_v50  ;;  %v6361_v56 = vld [vmem:[#allocation4 + $0x2d0] sm:$0xff] }
 0x4f6   : > { %10628 = vmatprep.mubr.f32.mxu1 %v14315_v22  ;;  %10533 = vmatpush3.msra.mxu0 %v6364_v50  ;;  %v6969_v50 = vld [vmem:[#allocation4 + $0x408] sm:$0xff] }
 0x4f7   : > { %10443 = vmatmul.mubr.f32.gmra.mxu0 %v14301_v11  ;;  %10534 = vmatprep.subr.mxu0 %v6363_v58  ;;  %v6980_v11 = vld [vmem:[#allocation4 + $0x460] sm:$0xff] }
 0x4f8   : > { %10629 = vmatmul.mubr.f32.gmra.mxu1 %v14329_v7  ;;  %10445 = vmatprep.mubr.f32.mxu0 %v14315_v22  ;;  %v6979_v22 = vld [vmem:[#allocation4 + $0x458] sm:$0xff] }
 0x4f9   : > { %10535 = vmatpush3.msra.mxu0 %v6363_v58  ;;  %10631 = vmatprep.mubr.f32.mxu1 %v14343_v26  ;;  %v6774_v58 = vld [vmem:[#allocation4 + $0x3f8] sm:$0xff] }
 0x4fa   : > { %10536 = vmatprep.subr.mxu0 %v6362_v16  ;;  %10716 = vmatprep.subr.mxu1 %v6982_v18 }
 0x4fb   : > { %10537 = vmatpush3.msra.mxu0 %v6362_v16  ;;  %10717 = vmatpush3.msra.mxu1 %v6982_v18  ;;  %v6773_v16 = vld [vmem:[#allocation4 + $0x3f0] sm:$0xff]  ;;  %v6771_v18 = vld [vmem:[#allocation4 + $0x3e0] sm:$0xff] }
 0x4fc   : > { %10446 = vmatmul.mubr.f32.gmra.mxu0 %v14329_v7  ;;  %10632 = vmatmul.mubr.f32.gmra.mxu1 %v14357_v61  ;;  %v6359_v7 = vld [vmem:[#allocation4 + $0x2c0] sm:$0xff] }
 0x4fd   : > { %10718 = vmatprep.subr.mxu1 %v6981_v30  ;;  %10448 = vmatprep.mubr.f32.mxu0 %v14343_v26  ;;  %v6358_v26 = vld [vmem:[#allocation4 + $0x2b8] sm:$0xff] }
 0x4fe   : > { %10538 = vmatprep.subr.mxu0 %v6361_v56  ;;  %10634 = vmatprep.mubr.f32.mxu1 %v14371_v40 }
 0x4ff   : > { %10719 = vmatpush3.msra.mxu1 %v6981_v30  ;;  %10539 = vmatpush3.msra.mxu0 %v6361_v56  ;;  %v6768_v30 = vld [vmem:[#allocation4 + $0x3c8] sm:$0xff]  ;;  %v6767_v56 = vld [vmem:[#allocation4 + $0x3c0] sm:$0xff] }
 0x500   : > { %10720 = vmatprep.subr.mxu1 %v6980_v11  ;;  %10540 = vmatprep.subr.mxu0 %v6360_v55 }
 0x501   : > { %10721 = vmatpush3.msra.mxu1 %v6980_v11  ;;  %10449 = vmatmul.mubr.f32.gmra.mxu0 %v14357_v61  ;;  %v6976_v61 = vld [vmem:[#allocation4 + $0x440] sm:$0xff]  ;;  %v6766_v11 = vld [vmem:[#allocation4 + $0x3b8] sm:$0xff] }
 0x502   : > { %10541 = vmatpush3.msra.mxu0 %v6360_v55  ;;  %10635 = vmatmul.mubr.f32.gmra.mxu1 %v14385_v35  ;;  %v6765_v55 = vld [vmem:[#allocation4 + $0x3b0] sm:$0xff] }
 0x503   : > { %10722 = vmatprep.subr.mxu1 %v6979_v22  ;;  %10451 = vmatprep.mubr.f32.mxu0 %v14371_v40  ;;  %v6975_v40 = vld [vmem:[#allocation4 + $0x438] sm:$0xff] }
 0x504   : > { %10637 = vmatprep.mubr.f32.mxu1 %v14405_v39  ;;  %10723 = vmatpush3.msra.mxu1 %v6979_v22  ;;  %v15625_v22 = vld [vmem:[#allocation70_spill] sm:$0xff] }
 0x505   : > { %10542 = vmatprep.subr.mxu0 %v6359_v7  ;;  %10724 = vmatprep.subr.mxu1 %v6978_v32 }
 0x506   : > { %10543 = vmatpush3.msra.mxu0 %v6359_v7  ;;  %10725 = vmatpush3.msra.mxu1 %v6978_v32  ;;  %v15626_v7 = vld [vmem:[#allocation39_spill] sm:$0xff]  ;;  %v6764_v32 = vld [vmem:[#allocation4 + $0x3a8] sm:$0xff] }
 0x507   : > { %10452 = vmatmul.mubr.f32.gmra.mxu0 %v14385_v35  ;;  %10544 = vmatprep.subr.mxu0 %v6358_v26  ;;  %v6974_v35 = vld [vmem:[#allocation4 + $0x430] sm:$0xff] }
 0x508   : > { %10638 = vmatmul.mubr.f32.gmra.mxu1 %v14419_v51  ;;  %10726 = vmatprep.subr.mxu1 %v6977_v45 }
 0x509   : > { %10454 = vmatprep.mubr.f32.mxu0 %v14405_v39  ;;  %10545 = vmatpush3.msra.mxu0 %v6358_v26  ;;  %v6355_v39 = vld [vmem:[#allocation4 + $0x2a0] sm:$0xff] }
 0x50a   : > { %10640 = vmatprep.mubr.f32.mxu1 %v14433_v54  ;;  %10727 = vmatpush3.msra.mxu1 %v6977_v45  ;;  %v15627_v45 = vld [vmem:[#allocation46_spill] sm:$0xff] }
 0x50b   : > { %10728 = vmatprep.subr.mxu1 %v6976_v61  ;;  %10546 = vmatprep.subr.mxu0 %v6357_v60 }
 0x50c   : > { %10729 = vmatpush3.msra.mxu1 %v6976_v61  ;;  %10455 = vmatmul.mubr.f32.gmra.mxu0 %v14419_v51  ;;  %v6354_v51 = vld [vmem:[#allocation4 + $0x298] sm:$0xff]  ;;  %v6763_v61 = vld [vmem:[#allocation4 + $0x3a0] sm:$0xff] }
 0x50d   : > { %10547 = vmatpush3.msra.mxu0 %v6357_v60  ;;  %10641 = vmatmul.mubr.f32.gmra.mxu1 %v14447_v21  ;;  %v6367_v60 = vrot.slane %v14560_v3, 2 }
 0x50e   : > { %10730 = vmatprep.subr.mxu1 %v6975_v40  ;;  %10457 = vmatprep.mubr.f32.mxu0 %v14433_v54  ;;  %v6971_v54 = vld [vmem:[#allocation4 + $0x418] sm:$0xff] }
 0x50f   : > { %10548 = vmatprep.subr.mxu0 %v6356_v48  ;;  %10643 = vmatprep.mubr.f32.mxu1 %v14461_v46 }
 0x510   : > { %10731 = vmatpush3.msra.mxu1 %v6975_v40  ;;  %10549 = vmatpush3.msra.mxu0 %v6356_v48  ;;  %v15628_v40 = vld [vmem:[#allocation48_spill] sm:$0xff]  ;;  %v6369_v48 = vrot.slane %v14566_v5, 2 }
 0x511   : > { %10732 = vmatprep.subr.mxu1 %v6974_v35  ;;  %10458 = vmatmul.mubr.f32.gmra.mxu0 %v14447_v21  ;;  %v14624_v21 = vld [vmem:[%s15232_s4] ss:$0 sm:$0xff] }
 0x512   : > { %10733 = vmatpush3.msra.mxu1 %v6974_v35  ;;  %10550 = vmatprep.subr.mxu0 %v6355_v39  ;;  %v5208_v47 = vadd.f32 %v14624_v21, %v14520_v15  ;;  %v6968_v15 = vld [vmem:[#allocation4 + $0x400] sm:$0xff]  ;;  %v14664_v26 = vadd.f32 %v14624_v21, %v14528_v1  ;;  %v6762_v1 = vld [vmem:[#allocation4 + $0x398] sm:$0xff] }
 0x513   : > { %10644 = vmatmul.mubr.f32.gmra.mxu1 %v14475_v59  ;;  %10734 = vmatprep.subr.mxu1 %v6973_v31 }
 0x514   : > { %10460 = vmatprep.mubr.f32.mxu0 %v14461_v46  ;;  %10551 = vmatpush3.msra.mxu0 %v6355_v39  ;;  %v6970_v46 = vld [vmem:[#allocation4 + $0x410] sm:$0xff]  ;;  %v14632_v8 = vmax.f32 %v5208_v47, 0.0  ;;  %v5234_v35 = vmax.f32 %v14664_v26, 0.0 }
 0x515   : > { %10646 = vmatprep.mubr.f32.mxu1 %v14491_v13  ;;  %10735 = vmatpush3.msra.mxu1 %v6973_v31 }
 0x516   : > { %10552 = vmatprep.subr.mxu0 %v6354_v51  ;;  %10736 = vmatprep.subr.mxu1 %v6972_v42  ;;  %v6984_v39 = vrot.slane %v14632_v8, 2 }
 0x517   : > { %10553 = vmatpush3.msra.mxu0 %v6354_v51  ;;  %10737 = vmatpush3.msra.mxu1 %v6972_v42  ;;  %v6761_v42 = vld [vmem:[#allocation4 + $0x390] sm:$0xff] }
 0x518   : > { %10461 = vmatmul.mubr.f32.gmra.mxu0 %v14475_v59  ;;  %10647 = vmatmul.mubr.f32.gmra.mxu1 %v14560_v3  ;;  %v6351_v59 = vld [vmem:[#allocation4 + $0x280] sm:$0xff] }
 0x519   : > { %10738 = vmatprep.subr.mxu1 %v6971_v54  ;;  %10463 = vmatprep.mubr.f32.mxu0 %v14491_v13  ;;  %v6760_v13 = vld [vmem:[#allocation4 + $0x388] sm:$0xff] }
 0x51a   : > { %10554 = vmatprep.subr.mxu0 %v6353_v34  ;;  %10649 = vmatprep.mubr.f32.mxu1 %v14566_v5 }
 0x51b   : > { %10739 = vmatpush3.msra.mxu1 %v6971_v54  ;;  %10555 = vmatpush3.msra.mxu0 %v6353_v34  ;;  %v6986_v54 = vrot.slane %v5234_v35, 2  ;;  %v6370_v34 = vsel %vm945_vm1, %v6367_v60, %v6369_v48 }
 0x51c   : > { %10740 = vmatprep.subr.mxu1 %v6970_v46  ;;  %10556 = vmatprep.subr.mxu0 %v6352_v4 }
 0x51d   : > { %10741 = vmatpush3.msra.mxu1 %v6970_v46  ;;  %10464 = vmatmul.mubr.f32.gmra.mxu0 %v14560_v3  ;;  %v6368_v3 = vsel %vm945_vm1, %v5734_v14, %v6367_v60  ;;  %v6985_v14 = vsel %vm945_vm1, %v6369_v48, %v6984_v39  ;;  %v6987_v46 = vsel %vm945_vm1, %v6984_v39, %v6986_v54 }
 0x51e   : > { %10557 = vmatpush3.msra.mxu0 %v6352_v4  ;;  %10650 = vmatmul.mubr.f32.gmra.mxu1 %v14632_v8  ;;  %v6759_v4 = vld [vmem:[#allocation4 + $0x380] sm:$0xff] }
 0x51f   : > { %10742 = vmatprep.subr.mxu1 %v6969_v50  ;;  %10560 = vmatprep.mubr.f32.mxu0 %v14266_v10  ;;  %v6772_v10 = vld [vmem:[#allocation4 + $0x3e8] sm:$0xff] }
 0x520   : > { %10743 = vmatpush3.msra.mxu1 %v6969_v50  ;;  %10746 = vmatprep.mubr.f32.mxu1 %v14294_v63 }
 0x521   : > { %10558 = vmatprep.subr.mxu0 %v6351_v59  ;;  %10744 = vmatprep.subr.mxu1 %v6968_v15 }
 0x522   : > { %10559 = vmatpush3.msra.mxu0 %v6351_v59  ;;  %10745 = vmatpush3.msra.mxu1 %v6968_v15 }
 0x523   : > { %10561 = vmatmul.mubr.f32.vlgmr.msra.gmra.mxu0 %v14280_v17  ;;  %10652 = vmatprep.subr.mxu0 %v6774_v58  ;;  %v6770_v17 = vld [vmem:[#allocation4 + $0x3d8] sm:$0xff] }
 0x524   : > { %10747 = vmatmul.mubr.f32.vlgmr.msra.gmra.mxu1 %v14308_v19  ;;  %10563 = vmatprep.mubr.f32.mxu0 %v14294_v63  ;;  %v15620_v63 = vld [vmem:[#allocation72_spill] sm:$0xff] }
 0x525   : > { %10653 = vmatpush3.msra.mxu0 %v6774_v58  ;;  %10749 = vmatprep.mubr.f32.mxu1 %v14322_v2 }
 0x526   : > { %10654 = vmatprep.subr.mxu0 %v6773_v16 }
 0x527   : > { %10564 = vmatmul.mubr.f32.gmra.mxu0 %v14308_v19  ;;  %v6769_v19 = vld [vmem:[#allocation4 + $0x3d0] sm:$0xff] }
 0x528   : > { %10655 = vmatpush3.msra.mxu0 %v6773_v16  ;;  %10750 = vmatmul.mubr.f32.gmra.mxu1 %v14336_v25 }
 0x529   : > { %10566 = vmatprep.mubr.f32.mxu0 %v14322_v2  ;;  %10656 = vmatprep.subr.mxu0 %v6772_v10  ;;  %v15621_v2 = vld [vmem:[#allocation51_spill] sm:$0xff] }
 0x52a   : > { %10752 = vmatprep.mubr.f32.mxu1 %v14350_v20  ;;  %10657 = vmatpush3.msra.mxu0 %v6772_v10 }
 0x52b   : > { %10567 = vmatmul.mubr.f32.gmra.mxu0 %v14336_v25  ;;  %10658 = vmatprep.subr.mxu0 %v6771_v18  ;;  %v15622_v25 = vld [vmem:[#allocation53_spill] sm:$0xff] }
 0x52c   : > { %10753 = vmatmul.mubr.f32.gmra.mxu1 %v14364_v0  ;;  %10569 = vmatprep.mubr.f32.mxu0 %v14350_v20  ;;  %v15623_v20 = vld [vmem:[#allocation55_spill] sm:$0xff] }
 0x52d   : > { %10659 = vmatpush3.msra.mxu0 %v6771_v18  ;;  %10755 = vmatprep.mubr.f32.mxu1 %v15620_v63 }
 0x52e   : > { %10660 = vmatprep.subr.mxu0 %v6770_v17 }
 0x52f   : > { %10661 = vmatpush3.msra.mxu0 %v6770_v17 }
 0x530   : > { %10570 = vmatmul.mubr.f32.gmra.mxu0 %v14364_v0  ;;  %10756 = vmatmul.mubr.f32.gmra.mxu1 %v15621_v2  ;;  %v15624_v0 = vld [vmem:[#allocation68_spill] sm:$0xff]  ;;  %v14680_v31 = vpop.f32.mrf.mxu0  ;;  %v14682_v51 = vpop.f32.mrf.mxu1 }
 0x531   : > { %10572 = vmatprep.mubr.f32.mxu0 %v15620_v63  ;;  %10662 = vmatprep.subr.mxu0 %v6769_v19 }
 0x532   : > { %10758 = vmatprep.mubr.f32.mxu1 %v15622_v25  ;;  %10663 = vmatpush3.msra.mxu0 %v6769_v19  ;;  %v14689_v21 = vpop.f32.mrf.mxu0  ;;  %v14691_v47 = vpop.f32.mrf.mxu1 }
 0x533   : > { %10664 = vmatprep.subr.mxu0 %v6768_v30 }
 0x534   : > { %10573 = vmatmul.mubr.f32.gmra.mxu0 %v15621_v2  ;;  %10759 = vmatmul.mubr.f32.gmra.mxu1 %v15623_v20 }
 0x535   : > { %10665 = vmatpush3.msra.mxu0 %v6768_v30  ;;  %10575 = vmatprep.mubr.f32.mxu0 %v15622_v25 }
 0x536   : > { %10761 = vmatprep.mubr.f32.mxu1 %v15624_v0  ;;  %10666 = vmatprep.subr.mxu0 %v6767_v56 }
 0x537   : > { %10667 = vmatpush3.msra.mxu0 %v6767_v56 }
 0x538   : > { %10576 = vmatmul.mubr.f32.gmra.mxu0 %v15623_v20  ;;  %10668 = vmatprep.subr.mxu0 %v6766_v11  ;;  %v14694_v50 = vpop.f32.mrf.mxu0  ;;  %v14696_v59 = vpop.f32.mrf.mxu1 }
 0x539   : > { %10762 = vmatmul.mubr.f32.gmra.mxu1 %v15625_v22  ;;  %10578 = vmatprep.mubr.f32.mxu0 %v15624_v0 }
 0x53a   : > { %10669 = vmatpush3.msra.mxu0 %v6766_v11  ;;  %10764 = vmatprep.mubr.f32.mxu1 %v15626_v7  ;;  %v14701_v15 = vpop.f32.mrf.mxu1 }
 0x53b   : > { %10670 = vmatprep.subr.mxu0 %v6765_v55 }
 0x53c   : > { %10579 = vmatmul.mubr.f32.gmra.mxu0 %v15625_v22 }
 0x53d   : > { %10671 = vmatpush3.msra.mxu0 %v6765_v55  ;;  %10765 = vmatmul.mubr.f32.gmra.mxu1 %v15627_v45 }
 0x53e   : > { %10581 = vmatprep.mubr.f32.mxu0 %v15626_v7  ;;  %10672 = vmatprep.subr.mxu0 %v6764_v32 }
 0x53f   : > { %10767 = vmatprep.mubr.f32.mxu1 %v15628_v40  ;;  %10673 = vmatpush3.msra.mxu0 %v6764_v32 }
 0x540   : > { %10582 = vmatmul.mubr.f32.gmra.mxu0 %v15627_v45  ;;  %10674 = vmatprep.subr.mxu0 %v6763_v61  ;;  %v14707_v16 = vpop.f32.mrf.mxu1 }
 0x541   : > { %10768 = vmatmul.mubr.f32.gmra.mxu1 %v14513_v24  ;;  %10584 = vmatprep.mubr.f32.mxu0 %v15628_v40 }
 0x542   : > { %10675 = vmatpush3.msra.mxu0 %v6763_v61  ;;  %10770 = vmatprep.mubr.f32.mxu1 %v6368_v3 }
 0x543   : > { %10676 = vmatprep.subr.mxu0 %v6762_v1 }
 0x544   : > { %10677 = vmatpush3.msra.mxu0 %v6762_v1 }
 0x545   : > { %10585 = vmatmul.mubr.f32.gmra.mxu0 %v14513_v24  ;;  %10771 = vmatmul.mubr.f32.gmra.mxu1 %v6370_v34  ;;  %v14699_v24 = vpop.f32.mrf.mxu0 }
 0x546   : > { %10587 = vmatprep.mubr.f32.mxu0 %v6368_v3  ;;  %10678 = vmatprep.subr.mxu0 %v6761_v42 }
 0x547   : > { %10773 = vmatprep.mubr.f32.mxu1 %v6985_v14  ;;  %10679 = vmatpush3.msra.mxu0 %v6761_v42  ;;  %v14705_v58 = vpop.f32.mrf.mxu0 }
 0x548   : > { %10680 = vmatprep.subr.mxu0 %v6760_v13 }
 0x549   : > { %10588 = vmatmul.mubr.f32.gmra.mxu0 %v6370_v34  ;;  %10774 = vmatmul.mubr.f32.gmra.mxu1 %v6987_v46  ;;  %v5435_v10 = vpop.f32.mrf.mxu0 }
 0x54a   : > { %10681 = vmatpush3.msra.mxu0 %v6760_v13  ;;  %10684 = vmatprep.mubr.f32.mxu0 %v14291_v37  ;;  %v14711_v37 = vpop.f32.mrf.mxu1 }
 0x54b   : > { %10682 = vmatprep.subr.mxu0 %v6759_v4  ;;  %v10261_v18 = vpop.f32.mrf.mxu0 }
 0x54c   : > { %10683 = vmatpush3.msra.mxu0 %v6759_v4  ;;  %v14713_v17 = vpop.f32.mrf.mxu1 }
 0x54d   : > { %10685 = vmatmul.mubr.f32.vlgmr.msra.gmra.mxu0 %v14305_v12  ;;  %15629 = vst [vmem:[#allocation50_spill] sm:$0xff] %v14713_v17  ;;  %v5445_v12 = vpop.f32.mrf.mxu0 }
 0x54e   : > { %10687 = vmatprep.mubr.f32.mxu0 %v14319_v38  ;;  %v5852_v38 = vpop.f32.mrf.mxu1 }
 0x550   : > { %v10264_v63 = vpop.f32.mrf.mxu0 }
 0x551   : > { %10688 = vmatmul.mubr.f32.gmra.mxu0 %v14333_v44  ;;  %v14719_v44 = vpop.f32.mrf.mxu1 }
 0x552   : > { %10690 = vmatprep.mubr.f32.mxu0 %v14347_v41  ;;  %v5455_v41 = vpop.f32.mrf.mxu0 }
 0x553   : > { %v5862_v19 = vpop.f32.mrf.mxu1 }
 0x555   : > { %10691 = vmatmul.mubr.f32.gmra.mxu0 %v14361_v27 }
 0x556   : > { %10693 = vmatprep.mubr.f32.mxu0 %v14375_v29 }
 0x558   : > { %v10267_v2 = vpop.f32.mrf.mxu0  ;;  %v14723_v30 = vpop.f32.mrf.mxu1 }
 0x559   : > { %10694 = vmatmul.mubr.f32.gmra.mxu0 %v14389_v6 }
 0x55a   : > { %10696 = vmatprep.mubr.f32.mxu0 %v14409_v53  ;;  %v5465_v27 = vpop.f32.mrf.mxu0  ;;  %v14727_v29 = vpop.f32.mrf.mxu1 }
 0x55d   : > { %10697 = vmatmul.mubr.f32.gmra.mxu0 %v14423_v62  ;;  %v6777_v62 = vrot.slane %v14632_v8, 1 }
 0x55e   : > { %10699 = vmatprep.mubr.f32.mxu0 %v14437_v43 }
 0x560   : > { %v10270_v6 = vpop.f32.mrf.mxu0  ;;  %v14731_v53 = vpop.f32.mrf.mxu1 }
 0x561   : > { %10700 = vmatmul.mubr.f32.gmra.mxu0 %v14451_v28 }
 0x562   : > { %10702 = vmatprep.mubr.f32.mxu0 %v14465_v33  ;;  %v5475_v43 = vpop.f32.mrf.mxu0  ;;  %v14736_v28 = vpop.f32.mrf.mxu1  ;;  %v6779_v33 = vrot.slane %v5234_v35, 1 }
 0x565   : > { %10703 = vmatmul.mubr.f32.gmra.mxu0 %v14479_v9  ;;  %v6778_v9 = vsel %vm407_vm0, %v6162_v57, %v6777_v62 }
 0x566   : > { %10705 = vmatprep.mubr.f32.mxu0 %v14494_v36  ;;  %v6780_v36 = vsel %vm407_vm0, %v6777_v62, %v6779_v33 }
 0x568   : > { %v10273_v25 = vpop.f32.mrf.mxu0  ;;  %v14740_v56 = vpop.f32.mrf.mxu1 }
 0x569   : > { %10706 = vmatmul.mubr.f32.gmra.mxu0 %v14508_v52 }
 0x56a   : > { %10708 = vmatprep.mubr.f32.mxu0 %v14577_v23  ;;  %v5485_v52 = vpop.f32.mrf.mxu0  ;;  %v5892_v23 = vpop.f32.mrf.mxu1 }
 0x56d   : > { %10709 = vmatmul.mubr.f32.gmra.mxu0 %v14584_v49 }
 0x56e   : > { %10711 = vmatprep.mubr.f32.mxu0 %v6778_v9 }
 0x570   : > { %v10276_v8 = vpop.f32.mrf.mxu0  ;;  %v14747_v20 = vpop.f32.mrf.mxu1 }
 0x571   : > { %10712 = vmatmul.mubr.f32.gmra.mxu0 %v6780_v36 }
 0x572   : > { %v14749_v11 = vpop.f32.mrf.mxu0  ;;  %v14751_v0 = vpop.f32.mrf.mxu1 }
 0x578   : > { %v14753_v55 = vpop.f32.mrf.mxu0  ;;  %v14755_v49 = vpop.f32.mrf.mxu1 }
 0x57a   : > { %v14757_v5 = vpop.f32.mrf.mxu0  ;;  %v14759_v57 = vpop.f32.mrf.mxu1 }
 0x57c   : > { %v10314_v22 = vpop.f32.mrf.mxu0  ;;  %v14761_v7 = vpop.f32.mrf.mxu1 }
 0x57e   : > { %v14763_v32 = vpop.f32.mrf.mxu0  ;;  %v14765_v26 = vpop.f32.mrf.mxu1 }
 0x580   : > { %v14767_v45 = vpop.f32.mrf.mxu0  ;;  %v14769_v61 = vpop.f32.mrf.mxu1 }
 0x582   : > { %v14771_v60 = vpop.f32.mrf.mxu0  ;;  %v14773_v40 = vpop.f32.mrf.mxu1 }
 0x584   : > { %v14775_v48 = vpop.f32.mrf.mxu0  ;;  %v14777_v35 = vpop.f32.mrf.mxu1 }
 0x586   : > { %v5600_v1 = vpop.f32.mrf.mxu0  ;;  %v14779_v3 = vpop.f32.mrf.mxu1 }
 0x587   : > { %15630 = vst [vmem:[#allocation52_spill] sm:$0xff] %v14779_v3  ;;  %v14781_v39 = vadd.f32 %v5600_v1, %v5435_v10 }
 0x588   : > { %v10323_v42 = vpop.f32.mrf.mxu0  ;;  %v14783_v54 = vpop.f32.mrf.mxu1 }
 0x589   : > { %15631 = vst [vmem:[#allocation54_spill] sm:$0xff] %v14783_v54  ;;  %v14785_v34 = vadd.f32 %v10323_v42, %v10261_v18 }
 0x58a   : > { %v5610_v13 = vpop.f32.mrf.mxu0  ;;  %v14787_v14 = vpop.f32.mrf.mxu1 }
 0x58b   : > { %v5611_v46 = vadd.f32 %v5610_v13, %v5445_v12 }
 0x58d   : > { %v10326_v4 = vpop.f32.mrf.mxu0  ;;  %v14789_v62 = vadd.f32 %v5852_v38, %v5611_v46 }
 0x58e   : > { %v5626_v33 = vadd.f32 %v10326_v4, %v10264_v63  ;;  %v14791_v9 = vpop.f32.mrf.mxu1 }
 0x58f   : > { %v5620_v36 = vpop.f32.mrf.mxu0 }
 0x590   : > { %v5621_v17 = vadd.f32 %v5620_v36, %v5455_v41  ;;  %v14793_v3 = vpop.f32.mrf.mxu1  ;;  %v14796_v10 = vadd.f32 %v14719_v44, %v5626_v33 }
 0x592   : > { %v14798_v1 = vadd.f32 %v5862_v19, %v5621_v17 }
 0x593   : > { %v10329_v18 = vpop.f32.mrf.mxu0 }
 0x594   : > { %v5636_v42 = vadd.f32 %v10329_v18, %v10267_v2  ;;  %v14800_v54 = vpop.f32.mrf.mxu1 }
 0x595   : > { %v5630_v12 = vpop.f32.mrf.mxu0 }
 0x596   : > { %v5631_v13 = vadd.f32 %v5630_v12, %v5465_v27  ;;  %v14802_v38 = vpop.f32.mrf.mxu1  ;;  %v14805_v63 = vadd.f32 %v14723_v30, %v5636_v42 }
 0x598   : > { %v10332_v46 = vpop.f32.mrf.mxu0  ;;  %v14808_v41 = vadd.f32 %v14727_v29, %v5631_v13 }
 0x599   : > { %v5646_v4 = vadd.f32 %v10332_v46, %v10270_v6  ;;  %v14810_v44 = vpop.f32.mrf.mxu1 }
 0x59a   : > { %v5640_v17 = vpop.f32.mrf.mxu0 }
 0x59b   : > { %v5641_v19 = vadd.f32 %v5640_v17, %v5475_v43  ;;  %v14812_v33 = vpop.f32.mrf.mxu1  ;;  %v14815_v2 = vadd.f32 %v14731_v53, %v5646_v4 }
 0x59d   : > { %v10335_v27 = vpop.f32.mrf.mxu0  ;;  %v14818_v36 = vadd.f32 %v14736_v28, %v5641_v19  ;;  %v5586_v19 = vadd.f32 %v10314_v22, %v14680_v31 }
 0x59e   : > { %v5656_v30 = vadd.f32 %v10335_v27, %v10273_v25 }
 0x59f   : > { %v14820_v18 = vpop.f32.mrf.mxu1  ;;  %v5650_v42 = vpop.f32.mrf.mxu0  ;;  %v5922_v31 = vadd.f32 %v14682_v51, %v5586_v19 }
 0x5a0   : > { %v5651_v29 = vadd.f32 %v5650_v42, %v5485_v52  ;;  %v14823_v6 = vadd.f32 %v14740_v56, %v5656_v30 }
 0x5a1   : > { %v14825_v12 = vpop.f32.mrf.mxu1 }
 0x5a2   : > { %v14827_v43 = vadd.f32 %v5892_v23, %v5651_v29  ;;  %v5591_v29 = vadd.f32 %v14771_v60, %v14699_v24 }
 0x5a4   : > { %v10338_v13 = vpop.f32.mrf.mxu0  ;;  %v14829_v46 = vpop.f32.mrf.mxu1  ;;  %v5923_v60 = vadd.f32 %v14701_v15, %v5591_v29  ;;  %v15633_v29 = vld [vmem:[#allocation52_spill] sm:$0xff] }
 0x5a5   : > { %v5666_v53 = vadd.f32 %v10338_v13, %v10276_v8  ;;  %v5581_v8 = vadd.f32 %v14763_v32, %v14689_v21 }
 0x5a6   : > { %v5660_v4 = vpop.f32.mrf.mxu0  ;;  %v14831_v17 = vpop.f32.mrf.mxu1 }
 0x5a7   : > { %v5661_v28 = vadd.f32 %v5660_v4, %v14749_v11  ;;  %v14835_v25 = vadd.f32 %v14747_v20, %v5666_v53 }
 0x5a9   : > { %v10341_v52 = vpop.f32.mrf.mxu0  ;;  %v14838_v56 = vadd.f32 %v14751_v0, %v5661_v28  ;;  %v5596_v0 = vadd.f32 %v14767_v45, %v14694_v50 }
 0x5aa   : > { %v5676_v23 = vadd.f32 %v10341_v52, %v14753_v55  ;;  %v14842_v27 = vpop.f32.mrf.mxu1 }
 0x5ab   : > { %v5670_v30 = vpop.f32.mrf.mxu0  ;;  %v5924_v51 = vadd.f32 %v14696_v59, %v5596_v0 }
 0x5ac   : > { %v5671_v42 = vadd.f32 %v5670_v30, %v14757_v5  ;;  %v14847_v11 = vpop.f32.mrf.mxu1  ;;  %v14850_v20 = vadd.f32 %v14755_v49, %v5676_v23  ;;  %v5921_v5 = vadd.f32 %v14691_v47, %v5581_v8  ;;  %v5606_v49 = vadd.f32 %v14775_v48, %v14705_v58 }
 0x5ad   : > { %v5925_v30 = vadd.f32 %v14711_v37, %v14781_v39 }
 0x5ae   : > { %v14856_v55 = vadd.f32 %v14759_v57, %v5671_v42  ;;  %v5926_v48 = vadd.f32 %v14707_v16, %v5606_v49  ;;  %v15632_v16 = vld [vmem:[#allocation50_spill] sm:$0xff] }
 0x5af   : > { %v10438_v22 = vpop.f32.mrf.mxu0 }
 0x5b0   : > { %v6123_v21 = vadd.f32 %v10438_v22, %v5922_v31  ;;  %v14860_v32 = vpop.f32.mrf.mxu1 }
 0x5b1   : > { %v6023_v13 = vpop.f32.mrf.mxu0 }
 0x5b2   : > { %v6122_v53 = vadd.f32 %v6023_v13, %v5921_v5  ;;  %v14865_v50 = vpop.f32.mrf.mxu1  ;;  %v14869_v57 = vadd.f32 %v14761_v7, %v6123_v21  ;;  %v15634_v13 = vld [vmem:[#allocation54_spill] sm:$0xff] }
 0x5b3   : > { %v10441_v45 = vpop.f32.mrf.mxu0 }
 0x5b4   : > { %v6125_v4 = vadd.f32 %v10441_v45, %v5924_v51  ;;  %v14871_v24 = vpop.f32.mrf.mxu1  ;;  %v14875_v47 = vadd.f32 %v14765_v26, %v6122_v53 }
 0x5b5   : > { %v6033_v28 = vpop.f32.mrf.mxu0 }
 0x5b6   : > { %v6124_v52 = vadd.f32 %v6033_v28, %v5923_v60  ;;  %v14877_v58 = vpop.f32.mrf.mxu1  ;;  %v14881_v59 = vadd.f32 %v14769_v61, %v6125_v4  ;;  %v5928_v61 = vadd.f32 %v15632_v16, %v14785_v34 }
 0x5b7   : > { %v10444_v7 = vpop.f32.mrf.mxu0 }
 0x5b8   : > { %v6127_v19 = vadd.f32 %v10444_v7, %v5926_v48  ;;  %v14883_v23 = vpop.f32.mrf.mxu1  ;;  %v14888_v15 = vadd.f32 %v14773_v40, %v6124_v52 }
 0x5b9   : > { %v6043_v26 = vpop.f32.mrf.mxu0 }
 0x5ba   : > { %v6126_v8 = vadd.f32 %v6043_v26, %v5925_v30  ;;  %v14890_v42 = vpop.f32.mrf.mxu1  ;;  %v14893_v0 = vadd.f32 %v14777_v35, %v6127_v19 }
 0x5bc   : > { %v10447_v31 = vpop.f32.mrf.mxu0  ;;  %v14897_v22 = vpop.f32.mrf.mxu1  ;;  %v14900_v21 = vadd.f32 %v15633_v29, %v6126_v8 }
 0x5bd   : > { %v6129_v37 = vadd.f32 %v10447_v31, %v5928_v61 }
 0x5be   : > { %v6053_v39 = vpop.f32.mrf.mxu0  ;;  %v14902_v40 = vpop.f32.mrf.mxu1 }
 0x5bf   : > { %v6128_v5 = vadd.f32 %v6053_v39, %v14789_v62  ;;  %v14906_v49 = vadd.f32 %v15634_v13, %v6129_v37 }
 0x5c1   : > { %v10450_v35 = vpop.f32.mrf.mxu0  ;;  %v14909_v53 = vadd.f32 %v14787_v14, %v6128_v5 }
 0x5c2   : > { %v6131_v34 = vadd.f32 %v10450_v35, %v14796_v10  ;;  %v14912_v51 = vpop.f32.mrf.mxu1 }
 0x5c3   : > { %v6063_v45 = vpop.f32.mrf.mxu0 }
 0x5c4   : > { %v6130_v4 = vadd.f32 %v6063_v45, %v14798_v1  ;;  %v14915_v60 = vpop.f32.mrf.mxu1  ;;  %v14918_v28 = vadd.f32 %v14791_v9, %v6131_v34 }
 0x5c6   : > { %v14921_v62 = vadd.f32 %v14793_v3, %v6130_v4 }
 0x5c7   : > { %v10453_v52 = vpop.f32.mrf.mxu0 }
 0x5c8   : > { %v6133_v48 = vadd.f32 %v10453_v52, %v14805_v63  ;;  %v14924_v14 = vpop.f32.mrf.mxu1 }
 0x5c9   : > { %v6073_v7 = vpop.f32.mrf.mxu0 }
 0x5ca   : > { %v6132_v10 = vadd.f32 %v6073_v7, %v14808_v41  ;;  %v14927_v19 = vpop.f32.mrf.mxu1  ;;  %v14930_v1 = vadd.f32 %v14800_v54, %v6133_v48 }
 0x5cc   : > { %v10456_v30 = vpop.f32.mrf.mxu0  ;;  %v14933_v9 = vadd.f32 %v14802_v38, %v6132_v10 }
 0x5cd   : > { %v6135_v3 = vadd.f32 %v10456_v30, %v14815_v2  ;;  %v14936_v26 = vpop.f32.mrf.mxu1 }
 0x5ce   : > { %v6083_v8 = vpop.f32.mrf.mxu0 }
 0x5cf   : > { %v6134_v63 = vadd.f32 %v6083_v8, %v14818_v36  ;;  %v14939_v16 = vpop.f32.mrf.mxu1  ;;  %v14942_v41 = vadd.f32 %v14810_v44, %v6135_v3 }
 0x5d0   : > { %15635 = vst [vmem:[#allocation56_spill] sm:$0xff] %v14939_v16 }
 0x5d1   : > { %v10459_v61 = vpop.f32.mrf.mxu0  ;;  %v14945_v54 = vadd.f32 %v14812_v33, %v6134_v63 }
 0x5d2   : > { %v6137_v31 = vadd.f32 %v10459_v61, %v14823_v6 }
 0x5d3   : > { %v14948_v38 = vpop.f32.mrf.mxu1  ;;  %v6093_v29 = vpop.f32.mrf.mxu0 }
 0x5d4   : > { %15636 = vst [vmem:[#allocation57_spill] sm:$0xff] %v14948_v38  ;;  %v6136_v2 = vadd.f32 %v6093_v29, %v14827_v43  ;;  %v14952_v37 = vadd.f32 %v14820_v18, %v6137_v31 }
 0x5d5   : > { %v14954_v36 = vpop.f32.mrf.mxu1 }
 0x5d6   : > { %15637 = vst [vmem:[#allocation59_spill] sm:$0xff] %v14954_v36  ;;  %v14957_v39 = vadd.f32 %v14825_v12, %v6136_v2 }
 0x5d8   : > { %v10462_v44 = vpop.f32.mrf.mxu0  ;;  %v14960_v33 = vpop.f32.mrf.mxu1 }
 0x5d9   : > { %v6139_v5 = vadd.f32 %v10462_v44, %v14835_v25  ;;  %15638 = vst [vmem:[#allocation75_spill] sm:$0xff] %v14960_v33 }
 0x5da   : > { %v6103_v13 = vpop.f32.mrf.mxu0  ;;  %v14966_v43 = vpop.f32.mrf.mxu1 }
 0x5db   : > { %v6138_v6 = vadd.f32 %v6103_v13, %v14838_v56  ;;  %v14964_v35 = vadd.f32 %v14829_v46, %v6139_v5  ;;  %15640 = vst [vmem:[#allocation73_spill] sm:$0xff] %v14966_v43 }
 0x5dd   : > { %15639 = vst [vmem:[#allocation71_spill] sm:$0xff] %v14964_v35  ;;  %v10465_v18 = vpop.f32.mrf.mxu0  ;;  %v14969_v34 = vadd.f32 %v14831_v17, %v6138_v6 }
 0x5de   : > { %v6141_v12 = vadd.f32 %v10465_v18, %v14850_v20  ;;  %v14976_v52 = vpop.f32.mrf.mxu1 }
 0x5df   : > { %15641 = vst [vmem:[#allocation84_spill] sm:$0xff] %v14969_v34  ;;  %v6113_v45 = vpop.f32.mrf.mxu0  ;;  %15643 = vst [vmem:[#allocation58_spill] sm:$0xff] %v14976_v52 }
 0x5e0   : > { %v6140_v4 = vadd.f32 %v6113_v45, %v14856_v55  ;;  %v14974_v25 = vadd.f32 %v14842_v27, %v6141_v12  ;;  %v14981_v48 = vpop.f32.mrf.mxu1 }
 0x5e1   : > { %15645 = vst [vmem:[#allocation77_spill] sm:$0xff] %v14981_v48 }
 0x5e2   : > { %15642 = vst [vmem:[#allocation85_spill] sm:$0xff] %v14974_v25  ;;  %v14979_v56 = vadd.f32 %v14847_v11, %v6140_v4 }
 0x5e3   : > { %v10562_v46 = vpop.f32.mrf.mxu0 }
 0x5e4   : > { %15644 = vst [vmem:[#allocation60_spill] sm:$0xff] %v14979_v56  ;;  %v10748_v17 = vpop.f32.mrf.mxu1  ;;  %v6539_v56 = vadd.f32 %v10562_v46, %v14869_v57 }
 0x5e5   : > { %v6439_v7 = vpop.f32.mrf.mxu0 }
 0x5e6   : > { %v7056_v20 = vpop.f32.mrf.mxu1  ;;  %v6538_v33 = vadd.f32 %v6439_v7, %v14875_v47  ;;  %v6740_v38 = vadd.f32 %v14860_v32, %v6539_v56  ;;  %v15021_v47 = vld [vmem:[%s15234_s6] ss:$0 sm:$0xff] }
 0x5e7   : > { %v10565_v10 = vpop.f32.mrf.mxu0 }
 0x5e8   : > { %v10751_v55 = vpop.f32.mrf.mxu1  ;;  %v6541_v34 = vadd.f32 %v10565_v10, %v14881_v59  ;;  %v6739_v57 = vadd.f32 %v14865_v50, %v6538_v33 }
 0x5e9   : > { %v6449_v30 = vpop.f32.mrf.mxu0 }
 0x5ea   : > { %v7066_v31 = vpop.f32.mrf.mxu1  ;;  %v6742_v32 = vadd.f32 %v14871_v24, %v6541_v34 }
 0x5eb   : > { %v10568_v3 = vpop.f32.mrf.mxu0 }
 0x5ec   : > { %v10754_v11 = vpop.f32.mrf.mxu1  ;;  %v6543_v46 = vadd.f32 %v10568_v3, %v14893_v0 }
 0x5ed   : > { %v6459_v8 = vpop.f32.mrf.mxu0 }
 0x5ee   : > { %v7076_v13 = vpop.f32.mrf.mxu1  ;;  %v6542_v56 = vadd.f32 %v6459_v8, %v14900_v21  ;;  %v6744_v3 = vadd.f32 %v14883_v23, %v6543_v46 }
 0x5f0   : > { %v10571_v63 = vpop.f32.mrf.mxu0  ;;  %v14993_v12 = vpop.f32.mrf.mxu1 }
 0x5f1   : > { %v6545_v33 = vadd.f32 %v10571_v63, %v14906_v49 }
 0x5f2   : > { %v6469_v61 = vpop.f32.mrf.mxu0  ;;  %v14997_v4 = vpop.f32.mrf.mxu1 }
 0x5f3   : > { %v6544_v21 = vadd.f32 %v6469_v61, %v14909_v53 }
 0x5f4   : > { %v10574_v27 = vpop.f32.mrf.mxu0  ;;  %v15004_v43 = vpop.f32.mrf.mxu1 }
 0x5f5   : > { %v6547_v46 = vadd.f32 %v10574_v27, %v14918_v28 }
 0x5f6   : > { %v6479_v29 = vpop.f32.mrf.mxu0  ;;  %v15013_v35 = vpop.f32.mrf.mxu1 }
 0x5f8   : > { %v14983_v2 = vpop.f32.mrf.mxu0 }
 0x5f9   : > { %v15025_v10 = vpop.f32.mrf.mxu1  ;;  %v6549_v28 = vadd.f32 %v14983_v2, %v14930_v1 }
 0x5fa   : > { %v14985_v44 = vpop.f32.mrf.mxu0 }
 0x5fb   : > { %v15035_v34 = vpop.f32.mrf.mxu1 }
 0x5fc   : > { %v14987_v5 = vpop.f32.mrf.mxu0 }
 0x5fe   : > { %v14989_v6 = vpop.f32.mrf.mxu0 }
 0x600   : > { %v14991_v18 = vpop.f32.mrf.mxu0 }
 0x602   : > { %v14995_v45 = vpop.f32.mrf.mxu0 }
 0x603   : > { %15646 = vst [vmem:[#allocation86_spill] sm:$0xff] %v14995_v45 }
 0x605   : > { %v14999_v48 = vpop.f32.mrf.mxu0 }
 0x606   : > { %15647 = vst [vmem:[#allocation87_spill] sm:$0xff] %v14999_v48  ;;  %v6540_v48 = vadd.f32 %v6449_v30, %v14888_v15 }
 0x607   : > { %v15001_v52 = vpop.f32.mrf.mxu0 }
 0x608   : > { %15648 = vst [vmem:[#allocation74_spill] sm:$0xff] %v15001_v52  ;;  %v6741_v50 = vadd.f32 %v14877_v58, %v6540_v48  ;;  %v6743_v58 = vadd.f32 %v14890_v42, %v6542_v56  ;;  %v6546_v42 = vadd.f32 %v6479_v29, %v14921_v62 }
 0x609   : > { %v15006_v25 = vpop.f32.mrf.mxu0 }
 0x60b   : > { %v15009_v36 = vpop.f32.mrf.mxu0 }
 0x60d   : > { %v10686_v16 = vpop.f32.mrf.mxu0 }
 0x60e   : > { %v6949_v52 = vadd.f32 %v10686_v16, %v6740_v38 }
 0x60f   : > { %v6849_v45 = vpop.f32.mrf.mxu0 }
 0x610   : > { %v7156_v7 = vadd.f32 %v10748_v17, %v6949_v52  ;;  %v6948_v59 = vadd.f32 %v6849_v45, %v6739_v57 }
 0x611   : > { %v10689_v15 = vpop.f32.mrf.mxu0 }
 0x612   : > { %v7155_v16 = vadd.f32 %v7056_v20, %v6948_v59  ;;  %v6951_v38 = vadd.f32 %v10689_v15, %v6742_v32  ;;  %v7183_v0 = vadd.f32 %v15021_v47, %v7156_v7 }
 0x613   : > { %v6859_v30 = vpop.f32.mrf.mxu0 }
 0x614   : > { %v7158_v52 = vadd.f32 %v10751_v55, %v6951_v38  ;;  %v6950_v17 = vadd.f32 %v6859_v30, %v6741_v50  ;;  %v15031_v45 = vmax.f32 %v7183_v0, 0.0  ;;  %v7182_v24 = vadd.f32 %v15021_v47, %v7155_v16 }
 0x615   : > { %v10692_v20 = vpop.f32.mrf.mxu0  ;;  %v6746_v55 = vadd.f32 %v14897_v22, %v6545_v33  ;;  %v6745_v22 = vadd.f32 %v14902_v40, %v6544_v21  ;;  %v6748_v40 = vadd.f32 %v14912_v51, %v6547_v46  ;;  %v6548_v0 = vadd.f32 %v14985_v44, %v14933_v9 }
 0x616   : > { %v7157_v48 = vadd.f32 %v7066_v31, %v6950_v17  ;;  %v6953_v8 = vadd.f32 %v10692_v20, %v6744_v3  ;;  %v7223_v49 = vmul.f32 %v15031_v45, %v15031_v45  ;;  %v15040_v63 = vmax.f32 %v7182_v24, 0.0  ;;  %v15047_v31 = vpop.f32.mrf.mxu1 }
 0x617   : > { %v6869_v23 = vpop.f32.mrf.mxu0  ;;  %v7185_v57 = vadd.f32 %v15021_v47, %v7158_v52  ;;  %v6747_v33 = vadd.f32 %v14915_v60, %v6546_v42  ;;  %v6551_v30 = vadd.f32 %v14987_v5, %v14942_v41  ;;  %v6750_v24 = vadd.f32 %v14924_v14, %v6549_v28 }
 0x618   : > { %v7160_v53 = vadd.f32 %v10754_v11, %v6953_v8  ;;  %v6952_v61 = vadd.f32 %v6869_v23, %v6743_v58  ;;  %7244 = vadd.xlane.f32.xlu0 %v7223_v49  ;;  %v7184_v7 = vadd.f32 %v15021_v47, %v7157_v48  ;;  %v7222_v16 = vmul.f32 %v15040_v63, %v15040_v63  ;;  %v7116_v1 = vpop.f32.mrf.mxu1 }
 0x619   : > { %v10695_v59 = vpop.f32.mrf.mxu0  ;;  %v15049_v32 = vmax.f32 %v7185_v57, 0.0  ;;  %v6749_v14 = vadd.f32 %v14927_v19, %v6548_v0  ;;  %v6553_v23 = vadd.f32 %v14991_v18, %v14952_v37 }
 0x61a   : > { %v7159_v56 = vadd.f32 %v7076_v13, %v6952_v61  ;;  %v6955_v15 = vadd.f32 %v10695_v59, %v6746_v55  ;;  %v15058_v62 = vmax.f32 %v7184_v7, 0.0  ;;  %v7187_v29 = vadd.f32 %v15021_v47, %v7160_v53  ;;  %v10769_v20 = vpop.f32.mrf.mxu1  ;;  %v15649_v53 = vld [vmem:[#allocation86_spill] sm:$0xff]  ;;  %v15650_v7 = vld [vmem:[#allocation56_spill] sm:$0xff]  ;;  %v15651_v59 = vld [vmem:[#allocation71_spill] sm:$0xff] }
 0x61b   : > { %v6879_v27 = vpop.f32.mrf.mxu0  ;;  %v7225_v11 = vmul.f32 %v15049_v32, %v15049_v32  ;;  %v6552_v61 = vadd.f32 %v15649_v53, %v14957_v39 }
 0x61c   : > { %v7162_v38 = vadd.f32 %v14993_v12, %v6955_v15  ;;  %v6954_v13 = vadd.f32 %v6879_v27, %v6745_v22  ;;  %7242 = vadd.xlane.f32.xlu0 %v7222_v16  ;;  %v7186_v50 = vadd.f32 %v15021_v47, %v7159_v56  ;;  %v7224_v51 = vmul.f32 %v15058_v62, %v15058_v62  ;;  %v7126_v37 = vpop.f32.mrf.mxu1  ;;  %v15652_v56 = vld [vmem:[#allocation87_spill] sm:$0xff] }
 0x61d   : > { %7248 = vadd.xlane.f32.xlu1 %v7225_v11  ;;  %v10698_v2 = vpop.f32.mrf.mxu0  ;;  %v15075_v9 = vmax.f32 %v7187_v29, 0.0  ;;  %v6555_v15 = vadd.f32 %v15652_v56, %v15651_v59  ;;  %v15653_v11 = vld [vmem:[#allocation57_spill] sm:$0xff] }
 0x61e   : > { %v7161_v3 = vadd.f32 %v14997_v4, %v6954_v13  ;;  %v6957_v12 = vadd.f32 %v10698_v2, %v6748_v40  ;;  %v15070_v52 = vmax.f32 %v7186_v50, 0.0  ;;  %v7189_v44 = vadd.f32 %v15021_v47, %v7162_v38  ;;  %v10772_v0 = vpop.f32.mrf.mxu1  ;;  %v15654_v2 = vld [vmem:[#allocation84_spill] sm:$0xff] }
 0x61f   : > { %v6889_v17 = vpop.f32.mrf.mxu0  ;;  %v6550_v4 = vadd.f32 %v14989_v6, %v14945_v54  ;;  %v7227_v54 = vmul.f32 %v15075_v9, %v15075_v9  ;;  %v6754_v39 = vadd.f32 %v15653_v11, %v6553_v23 }
 0x620   : > { %v7164_v60 = vadd.f32 %v15004_v43, %v6957_v12  ;;  %v6956_v21 = vadd.f32 %v6889_v17, %v6747_v33  ;;  %v7226_v41 = vmul.f32 %v15070_v52, %v15070_v52  ;;  %v7188_v5 = vadd.f32 %v15021_v47, %v7161_v3  ;;  %v15655_v33 = vld [vmem:[#allocation74_spill] sm:$0xff]  ;;  %v15656_v12 = vld [vmem:[#allocation59_spill] sm:$0xff]  ;;  %v7136_v23 = vpop.f32.mrf.mxu1 }
 0x621   : > { %7246 = vadd.xlane.f32.xlu1 %v7224_v51  ;;  %v10701_v58 = vpop.f32.mrf.mxu0  ;;  %v6752_v43 = vadd.f32 %v14936_v26, %v6551_v30  ;;  %v15093_v6 = vmax.f32 %v7189_v44, 0.0  ;;  %v6751_v42 = vadd.f32 %v15650_v7, %v6550_v4  ;;  %v6554_v30 = vadd.f32 %v15655_v33, %v15654_v2  ;;  %v15657_v44 = vld [vmem:[#allocation75_spill] sm:$0xff] }
 0x622   : > { %v7163_v48 = vadd.f32 %v15013_v35, %v6956_v21  ;;  %v6959_v8 = vadd.f32 %v10701_v58, %v6750_v24  ;;  %7250 = vadd.xlane.f32.xlu0 %v7226_v41  ;;  %v15087_v49 = vmax.f32 %v7188_v5, 0.0  ;;  %v7191_v57 = vadd.f32 %v15021_v47, %v7164_v60  ;;  %v15658_v21 = vld [vmem:[#allocation85_spill] sm:$0xff] }
 0x623   : > { %v6899_v55 = vpop.f32.mrf.mxu0  ;;  %v7229_v27 = vmul.f32 %v15093_v6, %v15093_v6  ;;  %v6753_v17 = vadd.f32 %v15656_v12, %v6552_v61  ;;  %v6756_v60 = vadd.f32 %v15657_v44, %v6555_v15  ;;  %v6557_v41 = vadd.f32 %v15006_v25, %v15658_v21  ;;  %v15661_v61 = vld [vmem:[#allocation58_spill] sm:$0xff]  ;;  %v10775_v15 = vpop.f32.mrf.mxu1 }
 0x624   : > { %v7166_v19 = vadd.f32 %v15025_v10, %v6959_v8  ;;  %v6958_v35 = vadd.f32 %v6899_v55, %v6749_v14  ;;  %v7228_v46 = vmul.f32 %v15087_v49, %v15087_v49  ;;  %v7190_v26 = vadd.f32 %v15021_v47, %v7163_v48 }
 0x625   : > { %7252 = vadd.xlane.f32.xlu1 %v7227_v54  ;;  %v10704_v18 = vpop.f32.mrf.mxu0  ;;  %v15111_v29 = vmax.f32 %v7191_v57, 0.0  ;;  %v15659_v54 = vld [vmem:[#allocation73_spill] sm:$0xff]  ;;  %v15660_v57 = vld [vmem:[#allocation60_spill] sm:$0xff] }
 0x626   : > { %v7165_v22 = vadd.f32 %v15035_v34, %v6958_v35  ;;  %v6961_v10 = vadd.f32 %v10704_v18, %v6752_v43  ;;  %7254 = vadd.xlane.f32.xlu0 %v7228_v46  ;;  %v15106_v16 = vmax.f32 %v7190_v26, 0.0  ;;  %v7193_v38 = vadd.f32 %v15021_v47, %v7166_v19 }
 0x627   : > { %v6909_v28 = vpop.f32.mrf.mxu0  ;;  %v7231_v4 = vmul.f32 %v15111_v29, %v15111_v29  ;;  %v6755_v25 = vadd.f32 %v15659_v54, %v6554_v30  ;;  %v6556_v19 = vadd.f32 %v15009_v36, %v15660_v57  ;;  %v6758_v18 = vadd.f32 %v15661_v61, %v6557_v41  ;;  %v7146_v30 = vpop.f32.mrf.mxu1 }
 0x628   : > { %v7168_v13 = vadd.f32 %v15047_v31, %v6961_v10  ;;  %v6960_v40 = vadd.f32 %v6909_v28, %v6751_v42  ;;  %v7230_v34 = vmul.f32 %v15106_v16, %v15106_v16  ;;  %v7192_v50 = vadd.f32 %v15021_v47, %v7165_v22 }
 0x629   : > { %7256 = vadd.xlane.f32.xlu1 %v7229_v27  ;;  %v10707_v3 = vpop.f32.mrf.mxu0  ;;  %v15128_v58 = vmax.f32 %v7193_v38, 0.0  ;;  %v15662_v27 = vld [vmem:[#allocation77_spill] sm:$0xff] }
 0x62a   : > { %v7167_v51 = vadd.f32 %v7116_v1, %v6960_v40  ;;  %v6963_v24 = vadd.f32 %v10707_v3, %v6754_v39  ;;  %7258 = vadd.xlane.f32.xlu0 %v7230_v34  ;;  %v15122_v31 = vmax.f32 %v7192_v50, 0.0  ;;  %v7195_v14 = vadd.f32 %v15021_v47, %v7168_v13 }
 0x62b   : > { %v6919_v5 = vpop.f32.mrf.mxu0  ;;  %v7233_v53 = vmul.f32 %v15128_v58, %v15128_v58  ;;  %v6757_v11 = vadd.f32 %v15662_v27, %v6556_v19 }
 0x62c   : > { %v7170_v48 = vadd.f32 %v10769_v20, %v6963_v24  ;;  %v6962_v8 = vadd.f32 %v6919_v5, %v6753_v17  ;;  %v7232_v1 = vmul.f32 %v15122_v31, %v15122_v31  ;;  %v7194_v43 = vadd.f32 %v15021_v47, %v7167_v51 }
 0x62d   : > { %7260 = vadd.xlane.f32.xlu1 %v7231_v4  ;;  %v10710_v55 = vpop.f32.mrf.mxu0  ;;  %v15142_v7 = vmax.f32 %v7195_v14, 0.0 }
 0x62e   : > { %v7169_v35 = vadd.f32 %v7126_v37, %v6962_v8  ;;  %v6965_v46 = vadd.f32 %v10710_v55, %v6756_v60  ;;  %7262 = vadd.xlane.f32.xlu0 %v7232_v1  ;;  %v15137_v26 = vmax.f32 %v7194_v43, 0.0  ;;  %v7197_v42 = vadd.f32 %v15021_v47, %v7170_v48 }
 0x62f   : > { %v6929_v20 = vpop.f32.mrf.mxu0  ;;  %v7235_v13 = vmul.f32 %v15142_v7, %v15142_v7 }
 0x630   : > { %v7172_v59 = vadd.f32 %v10772_v0, %v6965_v46  ;;  %v6964_v56 = vadd.f32 %v6929_v20, %v6755_v25  ;;  %v7234_v36 = vmul.f32 %v15137_v26, %v15137_v26  ;;  %v7196_v37 = vadd.f32 %v15021_v47, %v7169_v35 }
 0x631   : > { %7264 = vadd.xlane.f32.xlu1 %v7233_v53  ;;  %v10713_v22 = vpop.f32.mrf.mxu0  ;;  %v15153_v40 = vmax.f32 %v7197_v42, 0.0 }
 0x632   : > { %v7171_v10 = vadd.f32 %v7136_v23, %v6964_v56  ;;  %v6967_v28 = vadd.f32 %v10713_v22, %v6758_v18  ;;  %7266 = vadd.xlane.f32.xlu0 %v7234_v36  ;;  %v15149_v39 = vmax.f32 %v7196_v37, 0.0  ;;  %v7199_v34 = vadd.f32 %v15021_v47, %v7172_v59 }
 0x633   : > { %v6939_v38 = vpop.f32.mrf.mxu0  ;;  %v7237_v17 = vmul.f32 %v15153_v40, %v15153_v40 }
 0x634   : > { %v7174_v50 = vadd.f32 %v10775_v15, %v6967_v28  ;;  %v6966_v0 = vadd.f32 %v6939_v38, %v6757_v11  ;;  %v7236_v2 = vmul.f32 %v15149_v39, %v15149_v39  ;;  %v7198_v33 = vadd.f32 %v15021_v47, %v7171_v10 }
 0x635   : > { %7268 = vadd.xlane.f32.xlu1 %v7235_v13  ;;  %v15163_v51 = vmax.f32 %v7199_v34, 0.0 }
 0x636   : > { %v7173_v3 = vadd.f32 %v7146_v30, %v6966_v0  ;;  %7270 = vadd.xlane.f32.xlu0 %v7236_v2  ;;  %v15159_v12 = vmax.f32 %v7198_v33, 0.0  ;;  %v7201_v24 = vadd.f32 %v15021_v47, %v7174_v50 }
 0x637   : > { %v7239_v41 = vmul.f32 %v15163_v51, %v15163_v51 }
 0x638   : > { %v7238_v44 = vmul.f32 %v15159_v12, %v15159_v12  ;;  %v7200_v60 = vadd.f32 %v15021_v47, %v7173_v3  ;;  %v15173_v5 = vmax.f32 %v7201_v24, 0.0 }
 0x639   : > { %7272 = vadd.xlane.f32.xlu1 %v7237_v17 }
 0x63a   : > { %7274 = vadd.xlane.f32.xlu0 %v7238_v44  ;;  %v15169_v21 = vmax.f32 %v7200_v60, 0.0  ;;  %v7241_v14 = vmul.f32 %v15173_v5, %v15173_v5 }
 0x63c   : > { %v7240_v4 = vmul.f32 %v15169_v21, %v15169_v21 }
 0x63d   : > { %7276 = vadd.xlane.f32.xlu1 %v7239_v41 }
 0x63e   : > { %7278 = vadd.xlane.f32.xlu0 %v7240_v4 }
 0x641   : > { %7280 = vadd.xlane.f32.xlu1 %v7241_v14 }
 0x6a1   : > { %v7245_v47 = vpop.xlane.xlu0 %7244 }
 0x6a2   : > { %v7283_v48 = vmax.f32 %v7245_v47, 1e-24 }
 0x6a4   : > { %10811 = vrsqrt.f32 %v7283_v48 }
 0x6a5   : > { %v7243_v8 = vpop.xlane.xlu0 %7242 }
 0x6a6   : > { %v7282_v1 = vmax.f32 %v7243_v8, 1e-24  ;;  %v7249_v43 = vpop.xlane.xlu1 %7248 }
 0x6a7   : > { %v7285_v23 = vmax.f32 %v7249_v43, 1e-24 }
 0x6a8   : > { %10813 = vrsqrt.f32 %v7282_v1 }
 0x6a9   : > { %10815 = vrsqrt.f32 %v7285_v23 }
 0x6aa   : > { %v7247_v55 = vpop.xlane.xlu1 %7246 }
 0x6ab   : > { %v7284_v54 = vmax.f32 %v7247_v55, 1e-24  ;;  %v7251_v25 = vpop.xlane.xlu0 %7250 }
 0x6ac   : > { %v7286_v57 = vmax.f32 %v7251_v25, 1e-24 }
 0x6ad   : > { %10817 = vrsqrt.f32 %v7284_v54 }
 0x6ae   : > { %10819 = vrsqrt.f32 %v7286_v57  ;;  %v7253_v19 = vpop.xlane.xlu1 %7252 }
 0x6af   : > { %v7287_v35 = vmax.f32 %v7253_v19, 1e-24  ;;  %v7255_v46 = vpop.xlane.xlu0 %7254 }
 0x6b0   : > { %v7288_v20 = vmax.f32 %v7255_v46, 1e-24 }
 0x6b1   : > { %v10812_v53 = vpop.eup %10811  ;;  %10821 = vrsqrt.f32 %v7287_v35 }
 0x6b2   : > { %v7323_v61 = vmul.f32 %v10812_v53, %v15031_v45  ;;  %10823 = vrsqrt.f32 %v7288_v20  ;;  %v7257_v18 = vpop.xlane.xlu1 %7256 }
 0x6b3   : > { %v7289_v42 = vmax.f32 %v7257_v18, 1e-24  ;;  %v7259_v59 = vpop.xlane.xlu0 %7258 }
 0x6b4   : > { %7343 = vst [vmem:[%s15183_s16 + $0x8] sm:$0xff] %v7323_v61  ;;  %v7290_v56 = vmax.f32 %v7259_v59, 1e-24 }
 0x6b5   : > { %v10814_v36 = vpop.eup %10813  ;;  %10825 = vrsqrt.f32 %v7289_v42 }
 0x6b6   : > { %v10816_v37 = vpop.eup %10815  ;;  %v7322_v15 = vmul.f32 %v10814_v36, %v15040_v63  ;;  %10827 = vrsqrt.f32 %v7290_v56  ;;  %v7261_v22 = vpop.xlane.xlu1 %7260 }
 0x6b7   : > { %v7325_v10 = vmul.f32 %v10816_v37, %v15049_v32  ;;  %v7291_v28 = vmax.f32 %v7261_v22, 1e-24  ;;  %v7263_v45 = vpop.xlane.xlu0 %7262 }
 0x6b8   : > { %7342 = vst [vmem:[%s15183_s16] sm:$0xff] %v7322_v15  ;;  %v7292_v27 = vmax.f32 %v7263_v45, 1e-24 }
 0x6b9   : > { %7345 = vst [vmem:[%s15183_s16 + $0x18] sm:$0xff] %v7325_v10  ;;  %10829 = vrsqrt.f32 %v7291_v28 }
 0x6ba   : > { %v10818_v11 = vpop.eup %10817  ;;  %10831 = vrsqrt.f32 %v7292_v27  ;;  %v7265_v38 = vpop.xlane.xlu1 %7264 }
 0x6bb   : > { %v10820_v13 = vpop.eup %10819  ;;  %v7324_v34 = vmul.f32 %v10818_v11, %v15058_v62  ;;  %v7293_v50 = vmax.f32 %v7265_v38, 1e-24  ;;  %v7267_v63 = vpop.xlane.xlu0 %7266 }
 0x6bc   : > { %v7326_v0 = vmul.f32 %v10820_v13, %v15070_v52  ;;  %v7294_v32 = vmax.f32 %v7267_v63, 1e-24 }
 0x6bd   : > { %7344 = vst [vmem:[%s15183_s16 + $0x10] sm:$0xff] %v7324_v34  ;;  %10833 = vrsqrt.f32 %v7293_v50 }
 0x6be   : > { %v10822_v2 = vpop.eup %10821  ;;  %7346 = vst [vmem:[%s15183_s16 + $0x20] sm:$0xff] %v7326_v0  ;;  %10835 = vrsqrt.f32 %v7294_v32  ;;  %v7269_v33 = vpop.xlane.xlu1 %7268 }
 0x6bf   : > { %v10824_v30 = vpop.eup %10823  ;;  %v7327_v3 = vmul.f32 %v10822_v2, %v15075_v9  ;;  %v7295_v17 = vmax.f32 %v7269_v33, 1e-24  ;;  %v7271_v24 = vpop.xlane.xlu0 %7270 }
 0x6c0   : > { %v7328_v62 = vmul.f32 %v10824_v30, %v15087_v49  ;;  %v7296_v44 = vmax.f32 %v7271_v24, 1e-24 }
 0x6c1   : > { %7347 = vst [vmem:[%s15183_s16 + $0x28] sm:$0xff] %v7327_v3  ;;  %10837 = vrsqrt.f32 %v7295_v17 }
 0x6c2   : > { %v10826_v52 = vpop.eup %10825  ;;  %7348 = vst [vmem:[%s15183_s16 + $0x30] sm:$0xff] %v7328_v62  ;;  %10839 = vrsqrt.f32 %v7296_v44  ;;  %v7273_v60 = vpop.xlane.xlu1 %7272 }
 0x6c3   : > { %v10828_v41 = vpop.eup %10827  ;;  %v7329_v4 = vmul.f32 %v10826_v52, %v15093_v6  ;;  %v7297_v14 = vmax.f32 %v7273_v60, 1e-24  ;;  %v7275_v47 = vpop.xlane.xlu0 %7274 }
 0x6c4   : > { %v7330_v9 = vmul.f32 %v10828_v41, %v15106_v16  ;;  %v7298_v48 = vmax.f32 %v7275_v47, 1e-24 }
 0x6c5   : > { %7349 = vst [vmem:[%s15183_s16 + $0x38] sm:$0xff] %v7329_v4  ;;  %10841 = vrsqrt.f32 %v7297_v14 }
 0x6c6   : > { %v10830_v49 = vpop.eup %10829  ;;  %7350 = vst [vmem:[%s15183_s16 + $0x40] sm:$0xff] %v7330_v9  ;;  %10843 = vrsqrt.f32 %v7298_v48  ;;  %v7277_v8 = vpop.xlane.xlu1 %7276 }
 0x6c7   : > { %v10832_v1 = vpop.eup %10831  ;;  %v7331_v43 = vmul.f32 %v10830_v49, %v15111_v29  ;;  %v7299_v23 = vmax.f32 %v7277_v8, 1e-24  ;;  %v7279_v55 = vpop.xlane.xlu0 %7278 }
 0x6c8   : > { %v7332_v6 = vmul.f32 %v10832_v1, %v15122_v31  ;;  %v7300_v54 = vmax.f32 %v7279_v55, 1e-24 }
 0x6c9   : > { %7351 = vst [vmem:[%s15183_s16 + $0x48] sm:$0xff] %v7331_v43  ;;  %10845 = vrsqrt.f32 %v7299_v23 }
 0x6ca   : > { %v10834_v16 = vpop.eup %10833  ;;  %7352 = vst [vmem:[%s15183_s16 + $0x50] sm:$0xff] %v7332_v6  ;;  %10847 = vrsqrt.f32 %v7300_v54  ;;  %v7281_v25 = vpop.xlane.xlu1 %7280 }
 0x6cb   : > { %v10836_v57 = vpop.eup %10835  ;;  %v7333_v19 = vmul.f32 %v10834_v16, %v15128_v58  ;;  %v7301_v35 = vmax.f32 %v7281_v25, 1e-24 }
 0x6cc   : > { %v7334_v29 = vmul.f32 %v10836_v57, %v15137_v26 }
 0x6cd   : > { %7353 = vst [vmem:[%s15183_s16 + $0x58] sm:$0xff] %v7333_v19  ;;  %10849 = vrsqrt.f32 %v7301_v35 }
 0x6ce   : > { %v10838_v31 = vpop.eup %10837  ;;  %7354 = vst [vmem:[%s15183_s16 + $0x60] sm:$0xff] %v7334_v29 }
 0x6cf   : > { %v10840_v46 = vpop.eup %10839  ;;  %v7335_v20 = vmul.f32 %v10838_v31, %v15142_v7 }
 0x6d0   : > { %v7336_v53 = vmul.f32 %v10840_v46, %v15149_v39 }
 0x6d1   : > { %7355 = vst [vmem:[%s15183_s16 + $0x68] sm:$0xff] %v7335_v20 }
 0x6d2   : > { %v10842_v61 = vpop.eup %10841  ;;  %7356 = vst [vmem:[%s15183_s16 + $0x70] sm:$0xff] %v7336_v53 }
 0x6d3   : > { %v10844_v58 = vpop.eup %10843  ;;  %v7337_v18 = vmul.f32 %v10842_v61, %v15153_v40 }
 0x6d4   : > { %v7338_v26 = vmul.f32 %v10844_v58, %v15159_v12 }
 0x6d5   : > { %7357 = vst [vmem:[%s15183_s16 + $0x78] sm:$0xff] %v7337_v18 }
 0x6d6   : > { %v10846_v42 = vpop.eup %10845  ;;  %7358 = vst [vmem:[%s15183_s16 + $0x80] sm:$0xff] %v7338_v26 }
 0x6d7   : > { %v10848_v59 = vpop.eup %10847  ;;  %v7339_v56 = vmul.f32 %v10846_v42, %v15163_v51 }
 0x6d8   : > { %v7340_v7 = vmul.f32 %v10848_v59, %v15169_v21 }
 0x6d9   : > { %7359 = vst [vmem:[%s15183_s16 + $0x88] sm:$0xff] %v7339_v56 }
 0x6da   : > { %v10850_v36 = vpop.eup %10849  ;;  %7360 = vst [vmem:[%s15183_s16 + $0x90] sm:$0xff] %v7340_v7 }
 0x6db   : > { %v7341_v39 = vmul.f32 %v10850_v36, %v15173_v5 }
 0x6dd   : > { %7361 = vst [vmem:[%s15183_s16 + $0x98] sm:$0xff] %v7341_v39 }
 0x6de PF: > { %s19_s24 = sadd.s32 1, %s10945_s24  }
 0x6df   : > { %p16_p3 = scmp.ge.s32.totalorder %s19_s24, 4  }
 0x6e1   :  { %18 = sbr.rel (!%p16_p3) target bundleno = 2 (0x2), region = 87 }
 0x6e6   :  { %7383 = vsyncpa [#allocation3], 1 }
 0x6e7   :  { %7385 = vsyncpa [#allocation3 + $0x1], 1 }
 0x6e8   :  { %7386 = vsyncpa [#allocation5], 1 }

</bundles_post_ra>
